<compile_context>
chip_gen: v6e
topology: v6e:2x2x1
jax: 0.10.0
libtpu: 0.0.40
codegen_flags: <defaults>
</compile_context>

<pallas_src>
import math
import functools
import numpy as np

import jax
import jax.numpy as jnp
from jax import lax
from jax.experimental import pallas as pl
from jax.experimental.pallas import tpu as pltpu


# ----------------------------- Pallas kernel --------------------------------

def _genmodel_kernel(x_ref, w1_ref, b1_ref, w2_ref, b2_ref,
                     wc_ref, bc_ref, wb_ref, bb_ref,
                     vbase_ref, sel_ref, vert_ref):
    f32 = jnp.float32
    bf16 = jnp.bfloat16

    def dense(h, w_ref, b_ref):
        # bf16 MXU matmul with f32 accumulation.
        return jnp.dot(h.astype(bf16), w_ref[...].astype(bf16),
                       preferred_element_type=f32) + b_ref[...]

    x = x_ref[...]                                            # (B, 48)
    h = jnp.maximum(dense(x, w1_ref, b1_ref), 0.0)            # (B, 1024)
    h = jnp.maximum(dense(h, w2_ref, b2_ref), 0.0)            # (B, 2048)

    centroid = dense(h, wc_ref, bc_ref) * 0.1                 # (B, 3)  centroid_scale
    bias = dense(h, wb_ref, bb_ref)                           # (B, nv*3)  bias_scale=1.0

    # Template-mesh reparameterization (done in forward() in the PyTorch module).
    vb = vbase_ref[...] * 0.5                                 # obj_scale, (1, nv*3)
    sgn = jnp.where(vb > 0.0, 1.0, jnp.where(vb < 0.0, -1.0, 0.0))
    ab = jnp.abs(vb)
    base = jnp.log(ab / (1.0 - ab))                           # (1, nv*3)

    # Broadcast tanh(centroid) (B,3) -> (B, nv*3) via an exact 0/1 selection
    # matmul (sel[c, v*3+c] = 1).  HIGHEST keeps it bit-accurate; cost is ~2 KFLOP.
    cent = jnp.tanh(centroid)                                 # (B, 3)
    cent_full = jnp.dot(cent, sel_ref[...],
                        preferred_element_type=f32,
                        precision=lax.Precision.HIGHEST)      # (B, nv*3)

    scale_pos = 1.0 - cent_full
    scale_neg = cent_full + 1.0

    v = sgn / (1.0 + jnp.exp(-(base + bias)))                 # sigmoid(base+bias)*sign
    v = jnp.maximum(v, 0.0) * scale_pos - jnp.maximum(-v, 0.0) * scale_neg
    vert_ref[...] = (v + cent_full) * 0.5


# ------------------------------ forward pass ---------------------------------

@functools.partial(jax.jit, static_argnames=("batch_size", "nv"))
def genmodel_forward(params, x, vertices_base, faces, *, batch_size, nv):
    n_out = nv * 3
    vb_flat = vertices_base.reshape(1, n_out)

    # (3, nv*3) 0/1 selection masks, sel[c, j] = (j % 3 == c); constant-folded.
    cols = jnp.arange(n_out, dtype=jnp.int32) % 3
    sel = (cols[None, :] == jnp.arange(3, dtype=jnp.int32)[:, None]).astype(jnp.float32)

    verts_flat = pl.pallas_call(
        _genmodel_kernel,
        out_shape=jax.ShapeDtypeStruct((x.shape[0], n_out), jnp.float32),
        compiler_params=pltpu.CompilerParams(
            vmem_limit_bytes=48 * 1024 * 1024,
        ),
    )(x, params["w1"], params["b1"], params["w2"], params["b2"],
      params["wc"], params["bc"], params["wb"], params["bb"],
      vb_flat, sel)

    vertices = verts_flat.reshape(x.shape[0], nv, 3)
    # faces repeat is pure integer data replication -> plain JAX broadcast.
    faces_out = jnp.broadcast_to(faces[None], (batch_size,) + faces.shape)
    return vertices, faces_out


# ------------------------------ parameters -----------------------------------

def _linear_init(key, fan_in, fan_out):
    kw, kb = jax.random.split(key)
    bound = 1.0 / math.sqrt(fan_in)
    # Weights stored as (in, out) for the GEMM (PyTorch stores (out, in)).
    w = jax.random.uniform(kw, (fan_in, fan_out), jnp.float32, -bound, bound)
    b = jax.random.uniform(kb, (1, fan_out), jnp.float32, -bound, bound)
    return w, b


def init_params(key, din, nv):
    dim = 1024
    dim_hidden = [dim, dim * 2]
    ks = jax.random.split(key, 4)
    p = {}
    p["w1"], p["b1"] = _linear_init(ks[0], din, dim_hidden[0])
    p["w2"], p["b2"] = _linear_init(ks[1], dim_hidden[0], dim_hidden[1])
    p["wc"], p["bc"] = _linear_init(ks[2], dim_hidden[1], 3)
    p["wb"], p["bb"] = _linear_init(ks[3], dim_hidden[1], nv * 3)
    return p


# ------------------------------ reference ------------------------------------

@functools.partial(jax.jit, static_argnames=("batch_size", "nv"))
def reference_forward(params, x, vertices_base, faces, *, batch_size, nv):
    hi = lax.Precision.HIGHEST
    h = jax.nn.relu(jnp.dot(x, params["w1"], precision=hi) + params["b1"])
    h = jax.nn.relu(jnp.dot(h, params["w2"], precision=hi) + params["b2"])
    centroid = (jnp.dot(h, params["wc"], precision=hi) + params["bc"]) * 0.1
    bias = (jnp.dot(h, params["wb"], precision=hi) + params["bb"]) * 1.0
    bias = bias.reshape(-1, nv, 3)

    base = vertices_base * 0.5
    sgn = jnp.sign(base)
    base = jnp.abs(base)
    base = jnp.log(base / (1.0 - base))

    centroid = jnp.tanh(centroid)[:, None, :]
    scale_pos = 1.0 - centroid
    scale_neg = centroid + 1.0

    vertices = jax.nn.sigmoid(base + bias) * sgn
    vertices = jax.nn.relu(vertices) * scale_pos - jax.nn.relu(-vertices) * scale_neg
    vertices = (vertices + centroid) * 0.5

    faces_out = jnp.broadcast_to(faces[None], (batch_size,) + faces.shape)
    return vertices, faces_out


# --------------------------------- main ---------------------------------------

if __name__ == "__main__":
    # args: batch_size=2, global_latent_dim=16, local_latent_num=4,
    #       local_latent_dim=8  ->  input dim = 16 + 4*8 = 48
    batch_size = 2
    global_latent_dim = 16
    local_latent_num = 4
    local_latent_dim = 8
    din = global_latent_dim + local_latent_num * local_latent_dim

    # TODO(synk): the real module loads the template mesh from args.filename_obj
    # (soft_renderer file I/O); a synthetic vertices_base/faces buffer with the
    # same value range (|v| in (0,1) so the logit is finite) stands in here.
    nv = 128
    nf = 96

    key = jax.random.PRNGKey(0)
    kx, kp, kv, ks, kf = jax.random.split(key, 5)

    x = jax.random.normal(kx, (batch_size, din), dtype=jnp.float32)
    params = init_params(kp, din, nv)

    mag = jax.random.uniform(kv, (nv, 3), jnp.float32, 0.05, 0.95)
    sign = jnp.where(jax.random.bernoulli(ks, 0.5, (nv, 3)), 1.0, -1.0)
    vertices_base = mag * sign
    faces = jax.random.randint(kf, (nf, 3), 0, nv, dtype=jnp.int32)

    verts, faces_out = genmodel_forward(params, x, vertices_base, faces,
                                        batch_size=batch_size, nv=nv)
    verts = jax.block_until_ready(verts)
    faces_out = jax.block_until_ready(faces_out)

    ref_verts, ref_faces = reference_forward(params, x, vertices_base, faces,
                                             batch_size=batch_size, nv=nv)
    ref_verts = jax.block_until_ready(ref_verts)

    assert verts.shape == (batch_size, nv, 3), verts.shape
    assert faces_out.shape == (batch_size, nf, 3), faces_out.shape
    assert bool(jnp.all(jnp.isfinite(verts)))
    np.testing.assert_allclose(np.asarray(verts), np.asarray(ref_verts),
                               rtol=1e-2, atol=2e-3)
    np.testing.assert_array_equal(np.asarray(faces_out), np.asarray(ref_faces))
    print("KERNEL_OK")
</pallas_src>

<mosaic_0001>
module attributes {stable_mosaic.version = 11 : i64} {
  func.func @_genmodel_kernel(%arg0: memref<2x48xf32, #tpu.memory_space<vmem>>, %arg1: memref<48x1024xf32, #tpu.memory_space<vmem>>, %arg2: memref<1x1024xf32, #tpu.memory_space<vmem>>, %arg3: memref<1024x2048xf32, #tpu.memory_space<vmem>>, %arg4: memref<1x2048xf32, #tpu.memory_space<vmem>>, %arg5: memref<2048x3xf32, #tpu.memory_space<vmem>>, %arg6: memref<1x3xf32, #tpu.memory_space<vmem>>, %arg7: memref<2048x384xf32, #tpu.memory_space<vmem>>, %arg8: memref<1x384xf32, #tpu.memory_space<vmem>>, %arg9: memref<1x384xf32, #tpu.memory_space<vmem>>, %arg10: memref<3x384xf32, #tpu.memory_space<vmem>>, %arg11: memref<2x384xf32, #tpu.memory_space<vmem>>) attributes {dimension_semantics = [], scalar_prefetch = 0 : i64, scratch_operands = 0 : i64, tpu.core_type = #tpu.core_type<tc>} {
    %c0 = arith.constant 0 : index
    %c0_0 = arith.constant 0 : index
    %0 = vector.load %arg0[%c0, %c0_0] : memref<2x48xf32, #tpu.memory_space<vmem>>, vector<2x48xf32>
    %1 = arith.truncf %0 : vector<2x48xf32> to vector<2x48xbf16>
    %c0_1 = arith.constant 0 : index
    %c0_2 = arith.constant 0 : index
    %2 = vector.load %arg1[%c0_1, %c0_2] : memref<48x1024xf32, #tpu.memory_space<vmem>>, vector<48x1024xf32>
    %3 = arith.truncf %2 : vector<48x1024xf32> to vector<48x1024xbf16>
    %cst = arith.constant dense<0.000000e+00> : vector<2x1024xf32>
    %4 = tpu.matmul %1, %3, %cst {dimension_numbers = #tpu.dot_dimension_numbers<[1], [0], [0], [1], [0, 0, 1, 1], [], []>} : vector<2x48xbf16>, vector<48x1024xbf16>, vector<2x1024xf32> -> vector<2x1024xf32>
    %c0_3 = arith.constant 0 : index
    %c0_4 = arith.constant 0 : index
    %5 = vector.load %arg2[%c0_3, %c0_4] : memref<1x1024xf32, #tpu.memory_space<vmem>>, vector<1x1024xf32>
    %6 = vector.broadcast %5 : vector<1x1024xf32> to vector<2x1024xf32>
    %7 = arith.addf %4, %6 : vector<2x1024xf32>
    %cst_5 = arith.constant 0.000000e+00 : f32
    %8 = vector.broadcast %cst_5 : f32 to vector<2x1024xf32>
    %9 = arith.maximumf %7, %8 : vector<2x1024xf32>
    %10 = arith.truncf %9 : vector<2x1024xf32> to vector<2x1024xbf16>
    %c0_6 = arith.constant 0 : index
    %c0_7 = arith.constant 0 : index
    %11 = vector.load %arg3[%c0_6, %c0_7] : memref<1024x2048xf32, #tpu.memory_space<vmem>>, vector<1024x2048xf32>
    %12 = arith.truncf %11 : vector<1024x2048xf32> to vector<1024x2048xbf16>
    %cst_8 = arith.constant dense<0.000000e+00> : vector<2x2048xf32>
    %13 = tpu.matmul %10, %12, %cst_8 {dimension_numbers = #tpu.dot_dimension_numbers<[1], [0], [0], [1], [0, 0, 1, 1], [], []>} : vector<2x1024xbf16>, vector<1024x2048xbf16>, vector<2x2048xf32> -> vector<2x2048xf32>
    %c0_9 = arith.constant 0 : index
    %c0_10 = arith.constant 0 : index
    %14 = vector.load %arg4[%c0_9, %c0_10] : memref<1x2048xf32, #tpu.memory_space<vmem>>, vector<1x2048xf32>
    %15 = vector.broadcast %14 : vector<1x2048xf32> to vector<2x2048xf32>
    %16 = arith.addf %13, %15 : vector<2x2048xf32>
    %cst_11 = arith.constant 0.000000e+00 : f32
    %17 = vector.broadcast %cst_11 : f32 to vector<2x2048xf32>
    %18 = arith.maximumf %16, %17 : vector<2x2048xf32>
    %19 = arith.truncf %18 : vector<2x2048xf32> to vector<2x2048xbf16>
    %c0_12 = arith.constant 0 : index
    %c0_13 = arith.constant 0 : index
    %20 = vector.load %arg5[%c0_12, %c0_13] : memref<2048x3xf32, #tpu.memory_space<vmem>>, vector<2048x3xf32>
    %21 = arith.truncf %20 : vector<2048x3xf32> to vector<2048x3xbf16>
    %cst_14 = arith.constant dense<0.000000e+00> : vector<2x3xf32>
    %22 = tpu.matmul %19, %21, %cst_14 {dimension_numbers = #tpu.dot_dimension_numbers<[1], [0], [0], [1], [0, 0, 1, 1], [], []>} : vector<2x2048xbf16>, vector<2048x3xbf16>, vector<2x3xf32> -> vector<2x3xf32>
    %c0_15 = arith.constant 0 : index
    %c0_16 = arith.constant 0 : index
    %23 = vector.load %arg6[%c0_15, %c0_16] : memref<1x3xf32, #tpu.memory_space<vmem>>, vector<1x3xf32>
    %24 = vector.broadcast %23 : vector<1x3xf32> to vector<2x3xf32>
    %25 = arith.addf %22, %24 : vector<2x3xf32>
    %cst_17 = arith.constant 1.000000e-01 : f32
    %26 = vector.broadcast %cst_17 : f32 to vector<2x3xf32>
    %27 = arith.mulf %25, %26 : vector<2x3xf32>
    %28 = arith.truncf %18 : vector<2x2048xf32> to vector<2x2048xbf16>
    %c0_18 = arith.constant 0 : index
    %c0_19 = arith.constant 0 : index
    %29 = vector.load %arg7[%c0_18, %c0_19] : memref<2048x384xf32, #tpu.memory_space<vmem>>, vector<2048x384xf32>
    %30 = arith.truncf %29 : vector<2048x384xf32> to vector<2048x384xbf16>
    %cst_20 = arith.constant dense<0.000000e+00> : vector<2x384xf32>
    %31 = tpu.matmul %28, %30, %cst_20 {dimension_numbers = #tpu.dot_dimension_numbers<[1], [0], [0], [1], [0, 0, 1, 1], [], []>} : vector<2x2048xbf16>, vector<2048x384xbf16>, vector<2x384xf32> -> vector<2x384xf32>
    %c0_21 = arith.constant 0 : index
    %c0_22 = arith.constant 0 : index
    %32 = vector.load %arg8[%c0_21, %c0_22] : memref<1x384xf32, #tpu.memory_space<vmem>>, vector<1x384xf32>
    %33 = vector.broadcast %32 : vector<1x384xf32> to vector<2x384xf32>
    %34 = arith.addf %31, %33 : vector<2x384xf32>
    %c0_23 = arith.constant 0 : index
    %c0_24 = arith.constant 0 : index
    %35 = vector.load %arg9[%c0_23, %c0_24] : memref<1x384xf32, #tpu.memory_space<vmem>>, vector<1x384xf32>
    %cst_25 = arith.constant 5.000000e-01 : f32
    %36 = vector.broadcast %cst_25 : f32 to vector<1x384xf32>
    %37 = arith.mulf %35, %36 : vector<1x384xf32>
    %cst_26 = arith.constant 0.000000e+00 : f32
    %38 = vector.broadcast %cst_26 : f32 to vector<1x384xf32>
    %39 = arith.cmpf ogt, %37, %38 : vector<1x384xf32>
    %cst_27 = arith.constant 0.000000e+00 : f32
    %40 = vector.broadcast %cst_27 : f32 to vector<1x384xf32>
    %41 = arith.cmpf olt, %37, %40 : vector<1x384xf32>
    %cst_28 = arith.constant -1.000000e+00 : f32
    %cst_29 = arith.constant 0.000000e+00 : f32
    %42 = vector.broadcast %cst_28 : f32 to vector<1x384xf32>
    %43 = vector.broadcast %cst_29 : f32 to vector<1x384xf32>
    %44 = arith.select %41, %42, %43 : vector<1x384xi1>, vector<1x384xf32>
    %cst_30 = arith.constant 1.000000e+00 : f32
    %45 = vector.broadcast %cst_30 : f32 to vector<1x384xf32>
    %46 = arith.select %39, %45, %44 : vector<1x384xi1>, vector<1x384xf32>
    %47 = math.absf %37 : vector<1x384xf32>
    %cst_31 = arith.constant 1.000000e+00 : f32
    %48 = vector.broadcast %cst_31 : f32 to vector<1x384xf32>
    %49 = arith.subf %48, %47 : vector<1x384xf32>
    %50 = arith.divf %47, %49 : vector<1x384xf32>
    %51 = math.log %50 : vector<1x384xf32>
    %52 = math.tanh %27 : vector<2x3xf32>
    %c0_32 = arith.constant 0 : index
    %c0_33 = arith.constant 0 : index
    %53 = vector.load %arg10[%c0_32, %c0_33] : memref<3x384xf32, #tpu.memory_space<vmem>>, vector<3x384xf32>
    %cst_34 = arith.constant dense<0.000000e+00> : vector<2x384xf32>
    %54 = tpu.matmul %52, %53, %cst_34 {dimension_numbers = #tpu.dot_dimension_numbers<[1], [0], [0], [1], [0, 0, 1, 1], [], []>, precision = #tpu.contract_precision<fp32>} : vector<2x3xf32>, vector<3x384xf32>, vector<2x384xf32> -> vector<2x384xf32>
    %cst_35 = arith.constant 1.000000e+00 : f32
    %55 = vector.broadcast %cst_35 : f32 to vector<2x384xf32>
    %56 = arith.subf %55, %54 : vector<2x384xf32>
    %cst_36 = arith.constant 1.000000e+00 : f32
    %57 = vector.broadcast %cst_36 : f32 to vector<2x384xf32>
    %58 = arith.addf %54, %57 : vector<2x384xf32>
    %59 = vector.broadcast %51 : vector<1x384xf32> to vector<2x384xf32>
    %60 = arith.addf %59, %34 : vector<2x384xf32>
    %cst_37 = arith.constant 0.000000e+00 : f32
    %61 = vector.broadcast %cst_37 : f32 to vector<2x384xf32>
    %62 = arith.subf %61, %60 : vector<2x384xf32>
    %63 = math.exp %62 : vector<2x384xf32>
    %cst_38 = arith.constant 1.000000e+00 : f32
    %64 = vector.broadcast %cst_38 : f32 to vector<2x384xf32>
    %65 = arith.addf %64, %63 : vector<2x384xf32>
    %66 = vector.broadcast %46 : vector<1x384xf32> to vector<2x384xf32>
    %67 = arith.divf %66, %65 : vector<2x384xf32>
    %cst_39 = arith.constant 0.000000e+00 : f32
    %68 = vector.broadcast %cst_39 : f32 to vector<2x384xf32>
    %69 = arith.maximumf %67, %68 : vector<2x384xf32>
    %70 = arith.mulf %69, %56 : vector<2x384xf32>
    %cst_40 = arith.constant 0.000000e+00 : f32
    %71 = vector.broadcast %cst_40 : f32 to vector<2x384xf32>
    %72 = arith.subf %71, %67 : vector<2x384xf32>
    %cst_41 = arith.constant 0.000000e+00 : f32
    %73 = vector.broadcast %cst_41 : f32 to vector<2x384xf32>
    %74 = arith.maximumf %72, %73 : vector<2x384xf32>
    %75 = arith.mulf %74, %58 : vector<2x384xf32>
    %76 = arith.subf %70, %75 : vector<2x384xf32>
    %77 = arith.addf %76, %54 : vector<2x384xf32>
    %cst_42 = arith.constant 5.000000e-01 : f32
    %78 = vector.broadcast %cst_42 : f32 to vector<2x384xf32>
    %79 = arith.mulf %77, %78 : vector<2x384xf32>
    %c0_43 = arith.constant 0 : index
    %c0_44 = arith.constant 0 : index
    %80 = vector.load %arg11[%c0_43, %c0_44] : memref<2x384xf32, #tpu.memory_space<vmem>>, vector<2x384xf32>
    tpu.vector_store %arg11[%c0_43, %c0_44], %79 {strides = array<i32>} : memref<2x384xf32, #tpu.memory_space<vmem>>, vector<2x384xf32>,
    return
  }
}

</mosaic_0001>

<bundles_post_ra>
// kernel: genmodel_forward.1
= control target key start
LH: loop header
LB: loop body
LE: loop exit
PB: predicated region body
PF: predicated region fallthrough
CT: control target
= control target key end

     0   :  { %16 = vsyncpa [#allocation3], 0  ;;  %s10551_s0 = inlined_call_operand.hbm [shape: f32[2,48], index: 0, kind: input, shape index: {}]   ;;  %s10552_s1 = inlined_call_operand.hbm [shape: f32[48,1024], index: 1, kind: input, shape index: {}]   ;;  %s10553_s2 = inlined_call_operand.hbm [shape: f32[1,1024], index: 2, kind: input, shape index: {}]   ;;  %s10554_s3 = inlined_call_operand.hbm [shape: f32[1024,2048], index: 3, kind: input, shape index: {}]   ;;  %s10555_s4 = inlined_call_operand.hbm [shape: f32[1,2048], index: 4, kind: input, shape index: {}]   ;;  %s10556_s5 = inlined_call_operand.vmem [shape: f32[2048,3], index: 5, kind: input, shape index: {}]   ;;  %s10557_s6 = inlined_call_operand.hbm [shape: f32[1,3], index: 6, kind: input, shape index: {}]   ;;  %s10558_s7 = inlined_call_operand.hbm [shape: f32[2048,384], index: 7, kind: input, shape index: {}]   ;;  %s10559_s8 = inlined_call_operand.hbm [shape: f32[1,384], index: 8, kind: input, shape index: {}]   ;;  %s10560_s9 = inlined_call_operand.vmem [shape: f32[1,384], index: 9, kind: input, shape index: {}]   ;;  %s10561_s10 = inlined_call_operand.vmem [shape: f32[3,384], index: 10, kind: input, shape index: {}]   ;;  %s10562_s11 = inlined_call_operand.vmem [shape: f32[2,384], index: 11, kind: output, shape index: {}]  }
   0x1   :  { %17 = vsyncpa [#allocation5], 0 }
   0x2   :  { %18 = vsyncpa [#allocation8], 0 }
   0x3   :  { %19 = vsyncpa [#allocation11], 0 }
   0x4   :  { %20 = vsyncpa [#allocation14], 0  ;;  %s9134_s17 = smov [#allocation4]  }
   0x5   :  { %s36_s18 = sshll.u32 %s9134_s17, 4  ;;  %s37_s18 = int_to_ptr.vmem [resolvable:$true] %s36_s18 }
   0x6   :  { %s8972_s19 = scalar_lea.vmem %s37_s18, 6144  ;;  %p8977_p1 = scmp.lt.s32.totalorder %s37_s18, %s37_s18 }
   0x7   :  { %p8973_p0 = scmp.ne.s32.totalorder %s37_s18, %s8972_s19  ;;  %p8978_p2 = scmp.lt.s32.totalorder %s8972_s19, %s8972_s19 }
   0x9   :  { %p8979_p3 = por %p8978_p2, %p8977_p1 }
   0xb   :  { %p8980_p4 = pnand %p8979_p3, %p8973_p0 }
   0xd   :  { %8983 = shalt.err (!%p8980_p4)
}
   0xe   :  { %s9135_s20 = smov 1024   ;;  %s9136_s21 = smov 64  }
   0xf   :  { %42 = dma.hbm_to_vmem [thread:$0]  %s10552_s1, 6144, %s37_s18, [#allocation5], %s9135_s20, %s9135_s20, %s9136_s21  }
  0x10   :  { %s9137_s24 = smov [#allocation7]  }
  0x11   :  { %s58_s25 = sshll.u32 %s9137_s24, 4  ;;  %s59_s25 = int_to_ptr.vmem [resolvable:$true] %s58_s25 }
  0x12   :  { %s8992_s26 = scalar_lea.vmem %s59_s25, 262144  ;;  %p8997_p6 = scmp.lt.s32.totalorder %s59_s25, %s59_s25 }
  0x13   :  { %p8993_p5 = scmp.ne.s32.totalorder %s59_s25, %s8992_s26  ;;  %p8998_p7 = scmp.lt.s32.totalorder %s8992_s26, %s8992_s26 }
  0x15   :  { %p8999_p8 = por %p8998_p7, %p8997_p6 }
  0x17   :  { %p9000_p9 = pnand %p8999_p8, %p8993_p5 }
  0x19   :  { %9003 = shalt.err (!%p9000_p9)
}
  0x1a   :  { %s9138_s27 = smov 2048   ;;  %s9139_s28 = smov 128  }
  0x1b   :  { %64 = dma.hbm_to_vmem [thread:$0]  %s10554_s3, 262144, %s59_s25, [#allocation8], %s9138_s27, %s9138_s27, %s9139_s28  }
  0x1c   :  { %s9140_s12 = smov [#allocation10]   ;;  %s9141_s14 = smov [#allocation2]  }
  0x1d   :  { %s83_s13 = sshll.u32 %s9140_s12, 4  ;;  %s27_s1 = sshll.u32 %s9141_s14, 4  ;;  %s84_s13 = int_to_ptr.vmem [resolvable:$true] %s83_s13  ;;  %s28_s1 = int_to_ptr.vmem [resolvable:$true] %s27_s1 }
  0x1e   :  { %s9012_s15 = scalar_lea.vmem %s84_s13, 16  ;;  %s9016_s16 = scalar_lea.vmem %s84_s13, 32 }
  0x1f   :  { %p9013_p10 = scmp.ne.s32.totalorder %s84_s13, %s9012_s15  ;;  %p9017_p11 = scmp.lt.s32.totalorder %s84_s13, %s84_s13 }
  0x20   :  { %p9018_p12 = scmp.lt.s32.totalorder %s9016_s16, %s9012_s15 }
  0x22   :  { %p9019_p13 = por %p9018_p12, %p9017_p11 }
  0x24   :  { %p9020_p0 = pnand %p9019_p13, %p9013_p10 }
  0x26   :  { %9023 = shalt.err (!%p9020_p0)
}
  0x27   :  { %86 = dma.hbm_to_vmem [thread:$0]  %s10557_s6, 16, %s84_s13, [#allocation11]  }
  0x28   :  { %s9032_s19 = scalar_lea.vmem %s28_s1, 32  ;;  %p9037_p2 = scmp.lt.s32.totalorder %s28_s1, %s28_s1 }
  0x29   :  { %p9033_p1 = scmp.ne.s32.totalorder %s28_s1, %s9032_s19  ;;  %p9038_p3 = scmp.lt.s32.totalorder %s9032_s19, %s9032_s19 }
  0x2b   :  { %p9039_p4 = por %p9038_p3, %p9037_p2 }
  0x2d   :  { %p9040_p5 = pnand %p9039_p4, %p9033_p1 }
  0x2f   :  { %9043 = shalt.err (!%p9040_p5)
}
  0x30   :  { %30 = dma.hbm_to_vmem [thread:$0]  %s10551_s0, 32, %s28_s1, [#allocation3]  }
  0x31   :  { %s9142_s21 = smov [#allocation6]   ;;  %s9143_s23 = smov [#allocation9]  }
  0x32   :  { %s49_s22 = sshll.u32 %s9142_s21, 4  ;;  %s71_s24 = sshll.u32 %s9143_s23, 4  ;;  %s50_s22 = int_to_ptr.vmem [resolvable:$true] %s49_s22  ;;  %s72_s24 = int_to_ptr.vmem [resolvable:$true] %s71_s24 }
  0x33   :  { %s9052_s25 = scalar_lea.vmem %s50_s22, 128  ;;  %p9057_p7 = scmp.lt.s32.totalorder %s50_s22, %s50_s22 }
  0x34   :  { %p9053_p6 = scmp.ne.s32.totalorder %s50_s22, %s9052_s25  ;;  %p9058_p8 = scmp.lt.s32.totalorder %s9052_s25, %s9052_s25 }
  0x36   :  { %p9059_p9 = por %p9058_p8, %p9057_p7 }
  0x38   :  { %p9060_p10 = pnand %p9059_p9, %p9053_p6 }
  0x3a   :  { %9063 = shalt.err (!%p9060_p10)
}
  0x3b   :  { %52 = dma.hbm_to_vmem [thread:$0]  %s10553_s2, 128, %s50_s22, [#allocation5]  }
  0x3c   :  { %s9072_s27 = scalar_lea.vmem %s72_s24, 256  ;;  %p9077_p12 = scmp.lt.s32.totalorder %s72_s24, %s72_s24 }
  0x3d   :  { %p9073_p11 = scmp.ne.s32.totalorder %s72_s24, %s9072_s27  ;;  %p9078_p13 = scmp.lt.s32.totalorder %s9072_s27, %s9072_s27 }
  0x3f   :  { %p9079_p0 = por %p9078_p13, %p9077_p12 }
  0x41   :  { %p9080_p1 = pnand %p9079_p0, %p9073_p11 }
  0x43   :  { %9083 = shalt.err (!%p9080_p1)
}
  0x44   :  { %74 = dma.hbm_to_vmem [thread:$0]  %s10555_s4, 256, %s72_s24, [#allocation8]  }
  0x45   :  { %s9144_s29 = smov [#allocation12]  }
  0x46   :  { %s92_s30 = sshll.u32 %s9144_s29, 4  ;;  %s93_s30 = int_to_ptr.vmem [resolvable:$true] %s92_s30 }
  0x47   :  { %s9092_s12 = scalar_lea.vmem %s93_s30, 98304  ;;  %p9097_p3 = scmp.lt.s32.totalorder %s93_s30, %s93_s30 }
  0x48   :  { %p9093_p2 = scmp.ne.s32.totalorder %s93_s30, %s9092_s12  ;;  %p9098_p4 = scmp.lt.s32.totalorder %s9092_s12, %s9092_s12 }
  0x4a   :  { %p9099_p5 = por %p9098_p4, %p9097_p3 }
  0x4c   :  { %p9100_p6 = pnand %p9099_p5, %p9093_p2 }
  0x4e   :  { %9103 = shalt.err (!%p9100_p6)
}
  0x4f   :  { %s9145_s2 = smov 384   ;;  %s9146_s13 = smov 24  }
  0x50   :  { %98 = dma.hbm_to_vmem [thread:$0]  %s10558_s7, 98304, %s93_s30, [#allocation11], %s9145_s2, %s9145_s2, %s9146_s13  }
  0x51   :  { %s9147_s15 = smov [#allocation13]  }
  0x52   :  { %s105_s16 = sshll.u32 %s9147_s15, 4  ;;  %s106_s16 = int_to_ptr.vmem [resolvable:$true] %s105_s16 }
  0x53   :  { %s9112_s4 = scalar_lea.vmem %s106_s16, 48  ;;  %s9116_s17 = scalar_lea.vmem %s106_s16, 64 }
  0x54   :  { %p9113_p7 = scmp.ne.s32.totalorder %s106_s16, %s9112_s4  ;;  %p9117_p8 = scmp.lt.s32.totalorder %s106_s16, %s106_s16 }
  0x55   :  { %p9118_p9 = scmp.lt.s32.totalorder %s9116_s17, %s9112_s4 }
  0x57   :  { %p9119_p10 = por %p9118_p9, %p9117_p8 }
  0x59   :  { %p9120_p11 = pnand %p9119_p10, %p9113_p7 }
  0x5b   :  { %9123 = shalt.err (!%p9120_p11)
}
  0x5c   :  { %108 = dma.hbm_to_vmem [thread:$0]  %s10559_s8, 48, %s106_s16, [#allocation14]  }
  0x5d   :  { %9124 = dma.done.wait [#allocation3], 32  }
  0x5e   :  { %9125 = vsyncadd [#allocation3], 4294967264 }
  0x5f   :  { %9126 = dma.done.wait [#allocation5], 6272  }
  0x60   :  { %9127 = vsyncadd [#allocation5], 4294961024 }
  0x61   :  { %9128 = dma.done.wait [#allocation8], 262400  }
  0x62   :  { %9129 = vsyncadd [#allocation8], 4294704896 }
  0x63   :  { %9130 = dma.done.wait [#allocation11], 98320  }
  0x64   :  { %9131 = vsyncadd [#allocation11], 4294868976 }
  0x65   :  { %9132 = dma.done.wait [#allocation14], 48  }
  0x66   :  { %9133 = vsyncadd [#allocation14], 4294967248  ;;  %v9148_v0 = vmov 0   ;;  %v173_v1 = vld [vmem:[#allocation4 + $0x108] sm:$0xff]  ;;  %v175_v3 = vld [vmem:[#allocation4 + $0x118] sm:$0xff]  ;;  %vm254_vm0 = vcmask 392192  }
  0x67   :  { %290 = vmatprep.mubr.bf16.mxu0 %v9148_v0  ;;  %331 = vmatprep.mubr.bf16.mxu1 %v9148_v0  ;;  %v181_v2 = vld [vmem:[#allocation4 + $0x148] sm:$0xff]  ;;  %v183_v5 = vld [vmem:[#allocation4 + $0x158] sm:$0xff]  ;;  %v172_v6 = vld [vmem:[#allocation4 + $0x100] sm:$0xff]  ;;  %vm7485_vm1 = vcmask 23552   ;;  %vm7489_vm2 = vcmask 1042432   ;;  %vm9150_vm3 = vmmov 0  }
  0x68   :  { %v205_v4 = vpack.c.bf16 %v181_v2, %v173_v1  ;;  %v180_v7 = vld [vmem:[#allocation4 + $0x140] sm:$0xff]  ;;  %v207_v8 = vpack.c.bf16 %v183_v5, %v175_v3  ;;  %v174_v10 = vld [vmem:[#allocation4 + $0x110] sm:$0xff]  ;;  %v157_v12 = vld [vmem:[#allocation4 + $0x88] sm:$0xff] }
  0x69   :  { %v204_v9 = vpack.c.bf16 %v180_v7, %v172_v6  ;;  %v182_v11 = vld [vmem:[#allocation4 + $0x150] sm:$0xff]  ;;  %v165_v14 = vld [vmem:[#allocation4 + $0xc8] sm:$0xff]  ;;  %v159_v15 = vld [vmem:[#allocation4 + $0x98] sm:$0xff] }
  0x6a   :  { %268 = vmatprep.subr.bf16.mxu0 %v205_v4  ;;  %v206_v13 = vpack.c.bf16 %v182_v11, %v174_v10  ;;  %v167_v16 = vld [vmem:[#allocation4 + $0xd8] sm:$0xff]  ;;  %309 = vmatprep.subr.bf16.mxu1 %v207_v8  ;;  %v197_v17 = vpack.c.bf16 %v165_v14, %v157_v12  ;;  %v156_v19 = vld [vmem:[#allocation4 + $0x80] sm:$0xff]  ;;  %v158_v21 = vld [vmem:[#allocation4 + $0x90] sm:$0xff] }
  0x6b   :  { %269 = vmatpush1.bf16.msra.mxu0 %v204_v9  ;;  %v199_v18 = vpack.c.bf16 %v167_v16, %v159_v15  ;;  %v164_v20 = vld [vmem:[#allocation4 + $0xc0] sm:$0xff]  ;;  %v166_v23 = vld [vmem:[#allocation4 + $0xd0] sm:$0xff]  ;;  %v141_v24 = vld [vmem:[#allocation4 + $0x8] sm:$0xff] }
  0x6c   :  { %310 = vmatpush1.bf16.msra.mxu1 %v206_v13  ;;  %v196_v22 = vpack.c.bf16 %v164_v20, %v156_v19  ;;  %v149_v25 = vld [vmem:[#allocation4 + $0x48] sm:$0xff]  ;;  %270 = vmatprep.subr.bf16.mxu0 %v197_v17  ;;  %v198_v26 = vpack.c.bf16 %v166_v23, %v158_v21  ;;  %v143_v28 = vld [vmem:[#allocation4 + $0x18] sm:$0xff]  ;;  %v140_v30 = vld [vmem:[#allocation4] sm:$0xff] }
  0x6d   :  { %311 = vmatprep.subr.bf16.mxu1 %v199_v18  ;;  %v189_v27 = vpack.c.bf16 %v149_v25, %v141_v24  ;;  %v151_v29 = vld [vmem:[#allocation4 + $0x58] sm:$0xff]  ;;  %v148_v32 = vld [vmem:[#allocation4 + $0x40] sm:$0xff]  ;;  %v142_v33 = vld [vmem:[#allocation4 + $0x10] sm:$0xff] }
  0x6e   :  { %v191_v31 = vpack.c.bf16 %v151_v29, %v143_v28  ;;  %v150_v34 = vld [vmem:[#allocation4 + $0x50] sm:$0xff]  ;;  %v188_v35 = vpack.c.bf16 %v148_v32, %v140_v30  ;;  %v138_v36 = vld [vmem:[#allocation2] sm:$0x3]  ;;  %v177_v37 = vld [vmem:[#allocation4 + $0x128] sm:$0xff] }
  0x6f   :  { %271 = vmatpush1.bf16.msra.mxu0 %v196_v22  ;;  %v185_v38 = vld [vmem:[#allocation4 + $0x168] sm:$0xff]  ;;  %v190_v39 = vpack.c.bf16 %v150_v34, %v142_v33  ;;  %v176_v41 = vld [vmem:[#allocation4 + $0x120] sm:$0xff]  ;;  %v179_v43 = vld [vmem:[#allocation4 + $0x138] sm:$0xff]  ;;  %v9238_v47 = vpack.c.bf16 %v138_v36, %v138_v36 }
  0x70   :  { %312 = vmatpush1.bf16.msra.mxu1 %v198_v26  ;;  %272 = vmatprep.subr.bf16.mxu0 %v189_v27  ;;  %v209_v40 = vpack.c.bf16 %v185_v38, %v177_v37  ;;  %v184_v42 = vld [vmem:[#allocation4 + $0x160] sm:$0xff]  ;;  %v187_v44 = vld [vmem:[#allocation4 + $0x178] sm:$0xff]  ;;  %v178_v45 = vld [vmem:[#allocation4 + $0x130] sm:$0xff] }
  0x71   :  { %313 = vmatprep.subr.bf16.mxu1 %v191_v31  ;;  %v186_v46 = vld [vmem:[#allocation4 + $0x170] sm:$0xff]  ;;  %v211_v48 = vpack.c.bf16 %v187_v44, %v179_v43  ;;  %v161_v49 = vld [vmem:[#allocation4 + $0xa8] sm:$0xff]  ;;  %v208_v51 = vpack.c.bf16 %v184_v42, %v176_v41  ;;  %v163_v52 = vld [vmem:[#allocation4 + $0xb8] sm:$0xff] }
  0x72   :  { %v169_v50 = vld [vmem:[#allocation4 + $0xe8] sm:$0xff]  ;;  %v171_v53 = vld [vmem:[#allocation4 + $0xf8] sm:$0xff]  ;;  %v210_v54 = vpack.c.bf16 %v186_v46, %v178_v45  ;;  %v160_v56 = vld [vmem:[#allocation4 + $0xa0] sm:$0xff] }
  0x73   :  { %273 = vmatpush1.bf16.msra.mxu0 %v188_v35  ;;  %v201_v55 = vpack.c.bf16 %v169_v50, %v161_v49  ;;  %v168_v57 = vld [vmem:[#allocation4 + $0xe0] sm:$0xff]  ;;  %v162_v58 = vld [vmem:[#allocation4 + $0xb0] sm:$0xff]  ;;  %v203_v59 = vpack.c.bf16 %v171_v53, %v163_v52  ;;  %v145_v61 = vld [vmem:[#allocation4 + $0x28] sm:$0xff] }
  0x74   :  { %314 = vmatpush1.bf16.msra.mxu1 %v190_v39  ;;  %350 = vmatprep.subr.bf16.mxu0 %v209_v40  ;;  %v170_v60 = vld [vmem:[#allocation4 + $0xf0] sm:$0xff]  ;;  %v153_v62 = vld [vmem:[#allocation4 + $0x68] sm:$0xff]  ;;  %v147_v63 = vld [vmem:[#allocation4 + $0x38] sm:$0xff]  ;;  %v200_v2 = vpack.c.bf16 %v168_v57, %v160_v56 }
  0x75   :  { %391 = vmatprep.subr.bf16.mxu1 %v211_v48  ;;  %v155_v1 = vld [vmem:[#allocation4 + $0x78] sm:$0xff]  ;;  %v202_v3 = vpack.c.bf16 %v170_v60, %v162_v58  ;;  %v193_v4 = vpack.c.bf16 %v153_v62, %v145_v61  ;;  %v144_v5 = vld [vmem:[#allocation4 + $0x20] sm:$0xff]  ;;  %v146_v7 = vld [vmem:[#allocation4 + $0x30] sm:$0xff] }
  0x76   :  { %8520 = vmatmul.mubr.msk.bf16.vlgmr.msra.gmra.mxu0 %vm254_vm0, %v9238_v47  ;;  %v152_v6 = vld [vmem:[#allocation4 + $0x60] sm:$0xff]  ;;  %v195_v8 = vpack.c.bf16 %v155_v1, %v147_v63  ;;  %v154_v9 = vld [vmem:[#allocation4 + $0x70] sm:$0xff]  ;;  %v662_v17 = vld [vmem:[#allocation7 + $0x700] sm:$0xff] }
  0x77   :  { %8521 = vmatmul.mubr.msk.bf16.vlgmr.msra.gmra.mxu1 %vm254_vm0, %v9238_v47  ;;  %351 = vmatpush1.bf16.msra.mxu0 %v208_v51  ;;  %v663_v10 = vld [vmem:[#allocation7 + $0x708] sm:$0xff]  ;;  %v192_v14 = vpack.c.bf16 %v152_v6, %v144_v5  ;;  %v194_v15 = vpack.c.bf16 %v154_v9, %v146_v7  ;;  %v678_v18 = vld [vmem:[#allocation7 + $0x780] sm:$0xff] }
  0x78   :  { %392 = vmatpush1.bf16.msra.mxu1 %v210_v54  ;;  %352 = vmatprep.subr.bf16.mxu0 %v201_v55  ;;  %v679_v11 = vld [vmem:[#allocation7 + $0x788] sm:$0xff]  ;;  %v1174_v19 = vld [vmem:[#allocation7 + $0x1700] sm:$0xff] }
  0x79   :  { %393 = vmatprep.subr.bf16.mxu1 %v203_v59  ;;  %372 = vmatprep.mubr.bf16.mxu0 %v9148_v0  ;;  %v1175_v12 = vld [vmem:[#allocation7 + $0x1708] sm:$0xff]  ;;  %v2599_v16 = vpack.c.bf16 %v679_v11, %v663_v10  ;;  %v1190_v21 = vld [vmem:[#allocation7 + $0x1780] sm:$0xff] }
  0x7a   :  { %413 = vmatprep.mubr.bf16.mxu1 %v9148_v0  ;;  %v1191_v13 = vld [vmem:[#allocation7 + $0x1788] sm:$0xff]  ;;  %v2598_v0 = vpack.c.bf16 %v678_v18, %v662_v17  ;;  %v2854_v26 = vpack.c.bf16 %v1190_v21, %v1174_v19  ;;  %v630_v28 = vld [vmem:[#allocation7 + $0x600] sm:$0xff] }
  0x7b   :  { %353 = vmatpush1.bf16.msra.mxu0 %v200_v2  ;;  %v2855_v20 = vpack.c.bf16 %v1191_v13, %v1175_v12  ;;  %v631_v22 = vld [vmem:[#allocation7 + $0x608] sm:$0xff]  ;;  %v646_v29 = vld [vmem:[#allocation7 + $0x680] sm:$0xff] }
  0x7c   :  { %394 = vmatpush1.bf16.msra.mxu1 %v202_v3  ;;  %354 = vmatprep.subr.bf16.mxu0 %v193_v4  ;;  %v647_v23 = vld [vmem:[#allocation7 + $0x688] sm:$0xff]  ;;  %v1142_v30 = vld [vmem:[#allocation7 + $0x1600] sm:$0xff]  ;;  %v2582_v37 = vpack.c.bf16 %v646_v29, %v630_v28 }
  0x7d   :  { %395 = vmatprep.subr.bf16.mxu1 %v195_v8  ;;  %v1143_v24 = vld [vmem:[#allocation7 + $0x1608] sm:$0xff]  ;;  %v2583_v27 = vpack.c.bf16 %v647_v23, %v631_v22  ;;  %v1158_v32 = vld [vmem:[#allocation7 + $0x1680] sm:$0xff] }
  0x7e   :  { %v1159_v25 = vld [vmem:[#allocation7 + $0x1688] sm:$0xff]  ;;  %v2838_v38 = vpack.c.bf16 %v1158_v32, %v1142_v30  ;;  %v598_v40 = vld [vmem:[#allocation7 + $0x500] sm:$0xff] }
  0x7f   :  { %355 = vmatpush1.bf16.msra.mxu0 %v192_v14  ;;  %v2839_v31 = vpack.c.bf16 %v1159_v25, %v1143_v24  ;;  %v599_v33 = vld [vmem:[#allocation7 + $0x508] sm:$0xff]  ;;  %v614_v41 = vld [vmem:[#allocation7 + $0x580] sm:$0xff] }
  0x80   :  { %396 = vmatpush1.bf16.msra.mxu1 %v194_v15  ;;  %3594 = vmatprep.subr.bf16.mxu0 %v2599_v16  ;;  %v615_v34 = vld [vmem:[#allocation7 + $0x588] sm:$0xff]  ;;  %v1110_v42 = vld [vmem:[#allocation7 + $0x1500] sm:$0xff]  ;;  %v2566_v50 = vpack.c.bf16 %v614_v41, %v598_v40 }
  0x81   :  { %3635 = vmatprep.subr.bf16.mxu1 %v2855_v20  ;;  %v1111_v35 = vld [vmem:[#allocation7 + $0x1508] sm:$0xff]  ;;  %v2567_v39 = vpack.c.bf16 %v615_v34, %v599_v33  ;;  %v1126_v44 = vld [vmem:[#allocation7 + $0x1580] sm:$0xff] }
  0x82   :  { %8522 = vmatmul.mubr.msk.bf16.vlgmr.msra.gmra.mxu0 %vm254_vm0, %v9238_v47  ;;  %v1127_v36 = vld [vmem:[#allocation7 + $0x1588] sm:$0xff]  ;;  %v566_v52 = vld [vmem:[#allocation7 + $0x400] sm:$0xff] }
  0x83   :  { %8523 = vmatmul.mubr.msk.bf16.vlgmr.msra.gmra.mxu1 %vm254_vm0, %v9238_v47  ;;  %3595 = vmatpush1.bf16.msra.mxu0 %v2598_v0  ;;  %v2823_v43 = vpack.c.bf16 %v1127_v36, %v1111_v35  ;;  %v567_v45 = vld [vmem:[#allocation7 + $0x408] sm:$0xff]  ;;  %v2822_v47 = vpack.c.bf16 %v1126_v44, %v1110_v42  ;;  %v582_v53 = vld [vmem:[#allocation7 + $0x480] sm:$0xff] }
  0x84   :  { %3636 = vmatpush1.bf16.msra.mxu1 %v2854_v26  ;;  %3596 = vmatprep.subr.bf16.mxu0 %v2583_v27  ;;  %v583_v46 = vld [vmem:[#allocation7 + $0x488] sm:$0xff]  ;;  %v1078_v54 = vld [vmem:[#allocation7 + $0x1400] sm:$0xff]  ;;  %v2550_v61 = vpack.c.bf16 %v582_v53, %v566_v52 }
  0x85   :  { %3637 = vmatprep.subr.bf16.mxu1 %v2839_v31  ;;  %v1079_v48 = vld [vmem:[#allocation7 + $0x1408] sm:$0xff]  ;;  %v2551_v51 = vpack.c.bf16 %v583_v46, %v567_v45  ;;  %v1094_v56 = vld [vmem:[#allocation7 + $0x1480] sm:$0xff] }
  0x86   :  { %v1095_v49 = vld [vmem:[#allocation7 + $0x1488] sm:$0xff]  ;;  %v2806_v62 = vpack.c.bf16 %v1094_v56, %v1078_v54  ;;  %v534_v1 = vld [vmem:[#allocation7 + $0x300] sm:$0xff] }
  0x87   :  { %3597 = vmatpush1.bf16.msra.mxu0 %v2582_v37  ;;  %v2807_v55 = vpack.c.bf16 %v1095_v49, %v1079_v48  ;;  %v535_v57 = vld [vmem:[#allocation7 + $0x308] sm:$0xff]  ;;  %v550_v2 = vld [vmem:[#allocation7 + $0x380] sm:$0xff] }
  0x88   :  { %3638 = vmatpush1.bf16.msra.mxu1 %v2838_v38  ;;  %3598 = vmatprep.subr.bf16.mxu0 %v2567_v39  ;;  %v551_v58 = vld [vmem:[#allocation7 + $0x388] sm:$0xff]  ;;  %v1046_v3 = vld [vmem:[#allocation7 + $0x1300] sm:$0xff]  ;;  %v2534_v10 = vpack.c.bf16 %v550_v2, %v534_v1 }
  0x89   :  { %3639 = vmatprep.subr.bf16.mxu1 %v2823_v43  ;;  %v1047_v59 = vld [vmem:[#allocation7 + $0x1308] sm:$0xff]  ;;  %v2535_v63 = vpack.c.bf16 %v551_v58, %v535_v57  ;;  %v1062_v5 = vld [vmem:[#allocation7 + $0x1380] sm:$0xff] }
  0x8a   :  { %v1063_v60 = vld [vmem:[#allocation7 + $0x1388] sm:$0xff]  ;;  %v2790_v11 = vpack.c.bf16 %v1062_v5, %v1046_v3  ;;  %v502_v13 = vld [vmem:[#allocation7 + $0x200] sm:$0xff] }
  0x8b   :  { %3599 = vmatpush1.bf16.msra.mxu0 %v2566_v50  ;;  %v2791_v4 = vpack.c.bf16 %v1063_v60, %v1047_v59  ;;  %v503_v6 = vld [vmem:[#allocation7 + $0x208] sm:$0xff]  ;;  %v518_v14 = vld [vmem:[#allocation7 + $0x280] sm:$0xff] }
  0x8c   :  { %3640 = vmatpush1.bf16.msra.mxu1 %v2822_v47  ;;  %3600 = vmatprep.subr.bf16.mxu0 %v2551_v51  ;;  %v519_v7 = vld [vmem:[#allocation7 + $0x288] sm:$0xff]  ;;  %v1014_v15 = vld [vmem:[#allocation7 + $0x1200] sm:$0xff]  ;;  %v2518_v22 = vpack.c.bf16 %v518_v14, %v502_v13 }
  0x8d   :  { %3641 = vmatprep.subr.bf16.mxu1 %v2807_v55  ;;  %v1015_v8 = vld [vmem:[#allocation7 + $0x1208] sm:$0xff]  ;;  %v2519_v12 = vpack.c.bf16 %v519_v7, %v503_v6  ;;  %v1030_v17 = vld [vmem:[#allocation7 + $0x1280] sm:$0xff] }
  0x8e   :  { %v1031_v9 = vld [vmem:[#allocation7 + $0x1288] sm:$0xff]  ;;  %v2774_v23 = vpack.c.bf16 %v1030_v17, %v1014_v15  ;;  %v470_v25 = vld [vmem:[#allocation7 + $0x100] sm:$0xff] }
  0x8f   :  { %3601 = vmatpush1.bf16.msra.mxu0 %v2550_v61  ;;  %v2775_v16 = vpack.c.bf16 %v1031_v9, %v1015_v8  ;;  %v471_v18 = vld [vmem:[#allocation7 + $0x108] sm:$0xff]  ;;  %v486_v0 = vld [vmem:[#allocation7 + $0x180] sm:$0xff] }
  0x90   :  { %3642 = vmatpush1.bf16.msra.mxu1 %v2806_v62  ;;  %3602 = vmatprep.subr.bf16.mxu0 %v2535_v63  ;;  %v487_v19 = vld [vmem:[#allocation7 + $0x188] sm:$0xff]  ;;  %v982_v26 = vld [vmem:[#allocation7 + $0x1100] sm:$0xff]  ;;  %v2502_v33 = vpack.c.bf16 %v486_v0, %v470_v25 }
  0x91   :  { %3643 = vmatprep.subr.bf16.mxu1 %v2791_v4  ;;  %v983_v20 = vld [vmem:[#allocation7 + $0x1108] sm:$0xff]  ;;  %v2503_v24 = vpack.c.bf16 %v487_v19, %v471_v18  ;;  %v998_v28 = vld [vmem:[#allocation7 + $0x1180] sm:$0xff] }
  0x92   :  { %v999_v21 = vld [vmem:[#allocation7 + $0x1188] sm:$0xff]  ;;  %v2758_v34 = vpack.c.bf16 %v998_v28, %v982_v26  ;;  %v438_v36 = vld [vmem:[#allocation7] sm:$0xff] }
  0x93   :  { %3603 = vmatpush1.bf16.msra.mxu0 %v2534_v10  ;;  %v2759_v27 = vpack.c.bf16 %v999_v21, %v983_v20  ;;  %v439_v29 = vld [vmem:[#allocation7 + $0x8] sm:$0xff]  ;;  %v454_v37 = vld [vmem:[#allocation7 + $0x80] sm:$0xff] }
  0x94   :  { %3644 = vmatpush1.bf16.msra.mxu1 %v2790_v11  ;;  %3604 = vmatprep.subr.bf16.mxu0 %v2519_v12  ;;  %v455_v30 = vld [vmem:[#allocation7 + $0x88] sm:$0xff]  ;;  %v950_v38 = vld [vmem:[#allocation7 + $0x1000] sm:$0xff]  ;;  %v2486_v45 = vpack.c.bf16 %v454_v37, %v438_v36 }
  0x95   :  { %3645 = vmatprep.subr.bf16.mxu1 %v2775_v16  ;;  %v951_v31 = vld [vmem:[#allocation7 + $0x1008] sm:$0xff]  ;;  %v2487_v35 = vpack.c.bf16 %v455_v30, %v439_v29  ;;  %v966_v40 = vld [vmem:[#allocation7 + $0x1080] sm:$0xff] }
  0x96   :  { %v967_v32 = vld [vmem:[#allocation7 + $0x1088] sm:$0xff]  ;;  %v2742_v46 = vpack.c.bf16 %v966_v40, %v950_v38  ;;  %v918_v49 = vld [vmem:[#allocation7 + $0xf00] sm:$0xff] }
  0x97   :  { %3605 = vmatpush1.bf16.msra.mxu0 %v2518_v22  ;;  %v2743_v39 = vpack.c.bf16 %v967_v32, %v951_v31  ;;  %v919_v41 = vld [vmem:[#allocation7 + $0xf08] sm:$0xff]  ;;  %v934_v50 = vld [vmem:[#allocation7 + $0xf80] sm:$0xff] }
  0x98   :  { %3646 = vmatpush1.bf16.msra.mxu1 %v2774_v23  ;;  %3606 = vmatprep.subr.bf16.mxu0 %v2503_v24  ;;  %v935_v42 = vld [vmem:[#allocation7 + $0xf88] sm:$0xff]  ;;  %v1430_v47 = vld [vmem:[#allocation7 + $0x1f00] sm:$0xff]  ;;  %v2726_v57 = vpack.c.bf16 %v934_v50, %v918_v49 }
  0x99   :  { %3647 = vmatprep.subr.bf16.mxu1 %v2759_v27  ;;  %v1431_v43 = vld [vmem:[#allocation7 + $0x1f08] sm:$0xff]  ;;  %v2727_v48 = vpack.c.bf16 %v935_v42, %v919_v41  ;;  %v1446_v52 = vld [vmem:[#allocation7 + $0x1f80] sm:$0xff] }
  0x9a   :  { %v1447_v44 = vld [vmem:[#allocation7 + $0x1f88] sm:$0xff]  ;;  %v2982_v58 = vpack.c.bf16 %v1446_v52, %v1430_v47  ;;  %v886_v60 = vld [vmem:[#allocation7 + $0xe00] sm:$0xff] }
  0x9b   :  { %3607 = vmatpush1.bf16.msra.mxu0 %v2502_v33  ;;  %v2983_v51 = vpack.c.bf16 %v1447_v44, %v1431_v43  ;;  %v887_v53 = vld [vmem:[#allocation7 + $0xe08] sm:$0xff]  ;;  %v902_v61 = vld [vmem:[#allocation7 + $0xe80] sm:$0xff] }
  0x9c   :  { %3648 = vmatpush1.bf16.msra.mxu1 %v2758_v34  ;;  %3608 = vmatprep.subr.bf16.mxu0 %v2487_v35  ;;  %v903_v54 = vld [vmem:[#allocation7 + $0xe88] sm:$0xff]  ;;  %v1398_v62 = vld [vmem:[#allocation7 + $0x1e00] sm:$0xff]  ;;  %v2710_v6 = vpack.c.bf16 %v902_v61, %v886_v60 }
  0x9d   :  { %3649 = vmatprep.subr.bf16.mxu1 %v2743_v39  ;;  %v1399_v55 = vld [vmem:[#allocation7 + $0x1e08] sm:$0xff]  ;;  %v2711_v59 = vpack.c.bf16 %v903_v54, %v887_v53  ;;  %v1414_v1 = vld [vmem:[#allocation7 + $0x1e80] sm:$0xff] }
  0x9e   :  { %v1415_v56 = vld [vmem:[#allocation7 + $0x1e88] sm:$0xff]  ;;  %v2966_v7 = vpack.c.bf16 %v1414_v1, %v1398_v62  ;;  %v854_v9 = vld [vmem:[#allocation7 + $0xd00] sm:$0xff] }
  0x9f   :  { %3609 = vmatpush1.bf16.msra.mxu0 %v2486_v45  ;;  %v2967_v63 = vpack.c.bf16 %v1415_v56, %v1399_v55  ;;  %v855_v2 = vld [vmem:[#allocation7 + $0xd08] sm:$0xff]  ;;  %v870_v10 = vld [vmem:[#allocation7 + $0xd80] sm:$0xff] }
  0xa0   :  { %3650 = vmatpush1.bf16.msra.mxu1 %v2742_v46  ;;  %3610 = vmatprep.subr.bf16.mxu0 %v2727_v48  ;;  %v871_v3 = vld [vmem:[#allocation7 + $0xd88] sm:$0xff]  ;;  %v1366_v11 = vld [vmem:[#allocation7 + $0x1d00] sm:$0xff]  ;;  %v2694_v18 = vpack.c.bf16 %v870_v10, %v854_v9 }
  0xa1   :  { %3651 = vmatprep.subr.bf16.mxu1 %v2983_v51  ;;  %v1367_v4 = vld [vmem:[#allocation7 + $0x1d08] sm:$0xff]  ;;  %v2695_v8 = vpack.c.bf16 %v871_v3, %v855_v2  ;;  %v1382_v13 = vld [vmem:[#allocation7 + $0x1d80] sm:$0xff] }
  0xa2   :  { %v1383_v5 = vld [vmem:[#allocation7 + $0x1d88] sm:$0xff]  ;;  %v2950_v19 = vpack.c.bf16 %v1382_v13, %v1366_v11  ;;  %v822_v21 = vld [vmem:[#allocation7 + $0xc00] sm:$0xff] }
  0xa3   :  { %3611 = vmatpush2.bf16.msra.mxu0 %v2726_v57  ;;  %v2951_v12 = vpack.c.bf16 %v1383_v5, %v1367_v4  ;;  %v823_v14 = vld [vmem:[#allocation7 + $0xc08] sm:$0xff]  ;;  %v838_v22 = vld [vmem:[#allocation7 + $0xc80] sm:$0xff] }
  0xa4   :  { %3652 = vmatpush2.bf16.msra.mxu1 %v2982_v58  ;;  %3612 = vmatprep.subr.bf16.mxu0 %v2711_v59  ;;  %v839_v15 = vld [vmem:[#allocation7 + $0xc88] sm:$0xff]  ;;  %v1334_v23 = vld [vmem:[#allocation7 + $0x1c00] sm:$0xff]  ;;  %v2678_v29 = vpack.c.bf16 %v838_v22, %v822_v21  ;;  %v9255_v21 = vld [vmem:[#allocation6] sm:$0xff] }
  0xa5   :  { %3653 = vmatprep.subr.bf16.mxu1 %v2967_v63  ;;  %v1335_v16 = vld [vmem:[#allocation7 + $0x1c08] sm:$0xff]  ;;  %v2679_v20 = vpack.c.bf16 %v839_v15, %v823_v14  ;;  %v1350_v25 = vld [vmem:[#allocation7 + $0x1c80] sm:$0xff] }
  0xa6   :  { %v1351_v17 = vld [vmem:[#allocation7 + $0x1c88] sm:$0xff]  ;;  %v2934_v30 = vpack.c.bf16 %v1350_v25, %v1334_v23  ;;  %v790_v32 = vld [vmem:[#allocation7 + $0xb00] sm:$0xff] }
  0xa7   :  { %3613 = vmatpush2.bf16.msra.mxu0 %v2710_v6  ;;  %v2935_v24 = vpack.c.bf16 %v1351_v17, %v1335_v16  ;;  %v791_v0 = vld [vmem:[#allocation7 + $0xb08] sm:$0xff]  ;;  %v806_v33 = vld [vmem:[#allocation7 + $0xb80] sm:$0xff] }
  0xa8   :  { %3654 = vmatpush2.bf16.msra.mxu1 %v2966_v7  ;;  %3614 = vmatprep.subr.bf16.mxu0 %v2695_v8  ;;  %v807_v26 = vld [vmem:[#allocation7 + $0xb88] sm:$0xff]  ;;  %v1302_v34 = vld [vmem:[#allocation7 + $0x1b00] sm:$0xff]  ;;  %v2662_v41 = vpack.c.bf16 %v806_v33, %v790_v32 }
  0xa9   :  { %3655 = vmatprep.subr.bf16.mxu1 %v2951_v12  ;;  %v1303_v27 = vld [vmem:[#allocation7 + $0x1b08] sm:$0xff]  ;;  %v2663_v31 = vpack.c.bf16 %v807_v26, %v791_v0  ;;  %v1318_v36 = vld [vmem:[#allocation7 + $0x1b80] sm:$0xff] }
  0xaa   :  { %v1319_v28 = vld [vmem:[#allocation7 + $0x1b88] sm:$0xff]  ;;  %v2918_v42 = vpack.c.bf16 %v1318_v36, %v1302_v34  ;;  %v758_v44 = vld [vmem:[#allocation7 + $0xa00] sm:$0xff] }
  0xab   :  { %3615 = vmatpush2.bf16.msra.mxu0 %v2694_v18  ;;  %v2919_v35 = vpack.c.bf16 %v1319_v28, %v1303_v27  ;;  %v759_v37 = vld [vmem:[#allocation7 + $0xa08] sm:$0xff]  ;;  %v774_v45 = vld [vmem:[#allocation7 + $0xa80] sm:$0xff]  ;;  %v214_v18 = vlaneseq }
  0xac   :  { %3656 = vmatpush2.bf16.msra.mxu1 %v2950_v19  ;;  %3616 = vmatprep.subr.bf16.mxu0 %v2679_v20  ;;  %v775_v38 = vld [vmem:[#allocation7 + $0xa88] sm:$0xff]  ;;  %v1270_v48 = vld [vmem:[#allocation7 + $0x1a00] sm:$0xff]  ;;  %v2646_v50 = vpack.c.bf16 %v774_v45, %v758_v44 }
  0xad   :  { %3657 = vmatprep.subr.bf16.mxu1 %v2935_v24  ;;  %v1271_v39 = vld [vmem:[#allocation7 + $0x1a08] sm:$0xff]  ;;  %v2647_v43 = vpack.c.bf16 %v775_v38, %v759_v37  ;;  %v1286_v49 = vld [vmem:[#allocation7 + $0x1a80] sm:$0xff]  ;;  %v9250_v19 = vshrl.u32 %v214_v18, 7 }
  0xae   :  { %v1287_v40 = vld [vmem:[#allocation7 + $0x1a88] sm:$0xff]  ;;  %v2902_v47 = vpack.c.bf16 %v1286_v49, %v1270_v48  ;;  %v726_v56 = vld [vmem:[#allocation7 + $0x900] sm:$0xff] }
  0xaf   :  { %3617 = vmatpush2.bf16.msra.mxu0 %v2678_v29  ;;  %v2903_v46 = vpack.c.bf16 %v1287_v40, %v1271_v39  ;;  %v727_v51 = vld [vmem:[#allocation7 + $0x908] sm:$0xff]  ;;  %v742_v57 = vld [vmem:[#allocation7 + $0x980] sm:$0xff]  ;;  %v9253_v20 = vsub.s32 0, %v9250_v19  ;;  %v9258_v22 = vsub.s32 2, %v9250_v19  ;;  %v9261_v23 = vsub.s32 1, %v9250_v19 }
  0xb0   :  { %3658 = vmatpush2.bf16.msra.mxu1 %v2934_v30  ;;  %3618 = vmatprep.subr.bf16.mxu0 %v2663_v31  ;;  %v743_v52 = vld [vmem:[#allocation7 + $0x988] sm:$0xff]  ;;  %v2630_v59 = vpack.c.bf16 %v742_v57, %v726_v56  ;;  %v1238_v60 = vld [vmem:[#allocation7 + $0x1900] sm:$0xff]  ;;  %v9264_v24 = vsub.s32 3, %v9250_v19  ;;  %v9279_v56 = vsub.s32 5, %v9250_v19 }
  0xb1   :  { %3659 = vmatprep.subr.bf16.mxu1 %v2919_v35  ;;  %v1239_v53 = vld [vmem:[#allocation7 + $0x1908] sm:$0xff]  ;;  %v2631_v54 = vpack.c.bf16 %v743_v52, %v727_v51  ;;  %v1254_v61 = vld [vmem:[#allocation7 + $0x1980] sm:$0xff]  ;;  %v217_v25 = vrot.slane %v9255_v21, %v9253_v20  ;;  %v225_v0 = vrot.slane %v9255_v21, %v9258_v22  ;;  %v221_v26 = vrot.slane %v9255_v21, %v9261_v23 }
  0xb2   :  { %v1255_v55 = vld [vmem:[#allocation7 + $0x1988] sm:$0xff]  ;;  %v2886_v62 = vpack.c.bf16 %v1254_v61, %v1238_v60  ;;  %v694_v5 = vld [vmem:[#allocation7 + $0x800] sm:$0xff]  ;;  %v229_v28 = vrot.slane %v9255_v21, %v9264_v24 }
  0xb3   :  { %3619 = vmatpush2.bf16.msra.mxu0 %v2662_v41  ;;  %v2887_v58 = vpack.c.bf16 %v1255_v55, %v1239_v53  ;;  %v695_v63 = vld [vmem:[#allocation7 + $0x808] sm:$0xff]  ;;  %v710_v6 = vld [vmem:[#allocation7 + $0x880] sm:$0xff] }
  0xb4   :  { %3660 = vmatpush2.bf16.msra.mxu1 %v2918_v42  ;;  %3620 = vmatprep.subr.bf16.mxu0 %v2647_v43  ;;  %v711_v1 = vld [vmem:[#allocation7 + $0x888] sm:$0xff]  ;;  %v2614_v8 = vpack.c.bf16 %v710_v6, %v694_v5  ;;  %v1206_v9 = vld [vmem:[#allocation7 + $0x1800] sm:$0xff] }
  0xb5   :  { %3661 = vmatprep.subr.bf16.mxu1 %v2903_v46  ;;  %v1207_v2 = vld [vmem:[#allocation7 + $0x1808] sm:$0xff]  ;;  %v2615_v3 = vpack.c.bf16 %v711_v1, %v695_v63  ;;  %v1222_v10 = vld [vmem:[#allocation7 + $0x1880] sm:$0xff]  ;;  %v9286_v63 = vsub.s32 7, %v9250_v19 }
  0xb6   :  { %v1223_v4 = vld [vmem:[#allocation7 + $0x1888] sm:$0xff]  ;;  %v2870_v11 = vpack.c.bf16 %v1222_v10, %v1206_v9  ;;  %v1686_v35 = vld [vmem:[#allocation7 + $0x2700] sm:$0xff] }
  0xb7   :  { %3621 = vmatpush2.bf16.msra.mxu0 %v2646_v50  ;;  %v2871_v7 = vpack.c.bf16 %v1223_v4, %v1207_v2  ;;  %v1687_v12 = vld [vmem:[#allocation7 + $0x2708] sm:$0xff]  ;;  %v1702_v36 = vld [vmem:[#allocation7 + $0x2780] sm:$0xff] }
  0xb8   :  { %3662 = vmatpush2.bf16.msra.mxu1 %v2902_v47  ;;  %3622 = vmatprep.subr.bf16.mxu0 %v2631_v54  ;;  %v1703_v13 = vld [vmem:[#allocation7 + $0x2788] sm:$0xff]  ;;  %v2198_v41 = vld [vmem:[#allocation7 + $0x3700] sm:$0xff]  ;;  %v3110_v50 = vpack.c.bf16 %v1702_v36, %v1686_v35 }
  0xb9   :  { %3663 = vmatprep.subr.bf16.mxu1 %v2887_v58  ;;  %v2199_v14 = vld [vmem:[#allocation7 + $0x3708] sm:$0xff]  ;;  %v3111_v15 = vpack.c.bf16 %v1703_v13, %v1687_v12  ;;  %v2214_v42 = vld [vmem:[#allocation7 + $0x3780] sm:$0xff] }
  0xba   :  { %v2215_v16 = vld [vmem:[#allocation7 + $0x3788] sm:$0xff]  ;;  %v3366_v55 = vpack.c.bf16 %v2214_v42, %v2198_v41  ;;  %v1654_v60 = vld [vmem:[#allocation7 + $0x2600] sm:$0xff] }
  0xbb   :  { %3623 = vmatpush2.bf16.msra.mxu0 %v2630_v59  ;;  %v3367_v17 = vpack.c.bf16 %v2215_v16, %v2199_v14  ;;  %v1655_v45 = vld [vmem:[#allocation7 + $0x2608] sm:$0xff]  ;;  %v1670_v61 = vld [vmem:[#allocation7 + $0x2680] sm:$0xff] }
  0xbc   :  { %3664 = vmatpush2.bf16.msra.mxu1 %v2886_v62  ;;  %3624 = vmatprep.subr.bf16.mxu0 %v2615_v3  ;;  %v1671_v46 = vld [vmem:[#allocation7 + $0x2688] sm:$0xff]  ;;  %v2166_v62 = vld [vmem:[#allocation7 + $0x3600] sm:$0xff] }
  0xbd   :  { %3665 = vmatprep.subr.bf16.mxu1 %v2871_v7  ;;  %v2167_v47 = vld [vmem:[#allocation7 + $0x3608] sm:$0xff]  ;;  %v3095_v59 = vpack.c.bf16 %v1671_v46, %v1655_v45  ;;  %v2182_v2 = vld [vmem:[#allocation7 + $0x3680] sm:$0xff]  ;;  %v3094_v7 = vpack.c.bf16 %v1670_v61, %v1654_v60 }
  0xbe   :  { %v2183_v51 = vld [vmem:[#allocation7 + $0x3688] sm:$0xff]  ;;  %v3350_v9 = vpack.c.bf16 %v2182_v2, %v2166_v62  ;;  %v1638_v12 = vld [vmem:[#allocation7 + $0x2580] sm:$0xff] }
  0xbf   :  { %3625 = vmatpush2.bf16.msra.mxu0 %v2614_v8  ;;  %v3351_v1 = vpack.c.bf16 %v2183_v51, %v2167_v47  ;;  %v1623_v3 = vld [vmem:[#allocation7 + $0x2508] sm:$0xff]  ;;  %v237_v8 = vrot.slane %v9255_v21, %v9279_v56  ;;  %v2134_v13 = vld [vmem:[#allocation7 + $0x3500] sm:$0xff] }
  0xc0   :  { %3666 = vmatpush2.bf16.msra.mxu1 %v2870_v11  ;;  %3676 = vmatprep.subr.bf16.mxu0 %v3111_v15  ;;  %v1639_v4 = vld [vmem:[#allocation7 + $0x2588] sm:$0xff]  ;;  %v1622_v11 = vld [vmem:[#allocation7 + $0x2500] sm:$0xff]  ;;  %v245_v15 = vrot.slane %v9255_v21, %v9286_v63 }
  0xc1   :  { %3717 = vmatprep.subr.bf16.mxu1 %v3367_v17  ;;  %v2135_v5 = vld [vmem:[#allocation7 + $0x3508] sm:$0xff]  ;;  %v3079_v10 = vpack.c.bf16 %v1639_v4, %v1623_v3  ;;  %v2150_v17 = vld [vmem:[#allocation7 + $0x3580] sm:$0xff] }
  0xc2   :  { %v2151_v6 = vld [vmem:[#allocation7 + $0x3588] sm:$0xff]  ;;  %v1606_v35 = vld [vmem:[#allocation7 + $0x2480] sm:$0xff] }
  0xc3   :  { %v3335_v16 = vpack.c.bf16 %v2151_v6, %v2135_v5  ;;  %v1591_v18 = vld [vmem:[#allocation7 + $0x2408] sm:$0xff]  ;;  %v2102_v36 = vld [vmem:[#allocation7 + $0x3400] sm:$0xff] }
  0xc4   :  { %v1559_v41 = vld [vmem:[#allocation7 + $0x2308] sm:$0xff]  ;;  %v1574_v60 = vld [vmem:[#allocation7 + $0x2380] sm:$0xff] }
  0xc5   :  { %v1575_v42 = vld [vmem:[#allocation7 + $0x2388] sm:$0xff]  ;;  %v2070_v61 = vld [vmem:[#allocation7 + $0x3300] sm:$0xff] }
  0xc6   :  { %v2071_v45 = vld [vmem:[#allocation7 + $0x3308] sm:$0xff]  ;;  %v2086_v2 = vld [vmem:[#allocation7 + $0x3380] sm:$0xff] }
  0xc7   :  { %v2087_v46 = vld [vmem:[#allocation7 + $0x3388] sm:$0xff] }
  0xc8   :  { %v1527_v3 = vld [vmem:[#allocation7 + $0x2208] sm:$0xff] }
  0xc9   :  { %v1543_v4 = vld [vmem:[#allocation7 + $0x2288] sm:$0xff] }
  0xca   :  { %v2039_v5 = vld [vmem:[#allocation7 + $0x3208] sm:$0xff] }
  0xcb   :  { %v2055_v6 = vld [vmem:[#allocation7 + $0x3288] sm:$0xff] }
 0x136   :  { %v292_v27 = vpop.f32.mrf.mxu0 }
 0x137   :  { %v293_v29 = vadd.f32 %v292_v27, %v217_v25  ;;  %v333_v30 = vpop.f32.mrf.mxu1  ;;  %v1607_v25 = vld [vmem:[#allocation7 + $0x2488] sm:$0xff] }
 0x138   :  { %v334_v31 = vadd.f32 %v333_v30, %v225_v0  ;;  %v294_v32 = vpop.f32.mrf.mxu0  ;;  %v2119_v27 = vld [vmem:[#allocation7 + $0x3488] sm:$0xff] }
 0x139   :  { %v295_v33 = vadd.f32 %v294_v32, %v221_v26  ;;  %v335_v34 = vpop.f32.mrf.mxu1  ;;  %v422_v37 = vmax.f32 %v293_v29, 0.0  ;;  %v2103_v26 = vld [vmem:[#allocation7 + $0x3408] sm:$0xff]  ;;  %v3078_v29 = vpack.c.bf16 %v1638_v12, %v1622_v11  ;;  %v3334_v32 = vpack.c.bf16 %v2150_v17, %v2134_v13  ;;  %v1542_v11 = vld [vmem:[#allocation7 + $0x2280] sm:$0xff] }
 0x13a   :  { %v424_v38 = vmax.f32 %v334_v31, 0.0  ;;  %v336_v39 = vadd.f32 %v335_v34, %v229_v28  ;;  %v296_v40 = vpop.f32.mrf.mxu0  ;;  %v1590_v34 = vld [vmem:[#allocation7 + $0x2400] sm:$0xff]  ;;  %v3287_v13 = vpack.c.bf16 %v2055_v6, %v2039_v5  ;;  %v1511_v17 = vld [vmem:[#allocation7 + $0x2188] sm:$0xff] }
 0x13b   :  { %v423_v43 = vmax.f32 %v295_v33, 0.0  ;;  %v337_v44 = vpop.f32.mrf.mxu1  ;;  %v9281_v57 = vpack.c.bf16 %v422_v37, %v422_v37  ;;  %v3063_v33 = vpack.c.bf16 %v1607_v25, %v1591_v18  ;;  %v2118_v40 = vld [vmem:[#allocation7 + $0x3480] sm:$0xff]  ;;  %v2007_v18 = vld [vmem:[#allocation7 + $0x3108] sm:$0xff] }
 0x13c   :  { %v425_v48 = vmax.f32 %v336_v39, 0.0  ;;  %v297_v49 = vpop.f32.mrf.mxu0  ;;  %v9274_v52 = vpack.c.bf16 %v424_v38, %v424_v38  ;;  %v3319_v39 = vpack.c.bf16 %v2119_v27, %v2103_v26  ;;  %v2038_v12 = vld [vmem:[#allocation7 + $0x3200] sm:$0xff]  ;;  %v2023_v25 = vld [vmem:[#allocation7 + $0x3188] sm:$0xff] }
 0x13d   :  { %v9276_v53 = vpack.c.bf16 %v423_v43, %v423_v43  ;;  %v338_v54 = vpop.f32.mrf.mxu1  ;;  %v2423_v5 = vld [vmem:[#allocation7 + $0x3e08] sm:$0xff] }
 0x13e   :  { %v9283_v58 = vpack.c.bf16 %v425_v48, %v425_v48  ;;  %v3318_v54 = vpack.c.bf16 %v2118_v40, %v2102_v36  ;;  %v1975_v36 = vld [vmem:[#allocation7 + $0x3008] sm:$0xff] }
 0x13f   :  { %3626 = vmatprep.mubr.bf16.mxu0 %v9276_v53  ;;  %v2439_v6 = vld [vmem:[#allocation7 + $0x3e88] sm:$0xff] }
 0x140   :  { %3667 = vmatprep.mubr.bf16.mxu1 %v9283_v58  ;;  %3627 = vmatmul.mubr.bf16.vlgmr.msra.gmra.mxu0 %v9281_v57 }
 0x141   :  { %3668 = vmatmul.mubr.bf16.vlgmr.msra.gmra.mxu1 %v9274_v52  ;;  %3677 = vmatpush1.bf16.msra.mxu0 %v3110_v50  ;;  %v3062_v50 = vpack.c.bf16 %v1606_v35, %v1590_v34  ;;  %v1463_v34 = vld [vmem:[#allocation7 + $0x2008] sm:$0xff] }
 0x142   :  { %3718 = vmatpush1.bf16.msra.mxu1 %v3366_v55  ;;  %3678 = vmatprep.subr.bf16.mxu0 %v3095_v59  ;;  %v9294_v14 = vpop.f32.mrf.mxu0  ;;  %v3047_v55 = vpack.c.bf16 %v1575_v42, %v1559_v41  ;;  %v1558_v59 = vld [vmem:[#allocation7 + $0x2300] sm:$0xff]  ;;  %v1479_v35 = vld [vmem:[#allocation7 + $0x2088] sm:$0xff] }
 0x143   :  { %3719 = vmatprep.subr.bf16.mxu1 %v3351_v1  ;;  %v9298_v0 = vpop.f32.mrf.mxu1  ;;  %v3303_v1 = vpack.c.bf16 %v2087_v46, %v2071_v45  ;;  %v2999_v40 = vpack.c.bf16 %v1479_v35, %v1463_v34  ;;  %v1462_v41 = vld [vmem:[#allocation7 + $0x2000] sm:$0xff]  ;;  %v1943_v46 = vld [vmem:[#allocation7 + $0x2f08] sm:$0xff] }
 0x144   :  { %v376_v28 = vpop.f32.mrf.mxu0  ;;  %v1478_v42 = vld [vmem:[#allocation7 + $0x2080] sm:$0xff]  ;;  %v1847_v34 = vld [vmem:[#allocation7 + $0x2c08] sm:$0xff] }
 0x145   :  { %3679 = vmatpush1.bf16.msra.mxu0 %v3094_v7  ;;  %v377_v30 = vadd.f32 %v376_v28, %v237_v8  ;;  %v417_v31 = vpop.f32.mrf.mxu1  ;;  %v3046_v7 = vpack.c.bf16 %v1574_v60, %v1558_v59  ;;  %v3302_v8 = vpack.c.bf16 %v2086_v2, %v2070_v61  ;;  %v1990_v45 = vld [vmem:[#allocation7 + $0x3080] sm:$0xff]  ;;  %v1863_v35 = vld [vmem:[#allocation7 + $0x2c88] sm:$0xff] }
 0x146   :  { %3720 = vmatpush1.bf16.msra.mxu1 %v3350_v9  ;;  %3680 = vmatprep.subr.bf16.mxu0 %v3079_v10  ;;  %v378_v37 = vpop.f32.mrf.mxu0  ;;  %v418_v38 = vadd.f32 %v417_v31, %v245_v15  ;;  %v3031_v9 = vpack.c.bf16 %v1543_v4, %v1527_v3  ;;  %v1526_v10 = vld [vmem:[#allocation7 + $0x2200] sm:$0xff]  ;;  %v1911_v3 = vld [vmem:[#allocation7 + $0x2e08] sm:$0xff] }
 0x147   :  { %3721 = vmatprep.subr.bf16.mxu1 %v3335_v16  ;;  %v427_v43 = vmax.f32 %v377_v30, 0.0  ;;  %v419_v44 = vpop.f32.mrf.mxu1  ;;  %v2054_v15 = vld [vmem:[#allocation7 + $0x3280] sm:$0xff]  ;;  %v1495_v16 = vld [vmem:[#allocation7 + $0x2108] sm:$0xff]  ;;  %v3030_v26 = vpack.c.bf16 %v1542_v11, %v1526_v10 }
 0x148   :  { %v429_v48 = vmax.f32 %v418_v38, 0.0  ;;  %v379_v49 = vpop.f32.mrf.mxu0  ;;  %v3286_v27 = vpack.c.bf16 %v2054_v15, %v2038_v12  ;;  %v3015_v28 = vpack.c.bf16 %v1511_v17, %v1495_v16  ;;  %v1510_v30 = vld [vmem:[#allocation7 + $0x2180] sm:$0xff]  ;;  %v1991_v37 = vld [vmem:[#allocation7 + $0x3088] sm:$0xff] }
 0x149   :  { %3681 = vmatpush1.bf16.msra.mxu0 %v3078_v29  ;;  %v9300_v47 = vpack.c.bf16 %v427_v43, %v427_v43  ;;  %v420_v51 = vpop.f32.mrf.mxu1  ;;  %v1494_v29 = vld [vmem:[#allocation7 + $0x2100] sm:$0xff]  ;;  %v3255_v44 = vpack.c.bf16 %v1991_v37, %v1975_v36  ;;  %v2455_v49 = vld [vmem:[#allocation7 + $0x3f08] sm:$0xff] }
 0x14a   :  { %3722 = vmatpush1.bf16.msra.mxu1 %v3334_v32  ;;  %3682 = vmatprep.subr.bf16.mxu0 %v3063_v33  ;;  %v9302_v62 = vpack.c.bf16 %v429_v48, %v429_v48  ;;  %v2006_v31 = vld [vmem:[#allocation7 + $0x3100] sm:$0xff]  ;;  %v3271_v32 = vpack.c.bf16 %v2023_v25, %v2007_v18  ;;  %v3014_v38 = vpack.c.bf16 %v1510_v30, %v1494_v29  ;;  %v1959_v48 = vld [vmem:[#allocation7 + $0x2f88] sm:$0xff] }
 0x14b   :  { %3723 = vmatprep.subr.bf16.mxu1 %v3319_v39  ;;  %3708 = vmatprep.mubr.bf16.mxu0 %v9300_v47  ;;  %v2022_v33 = vld [vmem:[#allocation7 + $0x3180] sm:$0xff]  ;;  %v2998_v51 = vpack.c.bf16 %v1478_v42, %v1462_v41  ;;  %v1927_v4 = vld [vmem:[#allocation7 + $0x2e88] sm:$0xff] }
 0x14c   :  { %3749 = vmatprep.mubr.bf16.mxu1 %v9302_v62  ;;  %v3270_v39 = vpack.c.bf16 %v2022_v33, %v2006_v31  ;;  %v1974_v43 = vld [vmem:[#allocation7 + $0x3000] sm:$0xff]  ;;  %v1879_v16 = vld [vmem:[#allocation7 + $0x2d08] sm:$0xff] }
 0x14d   :  { %3683 = vmatpush1.bf16.msra.mxu0 %v3062_v50  ;;  %v2471_v50 = vld [vmem:[#allocation7 + $0x3f88] sm:$0xff]  ;;  %v1942_v59 = vld [vmem:[#allocation7 + $0x2f00] sm:$0xff] }
 0x14e   :  { %3724 = vmatpush1.bf16.msra.mxu1 %v3318_v54  ;;  %3684 = vmatprep.subr.bf16.mxu0 %v3047_v55  ;;  %v3254_v54 = vpack.c.bf16 %v1990_v45, %v1974_v43  ;;  %v3239_v55 = vpack.c.bf16 %v1959_v48, %v1943_v46  ;;  %v1958_v60 = vld [vmem:[#allocation7 + $0x2f80] sm:$0xff]  ;;  %v1895_v17 = vld [vmem:[#allocation7 + $0x2d88] sm:$0xff] }
 0x14f   :  { %3725 = vmatprep.subr.bf16.mxu1 %v3303_v1  ;;  %v2454_v61 = vld [vmem:[#allocation7 + $0x3f00] sm:$0xff]  ;;  %v3495_v1 = vpack.c.bf16 %v2471_v50, %v2455_v49  ;;  %v2391_v18 = vld [vmem:[#allocation7 + $0x3d08] sm:$0xff] }
 0x150   :  { %v2470_v2 = vld [vmem:[#allocation7 + $0x3f80] sm:$0xff]  ;;  %v2407_v25 = vld [vmem:[#allocation7 + $0x3d88] sm:$0xff] }
 0x151   :  { %3685 = vmatpush1.bf16.msra.mxu0 %v3046_v7  ;;  %v3238_v7 = vpack.c.bf16 %v1958_v60, %v1942_v59  ;;  %v1910_v10 = vld [vmem:[#allocation7 + $0x2e00] sm:$0xff]  ;;  %v2359_v36 = vld [vmem:[#allocation7 + $0x3c08] sm:$0xff] }
 0x152   :  { %3726 = vmatpush1.bf16.msra.mxu1 %v3302_v8  ;;  %3686 = vmatprep.subr.bf16.mxu0 %v3031_v9  ;;  %v3494_v8 = vpack.c.bf16 %v2470_v2, %v2454_v61  ;;  %v3223_v9 = vpack.c.bf16 %v1927_v4, %v1911_v3  ;;  %v1926_v11 = vld [vmem:[#allocation7 + $0x2e80] sm:$0xff]  ;;  %v2375_v37 = vld [vmem:[#allocation7 + $0x3c88] sm:$0xff] }
 0x153   :  { %3727 = vmatprep.subr.bf16.mxu1 %v3287_v13  ;;  %v2422_v12 = vld [vmem:[#allocation7 + $0x3e00] sm:$0xff]  ;;  %v3479_v13 = vpack.c.bf16 %v2439_v6, %v2423_v5  ;;  %v1815_v46 = vld [vmem:[#allocation7 + $0x2b08] sm:$0xff] }
 0x154   :  { %v2438_v15 = vld [vmem:[#allocation7 + $0x3e80] sm:$0xff]  ;;  %v1831_v48 = vld [vmem:[#allocation7 + $0x2b88] sm:$0xff] }
 0x155   :  { %3687 = vmatpush1.bf16.msra.mxu0 %v3030_v26  ;;  %v3222_v26 = vpack.c.bf16 %v1926_v11, %v1910_v10  ;;  %v1878_v29 = vld [vmem:[#allocation7 + $0x2d00] sm:$0xff]  ;;  %v2327_v49 = vld [vmem:[#allocation7 + $0x3b08] sm:$0xff] }
 0x156   :  { %3728 = vmatpush1.bf16.msra.mxu1 %v3286_v27  ;;  %3688 = vmatprep.subr.bf16.mxu0 %v3015_v28  ;;  %v3478_v27 = vpack.c.bf16 %v2438_v15, %v2422_v12  ;;  %v3207_v28 = vpack.c.bf16 %v1895_v17, %v1879_v16  ;;  %v1894_v30 = vld [vmem:[#allocation7 + $0x2d80] sm:$0xff]  ;;  %v2343_v50 = vld [vmem:[#allocation7 + $0x3b88] sm:$0xff] }
 0x157   :  { %3729 = vmatprep.subr.bf16.mxu1 %v3271_v32  ;;  %v2390_v31 = vld [vmem:[#allocation7 + $0x3d00] sm:$0xff]  ;;  %v3463_v32 = vpack.c.bf16 %v2407_v25, %v2391_v18  ;;  %v1783_v3 = vld [vmem:[#allocation7 + $0x2a08] sm:$0xff] }
 0x158   :  { %v2406_v33 = vld [vmem:[#allocation7 + $0x3d80] sm:$0xff]  ;;  %v1799_v4 = vld [vmem:[#allocation7 + $0x2a88] sm:$0xff] }
 0x159   :  { %3689 = vmatpush1.bf16.msra.mxu0 %v3014_v38  ;;  %v3206_v38 = vpack.c.bf16 %v1894_v30, %v1878_v29  ;;  %v1846_v41 = vld [vmem:[#allocation7 + $0x2c00] sm:$0xff]  ;;  %v2295_v5 = vld [vmem:[#allocation7 + $0x3a08] sm:$0xff]  ;;  %v3159_v11 = vpack.c.bf16 %v1799_v4, %v1783_v3  ;;  %v664_v3 = vld [vmem:[#allocation7 + $0x710] sm:$0xff] }
 0x15a   :  { %3730 = vmatpush1.bf16.msra.mxu1 %v3270_v39  ;;  %3690 = vmatprep.subr.bf16.mxu0 %v2999_v40  ;;  %v3462_v39 = vpack.c.bf16 %v2406_v33, %v2390_v31  ;;  %v3191_v40 = vpack.c.bf16 %v1863_v35, %v1847_v34  ;;  %v1862_v42 = vld [vmem:[#allocation7 + $0x2c80] sm:$0xff]  ;;  %v2311_v6 = vld [vmem:[#allocation7 + $0x3a88] sm:$0xff]  ;;  %v680_v4 = vld [vmem:[#allocation7 + $0x790] sm:$0xff] }
 0x15b   :  { %3731 = vmatprep.subr.bf16.mxu1 %v3255_v44  ;;  %v2358_v43 = vld [vmem:[#allocation7 + $0x3c00] sm:$0xff]  ;;  %v3447_v44 = vpack.c.bf16 %v2375_v37, %v2359_v36  ;;  %v3415_v16 = vpack.c.bf16 %v2311_v6, %v2295_v5  ;;  %v1751_v18 = vld [vmem:[#allocation7 + $0x2908] sm:$0xff]  ;;  %v1176_v6 = vld [vmem:[#allocation7 + $0x1710] sm:$0xff] }
 0x15c   :  { %v2374_v45 = vld [vmem:[#allocation7 + $0x3c80] sm:$0xff]  ;;  %v1767_v25 = vld [vmem:[#allocation7 + $0x2988] sm:$0xff] }
 0x15d   :  { %3691 = vmatpush1.bf16.msra.mxu0 %v2998_v51  ;;  %v3190_v51 = vpack.c.bf16 %v1862_v42, %v1846_v41  ;;  %v1814_v59 = vld [vmem:[#allocation7 + $0x2b00] sm:$0xff]  ;;  %v2247_v41 = vld [vmem:[#allocation7 + $0x3888] sm:$0xff] }
 0x15e   :  { %3732 = vmatpush1.bf16.msra.mxu1 %v3254_v54  ;;  %3692 = vmatprep.subr.bf16.mxu0 %v3239_v55  ;;  %v3446_v54 = vpack.c.bf16 %v2374_v45, %v2358_v43  ;;  %v3175_v55 = vpack.c.bf16 %v1831_v48, %v1815_v46  ;;  %v1830_v60 = vld [vmem:[#allocation7 + $0x2b80] sm:$0xff] }
 0x15f   :  { %3733 = vmatprep.subr.bf16.mxu1 %v3495_v1  ;;  %v2326_v61 = vld [vmem:[#allocation7 + $0x3b00] sm:$0xff]  ;;  %v3431_v1 = vpack.c.bf16 %v2343_v50, %v2327_v49 }
 0x160   :  { %v2342_v2 = vld [vmem:[#allocation7 + $0x3b80] sm:$0xff] }
 0x161   :  { %3693 = vmatpush2.bf16.msra.mxu0 %v3238_v7  ;;  %v3174_v7 = vpack.c.bf16 %v1830_v60, %v1814_v59  ;;  %v3430_v10 = vpack.c.bf16 %v2342_v2, %v2326_v61  ;;  %v1782_v12 = vld [vmem:[#allocation7 + $0x2a00] sm:$0xff]  ;;  %v1177_v59 = vld [vmem:[#allocation7 + $0x1718] sm:$0xff] }
 0x162   :  { %3734 = vmatpush2.bf16.msra.mxu1 %v3494_v8  ;;  %3694 = vmatprep.subr.bf16.mxu0 %v3223_v9  ;;  %v9307_v8 = vsub.s32 6, %v9250_v19  ;;  %v9310_v9 = vsub.s32 4, %v9250_v19  ;;  %v2294_v15 = vld [vmem:[#allocation7 + $0x3a00] sm:$0xff]  ;;  %v1193_v60 = vld [vmem:[#allocation7 + $0x1798] sm:$0xff] }
 0x163   :  { %3735 = vmatprep.subr.bf16.mxu1 %v3479_v13  ;;  %v1798_v13 = vld [vmem:[#allocation7 + $0x2a80] sm:$0xff]  ;;  %v2857_v5 = vpack.c.bf16 %v1193_v60, %v1177_v59  ;;  %v1096_v59 = vld [vmem:[#allocation7 + $0x1490] sm:$0xff]  ;;  %v537_v60 = vld [vmem:[#allocation7 + $0x318] sm:$0xff] }
 0x164   :  { %v2310_v17 = vld [vmem:[#allocation7 + $0x3a80] sm:$0xff]  ;;  %v3158_v29 = vpack.c.bf16 %v1798_v13, %v1782_v12  ;;  %v233_v30 = vrot.slane %v9255_v21, %v9310_v9  ;;  %v2600_v13 = vpack.c.bf16 %v680_v4, %v664_v3  ;;  %v536_v4 = vld [vmem:[#allocation7 + $0x310] sm:$0xff] }
 0x165   :  { %3695 = vmatpush2.bf16.msra.mxu0 %v3222_v26  ;;  %v2263_v26 = vld [vmem:[#allocation7 + $0x3908] sm:$0xff]  ;;  %v3414_v31 = vpack.c.bf16 %v2310_v17, %v2294_v15  ;;  %v1750_v33 = vld [vmem:[#allocation7 + $0x2900] sm:$0xff]  ;;  %v1145_v15 = vld [vmem:[#allocation7 + $0x1618] sm:$0xff] }
 0x166   :  { %3736 = vmatpush2.bf16.msra.mxu1 %v3478_v27  ;;  %3696 = vmatprep.subr.bf16.mxu0 %v3207_v28  ;;  %v2279_v27 = vld [vmem:[#allocation7 + $0x3988] sm:$0xff]  ;;  %v241_v28 = vrot.slane %v9255_v21, %v9307_v8  ;;  %v1766_v34 = vld [vmem:[#allocation7 + $0x2980] sm:$0xff]  ;;  %v375_v21 = vadd.f32 %v9294_v14, %v233_v30  ;;  %v601_v30 = vld [vmem:[#allocation7 + $0x518] sm:$0xff] }
 0x167   :  { %3737 = vmatprep.subr.bf16.mxu1 %v3463_v32  ;;  %v3143_v32 = vpack.c.bf16 %v1767_v25, %v1751_v18  ;;  %v2262_v35 = vld [vmem:[#allocation7 + $0x3900] sm:$0xff]  ;;  %v3399_v36 = vpack.c.bf16 %v2279_v27, %v2263_v26  ;;  %v3142_v43 = vpack.c.bf16 %v1766_v34, %v1750_v33  ;;  %v632_v25 = vld [vmem:[#allocation7 + $0x610] sm:$0xff]  ;;  %v1113_v33 = vld [vmem:[#allocation7 + $0x1518] sm:$0xff] }
 0x168   :  { %v2278_v37 = vld [vmem:[#allocation7 + $0x3980] sm:$0xff]  ;;  %v416_v42 = vadd.f32 %v9298_v0, %v241_v28  ;;  %v648_v26 = vld [vmem:[#allocation7 + $0x690] sm:$0xff]  ;;  %v1129_v34 = vld [vmem:[#allocation7 + $0x1598] sm:$0xff] }
 0x169   :  { %3697 = vmatpush2.bf16.msra.mxu0 %v3206_v38  ;;  %v1719_v38 = vld [vmem:[#allocation7 + $0x2808] sm:$0xff]  ;;  %v1718_v46 = vld [vmem:[#allocation7 + $0x2800] sm:$0xff]  ;;  %v1144_v27 = vld [vmem:[#allocation7 + $0x1610] sm:$0xff] }
 0x16a   :  { %3738 = vmatpush2.bf16.msra.mxu1 %v3462_v39  ;;  %3698 = vmatprep.subr.bf16.mxu0 %v3191_v40  ;;  %v1735_v39 = vld [vmem:[#allocation7 + $0x2888] sm:$0xff]  ;;  %v1734_v48 = vld [vmem:[#allocation7 + $0x2880] sm:$0xff]  ;;  %v428_v61 = vmax.f32 %v416_v42, 0.0  ;;  %v1128_v42 = vld [vmem:[#allocation7 + $0x1590] sm:$0xff] }
 0x16b   :  { %3739 = vmatprep.subr.bf16.mxu1 %v3447_v44  ;;  %v2231_v40 = vld [vmem:[#allocation7 + $0x3808] sm:$0xff]  ;;  %v3398_v44 = vpack.c.bf16 %v2278_v37, %v2262_v35  ;;  %v3127_v45 = vpack.c.bf16 %v1735_v39, %v1719_v38  ;;  %v2230_v49 = vld [vmem:[#allocation7 + $0x3800] sm:$0xff]  ;;  %v3126_v0 = vpack.c.bf16 %v1734_v48, %v1718_v46  ;;  %v2584_v35 = vpack.c.bf16 %v648_v26, %v632_v25  ;;  %v600_v38 = vld [vmem:[#allocation7 + $0x510] sm:$0xff] }
 0x16c   :  { %v3383_v50 = vpack.c.bf16 %v2247_v41, %v2231_v40  ;;  %v9318_v12 = vpack.c.bf16 %v428_v61, %v428_v61  ;;  %v616_v39 = vld [vmem:[#allocation7 + $0x590] sm:$0xff]  ;;  %v2825_v41 = vpack.c.bf16 %v1129_v34, %v1113_v33  ;;  %v553_v61 = vld [vmem:[#allocation7 + $0x398] sm:$0xff] }
 0x16d   :  { %3699 = vmatpush2.bf16.msra.mxu0 %v3190_v51  ;;  %v2246_v51 = vld [vmem:[#allocation7 + $0x3880] sm:$0xff]  ;;  %v1112_v40 = vld [vmem:[#allocation7 + $0x1510] sm:$0xff]  ;;  %v2568_v46 = vpack.c.bf16 %v616_v39, %v600_v38  ;;  %v2537_v3 = vpack.c.bf16 %v553_v61, %v537_v60  ;;  %v489_v33 = vld [vmem:[#allocation7 + $0x198] sm:$0xff] }
 0x16e   :  { %3740 = vmatpush2.bf16.msra.mxu1 %v3446_v54  ;;  %3700 = vmatprep.subr.bf16.mxu0 %v3175_v55  ;;  %v665_v54 = vld [vmem:[#allocation7 + $0x718] sm:$0xff]  ;;  %v3382_v14 = vpack.c.bf16 %v2246_v51, %v2230_v49  ;;  %v2824_v48 = vpack.c.bf16 %v1128_v42, %v1112_v40  ;;  %v584_v51 = vld [vmem:[#allocation7 + $0x490] sm:$0xff] }
 0x16f   :  { %3741 = vmatprep.subr.bf16.mxu1 %v3431_v1  ;;  %v681_v55 = vld [vmem:[#allocation7 + $0x798] sm:$0xff]  ;;  %v426_v1 = vmax.f32 %v375_v21, 0.0  ;;  %v472_v39 = vld [vmem:[#allocation7 + $0x110] sm:$0xff] }
 0x170   :  { %v2601_v2 = vpack.c.bf16 %v681_v55, %v665_v54  ;;  %v585_v21 = vld [vmem:[#allocation7 + $0x498] sm:$0xff]  ;;  %v1080_v54 = vld [vmem:[#allocation7 + $0x1410] sm:$0xff] }
 0x171   :  { %3701 = vmatpush2.bf16.msra.mxu0 %v3174_v7  ;;  %v1192_v7 = vld [vmem:[#allocation7 + $0x1790] sm:$0xff]  ;;  %v9320_v17 = vpack.c.bf16 %v426_v1, %v426_v1  ;;  %v1065_v1 = vld [vmem:[#allocation7 + $0x1398] sm:$0xff] }
 0x172   :  { %3742 = vmatpush2.bf16.msra.mxu1 %v3430_v10  ;;  %3702 = vmatprep.subr.bf16.mxu0 %v3159_v11  ;;  %v633_v10 = vld [vmem:[#allocation7 + $0x618] sm:$0xff]  ;;  %v2856_v18 = vpack.c.bf16 %v1192_v7, %v1176_v6  ;;  %v1048_v6 = vld [vmem:[#allocation7 + $0x1310] sm:$0xff] }
 0x173   :  { %3743 = vmatprep.subr.bf16.mxu1 %v3415_v16  ;;  %v649_v11 = vld [vmem:[#allocation7 + $0x698] sm:$0xff]  ;;  %v488_v40 = vld [vmem:[#allocation7 + $0x190] sm:$0xff] }
 0x174   :  { %v1161_v16 = vld [vmem:[#allocation7 + $0x1698] sm:$0xff]  ;;  %v2585_v28 = vpack.c.bf16 %v649_v11, %v633_v10  ;;  %v1064_v10 = vld [vmem:[#allocation7 + $0x1390] sm:$0xff] }
 0x175   :  { %3703 = vmatpush2.bf16.msra.mxu0 %v3158_v29  ;;  %v1160_v29 = vld [vmem:[#allocation7 + $0x1690] sm:$0xff]  ;;  %v505_v11 = vld [vmem:[#allocation7 + $0x218] sm:$0xff]  ;;  %v2792_v25 = vpack.c.bf16 %v1064_v10, %v1048_v6 }
 0x176   :  { %3744 = vmatpush2.bf16.msra.mxu1 %v3414_v31  ;;  %3704 = vmatprep.subr.bf16.mxu0 %v3143_v32  ;;  %v617_v31 = vld [vmem:[#allocation7 + $0x598] sm:$0xff]  ;;  %v2841_v32 = vpack.c.bf16 %v1161_v16, %v1145_v15  ;;  %v968_v60 = vld [vmem:[#allocation7 + $0x1090] sm:$0xff] }
 0x177   :  { %3745 = vmatprep.subr.bf16.mxu1 %v3399_v36  ;;  %v2840_v36 = vpack.c.bf16 %v1160_v29, %v1144_v27  ;;  %v2569_v37 = vpack.c.bf16 %v617_v31, %v601_v30  ;;  %v1017_v15 = vld [vmem:[#allocation7 + $0x1218] sm:$0xff]  ;;  %v504_v27 = vld [vmem:[#allocation7 + $0x210] sm:$0xff] }
 0x178   :  { %v1033_v16 = vld [vmem:[#allocation7 + $0x1298] sm:$0xff]  ;;  %v1016_v29 = vld [vmem:[#allocation7 + $0x1210] sm:$0xff] }
 0x179   :  { %3705 = vmatpush2.bf16.msra.mxu0 %v3142_v43  ;;  %v569_v43 = vld [vmem:[#allocation7 + $0x418] sm:$0xff]  ;;  %v2777_v30 = vpack.c.bf16 %v1033_v16, %v1017_v15  ;;  %v1032_v31 = vld [vmem:[#allocation7 + $0x1290] sm:$0xff] }
 0x17a   :  { %3746 = vmatpush2.bf16.msra.mxu1 %v3398_v44  ;;  %3706 = vmatprep.subr.bf16.mxu0 %v3127_v45  ;;  %v1081_v44 = vld [vmem:[#allocation7 + $0x1418] sm:$0xff]  ;;  %v2553_v49 = vpack.c.bf16 %v585_v21, %v569_v43  ;;  %v1000_v43 = vld [vmem:[#allocation7 + $0x1190] sm:$0xff] }
 0x17b   :  { %3747 = vmatprep.subr.bf16.mxu1 %v3383_v50  ;;  %v1097_v45 = vld [vmem:[#allocation7 + $0x1498] sm:$0xff]  ;;  %v568_v50 = vld [vmem:[#allocation7 + $0x410] sm:$0xff] }
 0x17c   :  { %v2809_v55 = vpack.c.bf16 %v1097_v45, %v1081_v44  ;;  %v985_v34 = vld [vmem:[#allocation7 + $0x1118] sm:$0xff]  ;;  %v936_v6 = vld [vmem:[#allocation7 + $0xf90] sm:$0xff] }
 0x17d   :  { %3707 = vmatpush2.bf16.msra.mxu0 %v3126_v0  ;;  %v1049_v0 = vld [vmem:[#allocation7 + $0x1318] sm:$0xff] }
 0x17e   :  { %3748 = vmatpush2.bf16.msra.mxu1 %v3382_v14  ;;  %3758 = vmatprep.subr.bf16.mxu0 %v2601_v2  ;;  %v2552_v14 = vpack.c.bf16 %v584_v51, %v568_v50  ;;  %v2808_v2 = vpack.c.bf16 %v1096_v59, %v1080_v54  ;;  %v2793_v7 = vpack.c.bf16 %v1065_v1, %v1049_v0  ;;  %v441_v21 = vld [vmem:[#allocation7 + $0x18] sm:$0xff]  ;;  %v440_v51 = vld [vmem:[#allocation7 + $0x10] sm:$0xff] }
 0x17f   :  { %3799 = vmatprep.subr.bf16.mxu1 %v2857_v5  ;;  %v552_v5 = vld [vmem:[#allocation7 + $0x390] sm:$0xff]  ;;  %v457_v44 = vld [vmem:[#allocation7 + $0x98] sm:$0xff] }
 0x180   :  { %3709 = vmatmul.mubr.bf16.vlgmr.msra.gmra.mxu0 %v9320_v17  ;;  %v953_v45 = vld [vmem:[#allocation7 + $0x1018] sm:$0xff]  ;;  %v2489_v50 = vpack.c.bf16 %v457_v44, %v441_v21  ;;  %v456_v54 = vld [vmem:[#allocation7 + $0x90] sm:$0xff] }
 0x181   :  { %3750 = vmatmul.mubr.bf16.vlgmr.msra.gmra.mxu1 %v9318_v12  ;;  %3759 = vmatpush1.bf16.msra.mxu0 %v2600_v13  ;;  %v521_v13 = vld [vmem:[#allocation7 + $0x298] sm:$0xff]  ;;  %v1384_v21 = vld [vmem:[#allocation7 + $0x1d90] sm:$0xff] }
 0x182   :  { %3790 = vmatprep.mubr.bf16.mxu0 %v9276_v53  ;;  %3800 = vmatpush1.bf16.msra.mxu1 %v2856_v18  ;;  %v2536_v18 = vpack.c.bf16 %v552_v5, %v536_v4  ;;  %v2521_v26 = vpack.c.bf16 %v521_v13, %v505_v11  ;;  %v921_v61 = vld [vmem:[#allocation7 + $0xf18] sm:$0xff]  ;;  %v920_v5 = vld [vmem:[#allocation7 + $0xf10] sm:$0xff] }
 0x183   :  { %3831 = vmatprep.mubr.bf16.mxu1 %v9283_v58  ;;  %3760 = vmatprep.subr.bf16.mxu0 %v2585_v28  ;;  %v520_v28 = vld [vmem:[#allocation7 + $0x290] sm:$0xff]  ;;  %v937_v0 = vld [vmem:[#allocation7 + $0xf98] sm:$0xff] }
 0x184   :  { %3801 = vmatprep.subr.bf16.mxu1 %v2841_v32  ;;  %v473_v32 = vld [vmem:[#allocation7 + $0x118] sm:$0xff]  ;;  %v2729_v4 = vpack.c.bf16 %v937_v0, %v921_v61  ;;  %v1448_v11 = vld [vmem:[#allocation7 + $0x1f90] sm:$0xff] }
 0x185   :  { %3761 = vmatpush1.bf16.msra.mxu0 %v2584_v35  ;;  %v1001_v35 = vld [vmem:[#allocation7 + $0x1198] sm:$0xff]  ;;  %v2505_v38 = vpack.c.bf16 %v489_v33, %v473_v32  ;;  %v1416_v32 = vld [vmem:[#allocation7 + $0x1e90] sm:$0xff] }
 0x186   :  { %3802 = vmatpush1.bf16.msra.mxu1 %v2840_v36  ;;  %3762 = vmatprep.subr.bf16.mxu0 %v2569_v37  ;;  %v2520_v36 = vpack.c.bf16 %v520_v28, %v504_v27  ;;  %v2776_v37 = vpack.c.bf16 %v1032_v31, %v1016_v29  ;;  %v2761_v42 = vpack.c.bf16 %v1001_v35, %v985_v34  ;;  %v1433_v1 = vld [vmem:[#allocation7 + $0x1f18] sm:$0xff]  ;;  %v888_v28 = vld [vmem:[#allocation7 + $0xe10] sm:$0xff] }
 0x187   :  { %3803 = vmatprep.subr.bf16.mxu1 %v2825_v41  ;;  %v984_v41 = vld [vmem:[#allocation7 + $0x1110] sm:$0xff]  ;;  %v889_v13 = vld [vmem:[#allocation7 + $0xe18] sm:$0xff] }
 0x188   :  { %v905_v15 = vld [vmem:[#allocation7 + $0xe98] sm:$0xff]  ;;  %v904_v29 = vld [vmem:[#allocation7 + $0xe90] sm:$0xff] }
 0x189   :  { %3763 = vmatpush1.bf16.msra.mxu0 %v2568_v46  ;;  %v969_v46 = vld [vmem:[#allocation7 + $0x1098] sm:$0xff]  ;;  %v2713_v27 = vpack.c.bf16 %v905_v15, %v889_v13  ;;  %v1352_v61 = vld [vmem:[#allocation7 + $0x1c90] sm:$0xff] }
 0x18a   :  { %3804 = vmatpush1.bf16.msra.mxu1 %v2824_v48  ;;  %3764 = vmatprep.subr.bf16.mxu0 %v2553_v49  ;;  %v2504_v48 = vpack.c.bf16 %v488_v40, %v472_v39  ;;  %v2760_v49 = vpack.c.bf16 %v1000_v43, %v984_v41  ;;  %v2745_v59 = vpack.c.bf16 %v969_v46, %v953_v45  ;;  %v1401_v16 = vld [vmem:[#allocation7 + $0x1e18] sm:$0xff]  ;;  %v856_v40 = vld [vmem:[#allocation7 + $0xd10] sm:$0xff] }
 0x18b   :  { %3805 = vmatprep.subr.bf16.mxu1 %v2809_v55  ;;  %v952_v55 = vld [vmem:[#allocation7 + $0x1010] sm:$0xff]  ;;  %v857_v33 = vld [vmem:[#allocation7 + $0xd18] sm:$0xff] }
 0x18c   :  { %v873_v34 = vld [vmem:[#allocation7 + $0xd98] sm:$0xff]  ;;  %v872_v41 = vld [vmem:[#allocation7 + $0xd90] sm:$0xff] }
 0x18d   :  { %3765 = vmatpush1.bf16.msra.mxu0 %v2552_v14  ;;  %v1449_v14 = vld [vmem:[#allocation7 + $0x1f98] sm:$0xff]  ;;  %v2697_v39 = vpack.c.bf16 %v873_v34, %v857_v33  ;;  %v1320_v13 = vld [vmem:[#allocation7 + $0x1b90] sm:$0xff] }
 0x18e   :  { %3806 = vmatpush1.bf16.msra.mxu1 %v2808_v2  ;;  %3766 = vmatprep.subr.bf16.mxu0 %v2537_v3  ;;  %v2488_v2 = vpack.c.bf16 %v456_v54, %v440_v51  ;;  %v2744_v3 = vpack.c.bf16 %v968_v60, %v952_v55  ;;  %v2985_v10 = vpack.c.bf16 %v1449_v14, %v1433_v1  ;;  %v1369_v35 = vld [vmem:[#allocation7 + $0x1d18] sm:$0xff]  ;;  %v824_v54 = vld [vmem:[#allocation7 + $0xc10] sm:$0xff] }
 0x18f   :  { %3807 = vmatprep.subr.bf16.mxu1 %v2793_v7  ;;  %v1432_v7 = vld [vmem:[#allocation7 + $0x1f10] sm:$0xff]  ;;  %v825_v44 = vld [vmem:[#allocation7 + $0xc18] sm:$0xff] }
 0x190   :  { %v841_v45 = vld [vmem:[#allocation7 + $0xc98] sm:$0xff]  ;;  %v840_v55 = vld [vmem:[#allocation7 + $0xc90] sm:$0xff] }
 0x191   :  { %3767 = vmatpush1.bf16.msra.mxu0 %v2536_v18  ;;  %v1417_v18 = vld [vmem:[#allocation7 + $0x1e98] sm:$0xff]  ;;  %v2681_v51 = vpack.c.bf16 %v841_v45, %v825_v44  ;;  %v1288_v33 = vld [vmem:[#allocation7 + $0x1a90] sm:$0xff] }
 0x192   :  { %3808 = vmatpush1.bf16.msra.mxu1 %v2792_v25  ;;  %3768 = vmatprep.subr.bf16.mxu0 %v2521_v26  ;;  %v2728_v25 = vpack.c.bf16 %v936_v6, %v920_v5  ;;  %v2984_v26 = vpack.c.bf16 %v1448_v11, %v1432_v7  ;;  %v2969_v31 = vpack.c.bf16 %v1417_v18, %v1401_v16  ;;  %v1337_v46 = vld [vmem:[#allocation7 + $0x1c18] sm:$0xff]  ;;  %v792_v6 = vld [vmem:[#allocation7 + $0xb10] sm:$0xff] }
 0x193   :  { %3809 = vmatprep.subr.bf16.mxu1 %v2777_v30  ;;  %v1400_v30 = vld [vmem:[#allocation7 + $0x1e10] sm:$0xff]  ;;  %v793_v0 = vld [vmem:[#allocation7 + $0xb18] sm:$0xff] }
 0x194   :  { %v809_v1 = vld [vmem:[#allocation7 + $0xb98] sm:$0xff]  ;;  %v808_v7 = vld [vmem:[#allocation7 + $0xb90] sm:$0xff] }
 0x195   :  { %3769 = vmatpush1.bf16.msra.mxu0 %v2520_v36  ;;  %v1385_v36 = vld [vmem:[#allocation7 + $0x1d98] sm:$0xff]  ;;  %v2665_v5 = vpack.c.bf16 %v809_v1, %v793_v0  ;;  %v1256_v44 = vld [vmem:[#allocation7 + $0x1990] sm:$0xff] }
 0x196   :  { %3810 = vmatpush1.bf16.msra.mxu1 %v2776_v37  ;;  %3770 = vmatprep.subr.bf16.mxu0 %v2505_v38  ;;  %v2712_v37 = vpack.c.bf16 %v904_v29, %v888_v28  ;;  %v2968_v38 = vpack.c.bf16 %v1416_v32, %v1400_v30  ;;  %v2953_v43 = vpack.c.bf16 %v1385_v36, %v1369_v35  ;;  %v1305_v14 = vld [vmem:[#allocation7 + $0x1b18] sm:$0xff]  ;;  %v760_v29 = vld [vmem:[#allocation7 + $0xa10] sm:$0xff] }
 0x197   :  { %3811 = vmatprep.subr.bf16.mxu1 %v2761_v42  ;;  %v1368_v42 = vld [vmem:[#allocation7 + $0x1d10] sm:$0xff]  ;;  %v761_v15 = vld [vmem:[#allocation7 + $0xa18] sm:$0xff] }
 0x198   :  { %v777_v16 = vld [vmem:[#allocation7 + $0xa98] sm:$0xff]  ;;  %v776_v30 = vld [vmem:[#allocation7 + $0xa90] sm:$0xff] }
 0x199   :  { %3771 = vmatpush1.bf16.msra.mxu0 %v2504_v48  ;;  %v1353_v48 = vld [vmem:[#allocation7 + $0x1c98] sm:$0xff]  ;;  %v2649_v28 = vpack.c.bf16 %v777_v16, %v761_v15  ;;  %v1224_v0 = vld [vmem:[#allocation7 + $0x1890] sm:$0xff] }
 0x19a   :  { %3812 = vmatpush1.bf16.msra.mxu1 %v2760_v49  ;;  %3772 = vmatprep.subr.bf16.mxu0 %v2489_v50  ;;  %v2696_v49 = vpack.c.bf16 %v872_v41, %v856_v40  ;;  %v2952_v50 = vpack.c.bf16 %v1384_v21, %v1368_v42  ;;  %v2937_v60 = vpack.c.bf16 %v1353_v48, %v1337_v46  ;;  %v1273_v18 = vld [vmem:[#allocation7 + $0x1a18] sm:$0xff]  ;;  %v728_v41 = vld [vmem:[#allocation7 + $0x910] sm:$0xff] }
 0x19b   :  { %3813 = vmatprep.subr.bf16.mxu1 %v2745_v59  ;;  %v1336_v59 = vld [vmem:[#allocation7 + $0x1c10] sm:$0xff]  ;;  %v729_v34 = vld [vmem:[#allocation7 + $0x918] sm:$0xff] }
 0x19c   :  { %v745_v35 = vld [vmem:[#allocation7 + $0x998] sm:$0xff]  ;;  %v744_v42 = vld [vmem:[#allocation7 + $0x990] sm:$0xff] }
 0x19d   :  { %3773 = vmatpush1.bf16.msra.mxu0 %v2488_v2  ;;  %v1321_v2 = vld [vmem:[#allocation7 + $0x1b98] sm:$0xff]  ;;  %v2633_v40 = vpack.c.bf16 %v745_v35, %v729_v34  ;;  %v2216_v15 = vld [vmem:[#allocation7 + $0x3790] sm:$0xff] }
 0x19e   :  { %3814 = vmatpush1.bf16.msra.mxu1 %v2744_v3  ;;  %3774 = vmatprep.subr.bf16.mxu0 %v2729_v4  ;;  %v2680_v3 = vpack.c.bf16 %v840_v55, %v824_v54  ;;  %v2936_v4 = vpack.c.bf16 %v1352_v61, %v1336_v59  ;;  %v2921_v11 = vpack.c.bf16 %v1321_v2, %v1305_v14  ;;  %v1241_v36 = vld [vmem:[#allocation7 + $0x1918] sm:$0xff]  ;;  %v696_v55 = vld [vmem:[#allocation7 + $0x810] sm:$0xff] }
 0x19f   :  { %3815 = vmatprep.subr.bf16.mxu1 %v2985_v10  ;;  %v1304_v10 = vld [vmem:[#allocation7 + $0x1b10] sm:$0xff]  ;;  %v697_v45 = vld [vmem:[#allocation7 + $0x818] sm:$0xff] }
 0x1a0   :  { %v713_v46 = vld [vmem:[#allocation7 + $0x898] sm:$0xff]  ;;  %v712_v59 = vld [vmem:[#allocation7 + $0x890] sm:$0xff] }
 0x1a1   :  { %3775 = vmatpush2.bf16.msra.mxu0 %v2728_v25  ;;  %v1289_v25 = vld [vmem:[#allocation7 + $0x1a98] sm:$0xff]  ;;  %v2617_v54 = vpack.c.bf16 %v713_v46, %v697_v45  ;;  %v2152_v45 = vld [vmem:[#allocation7 + $0x3590] sm:$0xff] }
 0x1a2   :  { %3816 = vmatpush2.bf16.msra.mxu1 %v2984_v26  ;;  %3776 = vmatprep.subr.bf16.mxu0 %v2713_v27  ;;  %v2664_v26 = vpack.c.bf16 %v808_v7, %v792_v6  ;;  %v2920_v27 = vpack.c.bf16 %v1320_v13, %v1304_v10  ;;  %v2905_v32 = vpack.c.bf16 %v1289_v25, %v1273_v18  ;;  %v1209_v48 = vld [vmem:[#allocation7 + $0x1818] sm:$0xff]  ;;  %v1688_v7 = vld [vmem:[#allocation7 + $0x2710] sm:$0xff] }
 0x1a3   :  { %3817 = vmatprep.subr.bf16.mxu1 %v2969_v31  ;;  %v1272_v31 = vld [vmem:[#allocation7 + $0x1a10] sm:$0xff]  ;;  %v1689_v1 = vld [vmem:[#allocation7 + $0x2718] sm:$0xff] }
 0x1a4   :  { %v1705_v14 = vld [vmem:[#allocation7 + $0x2798] sm:$0xff]  ;;  %v1704_v10 = vld [vmem:[#allocation7 + $0x2790] sm:$0xff] }
 0x1a5   :  { %3777 = vmatpush2.bf16.msra.mxu0 %v2712_v37  ;;  %v1257_v37 = vld [vmem:[#allocation7 + $0x1998] sm:$0xff]  ;;  %v3113_v6 = vpack.c.bf16 %v1705_v14, %v1689_v1  ;;  %v2200_v13 = vld [vmem:[#allocation7 + $0x3710] sm:$0xff]  ;;  %v3112_v25 = vpack.c.bf16 %v1704_v10, %v1688_v7 }
 0x1a6   :  { %3818 = vmatpush2.bf16.msra.mxu1 %v2968_v38  ;;  %3778 = vmatprep.subr.bf16.mxu0 %v2697_v39  ;;  %v2648_v38 = vpack.c.bf16 %v776_v30, %v760_v29  ;;  %v2904_v39 = vpack.c.bf16 %v1288_v33, %v1272_v31  ;;  %v2889_v21 = vpack.c.bf16 %v1257_v37, %v1241_v36  ;;  %v2201_v2 = vld [vmem:[#allocation7 + $0x3718] sm:$0xff]  ;;  %v1656_v29 = vld [vmem:[#allocation7 + $0x2610] sm:$0xff] }
 0x1a7   :  { %3819 = vmatprep.subr.bf16.mxu1 %v2953_v43  ;;  %v1240_v43 = vld [vmem:[#allocation7 + $0x1910] sm:$0xff]  ;;  %v1657_v16 = vld [vmem:[#allocation7 + $0x2618] sm:$0xff] }
 0x1a8   :  { %v1673_v18 = vld [vmem:[#allocation7 + $0x2698] sm:$0xff]  ;;  %v1672_v30 = vld [vmem:[#allocation7 + $0x2690] sm:$0xff] }
 0x1a9   :  { %3779 = vmatpush2.bf16.msra.mxu0 %v2696_v49  ;;  %v1225_v49 = vld [vmem:[#allocation7 + $0x1898] sm:$0xff]  ;;  %v2168_v31 = vld [vmem:[#allocation7 + $0x3610] sm:$0xff] }
 0x1aa   :  { %3820 = vmatpush2.bf16.msra.mxu1 %v2952_v50  ;;  %3780 = vmatprep.subr.bf16.mxu0 %v2681_v51  ;;  %v2632_v50 = vpack.c.bf16 %v744_v42, %v728_v41  ;;  %v2888_v51 = vpack.c.bf16 %v1256_v44, %v1240_v43  ;;  %v2873_v61 = vpack.c.bf16 %v1225_v49, %v1209_v48  ;;  %v2184_v33 = vld [vmem:[#allocation7 + $0x3690] sm:$0xff]  ;;  %v1625_v34 = vld [vmem:[#allocation7 + $0x2518] sm:$0xff] }
 0x1ab   :  { %3821 = vmatprep.subr.bf16.mxu1 %v2937_v60  ;;  %v1208_v60 = vld [vmem:[#allocation7 + $0x1810] sm:$0xff]  ;;  %v1641_v35 = vld [vmem:[#allocation7 + $0x2598] sm:$0xff] }
 0x1ac   :  { %v2137_v37 = vld [vmem:[#allocation7 + $0x3518] sm:$0xff]  ;;  %v3081_v41 = vpack.c.bf16 %v1641_v35, %v1625_v34  ;;  %v1624_v42 = vld [vmem:[#allocation7 + $0x2510] sm:$0xff] }
 0x1ad   :  { %3781 = vmatpush2.bf16.msra.mxu0 %v2680_v3  ;;  %v2217_v3 = vld [vmem:[#allocation7 + $0x3798] sm:$0xff]  ;;  %v1640_v43 = vld [vmem:[#allocation7 + $0x2590] sm:$0xff] }
 0x1ae   :  { %3822 = vmatpush2.bf16.msra.mxu1 %v2936_v4  ;;  %3782 = vmatprep.subr.bf16.mxu0 %v2665_v5  ;;  %v2616_v4 = vpack.c.bf16 %v712_v59, %v696_v55  ;;  %v2872_v5 = vpack.c.bf16 %v1224_v0, %v1208_v60  ;;  %v1593_v46 = vld [vmem:[#allocation7 + $0x2418] sm:$0xff]  ;;  %v1592_v59 = vld [vmem:[#allocation7 + $0x2410] sm:$0xff] }
 0x1af   :  { %3823 = vmatprep.subr.bf16.mxu1 %v2921_v11  ;;  %v3369_v11 = vpack.c.bf16 %v2217_v3, %v2201_v2  ;;  %v1609_v48 = vld [vmem:[#allocation7 + $0x2498] sm:$0xff]  ;;  %v1608_v60 = vld [vmem:[#allocation7 + $0x2490] sm:$0xff] }
 0x1b0   :  { %v2105_v49 = vld [vmem:[#allocation7 + $0x3418] sm:$0xff]  ;;  %v3065_v55 = vpack.c.bf16 %v1609_v48, %v1593_v46  ;;  %v2120_v1 = vld [vmem:[#allocation7 + $0x3490] sm:$0xff] }
 0x1b1   :  { %3783 = vmatpush2.bf16.msra.mxu0 %v2664_v26  ;;  %v2169_v26 = vld [vmem:[#allocation7 + $0x3618] sm:$0xff]  ;;  %v1560_v10 = vld [vmem:[#allocation7 + $0x2310] sm:$0xff] }
 0x1b2   :  { %3824 = vmatpush2.bf16.msra.mxu1 %v2920_v27  ;;  %3784 = vmatprep.subr.bf16.mxu0 %v2649_v28  ;;  %v2185_v27 = vld [vmem:[#allocation7 + $0x3698] sm:$0xff]  ;;  %v3368_v28 = vpack.c.bf16 %v2216_v15, %v2200_v13  ;;  %v2072_v13 = vld [vmem:[#allocation7 + $0x3310] sm:$0xff] }
 0x1b3   :  { %3825 = vmatprep.subr.bf16.mxu1 %v2905_v32  ;;  %v3097_v32 = vpack.c.bf16 %v1673_v18, %v1657_v16  ;;  %v3353_v36 = vpack.c.bf16 %v2185_v27, %v2169_v26  ;;  %v1561_v14 = vld [vmem:[#allocation7 + $0x2318] sm:$0xff]  ;;  %v2088_v16 = vld [vmem:[#allocation7 + $0x3390] sm:$0xff] }
 0x1b4   :  { %v1577_v2 = vld [vmem:[#allocation7 + $0x2398] sm:$0xff]  ;;  %v2056_v35 = vld [vmem:[#allocation7 + $0x3290] sm:$0xff] }
 0x1b5   :  { %3785 = vmatpush2.bf16.msra.mxu0 %v2648_v38  ;;  %v2153_v38 = vld [vmem:[#allocation7 + $0x3598] sm:$0xff]  ;;  %v3049_v7 = vpack.c.bf16 %v1577_v2, %v1561_v14  ;;  %v2024_v46 = vld [vmem:[#allocation7 + $0x3190] sm:$0xff] }
 0x1b6   :  { %3826 = vmatpush2.bf16.msra.mxu1 %v2904_v39  ;;  %3786 = vmatprep.subr.bf16.mxu0 %v2633_v40  ;;  %v3096_v39 = vpack.c.bf16 %v1672_v30, %v1656_v29  ;;  %v3352_v40 = vpack.c.bf16 %v2184_v33, %v2168_v31  ;;  %v3337_v44 = vpack.c.bf16 %v2153_v38, %v2137_v37  ;;  %v2073_v3 = vld [vmem:[#allocation7 + $0x3318] sm:$0xff]  ;;  %v1528_v31 = vld [vmem:[#allocation7 + $0x2210] sm:$0xff] }
 0x1b7   :  { %3827 = vmatprep.subr.bf16.mxu1 %v2889_v21  ;;  %v2136_v21 = vld [vmem:[#allocation7 + $0x3510] sm:$0xff]  ;;  %v1529_v18 = vld [vmem:[#allocation7 + $0x2218] sm:$0xff]  ;;  %v3304_v29 = vpack.c.bf16 %v2088_v16, %v2072_v13 }
 0x1b8   :  { %v2041_v26 = vld [vmem:[#allocation7 + $0x3218] sm:$0xff]  ;;  %v2040_v33 = vld [vmem:[#allocation7 + $0x3210] sm:$0xff] }
 0x1b9   :  { %3787 = vmatpush2.bf16.msra.mxu0 %v2632_v50  ;;  %v2121_v50 = vld [vmem:[#allocation7 + $0x3498] sm:$0xff]  ;;  %v1992_v14 = vld [vmem:[#allocation7 + $0x3090] sm:$0xff] }
 0x1ba   :  { %3828 = vmatpush2.bf16.msra.mxu1 %v2888_v51  ;;  %3788 = vmatprep.subr.bf16.mxu0 %v2617_v54  ;;  %v3080_v51 = vpack.c.bf16 %v1640_v43, %v1624_v42  ;;  %v3336_v54 = vpack.c.bf16 %v2152_v45, %v2136_v21  ;;  %v3321_v0 = vpack.c.bf16 %v2121_v50, %v2105_v49  ;;  %v2057_v27 = vld [vmem:[#allocation7 + $0x3298] sm:$0xff]  ;;  %v1496_v43 = vld [vmem:[#allocation7 + $0x2110] sm:$0xff] }
 0x1bb   :  { %3829 = vmatprep.subr.bf16.mxu1 %v2873_v61  ;;  %v2104_v61 = vld [vmem:[#allocation7 + $0x3410] sm:$0xff]  ;;  %v3289_v34 = vpack.c.bf16 %v2057_v27, %v2041_v26  ;;  %v1513_v37 = vld [vmem:[#allocation7 + $0x2198] sm:$0xff] }
 0x1bc   :  { %v2009_v38 = vld [vmem:[#allocation7 + $0x3118] sm:$0xff]  ;;  %v1512_v21 = vld [vmem:[#allocation7 + $0x2190] sm:$0xff] }
 0x1bd   :  { %3789 = vmatpush2.bf16.msra.mxu0 %v2616_v4  ;;  %v2089_v4 = vld [vmem:[#allocation7 + $0x3398] sm:$0xff]  ;;  %v1960_v13 = vld [vmem:[#allocation7 + $0x2f90] sm:$0xff] }
 0x1be   :  { %3830 = vmatpush2.bf16.msra.mxu1 %v2872_v5  ;;  %3840 = vmatprep.subr.bf16.mxu0 %v3113_v6  ;;  %v3064_v5 = vpack.c.bf16 %v1608_v60, %v1592_v59  ;;  %v3320_v6 = vpack.c.bf16 %v2120_v1, %v2104_v61  ;;  %v3305_v15 = vpack.c.bf16 %v2089_v4, %v2073_v3  ;;  %v1465_v48 = vld [vmem:[#allocation7 + $0x2018] sm:$0xff]  ;;  %v1464_v60 = vld [vmem:[#allocation7 + $0x2010] sm:$0xff] }
 0x1bf   :  { %3881 = vmatprep.subr.bf16.mxu1 %v3369_v11  ;;  %v1576_v11 = vld [vmem:[#allocation7 + $0x2390] sm:$0xff]  ;;  %v1481_v49 = vld [vmem:[#allocation7 + $0x2098] sm:$0xff] }
 0x1c0   :  { %3791 = vmatmul.mubr.bf16.vlgmr.msra.gmra.mxu0 %v9281_v57  ;;  %v1977_v50 = vld [vmem:[#allocation7 + $0x3018] sm:$0xff]  ;;  %v3001_v59 = vpack.c.bf16 %v1481_v49, %v1465_v48  ;;  %v1480_v61 = vld [vmem:[#allocation7 + $0x2090] sm:$0xff] }
 0x1c1   :  { %3832 = vmatmul.mubr.bf16.vlgmr.msra.gmra.mxu1 %v9274_v52  ;;  %3841 = vmatpush1.bf16.msra.mxu0 %v3112_v25  ;;  %v1545_v25 = vld [vmem:[#allocation7 + $0x2298] sm:$0xff]  ;;  %v2408_v48 = vld [vmem:[#allocation7 + $0x3d90] sm:$0xff] }
 0x1c2   :  { %3872 = vmatprep.mubr.bf16.mxu0 %v9300_v47  ;;  %3882 = vmatpush1.bf16.msra.mxu1 %v3368_v28  ;;  %v3048_v28 = vpack.c.bf16 %v1576_v11, %v1560_v10  ;;  %v3033_v30 = vpack.c.bf16 %v1545_v25, %v1529_v18  ;;  %v1945_v2 = vld [vmem:[#allocation7 + $0x2f18] sm:$0xff]  ;;  %v1944_v11 = vld [vmem:[#allocation7 + $0x2f10] sm:$0xff] }
 0x1c3   :  { %3913 = vmatprep.mubr.bf16.mxu1 %v9302_v62  ;;  %3842 = vmatprep.subr.bf16.mxu0 %v3097_v32  ;;  %v1544_v32 = vld [vmem:[#allocation7 + $0x2290] sm:$0xff]  ;;  %v1961_v3 = vld [vmem:[#allocation7 + $0x2f98] sm:$0xff] }
 0x1c4   :  { %3883 = vmatprep.subr.bf16.mxu1 %v3353_v36  ;;  %v1497_v36 = vld [vmem:[#allocation7 + $0x2118] sm:$0xff]  ;;  %v3241_v10 = vpack.c.bf16 %v1961_v3, %v1945_v2  ;;  %v2472_v18 = vld [vmem:[#allocation7 + $0x3f90] sm:$0xff] }
 0x1c5   :  { %3843 = vmatpush1.bf16.msra.mxu0 %v3096_v39  ;;  %v2025_v39 = vld [vmem:[#allocation7 + $0x3198] sm:$0xff]  ;;  %v3017_v42 = vpack.c.bf16 %v1513_v37, %v1497_v36  ;;  %v2440_v36 = vld [vmem:[#allocation7 + $0x3e90] sm:$0xff] }
 0x1c6   :  { %3884 = vmatpush1.bf16.msra.mxu1 %v3352_v40  ;;  %3844 = vmatprep.subr.bf16.mxu0 %v3081_v41  ;;  %v3032_v40 = vpack.c.bf16 %v1544_v32, %v1528_v31  ;;  %v3288_v41 = vpack.c.bf16 %v2056_v35, %v2040_v33  ;;  %v3273_v45 = vpack.c.bf16 %v2025_v39, %v2009_v38  ;;  %v2457_v4 = vld [vmem:[#allocation7 + $0x3f18] sm:$0xff]  ;;  %v1912_v32 = vld [vmem:[#allocation7 + $0x2e10] sm:$0xff] }
 0x1c7   :  { %3885 = vmatprep.subr.bf16.mxu1 %v3337_v44  ;;  %v2008_v44 = vld [vmem:[#allocation7 + $0x3110] sm:$0xff]  ;;  %v1913_v25 = vld [vmem:[#allocation7 + $0x2e18] sm:$0xff] }
 0x1c8   :  { %v1929_v26 = vld [vmem:[#allocation7 + $0x2e98] sm:$0xff]  ;;  %v1928_v33 = vld [vmem:[#allocation7 + $0x2e90] sm:$0xff] }
 0x1c9   :  { %3845 = vmatpush1.bf16.msra.mxu0 %v3080_v51  ;;  %v1993_v51 = vld [vmem:[#allocation7 + $0x3098] sm:$0xff]  ;;  %v3225_v31 = vpack.c.bf16 %v1929_v26, %v1913_v25  ;;  %v2376_v2 = vld [vmem:[#allocation7 + $0x3c90] sm:$0xff] }
 0x1ca   :  { %3886 = vmatpush1.bf16.msra.mxu1 %v3336_v54  ;;  %3846 = vmatprep.subr.bf16.mxu0 %v3065_v55  ;;  %v3016_v54 = vpack.c.bf16 %v1512_v21, %v1496_v43  ;;  %v3272_v55 = vpack.c.bf16 %v2024_v46, %v2008_v44  ;;  %v3257_v1 = vpack.c.bf16 %v1993_v51, %v1977_v50  ;;  %v2425_v27 = vld [vmem:[#allocation7 + $0x3e18] sm:$0xff]  ;;  %v1880_v21 = vld [vmem:[#allocation7 + $0x2d10] sm:$0xff] }
 0x1cb   :  { %3887 = vmatprep.subr.bf16.mxu1 %v3321_v0  ;;  %v1976_v0 = vld [vmem:[#allocation7 + $0x3010] sm:$0xff]  ;;  %v1881_v37 = vld [vmem:[#allocation7 + $0x2d18] sm:$0xff] }
 0x1cc   :  { %v1897_v38 = vld [vmem:[#allocation7 + $0x2d98] sm:$0xff]  ;;  %v1896_v44 = vld [vmem:[#allocation7 + $0x2d90] sm:$0xff] }
 0x1cd   :  { %3847 = vmatpush1.bf16.msra.mxu0 %v3064_v5  ;;  %v2473_v5 = vld [vmem:[#allocation7 + $0x3f98] sm:$0xff]  ;;  %v3209_v43 = vpack.c.bf16 %v1897_v38, %v1881_v37  ;;  %v2344_v25 = vld [vmem:[#allocation7 + $0x3b90] sm:$0xff] }
 0x1ce   :  { %3888 = vmatpush1.bf16.msra.mxu1 %v3320_v6  ;;  %3848 = vmatprep.subr.bf16.mxu0 %v3049_v7  ;;  %v3000_v6 = vpack.c.bf16 %v1480_v61, %v1464_v60  ;;  %v3256_v7 = vpack.c.bf16 %v1992_v14, %v1976_v0  ;;  %v3497_v16 = vpack.c.bf16 %v2473_v5, %v2457_v4  ;;  %v2393_v39 = vld [vmem:[#allocation7 + $0x3d18] sm:$0xff]  ;;  %v1848_v61 = vld [vmem:[#allocation7 + $0x2c10] sm:$0xff] }
 0x1cf   :  { %3889 = vmatprep.subr.bf16.mxu1 %v3305_v15  ;;  %v2456_v15 = vld [vmem:[#allocation7 + $0x3f10] sm:$0xff]  ;;  %v1849_v49 = vld [vmem:[#allocation7 + $0x2c18] sm:$0xff] }
 0x1d0   :  { %v1865_v50 = vld [vmem:[#allocation7 + $0x2c98] sm:$0xff]  ;;  %v1864_v0 = vld [vmem:[#allocation7 + $0x2c90] sm:$0xff] }
 0x1d1   :  { %3849 = vmatpush1.bf16.msra.mxu0 %v3048_v28  ;;  %v2441_v28 = vld [vmem:[#allocation7 + $0x3e98] sm:$0xff]  ;;  %v3193_v60 = vpack.c.bf16 %v1865_v50, %v1849_v49  ;;  %v2312_v37 = vld [vmem:[#allocation7 + $0x3a90] sm:$0xff] }
 0x1d2   :  { %3890 = vmatpush1.bf16.msra.mxu1 %v3304_v29  ;;  %3850 = vmatprep.subr.bf16.mxu0 %v3033_v30  ;;  %v3240_v29 = vpack.c.bf16 %v1960_v13, %v1944_v11  ;;  %v3496_v30 = vpack.c.bf16 %v2472_v18, %v2456_v15  ;;  %v3481_v35 = vpack.c.bf16 %v2441_v28, %v2425_v27  ;;  %v2361_v51 = vld [vmem:[#allocation7 + $0x3c18] sm:$0xff]  ;;  %v1816_v13 = vld [vmem:[#allocation7 + $0x2b10] sm:$0xff] }
 0x1d3   :  { %3891 = vmatprep.subr.bf16.mxu1 %v3289_v34  ;;  %v2424_v34 = vld [vmem:[#allocation7 + $0x3e10] sm:$0xff]  ;;  %v1817_v3 = vld [vmem:[#allocation7 + $0x2b18] sm:$0xff] }
 0x1d4   :  { %v1833_v4 = vld [vmem:[#allocation7 + $0x2b98] sm:$0xff]  ;;  %v1832_v15 = vld [vmem:[#allocation7 + $0x2b90] sm:$0xff] }
 0x1d5   :  { %3851 = vmatpush1.bf16.msra.mxu0 %v3032_v40  ;;  %v2409_v40 = vld [vmem:[#allocation7 + $0x3d98] sm:$0xff]  ;;  %v3177_v11 = vpack.c.bf16 %v1833_v4, %v1817_v3  ;;  %v2280_v49 = vld [vmem:[#allocation7 + $0x3990] sm:$0xff]  ;;  %v667_v4 = vld [vmem:[#allocation7 + $0x728] sm:$0xff] }
 0x1d6   :  { %3892 = vmatpush1.bf16.msra.mxu1 %v3288_v41  ;;  %3852 = vmatprep.subr.bf16.mxu0 %v3017_v42  ;;  %v3224_v41 = vpack.c.bf16 %v1928_v33, %v1912_v32  ;;  %v3480_v42 = vpack.c.bf16 %v2440_v36, %v2424_v34  ;;  %v3465_v46 = vpack.c.bf16 %v2409_v40, %v2393_v39  ;;  %v2329_v5 = vld [vmem:[#allocation7 + $0x3b18] sm:$0xff]  ;;  %v1784_v33 = vld [vmem:[#allocation7 + $0x2a10] sm:$0xff] }
 0x1d7   :  { %3893 = vmatprep.subr.bf16.mxu1 %v3273_v45  ;;  %v2392_v45 = vld [vmem:[#allocation7 + $0x3d10] sm:$0xff]  ;;  %v1785_v26 = vld [vmem:[#allocation7 + $0x2a18] sm:$0xff] }
 0x1d8   :  { %v1801_v27 = vld [vmem:[#allocation7 + $0x2a98] sm:$0xff]  ;;  %v1800_v34 = vld [vmem:[#allocation7 + $0x2a90] sm:$0xff] }
 0x1d9   :  { %3853 = vmatpush1.bf16.msra.mxu0 %v3016_v54  ;;  %v2377_v54 = vld [vmem:[#allocation7 + $0x3c98] sm:$0xff]  ;;  %v3161_v32 = vpack.c.bf16 %v1801_v27, %v1785_v26  ;;  %v2248_v3 = vld [vmem:[#allocation7 + $0x3890] sm:$0xff]  ;;  %v1178_v26 = vld [vmem:[#allocation7 + $0x1720] sm:$0xff] }
 0x1da   :  { %3894 = vmatpush1.bf16.msra.mxu1 %v3272_v55  ;;  %3854 = vmatprep.subr.bf16.mxu0 %v3001_v59  ;;  %v3208_v55 = vpack.c.bf16 %v1896_v44, %v1880_v21  ;;  %v3464_v59 = vpack.c.bf16 %v2408_v48, %v2392_v45  ;;  %v3449_v14 = vpack.c.bf16 %v2377_v54, %v2361_v51  ;;  %v2297_v28 = vld [vmem:[#allocation7 + $0x3a18] sm:$0xff]  ;;  %v1752_v44 = vld [vmem:[#allocation7 + $0x2910] sm:$0xff]  ;;  %v1194_v27 = vld [vmem:[#allocation7 + $0x17a0] sm:$0xff] }
 0x1db   :  { %3895 = vmatprep.subr.bf16.mxu1 %v3257_v1  ;;  %v2360_v1 = vld [vmem:[#allocation7 + $0x3c10] sm:$0xff]  ;;  %v1753_v38 = vld [vmem:[#allocation7 + $0x2918] sm:$0xff] }
 0x1dc   :  { %v1769_v39 = vld [vmem:[#allocation7 + $0x2998] sm:$0xff]  ;;  %v1768_v45 = vld [vmem:[#allocation7 + $0x2990] sm:$0xff] }
 0x1dd   :  { %3855 = vmatpush1.bf16.msra.mxu0 %v3000_v6  ;;  %v2345_v6 = vld [vmem:[#allocation7 + $0x3b98] sm:$0xff]  ;;  %v3145_v21 = vpack.c.bf16 %v1769_v39, %v1753_v38  ;;  %v1162_v39 = vld [vmem:[#allocation7 + $0x16a0] sm:$0xff] }
 0x1de   :  { %3896 = vmatpush1.bf16.msra.mxu1 %v3256_v7  ;;  %3856 = vmatprep.subr.bf16.mxu0 %v3241_v10  ;;  %v3192_v7 = vpack.c.bf16 %v1864_v0, %v1848_v61  ;;  %v3448_v10 = vpack.c.bf16 %v2376_v2, %v2360_v1  ;;  %v3433_v18 = vpack.c.bf16 %v2345_v6, %v2329_v5  ;;  %v2265_v40 = vld [vmem:[#allocation7 + $0x3918] sm:$0xff]  ;;  %v1720_v0 = vld [vmem:[#allocation7 + $0x2810] sm:$0xff]  ;;  %v683_v5 = vld [vmem:[#allocation7 + $0x7a8] sm:$0xff] }
 0x1df   :  { %3897 = vmatprep.subr.bf16.mxu1 %v3497_v16  ;;  %v2328_v16 = vld [vmem:[#allocation7 + $0x3b10] sm:$0xff]  ;;  %v1721_v50 = vld [vmem:[#allocation7 + $0x2818] sm:$0xff]  ;;  %v1179_v6 = vld [vmem:[#allocation7 + $0x1728] sm:$0xff] }
 0x1e0   :  { %v1737_v51 = vld [vmem:[#allocation7 + $0x2898] sm:$0xff]  ;;  %v1736_v1 = vld [vmem:[#allocation7 + $0x2890] sm:$0xff] }
 0x1e1   :  { %3857 = vmatpush2.bf16.msra.mxu0 %v3240_v29  ;;  %v2313_v29 = vld [vmem:[#allocation7 + $0x3a98] sm:$0xff]  ;;  %v3129_v61 = vpack.c.bf16 %v1737_v51, %v1721_v50 }
 0x1e2   :  { %3898 = vmatpush2.bf16.msra.mxu1 %v3496_v30  ;;  %3858 = vmatprep.subr.bf16.mxu0 %v3225_v31  ;;  %v3176_v30 = vpack.c.bf16 %v1832_v15, %v1816_v13  ;;  %v3432_v31 = vpack.c.bf16 %v2344_v25, %v2328_v16  ;;  %v3417_v36 = vpack.c.bf16 %v2313_v29, %v2297_v28  ;;  %v2233_v54 = vld [vmem:[#allocation7 + $0x3818] sm:$0xff]  ;;  %v3510_v15 = vld [vmem:[#allocation9] sm:$0xff]  ;;  %v635_v28 = vld [vmem:[#allocation7 + $0x628] sm:$0xff] }
 0x1e3   :  { %3899 = vmatprep.subr.bf16.mxu1 %v3481_v35  ;;  %v2296_v35 = vld [vmem:[#allocation7 + $0x3a10] sm:$0xff]  ;;  %v2603_v13 = vpack.c.bf16 %v683_v5, %v667_v4  ;;  %v666_v16 = vld [vmem:[#allocation7 + $0x720] sm:$0xff]  ;;  %v651_v29 = vld [vmem:[#allocation7 + $0x6a8] sm:$0xff] }
 0x1e4   :  { %v2587_v38 = vpack.c.bf16 %v651_v29, %v635_v28  ;;  %v1083_v4 = vld [vmem:[#allocation7 + $0x1428] sm:$0xff] }
 0x1e5   :  { %3859 = vmatpush2.bf16.msra.mxu0 %v3224_v41  ;;  %v2281_v41 = vld [vmem:[#allocation7 + $0x3998] sm:$0xff]  ;;  %v1099_v5 = vld [vmem:[#allocation7 + $0x14a8] sm:$0xff] }
 0x1e6   :  { %3900 = vmatpush2.bf16.msra.mxu1 %v3480_v42  ;;  %3860 = vmatprep.subr.bf16.mxu0 %v3209_v43  ;;  %v3160_v42 = vpack.c.bf16 %v1800_v34, %v1784_v33  ;;  %v3416_v43 = vpack.c.bf16 %v2312_v37, %v2296_v35  ;;  %v3401_v48 = vpack.c.bf16 %v2281_v41, %v2265_v40  ;;  %v1163_v33 = vld [vmem:[#allocation7 + $0x16a8] sm:$0xff]  ;;  %v634_v35 = vld [vmem:[#allocation7 + $0x620] sm:$0xff] }
 0x1e7   :  { %3901 = vmatprep.subr.bf16.mxu1 %v3465_v46  ;;  %v2264_v46 = vld [vmem:[#allocation7 + $0x3910] sm:$0xff]  ;;  %v2858_v34 = vpack.c.bf16 %v1194_v27, %v1178_v26  ;;  %v1146_v37 = vld [vmem:[#allocation7 + $0x1620] sm:$0xff]  ;;  %v603_v40 = vld [vmem:[#allocation7 + $0x528] sm:$0xff]  ;;  %v2811_v26 = vpack.c.bf16 %v1099_v5, %v1083_v4 }
 0x1e8   :  { %v619_v41 = vld [vmem:[#allocation7 + $0x5a8] sm:$0xff]  ;;  %v2842_v50 = vpack.c.bf16 %v1162_v39, %v1146_v37  ;;  %v1098_v27 = vld [vmem:[#allocation7 + $0x14a0] sm:$0xff] }
 0x1e9   :  { %3861 = vmatpush2.bf16.msra.mxu0 %v3208_v55  ;;  %v2249_v55 = vld [vmem:[#allocation7 + $0x3898] sm:$0xff]  ;;  %v2571_v51 = vpack.c.bf16 %v619_v41, %v603_v40  ;;  %v539_v28 = vld [vmem:[#allocation7 + $0x328] sm:$0xff]  ;;  %v1050_v37 = vld [vmem:[#allocation7 + $0x1320] sm:$0xff] }
 0x1ea   :  { %3902 = vmatpush2.bf16.msra.mxu1 %v3464_v59  ;;  %3862 = vmatprep.subr.bf16.mxu0 %v3193_v60  ;;  %v3144_v59 = vpack.c.bf16 %v1768_v45, %v1752_v44  ;;  %v3400_v60 = vpack.c.bf16 %v2280_v49, %v2264_v46  ;;  %v3385_v2 = vpack.c.bf16 %v2249_v55, %v2233_v54  ;;  %v1131_v44 = vld [vmem:[#allocation7 + $0x15a8] sm:$0xff]  ;;  %v602_v54 = vld [vmem:[#allocation7 + $0x520] sm:$0xff] }
 0x1eb   :  { %3903 = vmatprep.subr.bf16.mxu1 %v3449_v14  ;;  %v2232_v14 = vld [vmem:[#allocation7 + $0x3810] sm:$0xff]  ;;  %v618_v55 = vld [vmem:[#allocation7 + $0x5a0] sm:$0xff]  ;;  %v555_v29 = vld [vmem:[#allocation7 + $0x3a8] sm:$0xff] }
 0x1ec   :  { %v1066_v39 = vld [vmem:[#allocation7 + $0x13a0] sm:$0xff]  ;;  %v507_v40 = vld [vmem:[#allocation7 + $0x228] sm:$0xff] }
 0x1ed   :  { %3863 = vmatpush2.bf16.msra.mxu0 %v3192_v7  ;;  %v1195_v7 = vld [vmem:[#allocation7 + $0x17a8] sm:$0xff]  ;;  %v474_v4 = vld [vmem:[#allocation7 + $0x120] sm:$0xff] }
 0x1ee   :  { %3904 = vmatpush2.bf16.msra.mxu1 %v3448_v10  ;;  %3864 = vmatprep.subr.bf16.mxu0 %v3177_v11  ;;  %v3128_v10 = vpack.c.bf16 %v1736_v1, %v1720_v0  ;;  %v3384_v11 = vpack.c.bf16 %v2248_v3, %v2232_v14  ;;  %v2859_v25 = vpack.c.bf16 %v1195_v7, %v1179_v6  ;;  %v1130_v1 = vld [vmem:[#allocation7 + $0x15a0] sm:$0xff]  ;;  %v571_v14 = vld [vmem:[#allocation7 + $0x428] sm:$0xff] }
 0x1ef   :  { %3905 = vmatprep.subr.bf16.mxu1 %v3433_v18  ;;  %v682_v18 = vld [vmem:[#allocation7 + $0x7a0] sm:$0xff]  ;;  %v2570_v7 = vpack.c.bf16 %v618_v55, %v602_v54  ;;  %v523_v41 = vld [vmem:[#allocation7 + $0x2a8] sm:$0xff] }
 0x1f0   :  { %v1034_v54 = vld [vmem:[#allocation7 + $0x12a0] sm:$0xff]  ;;  %v475_v55 = vld [vmem:[#allocation7 + $0x128] sm:$0xff] }
 0x1f1   :  { %3865 = vmatpush2.bf16.msra.mxu0 %v3176_v30  ;;  %v3517_v30 = vrot.slane %v3510_v15, %v9253_v20  ;;  %v570_v15 = vld [vmem:[#allocation7 + $0x420] sm:$0xff] }
 0x1f2   :  { %3906 = vmatpush2.bf16.msra.mxu1 %v3432_v31  ;;  %3866 = vmatprep.subr.bf16.mxu0 %v3161_v32  ;;  %v2602_v31 = vpack.c.bf16 %v682_v18, %v666_v16  ;;  %v1147_v32 = vld [vmem:[#allocation7 + $0x1628] sm:$0xff]  ;;  %v586_v16 = vld [vmem:[#allocation7 + $0x4a0] sm:$0xff] }
 0x1f3   :  { %3907 = vmatprep.subr.bf16.mxu1 %v3417_v36  ;;  %v650_v36 = vld [vmem:[#allocation7 + $0x6a0] sm:$0xff] }
 0x1f4   :  { %v1082_v18 = vld [vmem:[#allocation7 + $0x1420] sm:$0xff] }
 0x1f5   :  { %3867 = vmatpush2.bf16.msra.mxu0 %v3160_v42  ;;  %v490_v5 = vld [vmem:[#allocation7 + $0x1a0] sm:$0xff] }
 0x1f6   :  { %3908 = vmatpush2.bf16.msra.mxu1 %v3416_v43  ;;  %3868 = vmatprep.subr.bf16.mxu0 %v3145_v21  ;;  %v2843_v43 = vpack.c.bf16 %v1163_v33, %v1147_v32  ;;  %v1115_v21 = vld [vmem:[#allocation7 + $0x1528] sm:$0xff]  ;;  %v2554_v32 = vpack.c.bf16 %v586_v16, %v570_v15  ;;  %v2810_v33 = vpack.c.bf16 %v1098_v27, %v1082_v18  ;;  %v442_v27 = vld [vmem:[#allocation7 + $0x20] sm:$0xff] }
 0x1f7   :  { %3909 = vmatprep.subr.bf16.mxu1 %v3401_v48  ;;  %v2586_v48 = vpack.c.bf16 %v650_v36, %v634_v35  ;;  %v2827_v0 = vpack.c.bf16 %v1131_v44, %v1115_v21  ;;  %v538_v35 = vld [vmem:[#allocation7 + $0x320] sm:$0xff]  ;;  %v2794_v44 = vpack.c.bf16 %v1066_v39, %v1050_v37  ;;  %v955_v15 = vld [vmem:[#allocation7 + $0x1028] sm:$0xff]  ;;  %v2506_v18 = vpack.c.bf16 %v490_v5, %v474_v4 }
 0x1f8   :  { %v554_v36 = vld [vmem:[#allocation7 + $0x3a0] sm:$0xff]  ;;  %v971_v16 = vld [vmem:[#allocation7 + $0x10a8] sm:$0xff] }
 0x1f9   :  { %3869 = vmatpush2.bf16.msra.mxu0 %v3144_v59  ;;  %v1114_v59 = vld [vmem:[#allocation7 + $0x1520] sm:$0xff]  ;;  %v2538_v21 = vpack.c.bf16 %v554_v36, %v538_v35  ;;  %v1451_v35 = vld [vmem:[#allocation7 + $0x1fa8] sm:$0xff] }
 0x1fa   :  { %3910 = vmatpush2.bf16.msra.mxu1 %v3400_v60  ;;  %3870 = vmatprep.subr.bf16.mxu0 %v3129_v61  ;;  %v922_v39 = vld [vmem:[#allocation7 + $0xf20] sm:$0xff]  ;;  %v1387_v4 = vld [vmem:[#allocation7 + $0x1da8] sm:$0xff] }
 0x1fb   :  { %3911 = vmatprep.subr.bf16.mxu1 %v3385_v2  ;;  %v587_v2 = vld [vmem:[#allocation7 + $0x4a8] sm:$0xff] }
 0x1fd   :  { %3871 = vmatpush2.bf16.msra.mxu0 %v3128_v10 }
 0x1fe   :  { %3912 = vmatpush2.bf16.msra.mxu1 %v3384_v11  ;;  %3922 = vmatprep.subr.bf16.mxu0 %v2603_v13  ;;  %v2826_v11 = vpack.c.bf16 %v1130_v1, %v1114_v59  ;;  %v2555_v13 = vpack.c.bf16 %v587_v2, %v571_v14  ;;  %v491_v59 = vld [vmem:[#allocation7 + $0x1a8] sm:$0xff] }
 0x1ff   :  { %3963 = vmatprep.subr.bf16.mxu1 %v2859_v25  ;;  %v1003_v1 = vld [vmem:[#allocation7 + $0x11a8] sm:$0xff] }
 0x200   :  { %3873 = vmatmul.mubr.bf16.vlgmr.msra.gmra.mxu0 %v9320_v17  ;;  %v3628_v42 = vpop.f32.mrf.mxu0 }
 0x201   :  { %3914 = vmatmul.mubr.bf16.vlgmr.msra.gmra.mxu1 %v9318_v12  ;;  %v3629_v45 = vadd.f32 %v3628_v42, %v3517_v30  ;;  %v3669_v46 = vpop.f32.mrf.mxu1  ;;  %3923 = vmatpush1.bf16.msra.mxu0 %v2602_v31  ;;  %v1051_v30 = vld [vmem:[#allocation7 + $0x1328] sm:$0xff] }
 0x202   :  { %3954 = vmatprep.mubr.bf16.mxu0 %v9276_v53  ;;  %3964 = vmatpush1.bf16.msra.mxu1 %v2858_v34  ;;  %v9334_v49 = vpop.f32.mrf.mxu0  ;;  %v1067_v31 = vld [vmem:[#allocation7 + $0x13a8] sm:$0xff]  ;;  %v2539_v34 = vpack.c.bf16 %v555_v29, %v539_v28  ;;  %v458_v28 = vld [vmem:[#allocation7 + $0xa0] sm:$0xff] }
 0x203   :  { %v9336_v60 = vadd.f32 %v3669_v46, %v3629_v45  ;;  %3995 = vmatprep.mubr.bf16.mxu1 %v9283_v58  ;;  %v9339_v61 = vpop.f32.mrf.mxu1  ;;  %3924 = vmatprep.subr.bf16.mxu0 %v2587_v38  ;;  %v2795_v38 = vpack.c.bf16 %v1067_v31, %v1051_v30  ;;  %v1019_v42 = vld [vmem:[#allocation7 + $0x1228] sm:$0xff]  ;;  %v2523_v45 = vpack.c.bf16 %v523_v41, %v507_v40  ;;  %v506_v46 = vld [vmem:[#allocation7 + $0x220] sm:$0xff] }
 0x204   :  { %3965 = vmatprep.subr.bf16.mxu1 %v2843_v43  ;;  %v3632_v3 = vpop.f32.mrf.mxu0  ;;  %v1035_v43 = vld [vmem:[#allocation7 + $0x12a8] sm:$0xff]  ;;  %v954_v29 = vld [vmem:[#allocation7 + $0x1020] sm:$0xff]  ;;  %v2747_v30 = vpack.c.bf16 %v971_v16, %v955_v15  ;;  %v2490_v36 = vpack.c.bf16 %v458_v28, %v442_v27 }
 0x205   :  { %v3673_v6 = vpop.f32.mrf.mxu1  ;;  %3925 = vmatpush1.bf16.msra.mxu0 %v2586_v48  ;;  %v522_v48 = vld [vmem:[#allocation7 + $0x2a0] sm:$0xff]  ;;  %v2507_v3 = vpack.c.bf16 %v491_v59, %v475_v55  ;;  %v1355_v27 = vld [vmem:[#allocation7 + $0x1ca8] sm:$0xff] }
 0x206   :  { %3966 = vmatpush1.bf16.msra.mxu1 %v2842_v50  ;;  %v3633_v10 = vpop.f32.mrf.mxu0  ;;  %3926 = vmatprep.subr.bf16.mxu0 %v2571_v51  ;;  %v1018_v50 = vld [vmem:[#allocation7 + $0x1220] sm:$0xff]  ;;  %v2779_v51 = vpack.c.bf16 %v1035_v43, %v1019_v42  ;;  %v2522_v14 = vpack.c.bf16 %v522_v48, %v506_v46  ;;  %v1419_v46 = vld [vmem:[#allocation7 + $0x1ea8] sm:$0xff] }
 0x207   :  { %v3674_v25 = vpop.f32.mrf.mxu1  ;;  %3967 = vmatprep.subr.bf16.mxu1 %v2827_v0  ;;  %v987_v0 = vld [vmem:[#allocation7 + $0x1128] sm:$0xff]  ;;  %v2778_v2 = vpack.c.bf16 %v1034_v54, %v1018_v50  ;;  %v986_v6 = vld [vmem:[#allocation7 + $0x1120] sm:$0xff] }
 0x208   :  { %v1002_v10 = vld [vmem:[#allocation7 + $0x11a0] sm:$0xff] }
 0x209   :  { %3927 = vmatpush1.bf16.msra.mxu0 %v2570_v7  ;;  %v2763_v7 = vpack.c.bf16 %v1003_v1, %v987_v0  ;;  %v2762_v25 = vpack.c.bf16 %v1002_v10, %v986_v6  ;;  %v970_v31 = vld [vmem:[#allocation7 + $0x10a0] sm:$0xff] }
 0x20a   :  { %3968 = vmatpush1.bf16.msra.mxu1 %v2826_v11  ;;  %3928 = vmatprep.subr.bf16.mxu0 %v2555_v13  ;;  %v443_v11 = vld [vmem:[#allocation7 + $0x28] sm:$0xff]  ;;  %v2746_v37 = vpack.c.bf16 %v970_v31, %v954_v29  ;;  %v938_v40 = vld [vmem:[#allocation7 + $0xfa0] sm:$0xff] }
 0x20b   :  { %3969 = vmatprep.subr.bf16.mxu1 %v2811_v26  ;;  %v459_v13 = vld [vmem:[#allocation7 + $0xa8] sm:$0xff]  ;;  %v1434_v41 = vld [vmem:[#allocation7 + $0x1f20] sm:$0xff]  ;;  %v2730_v48 = vpack.c.bf16 %v938_v40, %v922_v39 }
 0x20c   :  { %v2491_v26 = vpack.c.bf16 %v459_v13, %v443_v11  ;;  %v1450_v43 = vld [vmem:[#allocation7 + $0x1fa0] sm:$0xff]  ;;  %v1323_v39 = vld [vmem:[#allocation7 + $0x1ba8] sm:$0xff] }
 0x20d   :  { %3929 = vmatpush1.bf16.msra.mxu0 %v2554_v32  ;;  %v923_v32 = vld [vmem:[#allocation7 + $0xf28] sm:$0xff]  ;;  %v2986_v50 = vpack.c.bf16 %v1450_v43, %v1434_v41  ;;  %v890_v54 = vld [vmem:[#allocation7 + $0xe20] sm:$0xff] }
 0x20e   :  { %3970 = vmatpush1.bf16.msra.mxu1 %v2810_v33  ;;  %3930 = vmatprep.subr.bf16.mxu0 %v2539_v34  ;;  %v939_v33 = vld [vmem:[#allocation7 + $0xfa8] sm:$0xff]  ;;  %v906_v55 = vld [vmem:[#allocation7 + $0xea0] sm:$0xff] }
 0x20f   :  { %3971 = vmatprep.subr.bf16.mxu1 %v2795_v38  ;;  %v1435_v34 = vld [vmem:[#allocation7 + $0x1f28] sm:$0xff]  ;;  %v2731_v38 = vpack.c.bf16 %v939_v33, %v923_v32  ;;  %v1402_v59 = vld [vmem:[#allocation7 + $0x1e20] sm:$0xff]  ;;  %v2714_v5 = vpack.c.bf16 %v906_v55, %v890_v54 }
 0x210   :  { %v2987_v42 = vpack.c.bf16 %v1451_v35, %v1435_v34  ;;  %v1418_v1 = vld [vmem:[#allocation7 + $0x1ea0] sm:$0xff]  ;;  %v1291_v54 = vld [vmem:[#allocation7 + $0x1aa8] sm:$0xff] }
 0x211   :  { %3931 = vmatpush1.bf16.msra.mxu0 %v2538_v21  ;;  %v891_v21 = vld [vmem:[#allocation7 + $0xe28] sm:$0xff]  ;;  %v2970_v6 = vpack.c.bf16 %v1418_v1, %v1402_v59  ;;  %v858_v10 = vld [vmem:[#allocation7 + $0xd20] sm:$0xff] }
 0x212   :  { %3972 = vmatpush1.bf16.msra.mxu1 %v2794_v44  ;;  %3932 = vmatprep.subr.bf16.mxu0 %v2523_v45  ;;  %v907_v44 = vld [vmem:[#allocation7 + $0xea8] sm:$0xff]  ;;  %v874_v11 = vld [vmem:[#allocation7 + $0xda0] sm:$0xff] }
 0x213   :  { %3973 = vmatprep.subr.bf16.mxu1 %v2779_v51  ;;  %v1403_v45 = vld [vmem:[#allocation7 + $0x1e28] sm:$0xff]  ;;  %v2715_v51 = vpack.c.bf16 %v907_v44, %v891_v21  ;;  %v1370_v13 = vld [vmem:[#allocation7 + $0x1d20] sm:$0xff]  ;;  %v2698_v28 = vpack.c.bf16 %v874_v11, %v858_v10 }
 0x214   :  { %v2971_v0 = vpack.c.bf16 %v1419_v46, %v1403_v45  ;;  %v1386_v16 = vld [vmem:[#allocation7 + $0x1da0] sm:$0xff]  ;;  %v1259_v10 = vld [vmem:[#allocation7 + $0x19a8] sm:$0xff] }
 0x215   :  { %3933 = vmatpush1.bf16.msra.mxu0 %v2522_v14  ;;  %v859_v14 = vld [vmem:[#allocation7 + $0xd28] sm:$0xff]  ;;  %v2954_v29 = vpack.c.bf16 %v1386_v16, %v1370_v13  ;;  %v826_v31 = vld [vmem:[#allocation7 + $0xc20] sm:$0xff] }
 0x216   :  { %3974 = vmatpush1.bf16.msra.mxu1 %v2778_v2  ;;  %3934 = vmatprep.subr.bf16.mxu0 %v2507_v3  ;;  %v875_v2 = vld [vmem:[#allocation7 + $0xda8] sm:$0xff]  ;;  %v842_v32 = vld [vmem:[#allocation7 + $0xca0] sm:$0xff] }
 0x217   :  { %3975 = vmatprep.subr.bf16.mxu1 %v2763_v7  ;;  %v1371_v3 = vld [vmem:[#allocation7 + $0x1d28] sm:$0xff]  ;;  %v2699_v7 = vpack.c.bf16 %v875_v2, %v859_v14  ;;  %v1338_v33 = vld [vmem:[#allocation7 + $0x1c20] sm:$0xff]  ;;  %v2682_v40 = vpack.c.bf16 %v842_v32, %v826_v31 }
 0x218   :  { %v2955_v15 = vpack.c.bf16 %v1387_v4, %v1371_v3  ;;  %v1354_v35 = vld [vmem:[#allocation7 + $0x1ca0] sm:$0xff]  ;;  %v1227_v31 = vld [vmem:[#allocation7 + $0x18a8] sm:$0xff] }
 0x219   :  { %3935 = vmatpush1.bf16.msra.mxu0 %v2506_v18  ;;  %v827_v18 = vld [vmem:[#allocation7 + $0xc28] sm:$0xff]  ;;  %v2938_v41 = vpack.c.bf16 %v1354_v35, %v1338_v33  ;;  %v794_v43 = vld [vmem:[#allocation7 + $0xb20] sm:$0xff] }
 0x21a   :  { %3976 = vmatpush1.bf16.msra.mxu1 %v2762_v25  ;;  %3936 = vmatprep.subr.bf16.mxu0 %v2491_v26  ;;  %v843_v25 = vld [vmem:[#allocation7 + $0xca8] sm:$0xff]  ;;  %v810_v21 = vld [vmem:[#allocation7 + $0xba0] sm:$0xff] }
 0x21b   :  { %3977 = vmatprep.subr.bf16.mxu1 %v2747_v30  ;;  %v1339_v26 = vld [vmem:[#allocation7 + $0x1c28] sm:$0xff]  ;;  %v2683_v30 = vpack.c.bf16 %v843_v25, %v827_v18  ;;  %v1306_v44 = vld [vmem:[#allocation7 + $0x1b20] sm:$0xff]  ;;  %v2666_v55 = vpack.c.bf16 %v810_v21, %v794_v43 }
 0x21c   :  { %v2939_v34 = vpack.c.bf16 %v1355_v27, %v1339_v26  ;;  %v1322_v46 = vld [vmem:[#allocation7 + $0x1ba0] sm:$0xff]  ;;  %v2219_v43 = vld [vmem:[#allocation7 + $0x37a8] sm:$0xff] }
 0x21d   :  { %3937 = vmatpush1.bf16.msra.mxu0 %v2490_v36  ;;  %v795_v36 = vld [vmem:[#allocation7 + $0xb28] sm:$0xff]  ;;  %v2922_v59 = vpack.c.bf16 %v1322_v46, %v1306_v44  ;;  %v762_v1 = vld [vmem:[#allocation7 + $0xa20] sm:$0xff] }
 0x21e   :  { %3978 = vmatpush1.bf16.msra.mxu1 %v2746_v37  ;;  %3938 = vmatprep.subr.bf16.mxu0 %v2731_v38  ;;  %v811_v37 = vld [vmem:[#allocation7 + $0xba8] sm:$0xff]  ;;  %v778_v14 = vld [vmem:[#allocation7 + $0xaa0] sm:$0xff] }
 0x21f   :  { %3979 = vmatprep.subr.bf16.mxu1 %v2987_v42  ;;  %v1307_v38 = vld [vmem:[#allocation7 + $0x1b28] sm:$0xff]  ;;  %v2667_v42 = vpack.c.bf16 %v811_v37, %v795_v36  ;;  %v1274_v2 = vld [vmem:[#allocation7 + $0x1a20] sm:$0xff]  ;;  %v2650_v11 = vpack.c.bf16 %v778_v14, %v762_v1 }
 0x220   :  { %v2923_v45 = vpack.c.bf16 %v1323_v39, %v1307_v38  ;;  %v1290_v4 = vld [vmem:[#allocation7 + $0x1aa0] sm:$0xff]  ;;  %v2171_v1 = vld [vmem:[#allocation7 + $0x3628] sm:$0xff] }
 0x221   :  { %3939 = vmatpush2.bf16.msra.mxu0 %v2730_v48  ;;  %v763_v48 = vld [vmem:[#allocation7 + $0xa28] sm:$0xff]  ;;  %v2906_v13 = vpack.c.bf16 %v1290_v4, %v1274_v2  ;;  %v730_v16 = vld [vmem:[#allocation7 + $0x920] sm:$0xff] }
 0x222   :  { %3980 = vmatpush2.bf16.msra.mxu1 %v2986_v50  ;;  %3940 = vmatprep.subr.bf16.mxu0 %v2715_v51  ;;  %v779_v50 = vld [vmem:[#allocation7 + $0xaa8] sm:$0xff]  ;;  %v746_v18 = vld [vmem:[#allocation7 + $0x9a0] sm:$0xff] }
 0x223   :  { %3981 = vmatprep.subr.bf16.mxu1 %v2971_v0  ;;  %v1275_v51 = vld [vmem:[#allocation7 + $0x1a28] sm:$0xff]  ;;  %v2651_v0 = vpack.c.bf16 %v779_v50, %v763_v48  ;;  %v1242_v25 = vld [vmem:[#allocation7 + $0x1920] sm:$0xff]  ;;  %v2634_v32 = vpack.c.bf16 %v746_v18, %v730_v16 }
 0x224   :  { %v2907_v3 = vpack.c.bf16 %v1291_v54, %v1275_v51  ;;  %v1258_v27 = vld [vmem:[#allocation7 + $0x19a0] sm:$0xff]  ;;  %v2187_v14 = vld [vmem:[#allocation7 + $0x36a8] sm:$0xff] }
 0x225   :  { %3941 = vmatpush2.bf16.msra.mxu0 %v2714_v5  ;;  %v731_v5 = vld [vmem:[#allocation7 + $0x928] sm:$0xff]  ;;  %v2890_v33 = vpack.c.bf16 %v1258_v27, %v1242_v25  ;;  %v698_v35 = vld [vmem:[#allocation7 + $0x820] sm:$0xff] }
 0x226   :  { %3982 = vmatpush2.bf16.msra.mxu1 %v2970_v6  ;;  %3942 = vmatprep.subr.bf16.mxu0 %v2699_v7  ;;  %v747_v6 = vld [vmem:[#allocation7 + $0x9a8] sm:$0xff]  ;;  %v714_v36 = vld [vmem:[#allocation7 + $0x8a0] sm:$0xff] }
 0x227   :  { %3983 = vmatprep.subr.bf16.mxu1 %v2955_v15  ;;  %v1243_v7 = vld [vmem:[#allocation7 + $0x1928] sm:$0xff]  ;;  %v2635_v15 = vpack.c.bf16 %v747_v6, %v731_v5  ;;  %v1210_v37 = vld [vmem:[#allocation7 + $0x1820] sm:$0xff]  ;;  %v2618_v21 = vpack.c.bf16 %v714_v36, %v698_v35 }
 0x228   :  { %v2891_v26 = vpack.c.bf16 %v1259_v10, %v1243_v7  ;;  %v1226_v39 = vld [vmem:[#allocation7 + $0x18a0] sm:$0xff]  ;;  %v1627_v10 = vld [vmem:[#allocation7 + $0x2528] sm:$0xff] }
 0x229   :  { %3943 = vmatpush2.bf16.msra.mxu0 %v2698_v28  ;;  %v699_v28 = vld [vmem:[#allocation7 + $0x828] sm:$0xff]  ;;  %v2874_v44 = vpack.c.bf16 %v1226_v39, %v1210_v37  ;;  %v1690_v46 = vld [vmem:[#allocation7 + $0x2720] sm:$0xff] }
 0x22a   :  { %3984 = vmatpush2.bf16.msra.mxu1 %v2954_v29  ;;  %3944 = vmatprep.subr.bf16.mxu0 %v2683_v30  ;;  %v715_v29 = vld [vmem:[#allocation7 + $0x8a8] sm:$0xff]  ;;  %v1706_v48 = vld [vmem:[#allocation7 + $0x27a0] sm:$0xff] }
 0x22b   :  { %3985 = vmatprep.subr.bf16.mxu1 %v2939_v34  ;;  %v1211_v30 = vld [vmem:[#allocation7 + $0x1828] sm:$0xff]  ;;  %v2619_v34 = vpack.c.bf16 %v715_v29, %v699_v28  ;;  %v2202_v51 = vld [vmem:[#allocation7 + $0x3720] sm:$0xff] }
 0x22c   :  { %v2875_v38 = vpack.c.bf16 %v1227_v31, %v1211_v30  ;;  %v2218_v54 = vld [vmem:[#allocation7 + $0x37a0] sm:$0xff]  ;;  %v2139_v16 = vld [vmem:[#allocation7 + $0x3528] sm:$0xff] }
 0x22d   :  { %3945 = vmatpush2.bf16.msra.mxu0 %v2682_v40  ;;  %v1691_v40 = vld [vmem:[#allocation7 + $0x2728] sm:$0xff]  ;;  %v3370_v2 = vpack.c.bf16 %v2218_v54, %v2202_v51  ;;  %v1674_v4 = vld [vmem:[#allocation7 + $0x26a0] sm:$0xff] }
 0x22e   :  { %3986 = vmatpush2.bf16.msra.mxu1 %v2938_v41  ;;  %3946 = vmatprep.subr.bf16.mxu0 %v2667_v42  ;;  %v1707_v41 = vld [vmem:[#allocation7 + $0x27a8] sm:$0xff]  ;;  %v2170_v5 = vld [vmem:[#allocation7 + $0x3620] sm:$0xff] }
 0x22f   :  { %3987 = vmatprep.subr.bf16.mxu1 %v2923_v45  ;;  %v2203_v42 = vld [vmem:[#allocation7 + $0x3728] sm:$0xff]  ;;  %v3115_v45 = vpack.c.bf16 %v1707_v41, %v1691_v40  ;;  %v2186_v7 = vld [vmem:[#allocation7 + $0x36a0] sm:$0xff] }
 0x230   :  { %v3371_v50 = vpack.c.bf16 %v2219_v43, %v2203_v42  ;;  %v2155_v18 = vld [vmem:[#allocation7 + $0x35a8] sm:$0xff]  ;;  %v3354_v29 = vpack.c.bf16 %v2186_v7, %v2170_v5  ;;  %v1626_v31 = vld [vmem:[#allocation7 + $0x2520] sm:$0xff] }
 0x231   :  { %3947 = vmatpush2.bf16.msra.mxu0 %v2666_v55  ;;  %v1659_v55 = vld [vmem:[#allocation7 + $0x2628] sm:$0xff]  ;;  %v3339_v35 = vpack.c.bf16 %v2155_v18, %v2139_v16  ;;  %v2154_v36 = vld [vmem:[#allocation7 + $0x35a0] sm:$0xff] }
 0x232   :  { %3988 = vmatpush2.bf16.msra.mxu1 %v2922_v59  ;;  %3948 = vmatprep.subr.bf16.mxu0 %v2651_v0  ;;  %v1675_v59 = vld [vmem:[#allocation7 + $0x26a8] sm:$0xff]  ;;  %v3114_v0 = vpack.c.bf16 %v1706_v48, %v1690_v46  ;;  %v1594_v46 = vld [vmem:[#allocation7 + $0x2420] sm:$0xff] }
 0x233   :  { %3989 = vmatprep.subr.bf16.mxu1 %v2907_v3  ;;  %v1658_v3 = vld [vmem:[#allocation7 + $0x2620] sm:$0xff]  ;;  %v3099_v6 = vpack.c.bf16 %v1675_v59, %v1659_v55  ;;  %v1595_v37 = vld [vmem:[#allocation7 + $0x2428] sm:$0xff] }
 0x234   :  { %v3098_v27 = vpack.c.bf16 %v1674_v4, %v1658_v3  ;;  %v2107_v40 = vld [vmem:[#allocation7 + $0x3428] sm:$0xff]  ;;  %v1610_v48 = vld [vmem:[#allocation7 + $0x24a0] sm:$0xff] }
 0x235   :  { %3949 = vmatpush2.bf16.msra.mxu0 %v2650_v11  ;;  %v1643_v11 = vld [vmem:[#allocation7 + $0x25a8] sm:$0xff]  ;;  %v2122_v55 = vld [vmem:[#allocation7 + $0x34a0] sm:$0xff] }
 0x236   :  { %3990 = vmatpush2.bf16.msra.mxu1 %v2906_v13  ;;  %3950 = vmatprep.subr.bf16.mxu0 %v2635_v15  ;;  %v3355_v15 = vpack.c.bf16 %v2187_v14, %v2171_v1  ;;  %v3083_v30 = vpack.c.bf16 %v1643_v11, %v1627_v10  ;;  %v2123_v41 = vld [vmem:[#allocation7 + $0x34a8] sm:$0xff]  ;;  %v1562_v5 = vld [vmem:[#allocation7 + $0x2320] sm:$0xff] }
 0x237   :  { %3991 = vmatprep.subr.bf16.mxu1 %v2891_v26  ;;  %v3323_v54 = vpack.c.bf16 %v2123_v41, %v2107_v40  ;;  %v1563_v59 = vld [vmem:[#allocation7 + $0x2328] sm:$0xff]  ;;  %v2074_v7 = vld [vmem:[#allocation7 + $0x3320] sm:$0xff] }
 0x238   :  { %v2075_v1 = vld [vmem:[#allocation7 + $0x3328] sm:$0xff]  ;;  %v2090_v11 = vld [vmem:[#allocation7 + $0x33a0] sm:$0xff] }
 0x239   :  { %3951 = vmatpush2.bf16.msra.mxu0 %v2634_v32  ;;  %v1642_v32 = vld [vmem:[#allocation7 + $0x25a0] sm:$0xff]  ;;  %v2091_v14 = vld [vmem:[#allocation7 + $0x33a8] sm:$0xff] }
 0x23a   :  { %3992 = vmatpush2.bf16.msra.mxu1 %v2890_v33  ;;  %3952 = vmatprep.subr.bf16.mxu0 %v2619_v34  ;;  %v2138_v33 = vld [vmem:[#allocation7 + $0x3520] sm:$0xff]  ;;  %v3082_v43 = vpack.c.bf16 %v1642_v32, %v1626_v31  ;;  %v3307_v10 = vpack.c.bf16 %v2091_v14, %v2075_v1  ;;  %v2043_v16 = vld [vmem:[#allocation7 + $0x3228] sm:$0xff] }
 0x23b   :  { %3993 = vmatprep.subr.bf16.mxu1 %v2875_v38  ;;  %v1611_v38 = vld [vmem:[#allocation7 + $0x24a8] sm:$0xff]  ;;  %v2042_v31 = vld [vmem:[#allocation7 + $0x3220] sm:$0xff] }
 0x23c   :  { %v2059_v18 = vld [vmem:[#allocation7 + $0x32a8] sm:$0xff]  ;;  %v1482_v1 = vld [vmem:[#allocation7 + $0x20a0] sm:$0xff] }
 0x23d   :  { %3953 = vmatpush2.bf16.msra.mxu0 %v2618_v21  ;;  %v3291_v32 = vpack.c.bf16 %v2059_v18, %v2043_v16  ;;  %v1978_v14 = vld [vmem:[#allocation7 + $0x3020] sm:$0xff] }
 0x23e   :  { %3994 = vmatpush2.bf16.msra.mxu1 %v2874_v44  ;;  %4004 = vmatprep.subr.bf16.mxu0 %v3115_v45  ;;  %v3338_v44 = vpack.c.bf16 %v2154_v36, %v2138_v33  ;;  %v3067_v45 = vpack.c.bf16 %v1611_v38, %v1595_v37  ;;  %v2058_v33 = vld [vmem:[#allocation7 + $0x32a0] sm:$0xff]  ;;  %v1515_v36 = vld [vmem:[#allocation7 + $0x21a8] sm:$0xff] }
 0x23f   :  { %4045 = vmatprep.subr.bf16.mxu1 %v3371_v50  ;;  %v2106_v50 = vld [vmem:[#allocation7 + $0x3420] sm:$0xff]  ;;  %v2011_v37 = vld [vmem:[#allocation7 + $0x3128] sm:$0xff]  ;;  %v3290_v40 = vpack.c.bf16 %v2058_v33, %v2042_v31 }
 0x240   :  { %v3710_v13 = vpop.f32.mrf.mxu0  ;;  %3955 = vmatmul.mubr.bf16.vlgmr.msra.gmra.mxu0 %v9281_v57  ;;  %v3322_v3 = vpack.c.bf16 %v2122_v55, %v2106_v50  ;;  %v2027_v38 = vld [vmem:[#allocation7 + $0x31a8] sm:$0xff]  ;;  %v1962_v16 = vld [vmem:[#allocation7 + $0x2fa0] sm:$0xff] }
 0x241   :  { %v3711_v25 = vadd.f32 %v3710_v13, %v9336_v60  ;;  %v3751_v26 = vpop.f32.mrf.mxu1  ;;  %3996 = vmatmul.mubr.bf16.vlgmr.msra.gmra.mxu1 %v9274_v52  ;;  %4005 = vmatpush1.bf16.msra.mxu0 %v3114_v0  ;;  %v1579_v0 = vld [vmem:[#allocation7 + $0x23a8] sm:$0xff]  ;;  %v2458_v18 = vld [vmem:[#allocation7 + $0x3f20] sm:$0xff] }
 0x242   :  { %4036 = vmatprep.mubr.bf16.mxu0 %v9300_v47  ;;  %4046 = vmatpush1.bf16.msra.mxu1 %v3370_v2  ;;  %v9345_v28 = vpop.f32.mrf.mxu0  ;;  %v3066_v2 = vpack.c.bf16 %v1610_v48, %v1594_v46  ;;  %v3051_v4 = vpack.c.bf16 %v1579_v0, %v1563_v59  ;;  %v1531_v13 = vld [vmem:[#allocation7 + $0x2228] sm:$0xff]  ;;  %v1466_v0 = vld [vmem:[#allocation7 + $0x2020] sm:$0xff] }
 0x243   :  { %v9347_v34 = vadd.f32 %v3751_v26, %v3711_v25  ;;  %4077 = vmatprep.mubr.bf16.mxu1 %v9302_v62  ;;  %v9350_v60 = vpop.f32.mrf.mxu1  ;;  %4006 = vmatprep.subr.bf16.mxu0 %v3099_v6  ;;  %v1578_v6 = vld [vmem:[#allocation7 + $0x23a0] sm:$0xff]  ;;  %v3306_v26 = vpack.c.bf16 %v2090_v11, %v2074_v7  ;;  %v1467_v46 = vld [vmem:[#allocation7 + $0x2028] sm:$0xff] }
 0x244   :  { %v3714_v39 = vpop.f32.mrf.mxu0  ;;  %4047 = vmatprep.subr.bf16.mxu1 %v3355_v15  ;;  %v1547_v15 = vld [vmem:[#allocation7 + $0x22a8] sm:$0xff]  ;;  %v3050_v25 = vpack.c.bf16 %v1578_v6, %v1562_v5 }
 0x245   :  { %v3755_v42 = vpop.f32.mrf.mxu1  ;;  %4007 = vmatpush1.bf16.msra.mxu0 %v3098_v27  ;;  %v3035_v27 = vpack.c.bf16 %v1547_v15, %v1531_v13  ;;  %v1483_v48 = vld [vmem:[#allocation7 + $0x20a8] sm:$0xff]  ;;  %v1946_v15 = vld [vmem:[#allocation7 + $0x2f20] sm:$0xff] }
 0x246   :  { %4048 = vmatpush1.bf16.msra.mxu1 %v3354_v29  ;;  %v3715_v21 = vpop.f32.mrf.mxu0  ;;  %4008 = vmatprep.subr.bf16.mxu0 %v3083_v30  ;;  %v1530_v29 = vld [vmem:[#allocation7 + $0x2220] sm:$0xff]  ;;  %v1979_v50 = vld [vmem:[#allocation7 + $0x3028] sm:$0xff]  ;;  %v3003_v59 = vpack.c.bf16 %v1483_v48, %v1467_v46 }
 0x247   :  { %v3756_v51 = vpop.f32.mrf.mxu1  ;;  %4049 = vmatprep.subr.bf16.mxu1 %v3339_v35  ;;  %v1546_v30 = vld [vmem:[#allocation7 + $0x22a0] sm:$0xff]  ;;  %v1499_v35 = vld [vmem:[#allocation7 + $0x2128] sm:$0xff] }
 0x248   :  { %v3034_v39 = vpack.c.bf16 %v1546_v30, %v1530_v29  ;;  %v3019_v41 = vpack.c.bf16 %v1515_v36, %v1499_v35  ;;  %v1498_v42 = vld [vmem:[#allocation7 + $0x2120] sm:$0xff]  ;;  %v1995_v51 = vld [vmem:[#allocation7 + $0x30a8] sm:$0xff] }
 0x249   :  { %4009 = vmatpush1.bf16.msra.mxu0 %v3082_v43  ;;  %v1514_v43 = vld [vmem:[#allocation7 + $0x21a0] sm:$0xff]  ;;  %v1963_v5 = vld [vmem:[#allocation7 + $0x2fa8] sm:$0xff] }
 0x24a   :  { %4050 = vmatpush1.bf16.msra.mxu1 %v3338_v44  ;;  %4010 = vmatprep.subr.bf16.mxu0 %v3067_v45  ;;  %v2010_v21 = vld [vmem:[#allocation7 + $0x3120] sm:$0xff]  ;;  %v3275_v44 = vpack.c.bf16 %v2027_v38, %v2011_v37  ;;  %v2459_v6 = vld [vmem:[#allocation7 + $0x3f28] sm:$0xff] }
 0x24b   :  { %4051 = vmatprep.subr.bf16.mxu1 %v3323_v54  ;;  %v2026_v45 = vld [vmem:[#allocation7 + $0x31a0] sm:$0xff]  ;;  %v3018_v54 = vpack.c.bf16 %v1514_v43, %v1498_v42  ;;  %v2475_v7 = vld [vmem:[#allocation7 + $0x3fa8] sm:$0xff] }
 0x24c   :  { %v3274_v55 = vpack.c.bf16 %v2026_v45, %v2010_v21  ;;  %v1931_v29 = vld [vmem:[#allocation7 + $0x2ea8] sm:$0xff]  ;;  %v1914_v36 = vld [vmem:[#allocation7 + $0x2e20] sm:$0xff] }
 0x24d   :  { %4011 = vmatpush1.bf16.msra.mxu0 %v3066_v2  ;;  %v3259_v2 = vpack.c.bf16 %v1995_v51, %v1979_v50  ;;  %v2427_v30 = vld [vmem:[#allocation7 + $0x3e28] sm:$0xff]  ;;  %v1930_v37 = vld [vmem:[#allocation7 + $0x2ea0] sm:$0xff] }
 0x24e   :  { %4052 = vmatpush1.bf16.msra.mxu1 %v3322_v3  ;;  %4012 = vmatprep.subr.bf16.mxu0 %v3051_v4  ;;  %v1994_v3 = vld [vmem:[#allocation7 + $0x30a0] sm:$0xff]  ;;  %v1947_v4 = vld [vmem:[#allocation7 + $0x2f28] sm:$0xff] }
 0x24f   :  { %4053 = vmatprep.subr.bf16.mxu1 %v3307_v10  ;;  %v3002_v10 = vpack.c.bf16 %v1482_v1, %v1466_v0  ;;  %v3258_v11 = vpack.c.bf16 %v1994_v3, %v1978_v14  ;;  %v3243_v13 = vpack.c.bf16 %v1963_v5, %v1947_v4  ;;  %v2443_v31 = vld [vmem:[#allocation7 + $0x3ea8] sm:$0xff]  ;;  %v2426_v38 = vld [vmem:[#allocation7 + $0x3e20] sm:$0xff] }
 0x250   :  { %v1899_v42 = vld [vmem:[#allocation7 + $0x2da8] sm:$0xff]  ;;  %v1882_v48 = vld [vmem:[#allocation7 + $0x2d20] sm:$0xff] }
 0x251   :  { %4013 = vmatpush1.bf16.msra.mxu0 %v3050_v25  ;;  %v3499_v25 = vpack.c.bf16 %v2475_v7, %v2459_v6  ;;  %v2395_v43 = vld [vmem:[#allocation7 + $0x3d28] sm:$0xff]  ;;  %v1898_v50 = vld [vmem:[#allocation7 + $0x2da0] sm:$0xff] }
 0x252   :  { %4054 = vmatpush1.bf16.msra.mxu1 %v3306_v26  ;;  %4014 = vmatprep.subr.bf16.mxu0 %v3035_v27  ;;  %v2474_v26 = vld [vmem:[#allocation7 + $0x3fa0] sm:$0xff]  ;;  %v1915_v27 = vld [vmem:[#allocation7 + $0x2e28] sm:$0xff] }
 0x253   :  { %4055 = vmatprep.subr.bf16.mxu1 %v3291_v32  ;;  %v3242_v32 = vpack.c.bf16 %v1962_v16, %v1946_v15  ;;  %v3498_v33 = vpack.c.bf16 %v2474_v26, %v2458_v18  ;;  %v3227_v35 = vpack.c.bf16 %v1931_v29, %v1915_v27  ;;  %v2411_v21 = vld [vmem:[#allocation7 + $0x3da8] sm:$0xff]  ;;  %v2394_v51 = vld [vmem:[#allocation7 + $0x3d20] sm:$0xff] }
 0x254   :  { %v1867_v0 = vld [vmem:[#allocation7 + $0x2ca8] sm:$0xff]  ;;  %v1850_v5 = vld [vmem:[#allocation7 + $0x2c20] sm:$0xff] }
 0x255   :  { %4015 = vmatpush1.bf16.msra.mxu0 %v3034_v39  ;;  %v3483_v39 = vpack.c.bf16 %v2443_v31, %v2427_v30  ;;  %v2363_v1 = vld [vmem:[#allocation7 + $0x3c28] sm:$0xff]  ;;  %v1866_v6 = vld [vmem:[#allocation7 + $0x2ca0] sm:$0xff] }
 0x256   :  { %4056 = vmatpush1.bf16.msra.mxu1 %v3290_v40  ;;  %4016 = vmatprep.subr.bf16.mxu0 %v3019_v41  ;;  %v2442_v40 = vld [vmem:[#allocation7 + $0x3ea0] sm:$0xff]  ;;  %v1883_v41 = vld [vmem:[#allocation7 + $0x2d28] sm:$0xff] }
 0x257   :  { %4057 = vmatprep.subr.bf16.mxu1 %v3275_v44  ;;  %v3226_v44 = vpack.c.bf16 %v1930_v37, %v1914_v36  ;;  %v3482_v45 = vpack.c.bf16 %v2442_v40, %v2426_v38  ;;  %v3211_v46 = vpack.c.bf16 %v1899_v42, %v1883_v41  ;;  %v2379_v14 = vld [vmem:[#allocation7 + $0x3ca8] sm:$0xff]  ;;  %v2362_v7 = vld [vmem:[#allocation7 + $0x3c20] sm:$0xff] }
 0x258   :  { %v1835_v15 = vld [vmem:[#allocation7 + $0x2ba8] sm:$0xff]  ;;  %v1818_v29 = vld [vmem:[#allocation7 + $0x2b20] sm:$0xff] }
 0x259   :  { %4017 = vmatpush1.bf16.msra.mxu0 %v3018_v54  ;;  %v3467_v54 = vpack.c.bf16 %v2411_v21, %v2395_v43  ;;  %v2331_v16 = vld [vmem:[#allocation7 + $0x3b28] sm:$0xff]  ;;  %v1834_v30 = vld [vmem:[#allocation7 + $0x2ba0] sm:$0xff] }
 0x25a   :  { %4058 = vmatpush1.bf16.msra.mxu1 %v3274_v55  ;;  %4018 = vmatprep.subr.bf16.mxu0 %v3003_v59  ;;  %v2410_v55 = vld [vmem:[#allocation7 + $0x3da0] sm:$0xff]  ;;  %v1851_v59 = vld [vmem:[#allocation7 + $0x2c28] sm:$0xff] }
 0x25b   :  { %4059 = vmatprep.subr.bf16.mxu1 %v3259_v2  ;;  %v3210_v2 = vpack.c.bf16 %v1898_v50, %v1882_v48  ;;  %v3466_v3 = vpack.c.bf16 %v2410_v55, %v2394_v51  ;;  %v3195_v4 = vpack.c.bf16 %v1867_v0, %v1851_v59  ;;  %v2347_v18 = vld [vmem:[#allocation7 + $0x3ba8] sm:$0xff]  ;;  %v2330_v31 = vld [vmem:[#allocation7 + $0x3b20] sm:$0xff] }
 0x25c   :  { %v1803_v36 = vld [vmem:[#allocation7 + $0x2aa8] sm:$0xff]  ;;  %v1786_v42 = vld [vmem:[#allocation7 + $0x2a20] sm:$0xff] }
 0x25d   :  { %4019 = vmatpush1.bf16.msra.mxu0 %v3002_v10  ;;  %v3451_v10 = vpack.c.bf16 %v2379_v14, %v2363_v1  ;;  %v2299_v37 = vld [vmem:[#allocation7 + $0x3a28] sm:$0xff]  ;;  %v1802_v43 = vld [vmem:[#allocation7 + $0x2aa0] sm:$0xff] }
 0x25e   :  { %4060 = vmatpush1.bf16.msra.mxu1 %v3258_v11  ;;  %4020 = vmatprep.subr.bf16.mxu0 %v3243_v13  ;;  %v2378_v11 = vld [vmem:[#allocation7 + $0x3ca0] sm:$0xff]  ;;  %v1819_v13 = vld [vmem:[#allocation7 + $0x2b28] sm:$0xff] }
 0x25f   :  { %4061 = vmatprep.subr.bf16.mxu1 %v3499_v25  ;;  %v3194_v25 = vpack.c.bf16 %v1866_v6, %v1850_v5  ;;  %v3450_v26 = vpack.c.bf16 %v2378_v11, %v2362_v7  ;;  %v3179_v27 = vpack.c.bf16 %v1835_v15, %v1819_v13  ;;  %v2315_v38 = vld [vmem:[#allocation7 + $0x3aa8] sm:$0xff]  ;;  %v2298_v21 = vld [vmem:[#allocation7 + $0x3a20] sm:$0xff] }
 0x260   :  { %v1771_v48 = vld [vmem:[#allocation7 + $0x29a8] sm:$0xff]  ;;  %v1754_v0 = vld [vmem:[#allocation7 + $0x2920] sm:$0xff] }
 0x261   :  { %4021 = vmatpush2.bf16.msra.mxu0 %v3242_v32  ;;  %v3435_v32 = vpack.c.bf16 %v2347_v18, %v2331_v16  ;;  %v2267_v50 = vld [vmem:[#allocation7 + $0x3928] sm:$0xff]  ;;  %v1770_v1 = vld [vmem:[#allocation7 + $0x29a0] sm:$0xff] }
 0x262   :  { %4062 = vmatpush2.bf16.msra.mxu1 %v3498_v33  ;;  %4022 = vmatprep.subr.bf16.mxu0 %v3227_v35  ;;  %v2346_v33 = vld [vmem:[#allocation7 + $0x3ba0] sm:$0xff]  ;;  %v1787_v35 = vld [vmem:[#allocation7 + $0x2a28] sm:$0xff] }
 0x263   :  { %4063 = vmatprep.subr.bf16.mxu1 %v3483_v39  ;;  %v3178_v39 = vpack.c.bf16 %v1834_v30, %v1818_v29  ;;  %v3434_v40 = vpack.c.bf16 %v2346_v33, %v2330_v31  ;;  %v3163_v41 = vpack.c.bf16 %v1803_v36, %v1787_v35  ;;  %v2283_v51 = vld [vmem:[#allocation7 + $0x39a8] sm:$0xff]  ;;  %v2266_v14 = vld [vmem:[#allocation7 + $0x3920] sm:$0xff]  ;;  %v685_v29 = vld [vmem:[#allocation7 + $0x7b8] sm:$0xff] }
 0x264   :  { %v1739_v5 = vld [vmem:[#allocation7 + $0x28a8] sm:$0xff]  ;;  %v1722_v15 = vld [vmem:[#allocation7 + $0x2820] sm:$0xff]  ;;  %v1181_v30 = vld [vmem:[#allocation7 + $0x1738] sm:$0xff] }
 0x265   :  { %4023 = vmatpush2.bf16.msra.mxu0 %v3226_v44  ;;  %v3419_v44 = vpack.c.bf16 %v2315_v38, %v2299_v37  ;;  %v2235_v6 = vld [vmem:[#allocation7 + $0x3828] sm:$0xff]  ;;  %v1738_v16 = vld [vmem:[#allocation7 + $0x28a0] sm:$0xff]  ;;  %v1197_v31 = vld [vmem:[#allocation7 + $0x17b8] sm:$0xff] }
 0x266   :  { %4064 = vmatpush2.bf16.msra.mxu1 %v3482_v45  ;;  %4024 = vmatprep.subr.bf16.mxu0 %v3211_v46  ;;  %v2314_v45 = vld [vmem:[#allocation7 + $0x3aa0] sm:$0xff]  ;;  %v1755_v46 = vld [vmem:[#allocation7 + $0x2928] sm:$0xff]  ;;  %v668_v36 = vld [vmem:[#allocation7 + $0x730] sm:$0xff]  ;;  %v2861_v38 = vpack.c.bf16 %v1197_v31, %v1181_v30 }
 0x267   :  { %4065 = vmatprep.subr.bf16.mxu1 %v3467_v54  ;;  %v3162_v54 = vpack.c.bf16 %v1802_v43, %v1786_v42  ;;  %v3418_v55 = vpack.c.bf16 %v2314_v45, %v2298_v21  ;;  %v3147_v59 = vpack.c.bf16 %v1771_v48, %v1755_v46  ;;  %v2251_v7 = vld [vmem:[#allocation7 + $0x38a8] sm:$0xff]  ;;  %v2234_v18 = vld [vmem:[#allocation7 + $0x3820] sm:$0xff]  ;;  %v684_v37 = vld [vmem:[#allocation7 + $0x7b0] sm:$0xff] }
 0x268   :  { %v653_v42 = vld [vmem:[#allocation7 + $0x6b8] sm:$0xff]  ;;  %v9352_v43 = vld [vmem:[#allocation9] sm:$0xff] }
 0x269   :  { %4025 = vmatpush2.bf16.msra.mxu0 %v3210_v2  ;;  %v3403_v2 = vpack.c.bf16 %v2283_v51, %v2267_v50  ;;  %v3525_v21 = vrot.slane %v9352_v43, %v9258_v22  ;;  %v1149_v45 = vld [vmem:[#allocation7 + $0x1638] sm:$0xff]  ;;  %v636_v50 = vld [vmem:[#allocation7 + $0x630] sm:$0xff] }
 0x26a   :  { %4066 = vmatpush2.bf16.msra.mxu1 %v3466_v3  ;;  %4026 = vmatprep.subr.bf16.mxu0 %v3195_v4  ;;  %v2282_v3 = vld [vmem:[#allocation7 + $0x39a0] sm:$0xff]  ;;  %v1723_v4 = vld [vmem:[#allocation7 + $0x2828] sm:$0xff]  ;;  %v1165_v46 = vld [vmem:[#allocation7 + $0x16b8] sm:$0xff] }
 0x26b   :  { %4067 = vmatprep.subr.bf16.mxu1 %v3451_v10  ;;  %v3146_v10 = vpack.c.bf16 %v1770_v1, %v1754_v0  ;;  %v3402_v11 = vpack.c.bf16 %v2282_v3, %v2266_v14  ;;  %v3131_v13 = vpack.c.bf16 %v1739_v5, %v1723_v4  ;;  %v652_v51 = vld [vmem:[#allocation7 + $0x6b0] sm:$0xff]  ;;  %v605_v0 = vld [vmem:[#allocation7 + $0x538] sm:$0xff] }
 0x26c   :  { %v621_v1 = vld [vmem:[#allocation7 + $0x5b8] sm:$0xff] }
 0x26d   :  { %4027 = vmatpush2.bf16.msra.mxu0 %v3194_v25  ;;  %v3387_v25 = vpack.c.bf16 %v2251_v7, %v2235_v6  ;;  %v1117_v3 = vld [vmem:[#allocation7 + $0x1538] sm:$0xff]  ;;  %v2588_v7 = vpack.c.bf16 %v652_v51, %v636_v50 }
 0x26e   :  { %4068 = vmatpush2.bf16.msra.mxu1 %v3450_v26  ;;  %4028 = vmatprep.subr.bf16.mxu0 %v3179_v27  ;;  %v2250_v26 = vld [vmem:[#allocation7 + $0x38a0] sm:$0xff]  ;;  %v669_v27 = vld [vmem:[#allocation7 + $0x738] sm:$0xff] }
 0x26f   :  { %4069 = vmatprep.subr.bf16.mxu1 %v3435_v32  ;;  %v3130_v32 = vpack.c.bf16 %v1738_v16, %v1722_v15  ;;  %v3386_v33 = vpack.c.bf16 %v2250_v26, %v2234_v18  ;;  %v2605_v35 = vpack.c.bf16 %v685_v29, %v669_v27  ;;  %v1133_v4 = vld [vmem:[#allocation7 + $0x15b8] sm:$0xff]  ;;  %v604_v15 = vld [vmem:[#allocation7 + $0x530] sm:$0xff] }
 0x270   :  { %v620_v16 = vld [vmem:[#allocation7 + $0x5b0] sm:$0xff]  ;;  %v2829_v27 = vpack.c.bf16 %v1133_v4, %v1117_v3  ;;  %v573_v30 = vld [vmem:[#allocation7 + $0x438] sm:$0xff] }
 0x271   :  { %4029 = vmatpush2.bf16.msra.mxu0 %v3178_v39  ;;  %v1180_v39 = vld [vmem:[#allocation7 + $0x1730] sm:$0xff]  ;;  %v589_v31 = vld [vmem:[#allocation7 + $0x4b8] sm:$0xff] }
 0x272   :  { %4070 = vmatpush2.bf16.msra.mxu1 %v3434_v40  ;;  %4030 = vmatprep.subr.bf16.mxu0 %v3163_v41  ;;  %v1196_v40 = vld [vmem:[#allocation7 + $0x17b0] sm:$0xff]  ;;  %v637_v41 = vld [vmem:[#allocation7 + $0x638] sm:$0xff] }
 0x273   :  { %4071 = vmatprep.subr.bf16.mxu1 %v3419_v44  ;;  %v2604_v44 = vpack.c.bf16 %v684_v37, %v668_v36  ;;  %v2860_v48 = vpack.c.bf16 %v1196_v40, %v1180_v39  ;;  %v1116_v18 = vld [vmem:[#allocation7 + $0x1530] sm:$0xff]  ;;  %v2572_v37 = vpack.c.bf16 %v620_v16, %v604_v15  ;;  %v2557_v40 = vpack.c.bf16 %v589_v31, %v573_v30  ;;  %v557_v50 = vld [vmem:[#allocation7 + $0x3b8] sm:$0xff] }
 0x274   :  { %v1132_v29 = vld [vmem:[#allocation7 + $0x15b0] sm:$0xff]  ;;  %v1053_v51 = vld [vmem:[#allocation7 + $0x1338] sm:$0xff] }
 0x275   :  { %4031 = vmatpush2.bf16.msra.mxu0 %v3162_v54  ;;  %v1148_v54 = vld [vmem:[#allocation7 + $0x1630] sm:$0xff]  ;;  %v2828_v39 = vpack.c.bf16 %v1132_v29, %v1116_v18 }
 0x276   :  { %4072 = vmatpush2.bf16.msra.mxu1 %v3418_v55  ;;  %4032 = vmatprep.subr.bf16.mxu0 %v3147_v59  ;;  %v2589_v55 = vpack.c.bf16 %v653_v42, %v637_v41  ;;  %v1164_v59 = vld [vmem:[#allocation7 + $0x16b0] sm:$0xff] }
 0x277   :  { %4073 = vmatprep.subr.bf16.mxu1 %v3403_v2  ;;  %v2845_v2 = vpack.c.bf16 %v1165_v46, %v1149_v45  ;;  %v572_v41 = vld [vmem:[#allocation7 + $0x430] sm:$0xff] }
 0x278   :  { %v588_v42 = vld [vmem:[#allocation7 + $0x4b0] sm:$0xff] }
 0x279   :  { %4033 = vmatpush2.bf16.msra.mxu0 %v3146_v10  ;;  %v1100_v46 = vld [vmem:[#allocation7 + $0x14b0] sm:$0xff] }
 0x27a   :  { %4074 = vmatpush2.bf16.msra.mxu1 %v3402_v11  ;;  %4034 = vmatprep.subr.bf16.mxu0 %v3131_v13  ;;  %v2844_v11 = vpack.c.bf16 %v1164_v59, %v1148_v54  ;;  %v2573_v13 = vpack.c.bf16 %v621_v1, %v605_v0  ;;  %v1069_v54 = vld [vmem:[#allocation7 + $0x13b8] sm:$0xff]  ;;  %v540_v1 = vld [vmem:[#allocation7 + $0x330] sm:$0xff] }
 0x27b   :  { %4075 = vmatprep.subr.bf16.mxu1 %v3387_v25  ;;  %v2797_v3 = vpack.c.bf16 %v1069_v54, %v1053_v51  ;;  %v1068_v4 = vld [vmem:[#allocation7 + $0x13b0] sm:$0xff] }
 0x27c   :  { %v508_v18 = vld [vmem:[#allocation7 + $0x230] sm:$0xff] }
 0x27d   :  { %4035 = vmatpush2.bf16.msra.mxu0 %v3130_v32  ;;  %v1020_v29 = vld [vmem:[#allocation7 + $0x1230] sm:$0xff] }
 0x27e   :  { %4076 = vmatpush2.bf16.msra.mxu1 %v3386_v33  ;;  %4086 = vmatprep.subr.bf16.mxu0 %v2605_v35  ;;  %v1085_v33 = vld [vmem:[#allocation7 + $0x1438] sm:$0xff]  ;;  %v1036_v31 = vld [vmem:[#allocation7 + $0x12b0] sm:$0xff] }
 0x27f   :  { %4127 = vmatprep.subr.bf16.mxu1 %v2861_v38  ;;  %v1101_v35 = vld [vmem:[#allocation7 + $0x14b8] sm:$0xff] }
 0x280   :  { %v3792_v14 = vpop.f32.mrf.mxu0  ;;  %4037 = vmatmul.mubr.bf16.vlgmr.msra.gmra.mxu0 %v9320_v17  ;;  %v2813_v45 = vpack.c.bf16 %v1101_v35, %v1085_v33  ;;  %v493_v33 = vld [vmem:[#allocation7 + $0x1b8] sm:$0xff] }
 0x281   :  { %v3793_v5 = vadd.f32 %v3792_v14, %v3525_v21  ;;  %v3833_v6 = vpop.f32.mrf.mxu1  ;;  %4078 = vmatmul.mubr.bf16.vlgmr.msra.gmra.mxu1 %v9318_v12  ;;  %4087 = vmatpush1.bf16.msra.mxu0 %v2604_v44  ;;  %v1084_v21 = vld [vmem:[#allocation7 + $0x1430] sm:$0xff]  ;;  %v989_v35 = vld [vmem:[#allocation7 + $0x1138] sm:$0xff] }
 0x282   :  { %4118 = vmatprep.mubr.bf16.mxu0 %v9276_v53  ;;  %4128 = vmatpush1.bf16.msra.mxu1 %v2860_v48  ;;  %v9359_v10 = vpop.f32.mrf.mxu0  ;;  %v541_v48 = vld [vmem:[#allocation7 + $0x338] sm:$0xff]  ;;  %v2812_v59 = vpack.c.bf16 %v1100_v46, %v1084_v21  ;;  %v556_v14 = vld [vmem:[#allocation7 + $0x3b0] sm:$0xff] }
 0x283   :  { %v9361_v25 = vadd.f32 %v3833_v6, %v3793_v5  ;;  %4159 = vmatprep.mubr.bf16.mxu1 %v9283_v58  ;;  %v9364_v26 = vpop.f32.mrf.mxu1  ;;  %4088 = vmatprep.subr.bf16.mxu0 %v2589_v55  ;;  %v2556_v55 = vpack.c.bf16 %v588_v42, %v572_v41  ;;  %v2541_v0 = vpack.c.bf16 %v557_v50, %v541_v48  ;;  %v509_v5 = vld [vmem:[#allocation7 + $0x238] sm:$0xff]  ;;  %v492_v41 = vld [vmem:[#allocation7 + $0x1b0] sm:$0xff] }
 0x284   :  { %v3796_v32 = vpop.f32.mrf.mxu0  ;;  %4129 = vmatprep.subr.bf16.mxu1 %v2845_v2  ;;  %v1052_v2 = vld [vmem:[#allocation7 + $0x1330] sm:$0xff]  ;;  %v525_v6 = vld [vmem:[#allocation7 + $0x2b8] sm:$0xff] }
 0x285   :  { %v3837_v36 = vpop.f32.mrf.mxu1  ;;  %4089 = vmatpush1.bf16.msra.mxu0 %v2588_v7  ;;  %v1021_v7 = vld [vmem:[#allocation7 + $0x1238] sm:$0xff]  ;;  %v2796_v15 = vpack.c.bf16 %v1068_v4, %v1052_v2  ;;  %v2525_v16 = vpack.c.bf16 %v525_v6, %v509_v5  ;;  %v988_v42 = vld [vmem:[#allocation7 + $0x1130] sm:$0xff] }
 0x286   :  { %4130 = vmatpush1.bf16.msra.mxu1 %v2844_v11  ;;  %v3797_v38 = vpop.f32.mrf.mxu0  ;;  %4090 = vmatprep.subr.bf16.mxu0 %v2573_v13  ;;  %v1037_v11 = vld [vmem:[#allocation7 + $0x12b8] sm:$0xff]  ;;  %v2540_v13 = vpack.c.bf16 %v556_v14, %v540_v1  ;;  %v956_v1 = vld [vmem:[#allocation7 + $0x1030] sm:$0xff] }
 0x287   :  { %v3838_v44 = vpop.f32.mrf.mxu1  ;;  %4131 = vmatprep.subr.bf16.mxu1 %v2829_v27  ;;  %v524_v27 = vld [vmem:[#allocation7 + $0x2b0] sm:$0xff]  ;;  %v2781_v30 = vpack.c.bf16 %v1037_v11, %v1021_v7  ;;  %v477_v32 = vld [vmem:[#allocation7 + $0x138] sm:$0xff]  ;;  %v2780_v38 = vpack.c.bf16 %v1036_v31, %v1020_v29 }
 0x288   :  { %v1005_v36 = vld [vmem:[#allocation7 + $0x11b8] sm:$0xff]  ;;  %v1004_v44 = vld [vmem:[#allocation7 + $0x11b0] sm:$0xff] }
 0x289   :  { %4091 = vmatpush1.bf16.msra.mxu0 %v2572_v37  ;;  %v2524_v37 = vpack.c.bf16 %v524_v27, %v508_v18  ;;  %v2765_v21 = vpack.c.bf16 %v1005_v36, %v989_v35  ;;  %v461_v46 = vld [vmem:[#allocation7 + $0xb8] sm:$0xff]  ;;  %v2764_v54 = vpack.c.bf16 %v1004_v44, %v988_v42  ;;  %v972_v2 = vld [vmem:[#allocation7 + $0x10b0] sm:$0xff] }
 0x28a   :  { %4132 = vmatpush1.bf16.msra.mxu1 %v2828_v39  ;;  %4092 = vmatprep.subr.bf16.mxu0 %v2557_v40  ;;  %v2509_v39 = vpack.c.bf16 %v493_v33, %v477_v32  ;;  %v476_v40 = vld [vmem:[#allocation7 + $0x130] sm:$0xff]  ;;  %v957_v48 = vld [vmem:[#allocation7 + $0x1038] sm:$0xff]  ;;  %v2748_v11 = vpack.c.bf16 %v972_v2, %v956_v1 }
 0x28b   :  { %4133 = vmatprep.subr.bf16.mxu1 %v2813_v45  ;;  %v445_v45 = vld [vmem:[#allocation7 + $0x38] sm:$0xff]  ;;  %v2508_v51 = vpack.c.bf16 %v492_v41, %v476_v40  ;;  %v1436_v18 = vld [vmem:[#allocation7 + $0x1f30] sm:$0xff] }
 0x28c   :  { %v973_v50 = vld [vmem:[#allocation7 + $0x10b8] sm:$0xff]  ;;  %v1452_v29 = vld [vmem:[#allocation7 + $0x1fb0] sm:$0xff] }
 0x28d   :  { %4093 = vmatpush1.bf16.msra.mxu0 %v2556_v55  ;;  %v2493_v55 = vpack.c.bf16 %v461_v46, %v445_v45  ;;  %v2749_v14 = vpack.c.bf16 %v973_v50, %v957_v48  ;;  %v941_v4 = vld [vmem:[#allocation7 + $0xfb8] sm:$0xff]  ;;  %v2988_v36 = vpack.c.bf16 %v1452_v29, %v1436_v18  ;;  %v1404_v40 = vld [vmem:[#allocation7 + $0x1e30] sm:$0xff] }
 0x28e   :  { %4134 = vmatpush1.bf16.msra.mxu1 %v2812_v59  ;;  %4094 = vmatprep.subr.bf16.mxu0 %v2541_v0  ;;  %v444_v59 = vld [vmem:[#allocation7 + $0x30] sm:$0xff]  ;;  %v1437_v5 = vld [vmem:[#allocation7 + $0x1f38] sm:$0xff] }
 0x28f   :  { %4135 = vmatprep.subr.bf16.mxu1 %v2797_v3  ;;  %v460_v0 = vld [vmem:[#allocation7 + $0xb0] sm:$0xff]  ;;  %v925_v3 = vld [vmem:[#allocation7 + $0xf38] sm:$0xff] }
 0x290   :  { %v1453_v6 = vld [vmem:[#allocation7 + $0x1fb8] sm:$0xff]  ;;  %v2492_v7 = vpack.c.bf16 %v460_v0, %v444_v59  ;;  %v1420_v42 = vld [vmem:[#allocation7 + $0x1eb0] sm:$0xff] }
 0x291   :  { %4095 = vmatpush1.bf16.msra.mxu0 %v2540_v13  ;;  %v2733_v13 = vpack.c.bf16 %v941_v4, %v925_v3  ;;  %v2989_v27 = vpack.c.bf16 %v1453_v6, %v1437_v5  ;;  %v909_v31 = vld [vmem:[#allocation7 + $0xeb8] sm:$0xff]  ;;  %v2972_v50 = vpack.c.bf16 %v1420_v42, %v1404_v40  ;;  %v1372_v59 = vld [vmem:[#allocation7 + $0x1d30] sm:$0xff] }
 0x292   :  { %4136 = vmatpush1.bf16.msra.mxu1 %v2796_v15  ;;  %4096 = vmatprep.subr.bf16.mxu0 %v2525_v16  ;;  %v924_v15 = vld [vmem:[#allocation7 + $0xf30] sm:$0xff]  ;;  %v1405_v32 = vld [vmem:[#allocation7 + $0x1e38] sm:$0xff] }
 0x293   :  { %4137 = vmatprep.subr.bf16.mxu1 %v2781_v30  ;;  %v940_v16 = vld [vmem:[#allocation7 + $0xfb0] sm:$0xff]  ;;  %v893_v30 = vld [vmem:[#allocation7 + $0xe38] sm:$0xff] }
 0x294   :  { %v1421_v33 = vld [vmem:[#allocation7 + $0x1eb8] sm:$0xff]  ;;  %v2732_v35 = vpack.c.bf16 %v940_v16, %v924_v15  ;;  %v1388_v1 = vld [vmem:[#allocation7 + $0x1db0] sm:$0xff] }
 0x295   :  { %4097 = vmatpush1.bf16.msra.mxu0 %v2524_v37  ;;  %v2717_v37 = vpack.c.bf16 %v909_v31, %v893_v30  ;;  %v2973_v41 = vpack.c.bf16 %v1421_v33, %v1405_v32  ;;  %v877_v44 = vld [vmem:[#allocation7 + $0xdb8] sm:$0xff]  ;;  %v2956_v6 = vpack.c.bf16 %v1388_v1, %v1372_v59  ;;  %v1340_v15 = vld [vmem:[#allocation7 + $0x1c30] sm:$0xff] }
 0x296   :  { %4138 = vmatpush1.bf16.msra.mxu1 %v2780_v38  ;;  %4098 = vmatprep.subr.bf16.mxu0 %v2509_v39  ;;  %v892_v38 = vld [vmem:[#allocation7 + $0xe30] sm:$0xff]  ;;  %v1373_v45 = vld [vmem:[#allocation7 + $0x1d38] sm:$0xff] }
 0x297   :  { %4139 = vmatprep.subr.bf16.mxu1 %v2765_v21  ;;  %v908_v39 = vld [vmem:[#allocation7 + $0xeb0] sm:$0xff]  ;;  %v861_v21 = vld [vmem:[#allocation7 + $0xd38] sm:$0xff] }
 0x298   :  { %v1389_v46 = vld [vmem:[#allocation7 + $0x1db8] sm:$0xff]  ;;  %v2716_v48 = vpack.c.bf16 %v908_v39, %v892_v38  ;;  %v1356_v18 = vld [vmem:[#allocation7 + $0x1cb0] sm:$0xff] }
 0x299   :  { %4099 = vmatpush1.bf16.msra.mxu0 %v2508_v51  ;;  %v2701_v51 = vpack.c.bf16 %v877_v44, %v861_v21  ;;  %v2957_v0 = vpack.c.bf16 %v1389_v46, %v1373_v45  ;;  %v845_v2 = vld [vmem:[#allocation7 + $0xcb8] sm:$0xff]  ;;  %v2940_v33 = vpack.c.bf16 %v1356_v18, %v1340_v15  ;;  %v1308_v38 = vld [vmem:[#allocation7 + $0x1b30] sm:$0xff] }
 0x29a   :  { %4140 = vmatpush1.bf16.msra.mxu1 %v2764_v54  ;;  %4100 = vmatprep.subr.bf16.mxu0 %v2493_v55  ;;  %v860_v54 = vld [vmem:[#allocation7 + $0xd30] sm:$0xff]  ;;  %v1341_v3 = vld [vmem:[#allocation7 + $0x1c38] sm:$0xff] }
 0x29b   :  { %4141 = vmatprep.subr.bf16.mxu1 %v2749_v14  ;;  %v876_v55 = vld [vmem:[#allocation7 + $0xdb0] sm:$0xff]  ;;  %v829_v14 = vld [vmem:[#allocation7 + $0xc38] sm:$0xff] }
 0x29c   :  { %v1357_v4 = vld [vmem:[#allocation7 + $0x1cb8] sm:$0xff]  ;;  %v2700_v5 = vpack.c.bf16 %v876_v55, %v860_v54  ;;  %v1324_v40 = vld [vmem:[#allocation7 + $0x1bb0] sm:$0xff] }
 0x29d   :  { %4101 = vmatpush1.bf16.msra.mxu0 %v2492_v7  ;;  %v2685_v7 = vpack.c.bf16 %v845_v2, %v829_v14  ;;  %v2941_v16 = vpack.c.bf16 %v1357_v4, %v1341_v3  ;;  %v813_v29 = vld [vmem:[#allocation7 + $0xbb8] sm:$0xff]  ;;  %v2924_v46 = vpack.c.bf16 %v1324_v40, %v1308_v38  ;;  %v1276_v54 = vld [vmem:[#allocation7 + $0x1a30] sm:$0xff] }
 0x29e   :  { %4142 = vmatpush1.bf16.msra.mxu1 %v2748_v11  ;;  %4102 = vmatprep.subr.bf16.mxu0 %v2733_v13  ;;  %v828_v11 = vld [vmem:[#allocation7 + $0xc30] sm:$0xff]  ;;  %v1309_v30 = vld [vmem:[#allocation7 + $0x1b38] sm:$0xff] }
 0x29f   :  { %4143 = vmatprep.subr.bf16.mxu1 %v2989_v27  ;;  %v844_v13 = vld [vmem:[#allocation7 + $0xcb0] sm:$0xff]  ;;  %v797_v27 = vld [vmem:[#allocation7 + $0xb38] sm:$0xff] }
 0x2a0   :  { %v1325_v31 = vld [vmem:[#allocation7 + $0x1bb8] sm:$0xff]  ;;  %v2684_v32 = vpack.c.bf16 %v844_v13, %v828_v11  ;;  %v1292_v59 = vld [vmem:[#allocation7 + $0x1ab0] sm:$0xff] }
 0x2a1   :  { %4103 = vmatpush2.bf16.msra.mxu0 %v2732_v35  ;;  %v2669_v35 = vpack.c.bf16 %v813_v29, %v797_v27  ;;  %v2925_v39 = vpack.c.bf16 %v1325_v31, %v1309_v30  ;;  %v781_v42 = vld [vmem:[#allocation7 + $0xab8] sm:$0xff]  ;;  %v2908_v4 = vpack.c.bf16 %v1292_v59, %v1276_v54  ;;  %v1244_v11 = vld [vmem:[#allocation7 + $0x1930] sm:$0xff] }
 0x2a2   :  { %4144 = vmatpush2.bf16.msra.mxu1 %v2988_v36  ;;  %4104 = vmatprep.subr.bf16.mxu0 %v2717_v37  ;;  %v796_v36 = vld [vmem:[#allocation7 + $0xb30] sm:$0xff]  ;;  %v1277_v21 = vld [vmem:[#allocation7 + $0x1a38] sm:$0xff] }
 0x2a3   :  { %4145 = vmatprep.subr.bf16.mxu1 %v2973_v41  ;;  %v812_v37 = vld [vmem:[#allocation7 + $0xbb0] sm:$0xff]  ;;  %v765_v41 = vld [vmem:[#allocation7 + $0xa38] sm:$0xff] }
 0x2a4   :  { %v1293_v44 = vld [vmem:[#allocation7 + $0x1ab8] sm:$0xff]  ;;  %v2668_v45 = vpack.c.bf16 %v812_v37, %v796_v36  ;;  %v1260_v15 = vld [vmem:[#allocation7 + $0x19b0] sm:$0xff] }
 0x2a5   :  { %4105 = vmatpush2.bf16.msra.mxu0 %v2716_v48  ;;  %v2653_v48 = vpack.c.bf16 %v781_v42, %v765_v41  ;;  %v2909_v55 = vpack.c.bf16 %v1293_v44, %v1277_v21  ;;  %v749_v1 = vld [vmem:[#allocation7 + $0x9b8] sm:$0xff]  ;;  %v2892_v31 = vpack.c.bf16 %v1260_v15, %v1244_v11  ;;  %v1212_v36 = vld [vmem:[#allocation7 + $0x1830] sm:$0xff]  ;;  %v3529_v21 = vrot.slane %v9352_v43, %v9264_v24 }
 0x2a6   :  { %4146 = vmatpush2.bf16.msra.mxu1 %v2972_v50  ;;  %4106 = vmatprep.subr.bf16.mxu0 %v2701_v51  ;;  %v764_v50 = vld [vmem:[#allocation7 + $0xa30] sm:$0xff]  ;;  %v1245_v14 = vld [vmem:[#allocation7 + $0x1938] sm:$0xff] }
 0x2a7   :  { %4147 = vmatprep.subr.bf16.mxu1 %v2957_v0  ;;  %v780_v51 = vld [vmem:[#allocation7 + $0xab0] sm:$0xff]  ;;  %v733_v0 = vld [vmem:[#allocation7 + $0x938] sm:$0xff] }
 0x2a8   :  { %v1261_v2 = vld [vmem:[#allocation7 + $0x19b8] sm:$0xff]  ;;  %v2652_v3 = vpack.c.bf16 %v780_v51, %v764_v50  ;;  %v1228_v38 = vld [vmem:[#allocation7 + $0x18b0] sm:$0xff] }
 0x2a9   :  { %4107 = vmatpush2.bf16.msra.mxu0 %v2700_v5  ;;  %v2637_v5 = vpack.c.bf16 %v749_v1, %v733_v0  ;;  %v2893_v13 = vpack.c.bf16 %v1261_v2, %v1245_v14  ;;  %v717_v18 = vld [vmem:[#allocation7 + $0x8b8] sm:$0xff]  ;;  %v1708_v50 = vld [vmem:[#allocation7 + $0x27b0] sm:$0xff]  ;;  %v3795_v1 = vadd.f32 %v9359_v10, %v3529_v21 }
 0x2aa   :  { %4148 = vmatpush2.bf16.msra.mxu1 %v2956_v6  ;;  %4108 = vmatprep.subr.bf16.mxu0 %v2685_v7  ;;  %v732_v6 = vld [vmem:[#allocation7 + $0x930] sm:$0xff]  ;;  %v1213_v27 = vld [vmem:[#allocation7 + $0x1838] sm:$0xff] }
 0x2ab   :  { %4149 = vmatprep.subr.bf16.mxu1 %v2941_v16  ;;  %v748_v7 = vld [vmem:[#allocation7 + $0x9b0] sm:$0xff]  ;;  %v701_v16 = vld [vmem:[#allocation7 + $0x838] sm:$0xff] }
 0x2ac   :  { %v1229_v29 = vld [vmem:[#allocation7 + $0x18b8] sm:$0xff]  ;;  %v2636_v30 = vpack.c.bf16 %v748_v7, %v732_v6  ;;  %v2204_v54 = vld [vmem:[#allocation7 + $0x3730] sm:$0xff] }
 0x2ad   :  { %4109 = vmatpush2.bf16.msra.mxu0 %v2684_v32  ;;  %v2621_v32 = vpack.c.bf16 %v717_v18, %v701_v16  ;;  %v2877_v37 = vpack.c.bf16 %v1229_v29, %v1213_v27  ;;  %v1709_v40 = vld [vmem:[#allocation7 + $0x27b8] sm:$0xff]  ;;  %v2172_v6 = vld [vmem:[#allocation7 + $0x3630] sm:$0xff]  ;;  %v3836_v29 = vadd.f32 %v9364_v26, %v3795_v1 }
 0x2ae   :  { %4150 = vmatpush2.bf16.msra.mxu1 %v2940_v33  ;;  %4110 = vmatprep.subr.bf16.mxu0 %v2669_v35  ;;  %v700_v33 = vld [vmem:[#allocation7 + $0x830] sm:$0xff]  ;;  %v2205_v41 = vld [vmem:[#allocation7 + $0x3738] sm:$0xff] }
 0x2af   :  { %4151 = vmatprep.subr.bf16.mxu1 %v2925_v39  ;;  %v716_v35 = vld [vmem:[#allocation7 + $0x8b0] sm:$0xff]  ;;  %v1693_v39 = vld [vmem:[#allocation7 + $0x2738] sm:$0xff] }
 0x2b0   :  { %v2221_v42 = vld [vmem:[#allocation7 + $0x37b8] sm:$0xff]  ;;  %v2620_v44 = vpack.c.bf16 %v716_v35, %v700_v33  ;;  %v2188_v11 = vld [vmem:[#allocation7 + $0x36b0] sm:$0xff] }
 0x2b1   :  { %4111 = vmatpush2.bf16.msra.mxu0 %v2668_v45  ;;  %v2876_v45 = vpack.c.bf16 %v1228_v38, %v1212_v36  ;;  %v3373_v51 = vpack.c.bf16 %v2221_v42, %v2205_v41  ;;  %v1661_v59 = vld [vmem:[#allocation7 + $0x2638] sm:$0xff]  ;;  %v3356_v35 = vpack.c.bf16 %v2188_v11, %v2172_v6  ;;  %v1644_v38 = vld [vmem:[#allocation7 + $0x25b0] sm:$0xff] }
 0x2b2   :  { %4152 = vmatpush2.bf16.msra.mxu1 %v2924_v46  ;;  %4112 = vmatprep.subr.bf16.mxu0 %v2653_v48  ;;  %v3117_v46 = vpack.c.bf16 %v1709_v40, %v1693_v39  ;;  %v1692_v48 = vld [vmem:[#allocation7 + $0x2730] sm:$0xff]  ;;  %v1677_v0 = vld [vmem:[#allocation7 + $0x26b8] sm:$0xff] }
 0x2b3   :  { %4153 = vmatprep.subr.bf16.mxu1 %v2909_v55  ;;  %v2220_v55 = vld [vmem:[#allocation7 + $0x37b0] sm:$0xff]  ;;  %v3116_v14 = vpack.c.bf16 %v1708_v50, %v1692_v48  ;;  %v2173_v2 = vld [vmem:[#allocation7 + $0x3638] sm:$0xff]  ;;  %v3101_v7 = vpack.c.bf16 %v1677_v0, %v1661_v59 }
 0x2b4   :  { %v2189_v43 = vld [vmem:[#allocation7 + $0x36b8] sm:$0xff]  ;;  %v2140_v39 = vld [vmem:[#allocation7 + $0x3530] sm:$0xff] }
 0x2b5   :  { %4113 = vmatpush2.bf16.msra.mxu0 %v2652_v3  ;;  %v3372_v3 = vpack.c.bf16 %v2220_v55, %v2204_v54  ;;  %v1645_v15 = vld [vmem:[#allocation7 + $0x25b8] sm:$0xff]  ;;  %v3357_v18 = vpack.c.bf16 %v2189_v43, %v2173_v2  ;;  %v2156_v42 = vld [vmem:[#allocation7 + $0x35b0] sm:$0xff] }
 0x2b6   :  { %4154 = vmatpush2.bf16.msra.mxu1 %v2908_v4  ;;  %4114 = vmatprep.subr.bf16.mxu0 %v2637_v5  ;;  %v1660_v4 = vld [vmem:[#allocation7 + $0x2630] sm:$0xff]  ;;  %v2141_v10 = vld [vmem:[#allocation7 + $0x3538] sm:$0xff]  ;;  %v3340_v59 = vpack.c.bf16 %v2156_v42, %v2140_v39 }
 0x2b7   :  { %4155 = vmatprep.subr.bf16.mxu1 %v2893_v13  ;;  %v1676_v5 = vld [vmem:[#allocation7 + $0x26b0] sm:$0xff]  ;;  %v1629_v13 = vld [vmem:[#allocation7 + $0x2538] sm:$0xff] }
 0x2b8   :  { %v2157_v27 = vld [vmem:[#allocation7 + $0x35b8] sm:$0xff]  ;;  %v3085_v36 = vpack.c.bf16 %v1645_v15, %v1629_v13  ;;  %v1596_v1 = vld [vmem:[#allocation7 + $0x2430] sm:$0xff] }
 0x2b9   :  { %4115 = vmatpush2.bf16.msra.mxu0 %v2636_v30  ;;  %v3341_v41 = vpack.c.bf16 %v2157_v27, %v2141_v10  ;;  %v1597_v21 = vld [vmem:[#allocation7 + $0x2438] sm:$0xff]  ;;  %v2108_v2 = vld [vmem:[#allocation7 + $0x3430] sm:$0xff] }
 0x2ba   :  { %4156 = vmatpush2.bf16.msra.mxu1 %v2892_v31  ;;  %4116 = vmatprep.subr.bf16.mxu0 %v2621_v32  ;;  %v3100_v32 = vpack.c.bf16 %v1676_v5, %v1660_v4  ;;  %v2125_v48 = vld [vmem:[#allocation7 + $0x34b8] sm:$0xff]  ;;  %v2124_v4 = vld [vmem:[#allocation7 + $0x34b0] sm:$0xff] }
 0x2bb   :  { %4157 = vmatprep.subr.bf16.mxu1 %v2877_v37  ;;  %v1628_v37 = vld [vmem:[#allocation7 + $0x2530] sm:$0xff]  ;;  %v1565_v5 = vld [vmem:[#allocation7 + $0x2338] sm:$0xff]  ;;  %v3324_v15 = vpack.c.bf16 %v2124_v4, %v2108_v2 }
 0x2bc   :  { %v3084_v54 = vpack.c.bf16 %v1644_v38, %v1628_v37  ;;  %v1581_v6 = vld [vmem:[#allocation7 + $0x23b8] sm:$0xff]  ;;  %v1580_v10 = vld [vmem:[#allocation7 + $0x23b0] sm:$0xff] }
 0x2bd   :  { %4117 = vmatpush2.bf16.msra.mxu0 %v2620_v44  ;;  %v1613_v44 = vld [vmem:[#allocation7 + $0x24b8] sm:$0xff]  ;;  %v2076_v27 = vld [vmem:[#allocation7 + $0x3330] sm:$0xff] }
 0x2be   :  { %4158 = vmatpush2.bf16.msra.mxu1 %v2876_v45  ;;  %4168 = vmatprep.subr.bf16.mxu0 %v3117_v46  ;;  %v2109_v46 = vld [vmem:[#allocation7 + $0x3438] sm:$0xff]  ;;  %v3069_v0 = vpack.c.bf16 %v1613_v44, %v1597_v21  ;;  %v1532_v39 = vld [vmem:[#allocation7 + $0x2230] sm:$0xff] }
 0x2bf   :  { %4209 = vmatprep.subr.bf16.mxu1 %v3373_v51  ;;  %v2093_v11 = vld [vmem:[#allocation7 + $0x33b8] sm:$0xff]  ;;  %v2060_v42 = vld [vmem:[#allocation7 + $0x32b0] sm:$0xff] }
 0x2c0   :  { %v3874_v16 = vpop.f32.mrf.mxu0  ;;  %4119 = vmatmul.mubr.bf16.vlgmr.msra.gmra.mxu0 %v9281_v57  ;;  %v1501_v21 = vld [vmem:[#allocation7 + $0x2138] sm:$0xff] }
 0x2c1   :  { %v3875_v30 = vadd.f32 %v3874_v16, %v9361_v25  ;;  %v3915_v31 = vpop.f32.mrf.mxu1  ;;  %4160 = vmatmul.mubr.bf16.vlgmr.msra.gmra.mxu1 %v9274_v52  ;;  %4169 = vmatpush1.bf16.msra.mxu0 %v3116_v14  ;;  %v1612_v14 = vld [vmem:[#allocation7 + $0x24b0] sm:$0xff]  ;;  %v3053_v16 = vpack.c.bf16 %v1581_v6, %v1565_v5  ;;  %v1517_v44 = vld [vmem:[#allocation7 + $0x21b8] sm:$0xff] }
 0x2c2   :  { %4200 = vmatprep.mubr.bf16.mxu0 %v9300_v47  ;;  %4210 = vmatpush1.bf16.msra.mxu1 %v3372_v3  ;;  %v3876_v33 = vpop.f32.mrf.mxu0  ;;  %v3325_v3 = vpack.c.bf16 %v2125_v48, %v2109_v46  ;;  %v3068_v13 = vpack.c.bf16 %v1612_v14, %v1596_v1  ;;  %v2029_v46 = vld [vmem:[#allocation7 + $0x31b8] sm:$0xff]  ;;  %v2028_v14 = vld [vmem:[#allocation7 + $0x31b0] sm:$0xff] }
 0x2c3   :  { %v9374_v40 = vadd.f32 %v3915_v31, %v3875_v30  ;;  %4241 = vmatprep.mubr.bf16.mxu1 %v9302_v62  ;;  %v3877_v26 = vadd.f32 %v3876_v33, %v3836_v29  ;;  %v3917_v25 = vpop.f32.mrf.mxu1  ;;  %4170 = vmatprep.subr.bf16.mxu0 %v3101_v7  ;;  %v2077_v7 = vld [vmem:[#allocation7 + $0x3338] sm:$0xff]  ;;  %v2092_v30 = vld [vmem:[#allocation7 + $0x33b0] sm:$0xff] }
 0x2c4   :  { %v3878_v45 = vpop.f32.mrf.mxu0  ;;  %4211 = vmatprep.subr.bf16.mxu1 %v3357_v18  ;;  %v1564_v18 = vld [vmem:[#allocation7 + $0x2330] sm:$0xff]  ;;  %v3309_v29 = vpack.c.bf16 %v2093_v11, %v2077_v7  ;;  %v1533_v31 = vld [vmem:[#allocation7 + $0x2238] sm:$0xff]  ;;  %v3308_v37 = vpack.c.bf16 %v2092_v30, %v2076_v27 }
 0x2c5   :  { %v9377_v50 = vadd.f32 %v3917_v25, %v3877_v26  ;;  %v3919_v51 = vpop.f32.mrf.mxu1  ;;  %4171 = vmatpush1.bf16.msra.mxu0 %v3100_v32  ;;  %v1549_v32 = vld [vmem:[#allocation7 + $0x22b8] sm:$0xff]  ;;  %v1548_v26 = vld [vmem:[#allocation7 + $0x22b0] sm:$0xff] }
 0x2c6   :  { %4212 = vmatpush1.bf16.msra.mxu1 %v3356_v35  ;;  %v3879_v55 = vpop.f32.mrf.mxu0  ;;  %4172 = vmatprep.subr.bf16.mxu0 %v3085_v36  ;;  %v2045_v33 = vld [vmem:[#allocation7 + $0x3238] sm:$0xff]  ;;  %v3052_v36 = vpack.c.bf16 %v1580_v10, %v1564_v18  ;;  %v3037_v38 = vpack.c.bf16 %v1549_v32, %v1533_v31  ;;  %v2044_v25 = vld [vmem:[#allocation7 + $0x3230] sm:$0xff]  ;;  %v3036_v48 = vpack.c.bf16 %v1548_v26, %v1532_v39 }
 0x2c7   :  { %v3920_v43 = vpop.f32.mrf.mxu1  ;;  %4213 = vmatprep.subr.bf16.mxu1 %v3341_v41  ;;  %v2061_v35 = vld [vmem:[#allocation7 + $0x32b8] sm:$0xff]  ;;  %v3292_v51 = vpack.c.bf16 %v2060_v42, %v2044_v25  ;;  %v1500_v55 = vld [vmem:[#allocation7 + $0x2130] sm:$0xff] }
 0x2c8   :  { %v3293_v41 = vpack.c.bf16 %v2061_v35, %v2045_v33  ;;  %v2013_v45 = vld [vmem:[#allocation7 + $0x3138] sm:$0xff]  ;;  %v1468_v11 = vld [vmem:[#allocation7 + $0x2030] sm:$0xff] }
 0x2c9   :  { %4173 = vmatpush1.bf16.msra.mxu0 %v3084_v54  ;;  %v3021_v54 = vpack.c.bf16 %v1517_v44, %v1501_v21  ;;  %v3277_v1 = vpack.c.bf16 %v2029_v46, %v2013_v45  ;;  %v1469_v2 = vld [vmem:[#allocation7 + $0x2038] sm:$0xff]  ;;  %v1996_v18 = vld [vmem:[#allocation7 + $0x30b0] sm:$0xff] }
 0x2ca   :  { %4214 = vmatpush1.bf16.msra.mxu1 %v3340_v59  ;;  %4174 = vmatprep.subr.bf16.mxu0 %v3069_v0  ;;  %v1516_v59 = vld [vmem:[#allocation7 + $0x21b0] sm:$0xff]  ;;  %v1485_v43 = vld [vmem:[#allocation7 + $0x20b8] sm:$0xff] }
 0x2cb   :  { %4215 = vmatprep.subr.bf16.mxu1 %v3325_v3  ;;  %v2012_v0 = vld [vmem:[#allocation7 + $0x3130] sm:$0xff]  ;;  %v1981_v3 = vld [vmem:[#allocation7 + $0x3038] sm:$0xff]  ;;  %v3020_v5 = vpack.c.bf16 %v1516_v59, %v1500_v55  ;;  %v3005_v7 = vpack.c.bf16 %v1485_v43, %v1469_v2 }
 0x2cc   :  { %v1997_v4 = vld [vmem:[#allocation7 + $0x30b8] sm:$0xff]  ;;  %v3276_v6 = vpack.c.bf16 %v2028_v14, %v2012_v0  ;;  %v1948_v35 = vld [vmem:[#allocation7 + $0x2f30] sm:$0xff] }
 0x2cd   :  { %4175 = vmatpush1.bf16.msra.mxu0 %v3068_v13  ;;  %v1484_v13 = vld [vmem:[#allocation7 + $0x20b0] sm:$0xff]  ;;  %v1949_v10 = vld [vmem:[#allocation7 + $0x2f38] sm:$0xff] }
 0x2ce   :  { %4216 = vmatpush1.bf16.msra.mxu1 %v3324_v15  ;;  %4176 = vmatprep.subr.bf16.mxu0 %v3053_v16  ;;  %v1980_v15 = vld [vmem:[#allocation7 + $0x3030] sm:$0xff]  ;;  %v3261_v16 = vpack.c.bf16 %v1997_v4, %v1981_v3  ;;  %v1965_v27 = vld [vmem:[#allocation7 + $0x2fb8] sm:$0xff]  ;;  %v3004_v31 = vpack.c.bf16 %v1484_v13, %v1468_v11 }
 0x2cf   :  { %4217 = vmatprep.subr.bf16.mxu1 %v3309_v29  ;;  %v2461_v29 = vld [vmem:[#allocation7 + $0x3f38] sm:$0xff]  ;;  %v3260_v32 = vpack.c.bf16 %v1996_v18, %v1980_v15  ;;  %v3245_v33 = vpack.c.bf16 %v1965_v27, %v1949_v10  ;;  %v2476_v39 = vld [vmem:[#allocation7 + $0x3fb0] sm:$0xff] }
 0x2d0   :  { %v2477_v30 = vld [vmem:[#allocation7 + $0x3fb8] sm:$0xff]  ;;  %v1916_v46 = vld [vmem:[#allocation7 + $0x2e30] sm:$0xff] }
 0x2d1   :  { %4177 = vmatpush1.bf16.msra.mxu0 %v3052_v36  ;;  %v1964_v36 = vld [vmem:[#allocation7 + $0x2fb0] sm:$0xff]  ;;  %v1917_v26 = vld [vmem:[#allocation7 + $0x2e38] sm:$0xff] }
 0x2d2   :  { %4218 = vmatpush1.bf16.msra.mxu1 %v3308_v37  ;;  %4178 = vmatprep.subr.bf16.mxu0 %v3037_v38  ;;  %v2460_v37 = vld [vmem:[#allocation7 + $0x3f30] sm:$0xff]  ;;  %v3501_v38 = vpack.c.bf16 %v2477_v30, %v2461_v29  ;;  %v1933_v25 = vld [vmem:[#allocation7 + $0x2eb8] sm:$0xff]  ;;  %v3244_v21 = vpack.c.bf16 %v1964_v36, %v1948_v35 }
 0x2d3   :  { %4219 = vmatprep.subr.bf16.mxu1 %v3293_v41  ;;  %v2429_v41 = vld [vmem:[#allocation7 + $0x3e38] sm:$0xff]  ;;  %v3500_v44 = vpack.c.bf16 %v2476_v39, %v2460_v37  ;;  %v3229_v45 = vpack.c.bf16 %v1933_v25, %v1917_v26  ;;  %v2444_v55 = vld [vmem:[#allocation7 + $0x3eb0] sm:$0xff] }
 0x2d4   :  { %v2445_v42 = vld [vmem:[#allocation7 + $0x3eb8] sm:$0xff]  ;;  %v1884_v4 = vld [vmem:[#allocation7 + $0x2d30] sm:$0xff] }
 0x2d5   :  { %4179 = vmatpush1.bf16.msra.mxu0 %v3036_v48  ;;  %v1932_v48 = vld [vmem:[#allocation7 + $0x2eb0] sm:$0xff]  ;;  %v1885_v59 = vld [vmem:[#allocation7 + $0x2d38] sm:$0xff] }
 0x2d6   :  { %4220 = vmatpush1.bf16.msra.mxu1 %v3292_v51  ;;  %4180 = vmatprep.subr.bf16.mxu0 %v3021_v54  ;;  %v2428_v51 = vld [vmem:[#allocation7 + $0x3e30] sm:$0xff]  ;;  %v3485_v54 = vpack.c.bf16 %v2445_v42, %v2429_v41  ;;  %v1901_v0 = vld [vmem:[#allocation7 + $0x2db8] sm:$0xff]  ;;  %v3228_v2 = vpack.c.bf16 %v1932_v48, %v1916_v46 }
 0x2d7   :  { %4221 = vmatprep.subr.bf16.mxu1 %v3277_v1  ;;  %v2397_v1 = vld [vmem:[#allocation7 + $0x3d38] sm:$0xff]  ;;  %v3484_v43 = vpack.c.bf16 %v2444_v55, %v2428_v51  ;;  %v3213_v3 = vpack.c.bf16 %v1901_v0, %v1885_v59  ;;  %v2412_v11 = vld [vmem:[#allocation7 + $0x3db0] sm:$0xff] }
 0x2d8   :  { %v2413_v14 = vld [vmem:[#allocation7 + $0x3db8] sm:$0xff]  ;;  %v1852_v30 = vld [vmem:[#allocation7 + $0x2c30] sm:$0xff] }
 0x2d9   :  { %4181 = vmatpush1.bf16.msra.mxu0 %v3020_v5  ;;  %v1900_v5 = vld [vmem:[#allocation7 + $0x2db0] sm:$0xff]  ;;  %v1853_v13 = vld [vmem:[#allocation7 + $0x2c38] sm:$0xff] }
 0x2da   :  { %4222 = vmatpush1.bf16.msra.mxu1 %v3276_v6  ;;  %4182 = vmatprep.subr.bf16.mxu0 %v3005_v7  ;;  %v2396_v6 = vld [vmem:[#allocation7 + $0x3d30] sm:$0xff]  ;;  %v3469_v7 = vpack.c.bf16 %v2413_v14, %v2397_v1  ;;  %v1869_v15 = vld [vmem:[#allocation7 + $0x2cb8] sm:$0xff]  ;;  %v3212_v10 = vpack.c.bf16 %v1900_v5, %v1884_v4 }
 0x2db   :  { %4223 = vmatprep.subr.bf16.mxu1 %v3261_v16  ;;  %v2365_v16 = vld [vmem:[#allocation7 + $0x3c38] sm:$0xff]  ;;  %v3468_v27 = vpack.c.bf16 %v2412_v11, %v2396_v6  ;;  %v3197_v29 = vpack.c.bf16 %v1869_v15, %v1853_v13  ;;  %v2380_v35 = vld [vmem:[#allocation7 + $0x3cb0] sm:$0xff] }
 0x2dc   :  { %v2381_v18 = vld [vmem:[#allocation7 + $0x3cb8] sm:$0xff]  ;;  %v1820_v42 = vld [vmem:[#allocation7 + $0x2b30] sm:$0xff] }
 0x2dd   :  { %4183 = vmatpush1.bf16.msra.mxu0 %v3004_v31  ;;  %v1868_v31 = vld [vmem:[#allocation7 + $0x2cb0] sm:$0xff]  ;;  %v1821_v36 = vld [vmem:[#allocation7 + $0x2b38] sm:$0xff] }
 0x2de   :  { %4224 = vmatpush1.bf16.msra.mxu1 %v3260_v32  ;;  %4184 = vmatprep.subr.bf16.mxu0 %v3245_v33  ;;  %v2364_v32 = vld [vmem:[#allocation7 + $0x3c30] sm:$0xff]  ;;  %v3453_v33 = vpack.c.bf16 %v2381_v18, %v2365_v16  ;;  %v1837_v37 = vld [vmem:[#allocation7 + $0x2bb8] sm:$0xff]  ;;  %v3196_v26 = vpack.c.bf16 %v1868_v31, %v1852_v30 }
 0x2df   :  { %4225 = vmatprep.subr.bf16.mxu1 %v3501_v38  ;;  %v2333_v38 = vld [vmem:[#allocation7 + $0x3b38] sm:$0xff]  ;;  %v3452_v25 = vpack.c.bf16 %v2380_v35, %v2364_v32  ;;  %v3181_v41 = vpack.c.bf16 %v1837_v37, %v1821_v36  ;;  %v2348_v46 = vld [vmem:[#allocation7 + $0x3bb0] sm:$0xff] }
 0x2e0   :  { %v2349_v39 = vld [vmem:[#allocation7 + $0x3bb8] sm:$0xff]  ;;  %v1788_v14 = vld [vmem:[#allocation7 + $0x2a30] sm:$0xff] }
 0x2e1   :  { %4185 = vmatpush2.bf16.msra.mxu0 %v3244_v21  ;;  %v1836_v21 = vld [vmem:[#allocation7 + $0x2bb0] sm:$0xff]  ;;  %v1789_v48 = vld [vmem:[#allocation7 + $0x2a38] sm:$0xff] }
 0x2e2   :  { %4226 = vmatpush2.bf16.msra.mxu1 %v3500_v44  ;;  %4186 = vmatprep.subr.bf16.mxu0 %v3229_v45  ;;  %v2332_v44 = vld [vmem:[#allocation7 + $0x3b30] sm:$0xff]  ;;  %v3437_v45 = vpack.c.bf16 %v2349_v39, %v2333_v38  ;;  %v1805_v51 = vld [vmem:[#allocation7 + $0x2ab8] sm:$0xff]  ;;  %v3180_v59 = vpack.c.bf16 %v1836_v21, %v1820_v42  ;;  %v671_v21 = vld [vmem:[#allocation7 + $0x748] sm:$0xff] }
 0x2e3   :  { %4227 = vmatprep.subr.bf16.mxu1 %v3485_v54  ;;  %v2301_v54 = vld [vmem:[#allocation7 + $0x3a38] sm:$0xff]  ;;  %v3436_v0 = vpack.c.bf16 %v2348_v46, %v2332_v44  ;;  %v3165_v1 = vpack.c.bf16 %v1805_v51, %v1789_v48  ;;  %v2316_v4 = vld [vmem:[#allocation7 + $0x3ab0] sm:$0xff]  ;;  %v687_v44 = vld [vmem:[#allocation7 + $0x7c8] sm:$0xff] }
 0x2e4   :  { %v2317_v55 = vld [vmem:[#allocation7 + $0x3ab8] sm:$0xff]  ;;  %v1756_v18 = vld [vmem:[#allocation7 + $0x2930] sm:$0xff]  ;;  %v1199_v46 = vld [vmem:[#allocation7 + $0x17c8] sm:$0xff] }
 0x2e5   :  { %4187 = vmatpush2.bf16.msra.mxu0 %v3228_v2  ;;  %v1804_v2 = vld [vmem:[#allocation7 + $0x2ab0] sm:$0xff]  ;;  %v1757_v5 = vld [vmem:[#allocation7 + $0x2938] sm:$0xff] }
 0x2e6   :  { %4228 = vmatpush2.bf16.msra.mxu1 %v3484_v43  ;;  %4188 = vmatprep.subr.bf16.mxu0 %v3213_v3  ;;  %v2300_v43 = vld [vmem:[#allocation7 + $0x3a30] sm:$0xff]  ;;  %v3421_v3 = vpack.c.bf16 %v2317_v55, %v2301_v54  ;;  %v1773_v6 = vld [vmem:[#allocation7 + $0x29b8] sm:$0xff]  ;;  %v3164_v13 = vpack.c.bf16 %v1804_v2, %v1788_v14  ;;  %v2607_v54 = vpack.c.bf16 %v687_v44, %v671_v21  ;;  %v670_v55 = vld [vmem:[#allocation7 + $0x740] sm:$0xff] }
 0x2e7   :  { %4229 = vmatprep.subr.bf16.mxu1 %v3469_v7  ;;  %v2269_v7 = vld [vmem:[#allocation7 + $0x3938] sm:$0xff]  ;;  %v3420_v15 = vpack.c.bf16 %v2316_v4, %v2300_v43  ;;  %v3149_v16 = vpack.c.bf16 %v1773_v6, %v1757_v5  ;;  %v2284_v30 = vld [vmem:[#allocation7 + $0x39b0] sm:$0xff]  ;;  %v1198_v14 = vld [vmem:[#allocation7 + $0x17c0] sm:$0xff] }
 0x2e8   :  { %v2285_v11 = vld [vmem:[#allocation7 + $0x39b8] sm:$0xff]  ;;  %v1724_v39 = vld [vmem:[#allocation7 + $0x2830] sm:$0xff]  ;;  %v639_v2 = vld [vmem:[#allocation7 + $0x648] sm:$0xff] }
 0x2e9   :  { %4189 = vmatpush2.bf16.msra.mxu0 %v3212_v10  ;;  %v1772_v10 = vld [vmem:[#allocation7 + $0x29b0] sm:$0xff]  ;;  %v1725_v31 = vld [vmem:[#allocation7 + $0x2838] sm:$0xff]  ;;  %v655_v43 = vld [vmem:[#allocation7 + $0x6c8] sm:$0xff] }
 0x2ea   :  { %4230 = vmatpush2.bf16.msra.mxu1 %v3468_v27  ;;  %4190 = vmatprep.subr.bf16.mxu0 %v3197_v29  ;;  %v2268_v27 = vld [vmem:[#allocation7 + $0x3930] sm:$0xff]  ;;  %v3405_v29 = vpack.c.bf16 %v2285_v11, %v2269_v7  ;;  %v1741_v32 = vld [vmem:[#allocation7 + $0x28b8] sm:$0xff]  ;;  %v3148_v36 = vpack.c.bf16 %v1772_v10, %v1756_v18  ;;  %v1151_v6 = vld [vmem:[#allocation7 + $0x1648] sm:$0xff]  ;;  %v2591_v10 = vpack.c.bf16 %v655_v43, %v639_v2 }
 0x2eb   :  { %4231 = vmatprep.subr.bf16.mxu1 %v3453_v33  ;;  %v2237_v33 = vld [vmem:[#allocation7 + $0x3838] sm:$0xff]  ;;  %v3404_v37 = vpack.c.bf16 %v2284_v30, %v2268_v27  ;;  %v3133_v38 = vpack.c.bf16 %v1741_v32, %v1725_v31  ;;  %v2252_v42 = vld [vmem:[#allocation7 + $0x38b0] sm:$0xff]  ;;  %v1167_v7 = vld [vmem:[#allocation7 + $0x16c8] sm:$0xff] }
 0x2ec   :  { %v2253_v35 = vld [vmem:[#allocation7 + $0x38b8] sm:$0xff]  ;;  %v1166_v27 = vld [vmem:[#allocation7 + $0x16c0] sm:$0xff]  ;;  %v623_v30 = vld [vmem:[#allocation7 + $0x5c8] sm:$0xff]  ;;  %v2847_v32 = vpack.c.bf16 %v1167_v7, %v1151_v6 }
 0x2ed   :  { %4191 = vmatpush2.bf16.msra.mxu0 %v3196_v26  ;;  %v1740_v26 = vld [vmem:[#allocation7 + $0x28b0] sm:$0xff]  ;;  %v1118_v21 = vld [vmem:[#allocation7 + $0x1540] sm:$0xff] }
 0x2ee   :  { %4232 = vmatpush2.bf16.msra.mxu1 %v3452_v25  ;;  %4192 = vmatprep.subr.bf16.mxu0 %v3181_v41  ;;  %v2236_v25 = vld [vmem:[#allocation7 + $0x3830] sm:$0xff]  ;;  %v3389_v41 = vpack.c.bf16 %v2253_v35, %v2237_v33  ;;  %v3132_v48 = vpack.c.bf16 %v1740_v26, %v1724_v39  ;;  %v1119_v33 = vld [vmem:[#allocation7 + $0x1548] sm:$0xff]  ;;  %v574_v6 = vld [vmem:[#allocation7 + $0x440] sm:$0xff] }
 0x2ef   :  { %4233 = vmatprep.subr.bf16.mxu1 %v3437_v45  ;;  %v1183_v45 = vld [vmem:[#allocation7 + $0x1748] sm:$0xff]  ;;  %v3388_v51 = vpack.c.bf16 %v2252_v42, %v2236_v25  ;;  %v622_v42 = vld [vmem:[#allocation7 + $0x5c0] sm:$0xff] }
 0x2f0   :  { %v1135_v35 = vld [vmem:[#allocation7 + $0x15c8] sm:$0xff]  ;;  %v590_v7 = vld [vmem:[#allocation7 + $0x4c0] sm:$0xff] }
 0x2f1   :  { %4193 = vmatpush2.bf16.msra.mxu0 %v3180_v59  ;;  %v686_v59 = vld [vmem:[#allocation7 + $0x7c0] sm:$0xff] }
 0x2f2   :  { %4234 = vmatpush2.bf16.msra.mxu1 %v3436_v0  ;;  %4194 = vmatprep.subr.bf16.mxu0 %v3165_v1  ;;  %v2863_v0 = vpack.c.bf16 %v1199_v46, %v1183_v45  ;;  %v1182_v1 = vld [vmem:[#allocation7 + $0x1740] sm:$0xff]  ;;  %v2606_v5 = vpack.c.bf16 %v686_v59, %v670_v55  ;;  %v591_v55 = vld [vmem:[#allocation7 + $0x4c8] sm:$0xff] }
 0x2f3   :  { %4235 = vmatprep.subr.bf16.mxu1 %v3421_v3  ;;  %v8957_v3 = vld [vmem:[#allocation9] sm:$0xff]  ;;  %v2862_v11 = vpack.c.bf16 %v1198_v14, %v1182_v1  ;;  %v1103_v1 = vld [vmem:[#allocation7 + $0x14c8] sm:$0xff] }
 0x2f4   :  { %v3533_v4 = vrot.slane %v8957_v3, %v9310_v9  ;;  %v3537_v18 = vrot.slane %v8957_v3, %v9279_v56 }
 0x2f5   :  { %4195 = vmatpush2.bf16.msra.mxu0 %v3164_v13  ;;  %v638_v13 = vld [vmem:[#allocation7 + $0x640] sm:$0xff] }
 0x2f6   :  { %4236 = vmatpush2.bf16.msra.mxu1 %v3420_v15  ;;  %4196 = vmatprep.subr.bf16.mxu0 %v3149_v16  ;;  %v654_v15 = vld [vmem:[#allocation7 + $0x6c0] sm:$0xff] }
 0x2f7   :  { %4237 = vmatprep.subr.bf16.mxu1 %v3405_v29  ;;  %v1150_v16 = vld [vmem:[#allocation7 + $0x1640] sm:$0xff]  ;;  %v607_v29 = vld [vmem:[#allocation7 + $0x548] sm:$0xff] }
 0x2f8   :  { %v2846_v26 = vpack.c.bf16 %v1166_v27, %v1150_v16  ;;  %v2575_v25 = vpack.c.bf16 %v623_v30, %v607_v29  ;;  %v1102_v16 = vld [vmem:[#allocation7 + $0x14c0] sm:$0xff]  ;;  %v1055_v27 = vld [vmem:[#allocation7 + $0x1348] sm:$0xff]  ;;  %v2558_v30 = vpack.c.bf16 %v590_v7, %v574_v6 }
 0x2f9   :  { %4197 = vmatpush2.bf16.msra.mxu0 %v3148_v36  ;;  %v1071_v29 = vld [vmem:[#allocation7 + $0x13c8] sm:$0xff]  ;;  %v494_v6 = vld [vmem:[#allocation7 + $0x1c0] sm:$0xff] }
 0x2fa   :  { %4238 = vmatpush2.bf16.msra.mxu1 %v3404_v37  ;;  %4198 = vmatprep.subr.bf16.mxu0 %v3133_v38  ;;  %v2590_v38 = vpack.c.bf16 %v654_v15, %v638_v13  ;;  %v990_v7 = vld [vmem:[#allocation7 + $0x1140] sm:$0xff] }
 0x2fb   :  { %4239 = vmatprep.subr.bf16.mxu1 %v3389_v41  ;;  %v606_v41 = vld [vmem:[#allocation7 + $0x540] sm:$0xff] }
 0x2fc   :  { %v2574_v43 = vpack.c.bf16 %v622_v42, %v606_v41  ;;  %v1039_v41 = vld [vmem:[#allocation7 + $0x12c8] sm:$0xff] }
 0x2fd   :  { %4199 = vmatpush2.bf16.msra.mxu0 %v3132_v48  ;;  %v2831_v48 = vpack.c.bf16 %v1135_v35, %v1119_v33  ;;  %v542_v33 = vld [vmem:[#allocation7 + $0x340] sm:$0xff] }
 0x2fe   :  { %4240 = vmatpush2.bf16.msra.mxu1 %v3388_v51  ;;  %4250 = vmatprep.subr.bf16.mxu0 %v2607_v54  ;;  %v1134_v51 = vld [vmem:[#allocation7 + $0x15c0] sm:$0xff]  ;;  %v575_v54 = vld [vmem:[#allocation7 + $0x448] sm:$0xff] }
 0x2ff   :  { %4291 = vmatprep.subr.bf16.mxu1 %v2863_v0  ;;  %v1087_v0 = vld [vmem:[#allocation7 + $0x1448] sm:$0xff]  ;;  %v558_v35 = vld [vmem:[#allocation7 + $0x3c0] sm:$0xff] }
 0x300   :  { %v3956_v31 = vpop.f32.mrf.mxu0  ;;  %4201 = vmatmul.mubr.bf16.vlgmr.msra.gmra.mxu0 %v9320_v17  ;;  %v2815_v15 = vpack.c.bf16 %v1103_v1, %v1087_v0  ;;  %v2542_v42 = vpack.c.bf16 %v558_v35, %v542_v33  ;;  %v495_v0 = vld [vmem:[#allocation7 + $0x1c8] sm:$0xff]  ;;  %v958_v33 = vld [vmem:[#allocation7 + $0x1040] sm:$0xff] }
 0x301   :  { %v3957_v36 = vadd.f32 %v3956_v31, %v3533_v4  ;;  %v3997_v37 = vpop.f32.mrf.mxu1  ;;  %4242 = vmatmul.mubr.bf16.vlgmr.msra.gmra.mxu1 %v9318_v12  ;;  %4251 = vmatpush1.bf16.msra.mxu0 %v2606_v5  ;;  %v2830_v4 = vpack.c.bf16 %v1134_v51, %v1118_v21  ;;  %v2559_v5 = vpack.c.bf16 %v591_v55, %v575_v54  ;;  %v1022_v51 = vld [vmem:[#allocation7 + $0x1240] sm:$0xff]  ;;  %v991_v1 = vld [vmem:[#allocation7 + $0x1148] sm:$0xff] }
 0x302   :  { %4282 = vmatprep.mubr.bf16.mxu0 %v9276_v53  ;;  %4292 = vmatpush1.bf16.msra.mxu1 %v2862_v11  ;;  %v3958_v39 = vpop.f32.mrf.mxu0  ;;  %v1086_v11 = vld [vmem:[#allocation7 + $0x1440] sm:$0xff] }
 0x303   :  { %v9384_v44 = vadd.f32 %v3997_v37, %v3957_v36  ;;  %4323 = vmatprep.mubr.bf16.mxu1 %v9283_v58  ;;  %v3959_v45 = vadd.f32 %v3958_v39, %v3537_v18  ;;  %v3999_v46 = vpop.f32.mrf.mxu1  ;;  %4252 = vmatprep.subr.bf16.mxu0 %v2591_v10  ;;  %v543_v18 = vld [vmem:[#allocation7 + $0x348] sm:$0xff]  ;;  %v2814_v31 = vpack.c.bf16 %v1102_v16, %v1086_v11  ;;  %v1054_v36 = vld [vmem:[#allocation7 + $0x1340] sm:$0xff] }
 0x304   :  { %v3960_v59 = vpop.f32.mrf.mxu0  ;;  %4293 = vmatprep.subr.bf16.mxu1 %v2847_v32  ;;  %v559_v10 = vld [vmem:[#allocation7 + $0x3c8] sm:$0xff]  ;;  %v2799_v37 = vpack.c.bf16 %v1071_v29, %v1055_v27  ;;  %v1038_v55 = vld [vmem:[#allocation7 + $0x12c0] sm:$0xff] }
 0x305   :  { %v9387_v14 = vadd.f32 %v3999_v46, %v3959_v45  ;;  %v4001_v2 = vpop.f32.mrf.mxu1  ;;  %4253 = vmatpush1.bf16.msra.mxu0 %v2590_v38  ;;  %v2543_v32 = vpack.c.bf16 %v559_v10, %v543_v18  ;;  %v1070_v38 = vld [vmem:[#allocation7 + $0x13c0] sm:$0xff]  ;;  %v511_v39 = vld [vmem:[#allocation7 + $0x248] sm:$0xff] }
 0x306   :  { %4294 = vmatpush1.bf16.msra.mxu1 %v2846_v26  ;;  %v3961_v3 = vpop.f32.mrf.mxu0  ;;  %4254 = vmatprep.subr.bf16.mxu0 %v2575_v25  ;;  %v527_v26 = vld [vmem:[#allocation7 + $0x2c8] sm:$0xff]  ;;  %v2798_v21 = vpack.c.bf16 %v1070_v38, %v1054_v36  ;;  %v510_v46 = vld [vmem:[#allocation7 + $0x240] sm:$0xff] }
 0x307   :  { %v4002_v13 = vpop.f32.mrf.mxu1  ;;  %4295 = vmatprep.subr.bf16.mxu1 %v2831_v48  ;;  %v1023_v25 = vld [vmem:[#allocation7 + $0x1248] sm:$0xff]  ;;  %v2527_v45 = vpack.c.bf16 %v527_v26, %v511_v39  ;;  %v526_v48 = vld [vmem:[#allocation7 + $0x2c0] sm:$0xff]  ;;  %v2782_v3 = vpack.c.bf16 %v1038_v55, %v1022_v51 }
 0x308   :  { %v2783_v54 = vpack.c.bf16 %v1039_v41, %v1023_v25  ;;  %v479_v59 = vld [vmem:[#allocation7 + $0x148] sm:$0xff]  ;;  %v1006_v13 = vld [vmem:[#allocation7 + $0x11c0] sm:$0xff] }
 0x309   :  { %4255 = vmatpush1.bf16.msra.mxu0 %v2574_v43  ;;  %v1007_v2 = vld [vmem:[#allocation7 + $0x11c8] sm:$0xff]  ;;  %v2526_v43 = vpack.c.bf16 %v526_v48, %v510_v46  ;;  %v2766_v29 = vpack.c.bf16 %v1006_v13, %v990_v7  ;;  %v974_v36 = vld [vmem:[#allocation7 + $0x10c0] sm:$0xff] }
 0x30a   :  { %4296 = vmatpush1.bf16.msra.mxu1 %v2830_v4  ;;  %4256 = vmatprep.subr.bf16.mxu0 %v2559_v5  ;;  %v2511_v4 = vpack.c.bf16 %v495_v0, %v479_v59  ;;  %v478_v5 = vld [vmem:[#allocation7 + $0x140] sm:$0xff]  ;;  %v2767_v11 = vpack.c.bf16 %v1007_v2, %v991_v1  ;;  %v463_v16 = vld [vmem:[#allocation7 + $0xc8] sm:$0xff]  ;;  %v2750_v41 = vpack.c.bf16 %v974_v36, %v958_v33 }
 0x30b   :  { %4297 = vmatprep.subr.bf16.mxu1 %v2815_v15  ;;  %v447_v15 = vld [vmem:[#allocation7 + $0x48] sm:$0xff]  ;;  %v2510_v27 = vpack.c.bf16 %v494_v6, %v478_v5  ;;  %v1438_v46 = vld [vmem:[#allocation7 + $0x1f40] sm:$0xff] }
 0x30c   :  { %v959_v18 = vld [vmem:[#allocation7 + $0x1048] sm:$0xff]  ;;  %v1454_v51 = vld [vmem:[#allocation7 + $0x1fc0] sm:$0xff] }
 0x30d   :  { %4257 = vmatpush1.bf16.msra.mxu0 %v2558_v30  ;;  %v975_v10 = vld [vmem:[#allocation7 + $0x10c8] sm:$0xff]  ;;  %v2495_v30 = vpack.c.bf16 %v463_v16, %v447_v15  ;;  %v2990_v2 = vpack.c.bf16 %v1454_v51, %v1438_v46  ;;  %v1406_v5 = vld [vmem:[#allocation7 + $0x1e40] sm:$0xff] }
 0x30e   :  { %4298 = vmatpush1.bf16.msra.mxu1 %v2814_v31  ;;  %4258 = vmatprep.subr.bf16.mxu0 %v2543_v32  ;;  %v446_v31 = vld [vmem:[#allocation7 + $0x40] sm:$0xff]  ;;  %v2751_v35 = vpack.c.bf16 %v975_v10, %v959_v18  ;;  %v943_v38 = vld [vmem:[#allocation7 + $0xfc8] sm:$0xff] }
 0x30f   :  { %4299 = vmatprep.subr.bf16.mxu1 %v2799_v37  ;;  %v462_v32 = vld [vmem:[#allocation7 + $0xc0] sm:$0xff]  ;;  %v927_v37 = vld [vmem:[#allocation7 + $0xf48] sm:$0xff] }
 0x310   :  { %v1439_v39 = vld [vmem:[#allocation7 + $0x1f48] sm:$0xff]  ;;  %v2494_v25 = vpack.c.bf16 %v462_v32, %v446_v31  ;;  %v1422_v7 = vld [vmem:[#allocation7 + $0x1ec0] sm:$0xff] }
 0x311   :  { %4259 = vmatpush1.bf16.msra.mxu0 %v2542_v42  ;;  %v1455_v26 = vld [vmem:[#allocation7 + $0x1fc8] sm:$0xff]  ;;  %v2735_v42 = vpack.c.bf16 %v943_v38, %v927_v37  ;;  %v2974_v10 = vpack.c.bf16 %v1422_v7, %v1406_v5  ;;  %v1374_v31 = vld [vmem:[#allocation7 + $0x1d40] sm:$0xff] }
 0x312   :  { %4300 = vmatpush1.bf16.msra.mxu1 %v2798_v21  ;;  %4260 = vmatprep.subr.bf16.mxu0 %v2527_v45  ;;  %v926_v21 = vld [vmem:[#allocation7 + $0xf40] sm:$0xff]  ;;  %v2991_v48 = vpack.c.bf16 %v1455_v26, %v1439_v39  ;;  %v911_v55 = vld [vmem:[#allocation7 + $0xec8] sm:$0xff] }
 0x313   :  { %4301 = vmatprep.subr.bf16.mxu1 %v2783_v54  ;;  %v942_v45 = vld [vmem:[#allocation7 + $0xfc0] sm:$0xff]  ;;  %v895_v54 = vld [vmem:[#allocation7 + $0xe48] sm:$0xff] }
 0x314   :  { %v1407_v59 = vld [vmem:[#allocation7 + $0x1e48] sm:$0xff]  ;;  %v2734_v1 = vpack.c.bf16 %v942_v45, %v926_v21  ;;  %v1390_v33 = vld [vmem:[#allocation7 + $0x1dc0] sm:$0xff] }
 0x315   :  { %4261 = vmatpush1.bf16.msra.mxu0 %v2526_v43  ;;  %v1423_v0 = vld [vmem:[#allocation7 + $0x1ec8] sm:$0xff]  ;;  %v2719_v43 = vpack.c.bf16 %v911_v55, %v895_v54  ;;  %v2958_v26 = vpack.c.bf16 %v1390_v33, %v1374_v31  ;;  %v1342_v21 = vld [vmem:[#allocation7 + $0x1c40] sm:$0xff] }
 0x316   :  { %4302 = vmatpush1.bf16.msra.mxu1 %v2782_v3  ;;  %4262 = vmatprep.subr.bf16.mxu0 %v2511_v4  ;;  %v894_v3 = vld [vmem:[#allocation7 + $0xe40] sm:$0xff]  ;;  %v2975_v6 = vpack.c.bf16 %v1423_v0, %v1407_v59  ;;  %v879_v13 = vld [vmem:[#allocation7 + $0xdc8] sm:$0xff] }
 0x317   :  { %4303 = vmatprep.subr.bf16.mxu1 %v2767_v11  ;;  %v910_v4 = vld [vmem:[#allocation7 + $0xec0] sm:$0xff]  ;;  %v863_v11 = vld [vmem:[#allocation7 + $0xd48] sm:$0xff] }
 0x318   :  { %v1375_v15 = vld [vmem:[#allocation7 + $0x1d48] sm:$0xff]  ;;  %v2718_v18 = vpack.c.bf16 %v910_v4, %v894_v3  ;;  %v1358_v46 = vld [vmem:[#allocation7 + $0x1cc0] sm:$0xff] }
 0x319   :  { %4263 = vmatpush1.bf16.msra.mxu0 %v2510_v27  ;;  %v1391_v16 = vld [vmem:[#allocation7 + $0x1dc8] sm:$0xff]  ;;  %v2703_v27 = vpack.c.bf16 %v879_v13, %v863_v11  ;;  %v2942_v0 = vpack.c.bf16 %v1358_v46, %v1342_v21  ;;  %v1310_v3 = vld [vmem:[#allocation7 + $0x1b40] sm:$0xff] }
 0x31a   :  { %4304 = vmatpush1.bf16.msra.mxu1 %v2766_v29  ;;  %4264 = vmatprep.subr.bf16.mxu0 %v2495_v30  ;;  %v862_v29 = vld [vmem:[#allocation7 + $0xd40] sm:$0xff]  ;;  %v2959_v32 = vpack.c.bf16 %v1391_v16, %v1375_v15  ;;  %v847_v36 = vld [vmem:[#allocation7 + $0xcc8] sm:$0xff] }
 0x31b   :  { %4305 = vmatprep.subr.bf16.mxu1 %v2751_v35  ;;  %v878_v30 = vld [vmem:[#allocation7 + $0xdc0] sm:$0xff]  ;;  %v831_v35 = vld [vmem:[#allocation7 + $0xc48] sm:$0xff] }
 0x31c   :  { %v1343_v37 = vld [vmem:[#allocation7 + $0x1c48] sm:$0xff]  ;;  %v2702_v39 = vpack.c.bf16 %v878_v30, %v862_v29  ;;  %v1326_v5 = vld [vmem:[#allocation7 + $0x1bc0] sm:$0xff] }
 0x31d   :  { %4265 = vmatpush1.bf16.msra.mxu0 %v2494_v25  ;;  %v1359_v38 = vld [vmem:[#allocation7 + $0x1cc8] sm:$0xff]  ;;  %v2687_v25 = vpack.c.bf16 %v847_v36, %v831_v35  ;;  %v2926_v16 = vpack.c.bf16 %v1326_v5, %v1310_v3  ;;  %v1278_v29 = vld [vmem:[#allocation7 + $0x1a40] sm:$0xff] }
 0x31e   :  { %4306 = vmatpush1.bf16.msra.mxu1 %v2750_v41  ;;  %4266 = vmatprep.subr.bf16.mxu0 %v2735_v42  ;;  %v830_v41 = vld [vmem:[#allocation7 + $0xc40] sm:$0xff]  ;;  %v2943_v45 = vpack.c.bf16 %v1359_v38, %v1343_v37  ;;  %v815_v51 = vld [vmem:[#allocation7 + $0xbc8] sm:$0xff] }
 0x31f   :  { %4307 = vmatprep.subr.bf16.mxu1 %v2991_v48  ;;  %v846_v42 = vld [vmem:[#allocation7 + $0xcc0] sm:$0xff]  ;;  %v799_v48 = vld [vmem:[#allocation7 + $0xb48] sm:$0xff] }
 0x320   :  { %v1311_v54 = vld [vmem:[#allocation7 + $0x1b48] sm:$0xff]  ;;  %v2686_v59 = vpack.c.bf16 %v846_v42, %v830_v41  ;;  %v1294_v31 = vld [vmem:[#allocation7 + $0x1ac0] sm:$0xff] }
 0x321   :  { %4267 = vmatpush2.bf16.msra.mxu0 %v2734_v1  ;;  %v1327_v55 = vld [vmem:[#allocation7 + $0x1bc8] sm:$0xff]  ;;  %v2671_v1 = vpack.c.bf16 %v815_v51, %v799_v48  ;;  %v2910_v38 = vpack.c.bf16 %v1294_v31, %v1278_v29  ;;  %v1246_v41 = vld [vmem:[#allocation7 + $0x1940] sm:$0xff] }
 0x322   :  { %4308 = vmatpush2.bf16.msra.mxu1 %v2990_v2  ;;  %4268 = vmatprep.subr.bf16.mxu0 %v2719_v43  ;;  %v798_v2 = vld [vmem:[#allocation7 + $0xb40] sm:$0xff]  ;;  %v2927_v4 = vpack.c.bf16 %v1327_v55, %v1311_v54  ;;  %v783_v7 = vld [vmem:[#allocation7 + $0xac8] sm:$0xff] }
 0x323   :  { %4309 = vmatprep.subr.bf16.mxu1 %v2975_v6  ;;  %v814_v43 = vld [vmem:[#allocation7 + $0xbc0] sm:$0xff]  ;;  %v767_v6 = vld [vmem:[#allocation7 + $0xa48] sm:$0xff] }
 0x324   :  { %v1279_v11 = vld [vmem:[#allocation7 + $0x1a48] sm:$0xff]  ;;  %v2670_v15 = vpack.c.bf16 %v814_v43, %v798_v2  ;;  %v1262_v21 = vld [vmem:[#allocation7 + $0x19c0] sm:$0xff] }
 0x325   :  { %4269 = vmatpush2.bf16.msra.mxu0 %v2718_v18  ;;  %v1295_v13 = vld [vmem:[#allocation7 + $0x1ac8] sm:$0xff]  ;;  %v2655_v18 = vpack.c.bf16 %v783_v7, %v767_v6  ;;  %v2894_v55 = vpack.c.bf16 %v1262_v21, %v1246_v41  ;;  %v1214_v2 = vld [vmem:[#allocation7 + $0x1840] sm:$0xff] }
 0x326   :  { %4310 = vmatpush2.bf16.msra.mxu1 %v2974_v10  ;;  %4270 = vmatprep.subr.bf16.mxu0 %v2703_v27  ;;  %v766_v10 = vld [vmem:[#allocation7 + $0xa40] sm:$0xff]  ;;  %v2911_v30 = vpack.c.bf16 %v1295_v13, %v1279_v11  ;;  %v751_v33 = vld [vmem:[#allocation7 + $0x9c8] sm:$0xff] }
 0x327   :  { %4311 = vmatprep.subr.bf16.mxu1 %v2959_v32  ;;  %v782_v27 = vld [vmem:[#allocation7 + $0xac0] sm:$0xff]  ;;  %v735_v32 = vld [vmem:[#allocation7 + $0x948] sm:$0xff] }
 0x328   :  { %v1247_v35 = vld [vmem:[#allocation7 + $0x1948] sm:$0xff]  ;;  %v2654_v37 = vpack.c.bf16 %v782_v27, %v766_v10  ;;  %v1230_v3 = vld [vmem:[#allocation7 + $0x18c0] sm:$0xff] }
 0x329   :  { %4271 = vmatpush2.bf16.msra.mxu0 %v2702_v39  ;;  %v1263_v36 = vld [vmem:[#allocation7 + $0x19c8] sm:$0xff]  ;;  %v2639_v39 = vpack.c.bf16 %v751_v33, %v735_v32  ;;  %v2878_v13 = vpack.c.bf16 %v1230_v3, %v1214_v2  ;;  %v2206_v27 = vld [vmem:[#allocation7 + $0x3740] sm:$0xff] }
 0x32a   :  { %4312 = vmatpush2.bf16.msra.mxu1 %v2958_v26  ;;  %4272 = vmatprep.subr.bf16.mxu0 %v2687_v25  ;;  %v734_v26 = vld [vmem:[#allocation7 + $0x940] sm:$0xff]  ;;  %v2895_v42 = vpack.c.bf16 %v1263_v36, %v1247_v35  ;;  %v719_v46 = vld [vmem:[#allocation7 + $0x8c8] sm:$0xff] }
 0x32b   :  { %4313 = vmatprep.subr.bf16.mxu1 %v2943_v45  ;;  %v750_v25 = vld [vmem:[#allocation7 + $0x9c0] sm:$0xff]  ;;  %v703_v45 = vld [vmem:[#allocation7 + $0x848] sm:$0xff] }
 0x32c   :  { %v1215_v48 = vld [vmem:[#allocation7 + $0x1848] sm:$0xff]  ;;  %v2638_v54 = vpack.c.bf16 %v750_v25, %v734_v26  ;;  %v2222_v29 = vld [vmem:[#allocation7 + $0x37c0] sm:$0xff] }
 0x32d   :  { %4273 = vmatpush2.bf16.msra.mxu0 %v2686_v59  ;;  %v1231_v51 = vld [vmem:[#allocation7 + $0x18c8] sm:$0xff]  ;;  %v2623_v59 = vpack.c.bf16 %v719_v46, %v703_v45  ;;  %v3374_v36 = vpack.c.bf16 %v2222_v29, %v2206_v27  ;;  %v2190_v25 = vld [vmem:[#allocation7 + $0x36c0] sm:$0xff] }
 0x32e   :  { %4314 = vmatpush2.bf16.msra.mxu1 %v2942_v0  ;;  %4274 = vmatprep.subr.bf16.mxu0 %v2671_v1  ;;  %v702_v0 = vld [vmem:[#allocation7 + $0x840] sm:$0xff]  ;;  %v2879_v43 = vpack.c.bf16 %v1231_v51, %v1215_v48  ;;  %v1711_v5 = vld [vmem:[#allocation7 + $0x27c8] sm:$0xff] }
 0x32f   :  { %4315 = vmatprep.subr.bf16.mxu1 %v2927_v4  ;;  %v718_v1 = vld [vmem:[#allocation7 + $0x8c0] sm:$0xff]  ;;  %v1695_v4 = vld [vmem:[#allocation7 + $0x2748] sm:$0xff] }
 0x330   :  { %v2207_v6 = vld [vmem:[#allocation7 + $0x3748] sm:$0xff]  ;;  %v2622_v11 = vpack.c.bf16 %v718_v1, %v702_v0  ;;  %v1630_v2 = vld [vmem:[#allocation7 + $0x2540] sm:$0xff] }
 0x331   :  { %4275 = vmatpush2.bf16.msra.mxu0 %v2670_v15  ;;  %v2223_v7 = vld [vmem:[#allocation7 + $0x37c8] sm:$0xff]  ;;  %v3119_v15 = vpack.c.bf16 %v1711_v5, %v1695_v4  ;;  %v2142_v3 = vld [vmem:[#allocation7 + $0x3540] sm:$0xff] }
 0x332   :  { %4316 = vmatpush2.bf16.msra.mxu1 %v2926_v16  ;;  %4276 = vmatprep.subr.bf16.mxu0 %v2655_v18  ;;  %v1694_v16 = vld [vmem:[#allocation7 + $0x2740] sm:$0xff]  ;;  %v3375_v10 = vpack.c.bf16 %v2223_v7, %v2207_v6  ;;  %v1679_v31 = vld [vmem:[#allocation7 + $0x26c8] sm:$0xff] }
 0x333   :  { %4317 = vmatprep.subr.bf16.mxu1 %v2911_v30  ;;  %v1710_v18 = vld [vmem:[#allocation7 + $0x27c0] sm:$0xff]  ;;  %v1663_v30 = vld [vmem:[#allocation7 + $0x2648] sm:$0xff] }
 0x334   :  { %v3118_v32 = vpack.c.bf16 %v1710_v18, %v1694_v16  ;;  %v2175_v33 = vld [vmem:[#allocation7 + $0x3648] sm:$0xff]  ;;  %v3103_v26 = vpack.c.bf16 %v1679_v31, %v1663_v30  ;;  %v2158_v7 = vld [vmem:[#allocation7 + $0x35c0] sm:$0xff] }
 0x335   :  { %4277 = vmatpush2.bf16.msra.mxu0 %v2654_v37  ;;  %v2191_v35 = vld [vmem:[#allocation7 + $0x36c8] sm:$0xff]  ;;  %v1662_v37 = vld [vmem:[#allocation7 + $0x2640] sm:$0xff]  ;;  %v3342_v31 = vpack.c.bf16 %v2158_v7, %v2142_v3 }
 0x336   :  { %4318 = vmatpush2.bf16.msra.mxu1 %v2910_v38  ;;  %4278 = vmatprep.subr.bf16.mxu0 %v2639_v39  ;;  %v1678_v38 = vld [vmem:[#allocation7 + $0x26c0] sm:$0xff]  ;;  %v1631_v41 = vld [vmem:[#allocation7 + $0x2548] sm:$0xff]  ;;  %v3359_v45 = vpack.c.bf16 %v2191_v35, %v2175_v33 }
 0x337   :  { %4319 = vmatprep.subr.bf16.mxu1 %v2895_v42  ;;  %v2174_v39 = vld [vmem:[#allocation7 + $0x3640] sm:$0xff]  ;;  %v1647_v42 = vld [vmem:[#allocation7 + $0x25c8] sm:$0xff] }
 0x338   :  { %v2143_v46 = vld [vmem:[#allocation7 + $0x3548] sm:$0xff]  ;;  %v3358_v0 = vpack.c.bf16 %v2190_v25, %v2174_v39  ;;  %v3087_v1 = vpack.c.bf16 %v1647_v42, %v1631_v41  ;;  %v1614_v33 = vld [vmem:[#allocation7 + $0x24c0] sm:$0xff] }
 0x339   :  { %4279 = vmatpush2.bf16.msra.mxu0 %v2638_v54  ;;  %v2159_v48 = vld [vmem:[#allocation7 + $0x35c8] sm:$0xff]  ;;  %v2110_v35 = vld [vmem:[#allocation7 + $0x3440] sm:$0xff] }
 0x33a   :  { %4320 = vmatpush2.bf16.msra.mxu1 %v2894_v55  ;;  %4280 = vmatprep.subr.bf16.mxu0 %v2623_v59  ;;  %v3102_v55 = vpack.c.bf16 %v1678_v38, %v1662_v37  ;;  %v3343_v6 = vpack.c.bf16 %v2159_v48, %v2143_v46  ;;  %v2111_v16 = vld [vmem:[#allocation7 + $0x3448] sm:$0xff]  ;;  %v2126_v38 = vld [vmem:[#allocation7 + $0x34c0] sm:$0xff] }
 0x33b   :  { %4321 = vmatprep.subr.bf16.mxu1 %v2879_v43  ;;  %v1646_v43 = vld [vmem:[#allocation7 + $0x25c0] sm:$0xff]  ;;  %v2127_v18 = vld [vmem:[#allocation7 + $0x34c8] sm:$0xff] }
 0x33c   :  { %v3086_v29 = vpack.c.bf16 %v1646_v43, %v1630_v2  ;;  %v3327_v37 = vpack.c.bf16 %v2127_v18, %v2111_v16  ;;  %v1567_v39 = vld [vmem:[#allocation7 + $0x2348] sm:$0xff]  ;;  %v1566_v46 = vld [vmem:[#allocation7 + $0x2340] sm:$0xff] }
 0x33d   :  { %4281 = vmatpush2.bf16.msra.mxu0 %v2622_v11  ;;  %v1599_v11 = vld [vmem:[#allocation7 + $0x2448] sm:$0xff]  ;;  %v1582_v48 = vld [vmem:[#allocation7 + $0x23c0] sm:$0xff] }
 0x33e   :  { %4322 = vmatpush2.bf16.msra.mxu1 %v2878_v13  ;;  %4332 = vmatprep.subr.bf16.mxu0 %v3119_v15  ;;  %v1615_v13 = vld [vmem:[#allocation7 + $0x24c8] sm:$0xff]  ;;  %v3054_v43 = vpack.c.bf16 %v1582_v48, %v1566_v46  ;;  %v2046_v7 = vld [vmem:[#allocation7 + $0x3240] sm:$0xff] }
 0x33f   :  { %4373 = vmatprep.subr.bf16.mxu1 %v3375_v10  ;;  %v2079_v25 = vld [vmem:[#allocation7 + $0x3348] sm:$0xff]  ;;  %v1982_v46 = vld [vmem:[#allocation7 + $0x3040] sm:$0xff] }
 0x340   :  { %v4038_v21 = vpop.f32.mrf.mxu0  ;;  %4283 = vmatmul.mubr.bf16.vlgmr.msra.gmra.mxu0 %v9281_v57  ;;  %v2095_v41 = vld [vmem:[#allocation7 + $0x33c8] sm:$0xff] }
 0x341   :  { %v4039_v51 = vadd.f32 %v4038_v21, %v9384_v44  ;;  %v4079_v54 = vpop.f32.mrf.mxu1  ;;  %4324 = vmatmul.mubr.bf16.vlgmr.msra.gmra.mxu1 %v9274_v52  ;;  %4333 = vmatpush1.bf16.msra.mxu0 %v3118_v32  ;;  %v1598_v32 = vld [vmem:[#allocation7 + $0x2440] sm:$0xff]  ;;  %v3326_v21 = vpack.c.bf16 %v2126_v38, %v2110_v35  ;;  %v2063_v2 = vld [vmem:[#allocation7 + $0x32c8] sm:$0xff] }
 0x342   :  { %4364 = vmatprep.mubr.bf16.mxu0 %v9300_v47  ;;  %4374 = vmatpush1.bf16.msra.mxu1 %v3374_v36  ;;  %v4040_v59 = vpop.f32.mrf.mxu0  ;;  %v3070_v42 = vpack.c.bf16 %v1614_v33, %v1598_v32  ;;  %v1519_v16 = vld [vmem:[#allocation7 + $0x21c8] sm:$0xff]  ;;  %v1518_v32 = vld [vmem:[#allocation7 + $0x21c0] sm:$0xff] }
 0x343   :  { %v9393_v4 = vadd.f32 %v4079_v54, %v4039_v51  ;;  %4405 = vmatprep.mubr.bf16.mxu1 %v9302_v62  ;;  %v4041_v44 = vadd.f32 %v4040_v59, %v9387_v14  ;;  %v4081_v5 = vpop.f32.mrf.mxu1  ;;  %4334 = vmatprep.subr.bf16.mxu0 %v3103_v26  ;;  %v3071_v14 = vpack.c.bf16 %v1615_v13, %v1599_v11  ;;  %v1583_v26 = vld [vmem:[#allocation7 + $0x23c8] sm:$0xff]  ;;  %v2078_v51 = vld [vmem:[#allocation7 + $0x3340] sm:$0xff] }
 0x344   :  { %v4042_v15 = vpop.f32.mrf.mxu0  ;;  %4375 = vmatprep.subr.bf16.mxu1 %v3359_v45  ;;  %v3055_v45 = vpack.c.bf16 %v1583_v26, %v1567_v39  ;;  %v3311_v54 = vpack.c.bf16 %v2095_v41, %v2079_v25  ;;  %v1535_v59 = vld [vmem:[#allocation7 + $0x2248] sm:$0xff]  ;;  %v2062_v13 = vld [vmem:[#allocation7 + $0x32c0] sm:$0xff] }
 0x345   :  { %v9397_v10 = vadd.f32 %v4081_v5, %v4041_v44  ;;  %v4083_v27 = vpop.f32.mrf.mxu1  ;;  %4335 = vmatpush1.bf16.msra.mxu0 %v3102_v55  ;;  %v2094_v55 = vld [vmem:[#allocation7 + $0x33c0] sm:$0xff]  ;;  %v1503_v15 = vld [vmem:[#allocation7 + $0x2148] sm:$0xff] }
 0x346   :  { %4376 = vmatpush1.bf16.msra.mxu1 %v3358_v0  ;;  %v4043_v30 = vpop.f32.mrf.mxu0  ;;  %4336 = vmatprep.subr.bf16.mxu0 %v3087_v1  ;;  %v1551_v0 = vld [vmem:[#allocation7 + $0x22c8] sm:$0xff]  ;;  %v3310_v3 = vpack.c.bf16 %v2094_v55, %v2078_v51  ;;  %v1534_v5 = vld [vmem:[#allocation7 + $0x2240] sm:$0xff] }
 0x347   :  { %v4084_v36 = vpop.f32.mrf.mxu1  ;;  %4377 = vmatprep.subr.bf16.mxu1 %v3343_v6  ;;  %v2047_v1 = vld [vmem:[#allocation7 + $0x3248] sm:$0xff]  ;;  %v3039_v44 = vpack.c.bf16 %v1551_v0, %v1535_v59  ;;  %v1550_v6 = vld [vmem:[#allocation7 + $0x22c0] sm:$0xff]  ;;  %v3294_v30 = vpack.c.bf16 %v2062_v13, %v2046_v7 }
 0x348   :  { %v3295_v11 = vpack.c.bf16 %v2063_v2, %v2047_v1  ;;  %v2015_v18 = vld [vmem:[#allocation7 + $0x3148] sm:$0xff]  ;;  %v2014_v33 = vld [vmem:[#allocation7 + $0x3140] sm:$0xff] }
 0x349   :  { %4337 = vmatpush1.bf16.msra.mxu0 %v3086_v29  ;;  %v2031_v27 = vld [vmem:[#allocation7 + $0x31c8] sm:$0xff]  ;;  %v3038_v29 = vpack.c.bf16 %v1550_v6, %v1534_v5  ;;  %v2030_v36 = vld [vmem:[#allocation7 + $0x31c0] sm:$0xff] }
 0x34a   :  { %4378 = vmatpush1.bf16.msra.mxu1 %v3342_v31  ;;  %4338 = vmatprep.subr.bf16.mxu0 %v3071_v14  ;;  %v3023_v31 = vpack.c.bf16 %v1519_v16, %v1503_v15  ;;  %v1502_v14 = vld [vmem:[#allocation7 + $0x2140] sm:$0xff]  ;;  %v3279_v35 = vpack.c.bf16 %v2031_v27, %v2015_v18  ;;  %v1487_v38 = vld [vmem:[#allocation7 + $0x20c8] sm:$0xff]  ;;  %v3278_v41 = vpack.c.bf16 %v2030_v36, %v2014_v33 }
 0x34b   :  { %4379 = vmatprep.subr.bf16.mxu1 %v3327_v37  ;;  %v1471_v37 = vld [vmem:[#allocation7 + $0x2048] sm:$0xff]  ;;  %v3022_v25 = vpack.c.bf16 %v1518_v32, %v1502_v14  ;;  %v1998_v51 = vld [vmem:[#allocation7 + $0x30c0] sm:$0xff] }
 0x34c   :  { %v1983_v39 = vld [vmem:[#allocation7 + $0x3048] sm:$0xff]  ;;  %v3262_v2 = vpack.c.bf16 %v1998_v51, %v1982_v46  ;;  %v2462_v5 = vld [vmem:[#allocation7 + $0x3f40] sm:$0xff] }
 0x34d   :  { %4339 = vmatpush1.bf16.msra.mxu0 %v3070_v42  ;;  %v1999_v26 = vld [vmem:[#allocation7 + $0x30c8] sm:$0xff]  ;;  %v3007_v42 = vpack.c.bf16 %v1487_v38, %v1471_v37  ;;  %v2478_v7 = vld [vmem:[#allocation7 + $0x3fc0] sm:$0xff] }
 0x34e   :  { %4380 = vmatpush1.bf16.msra.mxu1 %v3326_v21  ;;  %4340 = vmatprep.subr.bf16.mxu0 %v3055_v45  ;;  %v1470_v21 = vld [vmem:[#allocation7 + $0x2040] sm:$0xff]  ;;  %v3263_v48 = vpack.c.bf16 %v1999_v26, %v1983_v39  ;;  %v1967_v55 = vld [vmem:[#allocation7 + $0x2fc8] sm:$0xff]  ;;  %v3502_v27 = vpack.c.bf16 %v2478_v7, %v2462_v5 }
 0x34f   :  { %4381 = vmatprep.subr.bf16.mxu1 %v3311_v54  ;;  %v1486_v45 = vld [vmem:[#allocation7 + $0x20c0] sm:$0xff]  ;;  %v1951_v54 = vld [vmem:[#allocation7 + $0x2f48] sm:$0xff] }
 0x350   :  { %v2463_v59 = vld [vmem:[#allocation7 + $0x3f48] sm:$0xff]  ;;  %v3006_v1 = vpack.c.bf16 %v1486_v45, %v1470_v21  ;;  %v2430_v14 = vld [vmem:[#allocation7 + $0x3e40] sm:$0xff] }
 0x351   :  { %4341 = vmatpush1.bf16.msra.mxu0 %v3054_v43  ;;  %v2479_v0 = vld [vmem:[#allocation7 + $0x3fc8] sm:$0xff]  ;;  %v3247_v43 = vpack.c.bf16 %v1967_v55, %v1951_v54  ;;  %v2446_v33 = vld [vmem:[#allocation7 + $0x3ec0] sm:$0xff] }
 0x352   :  { %4382 = vmatpush1.bf16.msra.mxu1 %v3310_v3  ;;  %4342 = vmatprep.subr.bf16.mxu0 %v3039_v44  ;;  %v1950_v3 = vld [vmem:[#allocation7 + $0x2f40] sm:$0xff]  ;;  %v3503_v6 = vpack.c.bf16 %v2479_v0, %v2463_v59  ;;  %v1935_v13 = vld [vmem:[#allocation7 + $0x2ec8] sm:$0xff]  ;;  %v3486_v26 = vpack.c.bf16 %v2446_v33, %v2430_v14 }
 0x353   :  { %4383 = vmatprep.subr.bf16.mxu1 %v3295_v11  ;;  %v1966_v44 = vld [vmem:[#allocation7 + $0x2fc0] sm:$0xff]  ;;  %v1919_v11 = vld [vmem:[#allocation7 + $0x2e48] sm:$0xff] }
 0x354   :  { %v2431_v15 = vld [vmem:[#allocation7 + $0x3e48] sm:$0xff]  ;;  %v3246_v18 = vpack.c.bf16 %v1966_v44, %v1950_v3  ;;  %v2398_v21 = vld [vmem:[#allocation7 + $0x3d40] sm:$0xff] }
 0x355   :  { %4343 = vmatpush1.bf16.msra.mxu0 %v3038_v29  ;;  %v2447_v16 = vld [vmem:[#allocation7 + $0x3ec8] sm:$0xff]  ;;  %v3231_v29 = vpack.c.bf16 %v1935_v13, %v1919_v11  ;;  %v2414_v46 = vld [vmem:[#allocation7 + $0x3dc0] sm:$0xff] }
 0x356   :  { %4384 = vmatpush1.bf16.msra.mxu1 %v3294_v30  ;;  %4344 = vmatprep.subr.bf16.mxu0 %v3023_v31  ;;  %v1918_v30 = vld [vmem:[#allocation7 + $0x2e40] sm:$0xff]  ;;  %v3487_v32 = vpack.c.bf16 %v2447_v16, %v2431_v15  ;;  %v1903_v36 = vld [vmem:[#allocation7 + $0x2dc8] sm:$0xff]  ;;  %v3470_v0 = vpack.c.bf16 %v2414_v46, %v2398_v21 }
 0x357   :  { %4385 = vmatprep.subr.bf16.mxu1 %v3279_v35  ;;  %v1934_v31 = vld [vmem:[#allocation7 + $0x2ec0] sm:$0xff]  ;;  %v1887_v35 = vld [vmem:[#allocation7 + $0x2d48] sm:$0xff] }
 0x358   :  { %v2399_v37 = vld [vmem:[#allocation7 + $0x3d48] sm:$0xff]  ;;  %v3230_v39 = vpack.c.bf16 %v1934_v31, %v1918_v30  ;;  %v2366_v3 = vld [vmem:[#allocation7 + $0x3c40] sm:$0xff] }
 0x359   :  { %4345 = vmatpush1.bf16.msra.mxu0 %v3022_v25  ;;  %v2415_v38 = vld [vmem:[#allocation7 + $0x3dc8] sm:$0xff]  ;;  %v3215_v25 = vpack.c.bf16 %v1903_v36, %v1887_v35  ;;  %v2382_v5 = vld [vmem:[#allocation7 + $0x3cc0] sm:$0xff] }
 0x35a   :  { %4386 = vmatpush1.bf16.msra.mxu1 %v3278_v41  ;;  %4346 = vmatprep.subr.bf16.mxu0 %v3007_v42  ;;  %v1886_v41 = vld [vmem:[#allocation7 + $0x2d40] sm:$0xff]  ;;  %v3471_v45 = vpack.c.bf16 %v2415_v38, %v2399_v37  ;;  %v1871_v51 = vld [vmem:[#allocation7 + $0x2cc8] sm:$0xff]  ;;  %v3454_v16 = vpack.c.bf16 %v2382_v5, %v2366_v3 }
 0x35b   :  { %4387 = vmatprep.subr.bf16.mxu1 %v3263_v48  ;;  %v1902_v42 = vld [vmem:[#allocation7 + $0x2dc0] sm:$0xff]  ;;  %v1855_v48 = vld [vmem:[#allocation7 + $0x2c48] sm:$0xff] }
 0x35c   :  { %v2367_v54 = vld [vmem:[#allocation7 + $0x3c48] sm:$0xff]  ;;  %v3214_v59 = vpack.c.bf16 %v1902_v42, %v1886_v41  ;;  %v2334_v30 = vld [vmem:[#allocation7 + $0x3b40] sm:$0xff] }
 0x35d   :  { %4347 = vmatpush1.bf16.msra.mxu0 %v3006_v1  ;;  %v2383_v55 = vld [vmem:[#allocation7 + $0x3cc8] sm:$0xff]  ;;  %v3199_v1 = vpack.c.bf16 %v1871_v51, %v1855_v48  ;;  %v2350_v14 = vld [vmem:[#allocation7 + $0x3bc0] sm:$0xff] }
 0x35e   :  { %4388 = vmatpush1.bf16.msra.mxu1 %v3262_v2  ;;  %4348 = vmatprep.subr.bf16.mxu0 %v3247_v43  ;;  %v1854_v2 = vld [vmem:[#allocation7 + $0x2c40] sm:$0xff]  ;;  %v3455_v44 = vpack.c.bf16 %v2383_v55, %v2367_v54  ;;  %v1839_v7 = vld [vmem:[#allocation7 + $0x2bc8] sm:$0xff]  ;;  %v3438_v38 = vpack.c.bf16 %v2350_v14, %v2334_v30  ;;  %v689_v14 = vld [vmem:[#allocation7 + $0x7d8] sm:$0xff] }
 0x35f   :  { %4389 = vmatprep.subr.bf16.mxu1 %v3503_v6  ;;  %v1870_v43 = vld [vmem:[#allocation7 + $0x2cc0] sm:$0xff]  ;;  %v1823_v6 = vld [vmem:[#allocation7 + $0x2b48] sm:$0xff] }
 0x360   :  { %v2335_v11 = vld [vmem:[#allocation7 + $0x3b48] sm:$0xff]  ;;  %v3198_v15 = vpack.c.bf16 %v1870_v43, %v1854_v2  ;;  %v2302_v41 = vld [vmem:[#allocation7 + $0x3a40] sm:$0xff] }
 0x361   :  { %4349 = vmatpush2.bf16.msra.mxu0 %v3246_v18  ;;  %v2351_v13 = vld [vmem:[#allocation7 + $0x3bc8] sm:$0xff]  ;;  %v3183_v18 = vpack.c.bf16 %v1839_v7, %v1823_v6  ;;  %v2318_v21 = vld [vmem:[#allocation7 + $0x3ac0] sm:$0xff] }
 0x362   :  { %4390 = vmatpush2.bf16.msra.mxu1 %v3502_v27  ;;  %4350 = vmatprep.subr.bf16.mxu0 %v3231_v29  ;;  %v1822_v27 = vld [vmem:[#allocation7 + $0x2b40] sm:$0xff]  ;;  %v3439_v31 = vpack.c.bf16 %v2351_v13, %v2335_v11  ;;  %v1807_v33 = vld [vmem:[#allocation7 + $0x2ac8] sm:$0xff]  ;;  %v3422_v55 = vpack.c.bf16 %v2318_v21, %v2302_v41  ;;  %v1200_v41 = vld [vmem:[#allocation7 + $0x17d0] sm:$0xff] }
 0x363   :  { %4391 = vmatprep.subr.bf16.mxu1 %v3487_v32  ;;  %v1838_v29 = vld [vmem:[#allocation7 + $0x2bc0] sm:$0xff]  ;;  %v1791_v32 = vld [vmem:[#allocation7 + $0x2a48] sm:$0xff]  ;;  %v657_v21 = vld [vmem:[#allocation7 + $0x6d8] sm:$0xff] }
 0x364   :  { %v2303_v35 = vld [vmem:[#allocation7 + $0x3a48] sm:$0xff]  ;;  %v3182_v37 = vpack.c.bf16 %v1838_v29, %v1822_v27  ;;  %v2270_v2 = vld [vmem:[#allocation7 + $0x3940] sm:$0xff] }
 0x365   :  { %4351 = vmatpush2.bf16.msra.mxu0 %v3230_v39  ;;  %v2319_v36 = vld [vmem:[#allocation7 + $0x3ac8] sm:$0xff]  ;;  %v3167_v39 = vpack.c.bf16 %v1807_v33, %v1791_v32  ;;  %v2286_v3 = vld [vmem:[#allocation7 + $0x39c0] sm:$0xff]  ;;  %v1185_v32 = vld [vmem:[#allocation7 + $0x1758] sm:$0xff] }
 0x366   :  { %4392 = vmatpush2.bf16.msra.mxu1 %v3486_v26  ;;  %4352 = vmatprep.subr.bf16.mxu0 %v3215_v25  ;;  %v1790_v26 = vld [vmem:[#allocation7 + $0x2a40] sm:$0xff]  ;;  %v3423_v42 = vpack.c.bf16 %v2319_v36, %v2303_v35  ;;  %v1775_v46 = vld [vmem:[#allocation7 + $0x29c8] sm:$0xff]  ;;  %v3406_v13 = vpack.c.bf16 %v2286_v3, %v2270_v2  ;;  %v1201_v33 = vld [vmem:[#allocation7 + $0x17d8] sm:$0xff] }
 0x367   :  { %4393 = vmatprep.subr.bf16.mxu1 %v3471_v45  ;;  %v1806_v25 = vld [vmem:[#allocation7 + $0x2ac0] sm:$0xff]  ;;  %v1759_v45 = vld [vmem:[#allocation7 + $0x2948] sm:$0xff]  ;;  %v1168_v3 = vld [vmem:[#allocation7 + $0x16d0] sm:$0xff] }
 0x368   :  { %v2271_v48 = vld [vmem:[#allocation7 + $0x3948] sm:$0xff]  ;;  %v3166_v54 = vpack.c.bf16 %v1806_v25, %v1790_v26  ;;  %v2238_v27 = vld [vmem:[#allocation7 + $0x3840] sm:$0xff]  ;;  %v2865_v26 = vpack.c.bf16 %v1201_v33, %v1185_v32  ;;  %v1184_v25 = vld [vmem:[#allocation7 + $0x1750] sm:$0xff] }
 0x369   :  { %4353 = vmatpush2.bf16.msra.mxu0 %v3214_v59  ;;  %v2287_v51 = vld [vmem:[#allocation7 + $0x39c8] sm:$0xff]  ;;  %v3151_v59 = vpack.c.bf16 %v1775_v46, %v1759_v45  ;;  %v2254_v30 = vld [vmem:[#allocation7 + $0x38c0] sm:$0xff]  ;;  %v1120_v32 = vld [vmem:[#allocation7 + $0x1550] sm:$0xff] }
 0x36a   :  { %4394 = vmatpush2.bf16.msra.mxu1 %v3470_v0  ;;  %4354 = vmatprep.subr.bf16.mxu0 %v3199_v1  ;;  %v1758_v0 = vld [vmem:[#allocation7 + $0x2940] sm:$0xff]  ;;  %v3407_v43 = vpack.c.bf16 %v2287_v51, %v2271_v48  ;;  %v1743_v5 = vld [vmem:[#allocation7 + $0x28c8] sm:$0xff]  ;;  %v3390_v36 = vpack.c.bf16 %v2254_v30, %v2238_v27  ;;  %v1153_v51 = vld [vmem:[#allocation7 + $0x1658] sm:$0xff] }
 0x36b   :  { %4395 = vmatprep.subr.bf16.mxu1 %v3455_v44  ;;  %v1774_v1 = vld [vmem:[#allocation7 + $0x29c0] sm:$0xff]  ;;  %v1727_v44 = vld [vmem:[#allocation7 + $0x2848] sm:$0xff] }
 0x36c   :  { %v2239_v6 = vld [vmem:[#allocation7 + $0x3848] sm:$0xff]  ;;  %v3150_v11 = vpack.c.bf16 %v1774_v1, %v1758_v0  ;;  %v8958_v45 = vld [vmem:[#allocation9] sm:$0xff]  ;;  %v656_v0 = vld [vmem:[#allocation7 + $0x6d0] sm:$0xff] }
 0x36d   :  { %4355 = vmatpush2.bf16.msra.mxu0 %v3198_v15  ;;  %v2255_v7 = vld [vmem:[#allocation7 + $0x38c8] sm:$0xff]  ;;  %v3135_v15 = vpack.c.bf16 %v1743_v5, %v1727_v44  ;;  %v3541_v46 = vrot.slane %v8958_v45, %v9307_v8  ;;  %v1152_v1 = vld [vmem:[#allocation7 + $0x1650] sm:$0xff]  ;;  %v3545_v2 = vrot.slane %v8958_v45, %v9286_v63  ;;  %v609_v44 = vld [vmem:[#allocation7 + $0x558] sm:$0xff] }
 0x36e   :  { %4396 = vmatpush2.bf16.msra.mxu1 %v3454_v16  ;;  %4356 = vmatprep.subr.bf16.mxu0 %v3183_v18  ;;  %v1726_v16 = vld [vmem:[#allocation7 + $0x2840] sm:$0xff]  ;;  %v3391_v29 = vpack.c.bf16 %v2255_v7, %v2239_v6  ;;  %v625_v5 = vld [vmem:[#allocation7 + $0x5d8] sm:$0xff] }
 0x36f   :  { %4397 = vmatprep.subr.bf16.mxu1 %v3439_v31  ;;  %v1742_v18 = vld [vmem:[#allocation7 + $0x28c0] sm:$0xff]  ;;  %v673_v31 = vld [vmem:[#allocation7 + $0x758] sm:$0xff]  ;;  %v2577_v30 = vpack.c.bf16 %v625_v5, %v609_v44 }
 0x370   :  { %v3134_v35 = vpack.c.bf16 %v1742_v18, %v1726_v16  ;;  %v561_v44 = vld [vmem:[#allocation7 + $0x3d8] sm:$0xff] }
 0x371   :  { %4357 = vmatpush2.bf16.msra.mxu0 %v3182_v37  ;;  %v2609_v37 = vpack.c.bf16 %v689_v14, %v673_v31  ;;  %v608_v31 = vld [vmem:[#allocation7 + $0x550] sm:$0xff]  ;;  %v1057_v5 = vld [vmem:[#allocation7 + $0x1358] sm:$0xff] }
 0x372   :  { %4398 = vmatpush2.bf16.msra.mxu1 %v3438_v38  ;;  %4358 = vmatprep.subr.bf16.mxu0 %v3167_v39  ;;  %v672_v38 = vld [vmem:[#allocation7 + $0x750] sm:$0xff] }
 0x373   :  { %4399 = vmatprep.subr.bf16.mxu1 %v3423_v42  ;;  %v688_v39 = vld [vmem:[#allocation7 + $0x7d0] sm:$0xff]  ;;  %v641_v42 = vld [vmem:[#allocation7 + $0x658] sm:$0xff] }
 0x374   :  { %v2608_v48 = vpack.c.bf16 %v688_v39, %v672_v38  ;;  %v624_v14 = vld [vmem:[#allocation7 + $0x5d0] sm:$0xff]  ;;  %v577_v39 = vld [vmem:[#allocation7 + $0x458] sm:$0xff] }
 0x375   :  { %4359 = vmatpush2.bf16.msra.mxu0 %v3166_v54  ;;  %v1169_v54 = vld [vmem:[#allocation7 + $0x16d8] sm:$0xff]  ;;  %v1136_v38 = vld [vmem:[#allocation7 + $0x15d0] sm:$0xff] }
 0x376   :  { %4400 = vmatpush2.bf16.msra.mxu1 %v3422_v55  ;;  %4360 = vmatprep.subr.bf16.mxu0 %v3151_v59  ;;  %v2864_v55 = vpack.c.bf16 %v1200_v41, %v1184_v25  ;;  %v640_v59 = vld [vmem:[#allocation7 + $0x650] sm:$0xff]  ;;  %v2849_v7 = vpack.c.bf16 %v1169_v54, %v1153_v51  ;;  %v1089_v41 = vld [vmem:[#allocation7 + $0x1458] sm:$0xff]  ;;  %v2832_v51 = vpack.c.bf16 %v1136_v38, %v1120_v32 }
 0x377   :  { %4401 = vmatprep.subr.bf16.mxu1 %v3407_v43  ;;  %v2593_v43 = vpack.c.bf16 %v657_v21, %v641_v42  ;;  %v2592_v18 = vpack.c.bf16 %v656_v0, %v640_v59  ;;  %v1105_v42 = vld [vmem:[#allocation7 + $0x14d8] sm:$0xff]  ;;  %v592_v59 = vld [vmem:[#allocation7 + $0x4d0] sm:$0xff] }
 0x378   :  { %v1088_v0 = vld [vmem:[#allocation7 + $0x1450] sm:$0xff]  ;;  %v1041_v32 = vld [vmem:[#allocation7 + $0x12d8] sm:$0xff] }
 0x379   :  { %4361 = vmatpush2.bf16.msra.mxu0 %v3150_v11  ;;  %v1121_v11 = vld [vmem:[#allocation7 + $0x1558] sm:$0xff]  ;;  %v512_v38 = vld [vmem:[#allocation7 + $0x250] sm:$0xff] }
 0x37a   :  { %4402 = vmatpush2.bf16.msra.mxu1 %v3406_v13  ;;  %4362 = vmatprep.subr.bf16.mxu0 %v3135_v15  ;;  %v1137_v13 = vld [vmem:[#allocation7 + $0x15d8] sm:$0xff] }
 0x37b   :  { %4403 = vmatprep.subr.bf16.mxu1 %v3391_v29  ;;  %v2848_v29 = vpack.c.bf16 %v1168_v3, %v1152_v1  ;;  %v545_v3 = vld [vmem:[#allocation7 + $0x358] sm:$0xff] }
 0x37d   :  { %4363 = vmatpush2.bf16.msra.mxu0 %v3134_v35 }
 0x37e   :  { %4404 = vmatpush2.bf16.msra.mxu1 %v3390_v36  ;;  %4414 = vmatprep.subr.bf16.mxu0 %v2609_v37  ;;  %v2833_v37 = vpack.c.bf16 %v1137_v13, %v1121_v11  ;;  %v2545_v13 = vpack.c.bf16 %v561_v44, %v545_v3  ;;  %v449_v3 = vld [vmem:[#allocation7 + $0x58] sm:$0xff] }
 0x37f   :  { %4455 = vmatprep.subr.bf16.mxu1 %v2865_v26  ;;  %v593_v26 = vld [vmem:[#allocation7 + $0x4d8] sm:$0xff] }
 0x380   :  { %v4120_v6 = vpop.f32.mrf.mxu0  ;;  %4365 = vmatmul.mubr.bf16.vlgmr.msra.gmra.mxu0 %v9320_v17  ;;  %v2561_v54 = vpack.c.bf16 %v593_v26, %v577_v39  ;;  %v528_v39 = vld [vmem:[#allocation7 + $0x2d0] sm:$0xff]  ;;  %v465_v44 = vld [vmem:[#allocation7 + $0xd8] sm:$0xff] }
 0x381   :  { %v4121_v15 = vadd.f32 %v4120_v6, %v3541_v46  ;;  %v4161_v16 = vpop.f32.mrf.mxu1  ;;  %4406 = vmatmul.mubr.bf16.vlgmr.msra.gmra.mxu1 %v9318_v12  ;;  %4415 = vmatpush1.bf16.msra.mxu0 %v2608_v48  ;;  %v2576_v46 = vpack.c.bf16 %v624_v14, %v608_v31  ;;  %v1073_v6 = vld [vmem:[#allocation7 + $0x13d8] sm:$0xff]  ;;  %v1024_v26 = vld [vmem:[#allocation7 + $0x1250] sm:$0xff] }
 0x382   :  { %4446 = vmatprep.mubr.bf16.mxu0 %v9276_v53  ;;  %4456 = vmatpush1.bf16.msra.mxu1 %v2864_v55  ;;  %v4122_v27 = vpop.f32.mrf.mxu0  ;;  %v576_v55 = vld [vmem:[#allocation7 + $0x450] sm:$0xff]  ;;  %v529_v31 = vld [vmem:[#allocation7 + $0x2d8] sm:$0xff] }
 0x383   :  { %v9404_v33 = vadd.f32 %v4161_v16, %v4121_v15  ;;  %4487 = vmatprep.mubr.bf16.mxu1 %v9283_v58  ;;  %v4123_v35 = vadd.f32 %v4122_v27, %v3545_v2  ;;  %v4163_v36 = vpop.f32.mrf.mxu1  ;;  %4416 = vmatprep.subr.bf16.mxu0 %v2593_v43  ;;  %v2817_v2 = vpack.c.bf16 %v1105_v42, %v1089_v41  ;;  %v1104_v43 = vld [vmem:[#allocation7 + $0x14d0] sm:$0xff]  ;;  %v1025_v14 = vld [vmem:[#allocation7 + $0x1258] sm:$0xff] }
 0x384   :  { %v4124_v25 = vpop.f32.mrf.mxu0  ;;  %4457 = vmatprep.subr.bf16.mxu1 %v2849_v7  ;;  %v2560_v7 = vpack.c.bf16 %v592_v59, %v576_v55  ;;  %v2816_v11 = vpack.c.bf16 %v1104_v43, %v1088_v0  ;;  %v544_v15 = vld [vmem:[#allocation7 + $0x350] sm:$0xff]  ;;  %v2801_v27 = vpack.c.bf16 %v1073_v6, %v1057_v5  ;;  %v481_v42 = vld [vmem:[#allocation7 + $0x158] sm:$0xff] }
 0x385   :  { %v9407_v21 = vadd.f32 %v4163_v36, %v4123_v35  ;;  %v4165_v45 = vpop.f32.mrf.mxu1  ;;  %4417 = vmatpush1.bf16.msra.mxu0 %v2592_v18  ;;  %v560_v16 = vld [vmem:[#allocation7 + $0x3d0] sm:$0xff]  ;;  %v2785_v25 = vpack.c.bf16 %v1041_v32, %v1025_v14  ;;  %v961_v5 = vld [vmem:[#allocation7 + $0x1058] sm:$0xff] }
 0x386   :  { %4458 = vmatpush1.bf16.msra.mxu1 %v2848_v29  ;;  %v4125_v48 = vpop.f32.mrf.mxu0  ;;  %4418 = vmatprep.subr.bf16.mxu0 %v2577_v30  ;;  %v1056_v18 = vld [vmem:[#allocation7 + $0x1350] sm:$0xff]  ;;  %v513_v30 = vld [vmem:[#allocation7 + $0x258] sm:$0xff]  ;;  %v2544_v35 = vpack.c.bf16 %v560_v16, %v544_v15 }
 0x387   :  { %v4166_v1 = vpop.f32.mrf.mxu1  ;;  %4459 = vmatprep.subr.bf16.mxu1 %v2833_v37  ;;  %v1072_v29 = vld [vmem:[#allocation7 + $0x13d0] sm:$0xff]  ;;  %v2529_v37 = vpack.c.bf16 %v529_v31, %v513_v30  ;;  %v497_v45 = vld [vmem:[#allocation7 + $0x1d8] sm:$0xff] }
 0x388   :  { %v2800_v36 = vpack.c.bf16 %v1072_v29, %v1056_v18  ;;  %v1040_v41 = vld [vmem:[#allocation7 + $0x12d0] sm:$0xff]  ;;  %v1009_v48 = vld [vmem:[#allocation7 + $0x11d8] sm:$0xff]  ;;  %v2513_v55 = vpack.c.bf16 %v497_v45, %v481_v42 }
 0x389   :  { %4419 = vmatpush1.bf16.msra.mxu0 %v2576_v46  ;;  %v993_v46 = vld [vmem:[#allocation7 + $0x1158] sm:$0xff]  ;;  %v480_v59 = vld [vmem:[#allocation7 + $0x150] sm:$0xff] }
 0x38a   :  { %4460 = vmatpush1.bf16.msra.mxu1 %v2832_v51  ;;  %4420 = vmatprep.subr.bf16.mxu0 %v2561_v54  ;;  %v2528_v51 = vpack.c.bf16 %v528_v39, %v512_v38  ;;  %v2784_v54 = vpack.c.bf16 %v1040_v41, %v1024_v26  ;;  %v496_v0 = vld [vmem:[#allocation7 + $0x1d0] sm:$0xff]  ;;  %v977_v6 = vld [vmem:[#allocation7 + $0x10d8] sm:$0xff] }
 0x38b   :  { %4461 = vmatprep.subr.bf16.mxu1 %v2817_v2  ;;  %v992_v1 = vld [vmem:[#allocation7 + $0x1150] sm:$0xff]  ;;  %v2769_v2 = vpack.c.bf16 %v1009_v48, %v993_v46  ;;  %v929_v30 = vld [vmem:[#allocation7 + $0xf58] sm:$0xff] }
 0x38c   :  { %v1008_v43 = vld [vmem:[#allocation7 + $0x11d0] sm:$0xff]  ;;  %v945_v31 = vld [vmem:[#allocation7 + $0xfd8] sm:$0xff] }
 0x38d   :  { %4421 = vmatpush1.bf16.msra.mxu0 %v2560_v7  ;;  %v2512_v7 = vpack.c.bf16 %v496_v0, %v480_v59  ;;  %v448_v15 = vld [vmem:[#allocation7 + $0x50] sm:$0xff]  ;;  %v1441_v14 = vld [vmem:[#allocation7 + $0x1f58] sm:$0xff] }
 0x38e   :  { %4462 = vmatpush1.bf16.msra.mxu1 %v2816_v11  ;;  %4422 = vmatprep.subr.bf16.mxu0 %v2545_v13  ;;  %v2768_v11 = vpack.c.bf16 %v1008_v43, %v992_v1  ;;  %v2497_v13 = vpack.c.bf16 %v465_v44, %v449_v3  ;;  %v464_v16 = vld [vmem:[#allocation7 + $0xd0] sm:$0xff]  ;;  %v1457_v32 = vld [vmem:[#allocation7 + $0x1fd8] sm:$0xff] }
 0x38f   :  { %4463 = vmatprep.subr.bf16.mxu1 %v2801_v27  ;;  %v960_v18 = vld [vmem:[#allocation7 + $0x1050] sm:$0xff]  ;;  %v2753_v27 = vpack.c.bf16 %v977_v6, %v961_v5  ;;  %v897_v42 = vld [vmem:[#allocation7 + $0xe58] sm:$0xff] }
 0x390   :  { %v976_v29 = vld [vmem:[#allocation7 + $0x10d0] sm:$0xff]  ;;  %v913_v45 = vld [vmem:[#allocation7 + $0xed8] sm:$0xff] }
 0x391   :  { %4423 = vmatpush1.bf16.msra.mxu0 %v2544_v35  ;;  %v2496_v35 = vpack.c.bf16 %v464_v16, %v448_v15  ;;  %v928_v38 = vld [vmem:[#allocation7 + $0xf50] sm:$0xff]  ;;  %v1409_v46 = vld [vmem:[#allocation7 + $0x1e58] sm:$0xff] }
 0x392   :  { %4464 = vmatpush1.bf16.msra.mxu1 %v2800_v36  ;;  %4424 = vmatprep.subr.bf16.mxu0 %v2529_v37  ;;  %v2752_v36 = vpack.c.bf16 %v976_v29, %v960_v18  ;;  %v2737_v37 = vpack.c.bf16 %v945_v31, %v929_v30  ;;  %v944_v39 = vld [vmem:[#allocation7 + $0xfd0] sm:$0xff]  ;;  %v1425_v48 = vld [vmem:[#allocation7 + $0x1ed8] sm:$0xff] }
 0x393   :  { %4465 = vmatprep.subr.bf16.mxu1 %v2785_v25  ;;  %v1440_v26 = vld [vmem:[#allocation7 + $0x1f50] sm:$0xff]  ;;  %v2993_v25 = vpack.c.bf16 %v1457_v32, %v1441_v14  ;;  %v865_v3 = vld [vmem:[#allocation7 + $0xd58] sm:$0xff] }
 0x394   :  { %v1456_v41 = vld [vmem:[#allocation7 + $0x1fd0] sm:$0xff]  ;;  %v881_v44 = vld [vmem:[#allocation7 + $0xdd8] sm:$0xff] }
 0x395   :  { %4425 = vmatpush1.bf16.msra.mxu0 %v2528_v51  ;;  %v2736_v51 = vpack.c.bf16 %v944_v39, %v928_v38  ;;  %v896_v59 = vld [vmem:[#allocation7 + $0xe50] sm:$0xff]  ;;  %v1377_v5 = vld [vmem:[#allocation7 + $0x1d58] sm:$0xff] }
 0x396   :  { %4466 = vmatpush1.bf16.msra.mxu1 %v2784_v54  ;;  %4426 = vmatprep.subr.bf16.mxu0 %v2513_v55  ;;  %v2992_v54 = vpack.c.bf16 %v1456_v41, %v1440_v26  ;;  %v2721_v55 = vpack.c.bf16 %v913_v45, %v897_v42  ;;  %v912_v0 = vld [vmem:[#allocation7 + $0xed0] sm:$0xff]  ;;  %v1393_v6 = vld [vmem:[#allocation7 + $0x1dd8] sm:$0xff] }
 0x397   :  { %4467 = vmatprep.subr.bf16.mxu1 %v2769_v2  ;;  %v1408_v1 = vld [vmem:[#allocation7 + $0x1e50] sm:$0xff]  ;;  %v2977_v2 = vpack.c.bf16 %v1425_v48, %v1409_v46  ;;  %v833_v30 = vld [vmem:[#allocation7 + $0xc58] sm:$0xff] }
 0x398   :  { %v1424_v43 = vld [vmem:[#allocation7 + $0x1ed0] sm:$0xff]  ;;  %v849_v31 = vld [vmem:[#allocation7 + $0xcd8] sm:$0xff] }
 0x399   :  { %4427 = vmatpush1.bf16.msra.mxu0 %v2512_v7  ;;  %v2720_v7 = vpack.c.bf16 %v912_v0, %v896_v59  ;;  %v864_v15 = vld [vmem:[#allocation7 + $0xd50] sm:$0xff]  ;;  %v1345_v14 = vld [vmem:[#allocation7 + $0x1c58] sm:$0xff] }
 0x39a   :  { %4468 = vmatpush1.bf16.msra.mxu1 %v2768_v11  ;;  %4428 = vmatprep.subr.bf16.mxu0 %v2497_v13  ;;  %v2976_v11 = vpack.c.bf16 %v1424_v43, %v1408_v1  ;;  %v2705_v13 = vpack.c.bf16 %v881_v44, %v865_v3  ;;  %v880_v16 = vld [vmem:[#allocation7 + $0xdd0] sm:$0xff]  ;;  %v1361_v32 = vld [vmem:[#allocation7 + $0x1cd8] sm:$0xff] }
 0x39b   :  { %4469 = vmatprep.subr.bf16.mxu1 %v2753_v27  ;;  %v1376_v18 = vld [vmem:[#allocation7 + $0x1d50] sm:$0xff]  ;;  %v2961_v27 = vpack.c.bf16 %v1393_v6, %v1377_v5  ;;  %v801_v42 = vld [vmem:[#allocation7 + $0xb58] sm:$0xff] }
 0x39c   :  { %v1392_v29 = vld [vmem:[#allocation7 + $0x1dd0] sm:$0xff]  ;;  %v817_v45 = vld [vmem:[#allocation7 + $0xbd8] sm:$0xff] }
 0x39d   :  { %4429 = vmatpush1.bf16.msra.mxu0 %v2496_v35  ;;  %v2704_v35 = vpack.c.bf16 %v880_v16, %v864_v15  ;;  %v832_v38 = vld [vmem:[#allocation7 + $0xc50] sm:$0xff]  ;;  %v1313_v46 = vld [vmem:[#allocation7 + $0x1b58] sm:$0xff] }
 0x39e   :  { %4470 = vmatpush1.bf16.msra.mxu1 %v2752_v36  ;;  %4430 = vmatprep.subr.bf16.mxu0 %v2737_v37  ;;  %v2960_v36 = vpack.c.bf16 %v1392_v29, %v1376_v18  ;;  %v2689_v37 = vpack.c.bf16 %v849_v31, %v833_v30  ;;  %v848_v39 = vld [vmem:[#allocation7 + $0xcd0] sm:$0xff]  ;;  %v1329_v48 = vld [vmem:[#allocation7 + $0x1bd8] sm:$0xff] }
 0x39f   :  { %4471 = vmatprep.subr.bf16.mxu1 %v2993_v25  ;;  %v1344_v26 = vld [vmem:[#allocation7 + $0x1c50] sm:$0xff]  ;;  %v2945_v25 = vpack.c.bf16 %v1361_v32, %v1345_v14  ;;  %v769_v3 = vld [vmem:[#allocation7 + $0xa58] sm:$0xff] }
 0x3a0   :  { %v1360_v41 = vld [vmem:[#allocation7 + $0x1cd0] sm:$0xff]  ;;  %v785_v44 = vld [vmem:[#allocation7 + $0xad8] sm:$0xff] }
 0x3a1   :  { %4431 = vmatpush2.bf16.msra.mxu0 %v2736_v51  ;;  %v2688_v51 = vpack.c.bf16 %v848_v39, %v832_v38  ;;  %v800_v59 = vld [vmem:[#allocation7 + $0xb50] sm:$0xff]  ;;  %v1281_v5 = vld [vmem:[#allocation7 + $0x1a58] sm:$0xff] }
 0x3a2   :  { %4472 = vmatpush2.bf16.msra.mxu1 %v2992_v54  ;;  %4432 = vmatprep.subr.bf16.mxu0 %v2721_v55  ;;  %v2944_v54 = vpack.c.bf16 %v1360_v41, %v1344_v26  ;;  %v2673_v55 = vpack.c.bf16 %v817_v45, %v801_v42  ;;  %v816_v0 = vld [vmem:[#allocation7 + $0xbd0] sm:$0xff]  ;;  %v1297_v6 = vld [vmem:[#allocation7 + $0x1ad8] sm:$0xff] }
 0x3a3   :  { %4473 = vmatprep.subr.bf16.mxu1 %v2977_v2  ;;  %v1312_v1 = vld [vmem:[#allocation7 + $0x1b50] sm:$0xff]  ;;  %v2929_v2 = vpack.c.bf16 %v1329_v48, %v1313_v46  ;;  %v737_v30 = vld [vmem:[#allocation7 + $0x958] sm:$0xff] }
 0x3a4   :  { %v1328_v43 = vld [vmem:[#allocation7 + $0x1bd0] sm:$0xff]  ;;  %v753_v31 = vld [vmem:[#allocation7 + $0x9d8] sm:$0xff] }
 0x3a5   :  { %4433 = vmatpush2.bf16.msra.mxu0 %v2720_v7  ;;  %v2672_v7 = vpack.c.bf16 %v816_v0, %v800_v59  ;;  %v768_v15 = vld [vmem:[#allocation7 + $0xa50] sm:$0xff]  ;;  %v1249_v14 = vld [vmem:[#allocation7 + $0x1958] sm:$0xff] }
 0x3a6   :  { %4474 = vmatpush2.bf16.msra.mxu1 %v2976_v11  ;;  %4434 = vmatprep.subr.bf16.mxu0 %v2705_v13  ;;  %v2928_v11 = vpack.c.bf16 %v1328_v43, %v1312_v1  ;;  %v2657_v13 = vpack.c.bf16 %v785_v44, %v769_v3  ;;  %v784_v16 = vld [vmem:[#allocation7 + $0xad0] sm:$0xff]  ;;  %v1265_v32 = vld [vmem:[#allocation7 + $0x19d8] sm:$0xff] }
 0x3a7   :  { %4475 = vmatprep.subr.bf16.mxu1 %v2961_v27  ;;  %v1280_v18 = vld [vmem:[#allocation7 + $0x1a50] sm:$0xff]  ;;  %v2913_v27 = vpack.c.bf16 %v1297_v6, %v1281_v5  ;;  %v705_v42 = vld [vmem:[#allocation7 + $0x858] sm:$0xff] }
 0x3a8   :  { %v1296_v29 = vld [vmem:[#allocation7 + $0x1ad0] sm:$0xff]  ;;  %v721_v45 = vld [vmem:[#allocation7 + $0x8d8] sm:$0xff] }
 0x3a9   :  { %4435 = vmatpush2.bf16.msra.mxu0 %v2704_v35  ;;  %v2656_v35 = vpack.c.bf16 %v784_v16, %v768_v15  ;;  %v736_v38 = vld [vmem:[#allocation7 + $0x950] sm:$0xff]  ;;  %v1217_v46 = vld [vmem:[#allocation7 + $0x1858] sm:$0xff] }
 0x3aa   :  { %4476 = vmatpush2.bf16.msra.mxu1 %v2960_v36  ;;  %4436 = vmatprep.subr.bf16.mxu0 %v2689_v37  ;;  %v2912_v36 = vpack.c.bf16 %v1296_v29, %v1280_v18  ;;  %v2641_v37 = vpack.c.bf16 %v753_v31, %v737_v30  ;;  %v752_v39 = vld [vmem:[#allocation7 + $0x9d0] sm:$0xff]  ;;  %v1233_v48 = vld [vmem:[#allocation7 + $0x18d8] sm:$0xff] }
 0x3ab   :  { %4477 = vmatprep.subr.bf16.mxu1 %v2945_v25  ;;  %v1248_v26 = vld [vmem:[#allocation7 + $0x1950] sm:$0xff]  ;;  %v2897_v25 = vpack.c.bf16 %v1265_v32, %v1249_v14  ;;  %v1697_v3 = vld [vmem:[#allocation7 + $0x2758] sm:$0xff] }
 0x3ac   :  { %v1264_v41 = vld [vmem:[#allocation7 + $0x19d0] sm:$0xff]  ;;  %v1713_v44 = vld [vmem:[#allocation7 + $0x27d8] sm:$0xff] }
 0x3ad   :  { %4437 = vmatpush2.bf16.msra.mxu0 %v2688_v51  ;;  %v2640_v51 = vpack.c.bf16 %v752_v39, %v736_v38  ;;  %v704_v59 = vld [vmem:[#allocation7 + $0x850] sm:$0xff]  ;;  %v2209_v5 = vld [vmem:[#allocation7 + $0x3758] sm:$0xff] }
 0x3ae   :  { %4478 = vmatpush2.bf16.msra.mxu1 %v2944_v54  ;;  %4438 = vmatprep.subr.bf16.mxu0 %v2673_v55  ;;  %v2896_v54 = vpack.c.bf16 %v1264_v41, %v1248_v26  ;;  %v2625_v55 = vpack.c.bf16 %v721_v45, %v705_v42  ;;  %v720_v0 = vld [vmem:[#allocation7 + $0x8d0] sm:$0xff]  ;;  %v2225_v6 = vld [vmem:[#allocation7 + $0x37d8] sm:$0xff] }
 0x3af   :  { %4479 = vmatprep.subr.bf16.mxu1 %v2929_v2  ;;  %v1216_v1 = vld [vmem:[#allocation7 + $0x1850] sm:$0xff]  ;;  %v2881_v2 = vpack.c.bf16 %v1233_v48, %v1217_v46  ;;  %v3377_v18 = vpack.c.bf16 %v2225_v6, %v2209_v5  ;;  %v1665_v30 = vld [vmem:[#allocation7 + $0x2658] sm:$0xff] }
 0x3b0   :  { %v1232_v43 = vld [vmem:[#allocation7 + $0x18d0] sm:$0xff]  ;;  %v1681_v31 = vld [vmem:[#allocation7 + $0x26d8] sm:$0xff] }
 0x3b1   :  { %4439 = vmatpush2.bf16.msra.mxu0 %v2672_v7  ;;  %v2624_v7 = vpack.c.bf16 %v720_v0, %v704_v59  ;;  %v1696_v15 = vld [vmem:[#allocation7 + $0x2750] sm:$0xff]  ;;  %v2177_v32 = vld [vmem:[#allocation7 + $0x3658] sm:$0xff]  ;;  %v3105_v26 = vpack.c.bf16 %v1681_v31, %v1665_v30 }
 0x3b2   :  { %4480 = vmatpush2.bf16.msra.mxu1 %v2928_v11  ;;  %4440 = vmatprep.subr.bf16.mxu0 %v2657_v13  ;;  %v2880_v11 = vpack.c.bf16 %v1232_v43, %v1216_v1  ;;  %v3121_v13 = vpack.c.bf16 %v1713_v44, %v1697_v3  ;;  %v1712_v16 = vld [vmem:[#allocation7 + $0x27d0] sm:$0xff]  ;;  %v1633_v41 = vld [vmem:[#allocation7 + $0x2558] sm:$0xff] }
 0x3b3   :  { %4481 = vmatprep.subr.bf16.mxu1 %v2913_v27  ;;  %v2208_v27 = vld [vmem:[#allocation7 + $0x3750] sm:$0xff]  ;;  %v3120_v14 = vpack.c.bf16 %v1712_v16, %v1696_v15  ;;  %v1649_v42 = vld [vmem:[#allocation7 + $0x25d8] sm:$0xff] }
 0x3b4   :  { %v2224_v29 = vld [vmem:[#allocation7 + $0x37d0] sm:$0xff]  ;;  %v2145_v48 = vld [vmem:[#allocation7 + $0x3558] sm:$0xff] }
 0x3b5   :  { %4441 = vmatpush2.bf16.msra.mxu0 %v2656_v35  ;;  %v2193_v35 = vld [vmem:[#allocation7 + $0x36d8] sm:$0xff]  ;;  %v1680_v38 = vld [vmem:[#allocation7 + $0x26d0] sm:$0xff] }
 0x3b6   :  { %4482 = vmatpush2.bf16.msra.mxu1 %v2912_v36  ;;  %4442 = vmatprep.subr.bf16.mxu0 %v2641_v37  ;;  %v3376_v36 = vpack.c.bf16 %v2224_v29, %v2208_v27  ;;  %v1664_v37 = vld [vmem:[#allocation7 + $0x2650] sm:$0xff]  ;;  %v3361_v46 = vpack.c.bf16 %v2193_v35, %v2177_v32  ;;  %v1617_v15 = vld [vmem:[#allocation7 + $0x24d8] sm:$0xff] }
 0x3b7   :  { %4483 = vmatprep.subr.bf16.mxu1 %v2897_v25  ;;  %v2176_v39 = vld [vmem:[#allocation7 + $0x3650] sm:$0xff]  ;;  %v3104_v59 = vpack.c.bf16 %v1680_v38, %v1664_v37  ;;  %v2129_v27 = vld [vmem:[#allocation7 + $0x34d8] sm:$0xff] }
 0x3b8   :  { %v2192_v25 = vld [vmem:[#allocation7 + $0x36d0] sm:$0xff] }
 0x3b9   :  { %4443 = vmatpush2.bf16.msra.mxu0 %v2640_v51  ;;  %v2161_v51 = vld [vmem:[#allocation7 + $0x35d8] sm:$0xff]  ;;  %v3360_v1 = vpack.c.bf16 %v2192_v25, %v2176_v39  ;;  %v1632_v43 = vld [vmem:[#allocation7 + $0x2550] sm:$0xff] }
 0x3ba   :  { %4484 = vmatpush2.bf16.msra.mxu1 %v2896_v54  ;;  %4444 = vmatprep.subr.bf16.mxu0 %v2625_v55  ;;  %v1648_v3 = vld [vmem:[#allocation7 + $0x25d0] sm:$0xff]  ;;  %v1569_v25 = vld [vmem:[#allocation7 + $0x2358] sm:$0xff] }
 0x3bb   :  { %4485 = vmatprep.subr.bf16.mxu1 %v2881_v2  ;;  %v3089_v2 = vpack.c.bf16 %v1649_v42, %v1633_v41  ;;  %v2144_v44 = vld [vmem:[#allocation7 + $0x3550] sm:$0xff]  ;;  %v3088_v31 = vpack.c.bf16 %v1648_v3, %v1632_v43  ;;  %v1585_v41 = vld [vmem:[#allocation7 + $0x23d8] sm:$0xff] }
 0x3bc   :  { %v1600_v35 = vld [vmem:[#allocation7 + $0x2450] sm:$0xff]  ;;  %v2081_v42 = vld [vmem:[#allocation7 + $0x3358] sm:$0xff] }
 0x3bd   :  { %4445 = vmatpush2.bf16.msra.mxu0 %v2624_v7  ;;  %v3345_v7 = vpack.c.bf16 %v2161_v51, %v2145_v48  ;;  %v2112_v37 = vld [vmem:[#allocation7 + $0x3450] sm:$0xff]  ;;  %v3057_v51 = vpack.c.bf16 %v1585_v41, %v1569_v25  ;;  %v1553_v43 = vld [vmem:[#allocation7 + $0x22d8] sm:$0xff] }
 0x3be   :  { %4486 = vmatpush2.bf16.msra.mxu1 %v2880_v11  ;;  %4496 = vmatprep.subr.bf16.mxu0 %v3121_v13  ;;  %v2160_v11 = vld [vmem:[#allocation7 + $0x35d0] sm:$0xff]  ;;  %v1601_v13 = vld [vmem:[#allocation7 + $0x2458] sm:$0xff] }
 0x3bf   :  { %4537 = vmatprep.subr.bf16.mxu1 %v3377_v18  ;;  %v2113_v18 = vld [vmem:[#allocation7 + $0x3458] sm:$0xff]  ;;  %v3344_v32 = vpack.c.bf16 %v2160_v11, %v2144_v44  ;;  %v1536_v11 = vld [vmem:[#allocation7 + $0x2250] sm:$0xff] }
 0x3c0   :  { %v4202_v45 = vpop.f32.mrf.mxu0  ;;  %4447 = vmatmul.mubr.bf16.vlgmr.msra.gmra.mxu0 %v9281_v57  ;;  %v3329_v39 = vpack.c.bf16 %v2129_v27, %v2113_v18  ;;  %v2049_v3 = vld [vmem:[#allocation7 + $0x3258] sm:$0xff]  ;;  %v2064_v18 = vld [vmem:[#allocation7 + $0x32d0] sm:$0xff] }
 0x3c1   :  { %v4203_v54 = vadd.f32 %v4202_v45, %v9404_v33  ;;  %v4243_v55 = vpop.f32.mrf.mxu1  ;;  %4488 = vmatmul.mubr.bf16.vlgmr.msra.gmra.mxu1 %v9274_v52  ;;  %4497 = vmatpush1.bf16.msra.mxu0 %v3120_v14  ;;  %v2097_v45 = vld [vmem:[#allocation7 + $0x33d8] sm:$0xff] }
 0x3c2   :  { %4528 = vmatprep.mubr.bf16.mxu0 %v9300_v47  ;;  %4538 = vmatpush1.bf16.msra.mxu1 %v3376_v36  ;;  %v4204_v0 = vpop.f32.mrf.mxu0  ;;  %v1616_v36 = vld [vmem:[#allocation7 + $0x24d0] sm:$0xff]  ;;  %v2065_v44 = vld [vmem:[#allocation7 + $0x32d8] sm:$0xff] }
 0x3c3   :  { %v9413_v5 = vadd.f32 %v4243_v55, %v4203_v54  ;;  %4569 = vmatprep.mubr.bf16.mxu1 %v9302_v62  ;;  %v4205_v33 = vadd.f32 %v4204_v0, %v9407_v21  ;;  %v4245_v6 = vpop.f32.mrf.mxu1  ;;  %4498 = vmatprep.subr.bf16.mxu0 %v3105_v26  ;;  %v3073_v21 = vpack.c.bf16 %v1617_v15, %v1601_v13  ;;  %v2128_v26 = vld [vmem:[#allocation7 + $0x34d0] sm:$0xff]  ;;  %v1505_v27 = vld [vmem:[#allocation7 + $0x2158] sm:$0xff] }
 0x3c4   :  { %v4206_v16 = vpop.f32.mrf.mxu0  ;;  %4539 = vmatprep.subr.bf16.mxu1 %v3361_v46  ;;  %v3072_v46 = vpack.c.bf16 %v1616_v36, %v1600_v35  ;;  %v3328_v48 = vpack.c.bf16 %v2128_v26, %v2112_v37  ;;  %v1568_v54 = vld [vmem:[#allocation7 + $0x2350] sm:$0xff]  ;;  %v3313_v0 = vpack.c.bf16 %v2097_v45, %v2081_v42  ;;  %v1473_v25 = vld [vmem:[#allocation7 + $0x2058] sm:$0xff] }
 0x3c5   :  { %v9417_v29 = vadd.f32 %v4245_v6, %v4205_v33  ;;  %v4247_v30 = vpop.f32.mrf.mxu1  ;;  %4499 = vmatpush1.bf16.msra.mxu0 %v3104_v59  ;;  %v1584_v55 = vld [vmem:[#allocation7 + $0x23d0] sm:$0xff]  ;;  %v3297_v16 = vpack.c.bf16 %v2065_v44, %v2049_v3  ;;  %v1489_v41 = vld [vmem:[#allocation7 + $0x20d8] sm:$0xff] }
 0x3c6   :  { %4540 = vmatpush1.bf16.msra.mxu1 %v3360_v1  ;;  %v4207_v14 = vpop.f32.mrf.mxu0  ;;  %4500 = vmatprep.subr.bf16.mxu0 %v3089_v2  ;;  %v2080_v59 = vld [vmem:[#allocation7 + $0x3350] sm:$0xff]  ;;  %v1537_v2 = vld [vmem:[#allocation7 + $0x2258] sm:$0xff]  ;;  %v3056_v33 = vpack.c.bf16 %v1584_v55, %v1568_v54 }
 0x3c7   :  { %v4248_v38 = vpop.f32.mrf.mxu1  ;;  %4541 = vmatprep.subr.bf16.mxu1 %v3345_v7  ;;  %v2096_v1 = vld [vmem:[#allocation7 + $0x33d0] sm:$0xff]  ;;  %v3041_v7 = vpack.c.bf16 %v1553_v43, %v1537_v2  ;;  %v1521_v30 = vld [vmem:[#allocation7 + $0x21d8] sm:$0xff] }
 0x3c8   :  { %v3312_v6 = vpack.c.bf16 %v2096_v1, %v2080_v59  ;;  %v1552_v13 = vld [vmem:[#allocation7 + $0x22d0] sm:$0xff]  ;;  %v2033_v14 = vld [vmem:[#allocation7 + $0x31d8] sm:$0xff]  ;;  %v3025_v35 = vpack.c.bf16 %v1521_v30, %v1505_v27 }
 0x3c9   :  { %4501 = vmatpush1.bf16.msra.mxu0 %v3088_v31  ;;  %v2048_v15 = vld [vmem:[#allocation7 + $0x3250] sm:$0xff]  ;;  %v2017_v31 = vld [vmem:[#allocation7 + $0x3158] sm:$0xff] }
 0x3ca   :  { %4542 = vmatpush1.bf16.msra.mxu1 %v3344_v32  ;;  %4502 = vmatprep.subr.bf16.mxu0 %v3073_v21  ;;  %v3040_v32 = vpack.c.bf16 %v1552_v13, %v1536_v11  ;;  %v3296_v21 = vpack.c.bf16 %v2064_v18, %v2048_v15  ;;  %v1504_v36 = vld [vmem:[#allocation7 + $0x2150] sm:$0xff]  ;;  %v1985_v42 = vld [vmem:[#allocation7 + $0x3058] sm:$0xff] }
 0x3cb   :  { %4543 = vmatprep.subr.bf16.mxu1 %v3329_v39  ;;  %v1520_v37 = vld [vmem:[#allocation7 + $0x21d0] sm:$0xff]  ;;  %v3281_v39 = vpack.c.bf16 %v2033_v14, %v2017_v31  ;;  %v2001_v45 = vld [vmem:[#allocation7 + $0x30d8] sm:$0xff] }
 0x3cc   :  { %v2016_v38 = vld [vmem:[#allocation7 + $0x3150] sm:$0xff]  ;;  %v1953_v2 = vld [vmem:[#allocation7 + $0x2f58] sm:$0xff] }
 0x3cd   :  { %4503 = vmatpush1.bf16.msra.mxu0 %v3072_v46  ;;  %v2032_v26 = vld [vmem:[#allocation7 + $0x31d0] sm:$0xff]  ;;  %v3024_v46 = vpack.c.bf16 %v1520_v37, %v1504_v36  ;;  %v1969_v43 = vld [vmem:[#allocation7 + $0x2fd8] sm:$0xff] }
 0x3ce   :  { %4544 = vmatpush1.bf16.msra.mxu1 %v3328_v48  ;;  %4504 = vmatprep.subr.bf16.mxu0 %v3057_v51  ;;  %v3280_v48 = vpack.c.bf16 %v2032_v26, %v2016_v38  ;;  %v3009_v51 = vpack.c.bf16 %v1489_v41, %v1473_v25  ;;  %v1472_v54 = vld [vmem:[#allocation7 + $0x2050] sm:$0xff]  ;;  %v2465_v3 = vld [vmem:[#allocation7 + $0x3f58] sm:$0xff] }
 0x3cf   :  { %4545 = vmatprep.subr.bf16.mxu1 %v3313_v0  ;;  %v1488_v55 = vld [vmem:[#allocation7 + $0x20d0] sm:$0xff]  ;;  %v3265_v0 = vpack.c.bf16 %v2001_v45, %v1985_v42  ;;  %v2481_v44 = vld [vmem:[#allocation7 + $0x3fd8] sm:$0xff] }
 0x3d0   :  { %v1984_v59 = vld [vmem:[#allocation7 + $0x3050] sm:$0xff]  ;;  %v1921_v27 = vld [vmem:[#allocation7 + $0x2e58] sm:$0xff] }
 0x3d1   :  { %4505 = vmatpush1.bf16.msra.mxu0 %v3056_v33  ;;  %v2000_v1 = vld [vmem:[#allocation7 + $0x30d0] sm:$0xff]  ;;  %v3008_v33 = vpack.c.bf16 %v1488_v55, %v1472_v54  ;;  %v1937_v30 = vld [vmem:[#allocation7 + $0x2ed8] sm:$0xff] }
 0x3d2   :  { %4546 = vmatpush1.bf16.msra.mxu1 %v3312_v6  ;;  %4506 = vmatprep.subr.bf16.mxu0 %v3041_v7  ;;  %v3264_v6 = vpack.c.bf16 %v2000_v1, %v1984_v59  ;;  %v3249_v7 = vpack.c.bf16 %v1969_v43, %v1953_v2  ;;  %v1952_v11 = vld [vmem:[#allocation7 + $0x2f50] sm:$0xff]  ;;  %v2433_v31 = vld [vmem:[#allocation7 + $0x3e58] sm:$0xff] }
 0x3d3   :  { %4547 = vmatprep.subr.bf16.mxu1 %v3297_v16  ;;  %v1968_v13 = vld [vmem:[#allocation7 + $0x2fd0] sm:$0xff]  ;;  %v3505_v16 = vpack.c.bf16 %v2481_v44, %v2465_v3  ;;  %v2449_v14 = vld [vmem:[#allocation7 + $0x3ed8] sm:$0xff] }
 0x3d4   :  { %v2464_v15 = vld [vmem:[#allocation7 + $0x3f50] sm:$0xff]  ;;  %v1889_v25 = vld [vmem:[#allocation7 + $0x2d58] sm:$0xff] }
 0x3d5   :  { %4507 = vmatpush1.bf16.msra.mxu0 %v3040_v32  ;;  %v2480_v18 = vld [vmem:[#allocation7 + $0x3fd0] sm:$0xff]  ;;  %v3248_v32 = vpack.c.bf16 %v1968_v13, %v1952_v11  ;;  %v1905_v41 = vld [vmem:[#allocation7 + $0x2dd8] sm:$0xff] }
 0x3d6   :  { %4548 = vmatpush1.bf16.msra.mxu1 %v3296_v21  ;;  %4508 = vmatprep.subr.bf16.mxu0 %v3025_v35  ;;  %v3504_v21 = vpack.c.bf16 %v2480_v18, %v2464_v15  ;;  %v3233_v35 = vpack.c.bf16 %v1937_v30, %v1921_v27  ;;  %v1920_v36 = vld [vmem:[#allocation7 + $0x2e50] sm:$0xff]  ;;  %v2401_v42 = vld [vmem:[#allocation7 + $0x3d58] sm:$0xff] }
 0x3d7   :  { %4549 = vmatprep.subr.bf16.mxu1 %v3281_v39  ;;  %v1936_v37 = vld [vmem:[#allocation7 + $0x2ed0] sm:$0xff]  ;;  %v3489_v39 = vpack.c.bf16 %v2449_v14, %v2433_v31  ;;  %v2417_v45 = vld [vmem:[#allocation7 + $0x3dd8] sm:$0xff] }
 0x3d8   :  { %v2432_v38 = vld [vmem:[#allocation7 + $0x3e50] sm:$0xff]  ;;  %v1857_v2 = vld [vmem:[#allocation7 + $0x2c58] sm:$0xff] }
 0x3d9   :  { %4509 = vmatpush1.bf16.msra.mxu0 %v3024_v46  ;;  %v2448_v26 = vld [vmem:[#allocation7 + $0x3ed0] sm:$0xff]  ;;  %v3232_v46 = vpack.c.bf16 %v1936_v37, %v1920_v36  ;;  %v1873_v43 = vld [vmem:[#allocation7 + $0x2cd8] sm:$0xff] }
 0x3da   :  { %4550 = vmatpush1.bf16.msra.mxu1 %v3280_v48  ;;  %4510 = vmatprep.subr.bf16.mxu0 %v3009_v51  ;;  %v3488_v48 = vpack.c.bf16 %v2448_v26, %v2432_v38  ;;  %v3217_v51 = vpack.c.bf16 %v1905_v41, %v1889_v25  ;;  %v1888_v54 = vld [vmem:[#allocation7 + $0x2d50] sm:$0xff]  ;;  %v2369_v3 = vld [vmem:[#allocation7 + $0x3c58] sm:$0xff] }
 0x3db   :  { %4551 = vmatprep.subr.bf16.mxu1 %v3265_v0  ;;  %v1904_v55 = vld [vmem:[#allocation7 + $0x2dd0] sm:$0xff]  ;;  %v3473_v0 = vpack.c.bf16 %v2417_v45, %v2401_v42  ;;  %v2385_v44 = vld [vmem:[#allocation7 + $0x3cd8] sm:$0xff] }
 0x3dc   :  { %v2400_v59 = vld [vmem:[#allocation7 + $0x3d50] sm:$0xff]  ;;  %v1825_v27 = vld [vmem:[#allocation7 + $0x2b58] sm:$0xff] }
 0x3dd   :  { %4511 = vmatpush1.bf16.msra.mxu0 %v3008_v33  ;;  %v2416_v1 = vld [vmem:[#allocation7 + $0x3dd0] sm:$0xff]  ;;  %v3216_v33 = vpack.c.bf16 %v1904_v55, %v1888_v54  ;;  %v1841_v30 = vld [vmem:[#allocation7 + $0x2bd8] sm:$0xff] }
 0x3de   :  { %4552 = vmatpush1.bf16.msra.mxu1 %v3264_v6  ;;  %4512 = vmatprep.subr.bf16.mxu0 %v3249_v7  ;;  %v3472_v6 = vpack.c.bf16 %v2416_v1, %v2400_v59  ;;  %v3201_v7 = vpack.c.bf16 %v1873_v43, %v1857_v2  ;;  %v1856_v11 = vld [vmem:[#allocation7 + $0x2c50] sm:$0xff]  ;;  %v2337_v31 = vld [vmem:[#allocation7 + $0x3b58] sm:$0xff] }
 0x3df   :  { %4553 = vmatprep.subr.bf16.mxu1 %v3505_v16  ;;  %v1872_v13 = vld [vmem:[#allocation7 + $0x2cd0] sm:$0xff]  ;;  %v3457_v16 = vpack.c.bf16 %v2385_v44, %v2369_v3  ;;  %v2353_v14 = vld [vmem:[#allocation7 + $0x3bd8] sm:$0xff] }
 0x3e0   :  { %v2368_v15 = vld [vmem:[#allocation7 + $0x3c50] sm:$0xff]  ;;  %v1793_v25 = vld [vmem:[#allocation7 + $0x2a58] sm:$0xff] }
 0x3e1   :  { %4513 = vmatpush2.bf16.msra.mxu0 %v3248_v32  ;;  %v2384_v18 = vld [vmem:[#allocation7 + $0x3cd0] sm:$0xff]  ;;  %v3200_v32 = vpack.c.bf16 %v1872_v13, %v1856_v11  ;;  %v1809_v41 = vld [vmem:[#allocation7 + $0x2ad8] sm:$0xff] }
 0x3e2   :  { %4554 = vmatpush2.bf16.msra.mxu1 %v3504_v21  ;;  %4514 = vmatprep.subr.bf16.mxu0 %v3233_v35  ;;  %v3456_v21 = vpack.c.bf16 %v2384_v18, %v2368_v15  ;;  %v3185_v35 = vpack.c.bf16 %v1841_v30, %v1825_v27  ;;  %v1824_v36 = vld [vmem:[#allocation7 + $0x2b50] sm:$0xff]  ;;  %v2305_v42 = vld [vmem:[#allocation7 + $0x3a58] sm:$0xff] }
 0x3e3   :  { %4555 = vmatprep.subr.bf16.mxu1 %v3489_v39  ;;  %v1840_v37 = vld [vmem:[#allocation7 + $0x2bd0] sm:$0xff]  ;;  %v3441_v39 = vpack.c.bf16 %v2353_v14, %v2337_v31  ;;  %v2321_v45 = vld [vmem:[#allocation7 + $0x3ad8] sm:$0xff] }
 0x3e4   :  { %v2336_v38 = vld [vmem:[#allocation7 + $0x3b50] sm:$0xff]  ;;  %v1761_v2 = vld [vmem:[#allocation7 + $0x2958] sm:$0xff] }
 0x3e5   :  { %4515 = vmatpush2.bf16.msra.mxu0 %v3232_v46  ;;  %v2352_v26 = vld [vmem:[#allocation7 + $0x3bd0] sm:$0xff]  ;;  %v3184_v46 = vpack.c.bf16 %v1840_v37, %v1824_v36  ;;  %v1777_v43 = vld [vmem:[#allocation7 + $0x29d8] sm:$0xff] }
 0x3e6   :  { %4556 = vmatpush2.bf16.msra.mxu1 %v3488_v48  ;;  %4516 = vmatprep.subr.bf16.mxu0 %v3217_v51  ;;  %v3440_v48 = vpack.c.bf16 %v2352_v26, %v2336_v38  ;;  %v3169_v51 = vpack.c.bf16 %v1809_v41, %v1793_v25  ;;  %v1792_v54 = vld [vmem:[#allocation7 + $0x2a50] sm:$0xff]  ;;  %v2273_v3 = vld [vmem:[#allocation7 + $0x3958] sm:$0xff]  ;;  %v675_v25 = vld [vmem:[#allocation7 + $0x768] sm:$0xff] }
 0x3e7   :  { %4557 = vmatprep.subr.bf16.mxu1 %v3473_v0  ;;  %v1808_v55 = vld [vmem:[#allocation7 + $0x2ad0] sm:$0xff]  ;;  %v3425_v0 = vpack.c.bf16 %v2321_v45, %v2305_v42  ;;  %v2289_v44 = vld [vmem:[#allocation7 + $0x39d8] sm:$0xff]  ;;  %v691_v41 = vld [vmem:[#allocation7 + $0x7e8] sm:$0xff] }
 0x3e8   :  { %v2304_v59 = vld [vmem:[#allocation7 + $0x3a50] sm:$0xff]  ;;  %v1729_v27 = vld [vmem:[#allocation7 + $0x2858] sm:$0xff]  ;;  %v1187_v42 = vld [vmem:[#allocation7 + $0x1768] sm:$0xff] }
 0x3e9   :  { %4517 = vmatpush2.bf16.msra.mxu0 %v3216_v33  ;;  %v2320_v1 = vld [vmem:[#allocation7 + $0x3ad0] sm:$0xff]  ;;  %v3168_v33 = vpack.c.bf16 %v1808_v55, %v1792_v54  ;;  %v1745_v30 = vld [vmem:[#allocation7 + $0x28d8] sm:$0xff]  ;;  %v1203_v45 = vld [vmem:[#allocation7 + $0x17e8] sm:$0xff]  ;;  %v2611_v54 = vpack.c.bf16 %v691_v41, %v675_v25 }
 0x3ea   :  { %4558 = vmatpush2.bf16.msra.mxu1 %v3472_v6  ;;  %4518 = vmatprep.subr.bf16.mxu0 %v3201_v7  ;;  %v3424_v6 = vpack.c.bf16 %v2320_v1, %v2304_v59  ;;  %v3153_v7 = vpack.c.bf16 %v1777_v43, %v1761_v2  ;;  %v1760_v11 = vld [vmem:[#allocation7 + $0x2950] sm:$0xff]  ;;  %v2241_v31 = vld [vmem:[#allocation7 + $0x3858] sm:$0xff]  ;;  %v674_v55 = vld [vmem:[#allocation7 + $0x760] sm:$0xff] }
 0x3eb   :  { %4559 = vmatprep.subr.bf16.mxu1 %v3457_v16  ;;  %v1776_v13 = vld [vmem:[#allocation7 + $0x29d0] sm:$0xff]  ;;  %v3409_v16 = vpack.c.bf16 %v2289_v44, %v2273_v3  ;;  %v2257_v14 = vld [vmem:[#allocation7 + $0x38d8] sm:$0xff]  ;;  %v690_v59 = vld [vmem:[#allocation7 + $0x7e0] sm:$0xff] }
 0x3ec   :  { %v2272_v15 = vld [vmem:[#allocation7 + $0x3950] sm:$0xff]  ;;  %v1186_v1 = vld [vmem:[#allocation7 + $0x1760] sm:$0xff]  ;;  %v643_v43 = vld [vmem:[#allocation7 + $0x668] sm:$0xff] }
 0x3ed   :  { %4519 = vmatpush2.bf16.msra.mxu0 %v3200_v32  ;;  %v2288_v18 = vld [vmem:[#allocation7 + $0x39d0] sm:$0xff]  ;;  %v3152_v32 = vpack.c.bf16 %v1776_v13, %v1760_v11  ;;  %v1202_v2 = vld [vmem:[#allocation7 + $0x17e0] sm:$0xff]  ;;  %v659_v3 = vld [vmem:[#allocation7 + $0x6e8] sm:$0xff] }
 0x3ee   :  { %4560 = vmatpush2.bf16.msra.mxu1 %v3456_v21  ;;  %4520 = vmatprep.subr.bf16.mxu0 %v3185_v35  ;;  %v3408_v21 = vpack.c.bf16 %v2288_v18, %v2272_v15  ;;  %v3137_v35 = vpack.c.bf16 %v1745_v30, %v1729_v27  ;;  %v1728_v36 = vld [vmem:[#allocation7 + $0x2850] sm:$0xff]  ;;  %v2866_v11 = vpack.c.bf16 %v1202_v2, %v1186_v1  ;;  %v642_v13 = vld [vmem:[#allocation7 + $0x660] sm:$0xff]  ;;  %v595_v1 = vld [vmem:[#allocation7 + $0x4e8] sm:$0xff] }
 0x3ef   :  { %4561 = vmatprep.subr.bf16.mxu1 %v3441_v39  ;;  %v1744_v37 = vld [vmem:[#allocation7 + $0x28d0] sm:$0xff]  ;;  %v3393_v39 = vpack.c.bf16 %v2257_v14, %v2241_v31  ;;  %v658_v15 = vld [vmem:[#allocation7 + $0x6e0] sm:$0xff]  ;;  %v2595_v27 = vpack.c.bf16 %v659_v3, %v643_v43  ;;  %v611_v31 = vld [vmem:[#allocation7 + $0x568] sm:$0xff] }
 0x3f0   :  { %v2240_v38 = vld [vmem:[#allocation7 + $0x3850] sm:$0xff]  ;;  %v1170_v30 = vld [vmem:[#allocation7 + $0x16e0] sm:$0xff]  ;;  %v627_v14 = vld [vmem:[#allocation7 + $0x5e8] sm:$0xff] }
 0x3f1   :  { %4521 = vmatpush2.bf16.msra.mxu0 %v3184_v46  ;;  %v2256_v26 = vld [vmem:[#allocation7 + $0x38d0] sm:$0xff]  ;;  %v3136_v46 = vpack.c.bf16 %v1744_v37, %v1728_v36  ;;  %v1139_v36 = vld [vmem:[#allocation7 + $0x15e8] sm:$0xff]  ;;  %v2579_v41 = vpack.c.bf16 %v627_v14, %v611_v31  ;;  %v1106_v31 = vld [vmem:[#allocation7 + $0x14e0] sm:$0xff] }
 0x3f2   :  { %4562 = vmatpush2.bf16.msra.mxu1 %v3440_v48  ;;  %4522 = vmatprep.subr.bf16.mxu0 %v3169_v51  ;;  %v3392_v48 = vpack.c.bf16 %v2256_v26, %v2240_v38  ;;  %v3511_v51 = vld [vmem:[#allocation9 + $0x8] sm:$0xff] }
 0x3f3   :  { %4563 = vmatprep.subr.bf16.mxu1 %v3425_v0  ;;  %v2867_v0 = vpack.c.bf16 %v1203_v45, %v1187_v42  ;;  %v3549_v44 = vrot.slane %v3511_v51, %v9253_v20  ;;  %v3553_v18 = vrot.slane %v3511_v51, %v9261_v23  ;;  %v610_v42 = vld [vmem:[#allocation7 + $0x560] sm:$0xff]  ;;  %v1091_v43 = vld [vmem:[#allocation7 + $0x1468] sm:$0xff] }
 0x3f4   :  { %v626_v45 = vld [vmem:[#allocation7 + $0x5e0] sm:$0xff]  ;;  %v1107_v3 = vld [vmem:[#allocation7 + $0x14e8] sm:$0xff] }
 0x3f5   :  { %4523 = vmatpush2.bf16.msra.mxu0 %v3168_v33  ;;  %v2610_v33 = vpack.c.bf16 %v690_v59, %v674_v55  ;;  %v1138_v59 = vld [vmem:[#allocation7 + $0x15e0] sm:$0xff]  ;;  %v547_v14 = vld [vmem:[#allocation7 + $0x368] sm:$0xff] }
 0x3f6   :  { %4564 = vmatpush2.bf16.msra.mxu1 %v3424_v6  ;;  %4524 = vmatprep.subr.bf16.mxu0 %v3153_v7  ;;  %v1155_v6 = vld [vmem:[#allocation7 + $0x1668] sm:$0xff] }
 0x3f7   :  { %4565 = vmatprep.subr.bf16.mxu1 %v3409_v16  ;;  %v1171_v7 = vld [vmem:[#allocation7 + $0x16e8] sm:$0xff]  ;;  %v1154_v16 = vld [vmem:[#allocation7 + $0x1660] sm:$0xff] }
 0x3f8   :  { %v2850_v25 = vpack.c.bf16 %v1170_v30, %v1154_v16  ;;  %v594_v16 = vld [vmem:[#allocation7 + $0x4e0] sm:$0xff]  ;;  %v2819_v30 = vpack.c.bf16 %v1107_v3, %v1091_v43 }
 0x3f9   :  { %4525 = vmatpush2.bf16.msra.mxu0 %v3152_v32  ;;  %v1026_v43 = vld [vmem:[#allocation7 + $0x1260] sm:$0xff] }
 0x3fa   :  { %4566 = vmatpush2.bf16.msra.mxu1 %v3408_v21  ;;  %4526 = vmatprep.subr.bf16.mxu0 %v3137_v35  ;;  %v2851_v21 = vpack.c.bf16 %v1171_v7, %v1155_v6  ;;  %v1123_v35 = vld [vmem:[#allocation7 + $0x1568] sm:$0xff]  ;;  %v2578_v6 = vpack.c.bf16 %v626_v45, %v610_v42  ;;  %v1074_v42 = vld [vmem:[#allocation7 + $0x13e0] sm:$0xff] }
 0x3fb   :  { %4567 = vmatprep.subr.bf16.mxu1 %v3393_v39  ;;  %v2594_v39 = vpack.c.bf16 %v658_v15, %v642_v13  ;;  %v2835_v55 = vpack.c.bf16 %v1139_v36, %v1123_v35  ;;  %v578_v15 = vld [vmem:[#allocation7 + $0x460] sm:$0xff]  ;;  %v1075_v35 = vld [vmem:[#allocation7 + $0x13e8] sm:$0xff] }
 0x3fc   :  { %v2562_v36 = vpack.c.bf16 %v594_v16, %v578_v15  ;;  %v515_v45 = vld [vmem:[#allocation7 + $0x268] sm:$0xff] }
 0x3fd   :  { %4527 = vmatpush2.bf16.msra.mxu0 %v3136_v46  ;;  %v1122_v46 = vld [vmem:[#allocation7 + $0x1560] sm:$0xff] }
 0x3fe   :  { %4568 = vmatpush2.bf16.msra.mxu1 %v3392_v48  ;;  %4578 = vmatprep.subr.bf16.mxu0 %v2611_v54 }
 0x3ff   :  { %4619 = vmatprep.subr.bf16.mxu1 %v2867_v0  ;;  %v579_v0 = vld [vmem:[#allocation7 + $0x468] sm:$0xff] }
 0x400   :  { %v4284_v32 = vpop.f32.mrf.mxu0  ;;  %4529 = vmatmul.mubr.bf16.vlgmr.msra.gmra.mxu0 %v9320_v17  ;;  %v2563_v13 = vpack.c.bf16 %v595_v1, %v579_v0  ;;  %v514_v1 = vld [vmem:[#allocation7 + $0x260] sm:$0xff] }
 0x401   :  { %v4285_v37 = vadd.f32 %v4284_v32, %v3549_v44  ;;  %v4325_v38 = vpop.f32.mrf.mxu1  ;;  %4570 = vmatmul.mubr.bf16.vlgmr.msra.gmra.mxu1 %v9318_v12  ;;  %4579 = vmatpush1.bf16.msra.mxu0 %v2610_v33  ;;  %v563_v32 = vld [vmem:[#allocation7 + $0x3e8] sm:$0xff] }
 0x402   :  { %4610 = vmatprep.mubr.bf16.mxu0 %v9276_v53  ;;  %4620 = vmatpush1.bf16.msra.mxu1 %v2866_v11  ;;  %v4286_v26 = vpop.f32.mrf.mxu0  ;;  %v2834_v11 = vpack.c.bf16 %v1138_v59, %v1122_v46  ;;  %v531_v46 = vld [vmem:[#allocation7 + $0x2e8] sm:$0xff] }
 0x403   :  { %v9424_v48 = vadd.f32 %v4325_v38, %v4285_v37  ;;  %4651 = vmatprep.mubr.bf16.mxu1 %v9283_v58  ;;  %v4287_v51 = vadd.f32 %v4286_v26, %v3553_v18  ;;  %v4327_v54 = vpop.f32.mrf.mxu1  ;;  %4580 = vmatprep.subr.bf16.mxu0 %v2595_v27  ;;  %v1090_v18 = vld [vmem:[#allocation7 + $0x1460] sm:$0xff]  ;;  %v2547_v38 = vpack.c.bf16 %v563_v32, %v547_v14 }
 0x404   :  { %v4288_v2 = vpop.f32.mrf.mxu0  ;;  %4621 = vmatprep.subr.bf16.mxu1 %v2851_v21  ;;  %v1059_v21 = vld [vmem:[#allocation7 + $0x1368] sm:$0xff]  ;;  %v2818_v37 = vpack.c.bf16 %v1106_v31, %v1090_v18  ;;  %v562_v26 = vld [vmem:[#allocation7 + $0x3e0] sm:$0xff]  ;;  %v2531_v0 = vpack.c.bf16 %v531_v46, %v515_v45 }
 0x405   :  { %v9427_v44 = vadd.f32 %v4327_v54, %v4287_v51  ;;  %v4329_v33 = vpop.f32.mrf.mxu1  ;;  %4581 = vmatpush1.bf16.msra.mxu0 %v2594_v39  ;;  %v546_v39 = vld [vmem:[#allocation7 + $0x360] sm:$0xff]  ;;  %v1027_v51 = vld [vmem:[#allocation7 + $0x1268] sm:$0xff] }
 0x406   :  { %4622 = vmatpush1.bf16.msra.mxu1 %v2850_v25  ;;  %v4289_v7 = vpop.f32.mrf.mxu0  ;;  %4582 = vmatprep.subr.bf16.mxu0 %v2579_v41  ;;  %v1058_v25 = vld [vmem:[#allocation7 + $0x1360] sm:$0xff]  ;;  %v2803_v41 = vpack.c.bf16 %v1075_v35, %v1059_v21  ;;  %v1043_v54 = vld [vmem:[#allocation7 + $0x12e8] sm:$0xff] }
 0x407   :  { %v4330_v27 = vpop.f32.mrf.mxu1  ;;  %4623 = vmatprep.subr.bf16.mxu1 %v2835_v55  ;;  %v2546_v55 = vpack.c.bf16 %v562_v26, %v546_v39  ;;  %v2802_v59 = vpack.c.bf16 %v1074_v42, %v1058_v25  ;;  %v530_v2 = vld [vmem:[#allocation7 + $0x2e0] sm:$0xff]  ;;  %v2787_v3 = vpack.c.bf16 %v1043_v54, %v1027_v51  ;;  %v499_v7 = vld [vmem:[#allocation7 + $0x1e8] sm:$0xff] }
 0x408   :  { %v1042_v33 = vld [vmem:[#allocation7 + $0x12e0] sm:$0xff]  ;;  %v2530_v15 = vpack.c.bf16 %v530_v2, %v514_v1  ;;  %v451_v21 = vld [vmem:[#allocation7 + $0x68] sm:$0xff] }
 0x409   :  { %4583 = vmatpush1.bf16.msra.mxu0 %v2578_v6  ;;  %v483_v6 = vld [vmem:[#allocation7 + $0x168] sm:$0xff]  ;;  %v2786_v16 = vpack.c.bf16 %v1042_v33, %v1026_v43  ;;  %v482_v27 = vld [vmem:[#allocation7 + $0x160] sm:$0xff] }
 0x40a   :  { %4624 = vmatpush1.bf16.msra.mxu1 %v2834_v11  ;;  %4584 = vmatprep.subr.bf16.mxu0 %v2563_v13  ;;  %v995_v11 = vld [vmem:[#allocation7 + $0x1168] sm:$0xff]  ;;  %v2515_v18 = vpack.c.bf16 %v499_v7, %v483_v6  ;;  %v994_v31 = vld [vmem:[#allocation7 + $0x1160] sm:$0xff] }
 0x40b   :  { %4625 = vmatprep.subr.bf16.mxu1 %v2819_v30  ;;  %v1011_v13 = vld [vmem:[#allocation7 + $0x11e8] sm:$0xff]  ;;  %v498_v30 = vld [vmem:[#allocation7 + $0x1e0] sm:$0xff] }
 0x40c   :  { %v2771_v14 = vpack.c.bf16 %v1011_v13, %v995_v11  ;;  %v1010_v32 = vld [vmem:[#allocation7 + $0x11e0] sm:$0xff]  ;;  %v467_v35 = vld [vmem:[#allocation7 + $0xe8] sm:$0xff] }
 0x40d   :  { %4585 = vmatpush1.bf16.msra.mxu0 %v2562_v36  ;;  %v963_v36 = vld [vmem:[#allocation7 + $0x1068] sm:$0xff]  ;;  %v2770_v39 = vpack.c.bf16 %v1010_v32, %v994_v31  ;;  %v2499_v26 = vpack.c.bf16 %v467_v35, %v451_v21  ;;  %v450_v25 = vld [vmem:[#allocation7 + $0x60] sm:$0xff] }
 0x40e   :  { %4626 = vmatpush1.bf16.msra.mxu1 %v2818_v37  ;;  %4586 = vmatprep.subr.bf16.mxu0 %v2547_v38  ;;  %v979_v37 = vld [vmem:[#allocation7 + $0x10e8] sm:$0xff]  ;;  %v2514_v38 = vpack.c.bf16 %v498_v30, %v482_v27  ;;  %v962_v42 = vld [vmem:[#allocation7 + $0x1060] sm:$0xff] }
 0x40f   :  { %4627 = vmatprep.subr.bf16.mxu1 %v2803_v41  ;;  %v466_v41 = vld [vmem:[#allocation7 + $0xe0] sm:$0xff]  ;;  %v2755_v45 = vpack.c.bf16 %v979_v37, %v963_v36  ;;  %v931_v51 = vld [vmem:[#allocation7 + $0xf68] sm:$0xff] }
 0x410   :  { %v978_v46 = vld [vmem:[#allocation7 + $0x10e0] sm:$0xff]  ;;  %v947_v54 = vld [vmem:[#allocation7 + $0xfe8] sm:$0xff] }
 0x411   :  { %4587 = vmatpush1.bf16.msra.mxu0 %v2546_v55  ;;  %v1443_v55 = vld [vmem:[#allocation7 + $0x1f68] sm:$0xff]  ;;  %v2754_v1 = vpack.c.bf16 %v978_v46, %v962_v42  ;;  %v2739_v2 = vpack.c.bf16 %v947_v54, %v931_v51  ;;  %v930_v43 = vld [vmem:[#allocation7 + $0xf60] sm:$0xff] }
 0x412   :  { %4628 = vmatpush1.bf16.msra.mxu1 %v2802_v59  ;;  %4588 = vmatprep.subr.bf16.mxu0 %v2531_v0  ;;  %v1459_v59 = vld [vmem:[#allocation7 + $0x1fe8] sm:$0xff]  ;;  %v2498_v0 = vpack.c.bf16 %v466_v41, %v450_v25  ;;  %v1442_v33 = vld [vmem:[#allocation7 + $0x1f60] sm:$0xff] }
 0x413   :  { %4629 = vmatprep.subr.bf16.mxu1 %v2787_v3  ;;  %v946_v3 = vld [vmem:[#allocation7 + $0xfe0] sm:$0xff]  ;;  %v2995_v6 = vpack.c.bf16 %v1459_v59, %v1443_v55  ;;  %v899_v11 = vld [vmem:[#allocation7 + $0xe68] sm:$0xff] }
 0x414   :  { %v1458_v7 = vld [vmem:[#allocation7 + $0x1fe0] sm:$0xff]  ;;  %v915_v13 = vld [vmem:[#allocation7 + $0xee8] sm:$0xff] }
 0x415   :  { %4589 = vmatpush1.bf16.msra.mxu0 %v2530_v15  ;;  %v1411_v15 = vld [vmem:[#allocation7 + $0x1e68] sm:$0xff]  ;;  %v2994_v27 = vpack.c.bf16 %v1458_v7, %v1442_v33  ;;  %v2723_v30 = vpack.c.bf16 %v915_v13, %v899_v11  ;;  %v898_v31 = vld [vmem:[#allocation7 + $0xe60] sm:$0xff] }
 0x416   :  { %4630 = vmatpush1.bf16.msra.mxu1 %v2786_v16  ;;  %4590 = vmatprep.subr.bf16.mxu0 %v2515_v18  ;;  %v1427_v16 = vld [vmem:[#allocation7 + $0x1ee8] sm:$0xff]  ;;  %v2738_v18 = vpack.c.bf16 %v946_v3, %v930_v43  ;;  %v1410_v32 = vld [vmem:[#allocation7 + $0x1e60] sm:$0xff] }
 0x417   :  { %4631 = vmatprep.subr.bf16.mxu1 %v2771_v14  ;;  %v914_v14 = vld [vmem:[#allocation7 + $0xee0] sm:$0xff]  ;;  %v2979_v21 = vpack.c.bf16 %v1427_v16, %v1411_v15  ;;  %v867_v36 = vld [vmem:[#allocation7 + $0xd68] sm:$0xff] }
 0x418   :  { %v1426_v35 = vld [vmem:[#allocation7 + $0x1ee0] sm:$0xff]  ;;  %v883_v37 = vld [vmem:[#allocation7 + $0xde8] sm:$0xff] }
 0x419   :  { %4591 = vmatpush1.bf16.msra.mxu0 %v2514_v38  ;;  %v1379_v38 = vld [vmem:[#allocation7 + $0x1d68] sm:$0xff]  ;;  %v2978_v25 = vpack.c.bf16 %v1426_v35, %v1410_v32  ;;  %v2707_v41 = vpack.c.bf16 %v883_v37, %v867_v36  ;;  %v866_v42 = vld [vmem:[#allocation7 + $0xd60] sm:$0xff] }
 0x41a   :  { %4632 = vmatpush1.bf16.msra.mxu1 %v2770_v39  ;;  %4592 = vmatprep.subr.bf16.mxu0 %v2499_v26  ;;  %v1395_v39 = vld [vmem:[#allocation7 + $0x1de8] sm:$0xff]  ;;  %v2722_v26 = vpack.c.bf16 %v914_v14, %v898_v31  ;;  %v1378_v46 = vld [vmem:[#allocation7 + $0x1d60] sm:$0xff] }
 0x41b   :  { %4633 = vmatprep.subr.bf16.mxu1 %v2755_v45  ;;  %v882_v45 = vld [vmem:[#allocation7 + $0xde0] sm:$0xff]  ;;  %v2963_v51 = vpack.c.bf16 %v1395_v39, %v1379_v38  ;;  %v835_v55 = vld [vmem:[#allocation7 + $0xc68] sm:$0xff] }
 0x41c   :  { %v1394_v54 = vld [vmem:[#allocation7 + $0x1de0] sm:$0xff]  ;;  %v851_v59 = vld [vmem:[#allocation7 + $0xce8] sm:$0xff] }
 0x41d   :  { %4593 = vmatpush1.bf16.msra.mxu0 %v2498_v0  ;;  %v1347_v0 = vld [vmem:[#allocation7 + $0x1c68] sm:$0xff]  ;;  %v2962_v43 = vpack.c.bf16 %v1394_v54, %v1378_v46  ;;  %v2691_v3 = vpack.c.bf16 %v851_v59, %v835_v55  ;;  %v834_v33 = vld [vmem:[#allocation7 + $0xc60] sm:$0xff] }
 0x41e   :  { %4634 = vmatpush1.bf16.msra.mxu1 %v2754_v1  ;;  %4594 = vmatprep.subr.bf16.mxu0 %v2739_v2  ;;  %v1363_v1 = vld [vmem:[#allocation7 + $0x1ce8] sm:$0xff]  ;;  %v2706_v2 = vpack.c.bf16 %v882_v45, %v866_v42  ;;  %v1346_v7 = vld [vmem:[#allocation7 + $0x1c60] sm:$0xff] }
 0x41f   :  { %4635 = vmatprep.subr.bf16.mxu1 %v2995_v6  ;;  %v850_v6 = vld [vmem:[#allocation7 + $0xce0] sm:$0xff]  ;;  %v2947_v11 = vpack.c.bf16 %v1363_v1, %v1347_v0  ;;  %v803_v15 = vld [vmem:[#allocation7 + $0xb68] sm:$0xff] }
 0x420   :  { %v1362_v13 = vld [vmem:[#allocation7 + $0x1ce0] sm:$0xff]  ;;  %v819_v16 = vld [vmem:[#allocation7 + $0xbe8] sm:$0xff] }
 0x421   :  { %4595 = vmatpush2.bf16.msra.mxu0 %v2738_v18  ;;  %v1315_v18 = vld [vmem:[#allocation7 + $0x1b68] sm:$0xff]  ;;  %v2946_v31 = vpack.c.bf16 %v1362_v13, %v1346_v7  ;;  %v2675_v14 = vpack.c.bf16 %v819_v16, %v803_v15  ;;  %v802_v32 = vld [vmem:[#allocation7 + $0xb60] sm:$0xff] }
 0x422   :  { %4636 = vmatpush2.bf16.msra.mxu1 %v2994_v27  ;;  %4596 = vmatprep.subr.bf16.mxu0 %v2723_v30  ;;  %v1331_v27 = vld [vmem:[#allocation7 + $0x1be8] sm:$0xff]  ;;  %v2690_v30 = vpack.c.bf16 %v850_v6, %v834_v33  ;;  %v1314_v35 = vld [vmem:[#allocation7 + $0x1b60] sm:$0xff] }
 0x423   :  { %4637 = vmatprep.subr.bf16.mxu1 %v2979_v21  ;;  %v818_v21 = vld [vmem:[#allocation7 + $0xbe0] sm:$0xff]  ;;  %v2931_v36 = vpack.c.bf16 %v1331_v27, %v1315_v18  ;;  %v771_v38 = vld [vmem:[#allocation7 + $0xa68] sm:$0xff] }
 0x424   :  { %v1330_v37 = vld [vmem:[#allocation7 + $0x1be0] sm:$0xff]  ;;  %v787_v39 = vld [vmem:[#allocation7 + $0xae8] sm:$0xff] }
 0x425   :  { %4597 = vmatpush2.bf16.msra.mxu0 %v2722_v26  ;;  %v1283_v26 = vld [vmem:[#allocation7 + $0x1a68] sm:$0xff]  ;;  %v2930_v42 = vpack.c.bf16 %v1330_v37, %v1314_v35  ;;  %v2659_v45 = vpack.c.bf16 %v787_v39, %v771_v38  ;;  %v770_v46 = vld [vmem:[#allocation7 + $0xa60] sm:$0xff] }
 0x426   :  { %4638 = vmatpush2.bf16.msra.mxu1 %v2978_v25  ;;  %4598 = vmatprep.subr.bf16.mxu0 %v2707_v41  ;;  %v1299_v25 = vld [vmem:[#allocation7 + $0x1ae8] sm:$0xff]  ;;  %v2674_v41 = vpack.c.bf16 %v818_v21, %v802_v32  ;;  %v1282_v54 = vld [vmem:[#allocation7 + $0x1a60] sm:$0xff] }
 0x427   :  { %4639 = vmatprep.subr.bf16.mxu1 %v2963_v51  ;;  %v786_v51 = vld [vmem:[#allocation7 + $0xae0] sm:$0xff]  ;;  %v2915_v55 = vpack.c.bf16 %v1299_v25, %v1283_v26  ;;  %v739_v0 = vld [vmem:[#allocation7 + $0x968] sm:$0xff] }
 0x428   :  { %v1298_v59 = vld [vmem:[#allocation7 + $0x1ae0] sm:$0xff]  ;;  %v755_v1 = vld [vmem:[#allocation7 + $0x9e8] sm:$0xff] }
 0x429   :  { %4599 = vmatpush2.bf16.msra.mxu0 %v2706_v2  ;;  %v1251_v2 = vld [vmem:[#allocation7 + $0x1968] sm:$0xff]  ;;  %v2914_v33 = vpack.c.bf16 %v1298_v59, %v1282_v54  ;;  %v2643_v6 = vpack.c.bf16 %v755_v1, %v739_v0  ;;  %v738_v7 = vld [vmem:[#allocation7 + $0x960] sm:$0xff] }
 0x42a   :  { %4640 = vmatpush2.bf16.msra.mxu1 %v2962_v43  ;;  %4600 = vmatprep.subr.bf16.mxu0 %v2691_v3  ;;  %v1267_v43 = vld [vmem:[#allocation7 + $0x19e8] sm:$0xff]  ;;  %v2658_v3 = vpack.c.bf16 %v786_v51, %v770_v46  ;;  %v1250_v13 = vld [vmem:[#allocation7 + $0x1960] sm:$0xff] }
 0x42b   :  { %4641 = vmatprep.subr.bf16.mxu1 %v2947_v11  ;;  %v754_v11 = vld [vmem:[#allocation7 + $0x9e0] sm:$0xff]  ;;  %v2899_v15 = vpack.c.bf16 %v1267_v43, %v1251_v2  ;;  %v707_v18 = vld [vmem:[#allocation7 + $0x868] sm:$0xff] }
 0x42c   :  { %v1266_v16 = vld [vmem:[#allocation7 + $0x19e0] sm:$0xff]  ;;  %v723_v27 = vld [vmem:[#allocation7 + $0x8e8] sm:$0xff] }
 0x42d   :  { %4601 = vmatpush2.bf16.msra.mxu0 %v2690_v30  ;;  %v1219_v30 = vld [vmem:[#allocation7 + $0x1868] sm:$0xff]  ;;  %v2898_v32 = vpack.c.bf16 %v1266_v16, %v1250_v13  ;;  %v2627_v21 = vpack.c.bf16 %v723_v27, %v707_v18  ;;  %v706_v35 = vld [vmem:[#allocation7 + $0x860] sm:$0xff] }
 0x42e   :  { %4642 = vmatpush2.bf16.msra.mxu1 %v2946_v31  ;;  %4602 = vmatprep.subr.bf16.mxu0 %v2675_v14  ;;  %v1235_v31 = vld [vmem:[#allocation7 + $0x18e8] sm:$0xff]  ;;  %v2642_v14 = vpack.c.bf16 %v754_v11, %v738_v7  ;;  %v1218_v37 = vld [vmem:[#allocation7 + $0x1860] sm:$0xff] }
 0x42f   :  { %4643 = vmatprep.subr.bf16.mxu1 %v2931_v36  ;;  %v722_v36 = vld [vmem:[#allocation7 + $0x8e0] sm:$0xff]  ;;  %v2883_v38 = vpack.c.bf16 %v1235_v31, %v1219_v30  ;;  %v1699_v26 = vld [vmem:[#allocation7 + $0x2768] sm:$0xff] }
 0x430   :  { %v1234_v39 = vld [vmem:[#allocation7 + $0x18e0] sm:$0xff]  ;;  %v1715_v25 = vld [vmem:[#allocation7 + $0x27e8] sm:$0xff] }
 0x431   :  { %4603 = vmatpush2.bf16.msra.mxu0 %v2674_v41  ;;  %v2211_v41 = vld [vmem:[#allocation7 + $0x3768] sm:$0xff]  ;;  %v2882_v46 = vpack.c.bf16 %v1234_v39, %v1218_v37  ;;  %v3123_v51 = vpack.c.bf16 %v1715_v25, %v1699_v26  ;;  %v1698_v54 = vld [vmem:[#allocation7 + $0x2760] sm:$0xff] }
 0x432   :  { %4644 = vmatpush2.bf16.msra.mxu1 %v2930_v42  ;;  %4604 = vmatprep.subr.bf16.mxu0 %v2659_v45  ;;  %v2227_v42 = vld [vmem:[#allocation7 + $0x37e8] sm:$0xff]  ;;  %v2626_v45 = vpack.c.bf16 %v722_v36, %v706_v35  ;;  %v2210_v0 = vld [vmem:[#allocation7 + $0x3760] sm:$0xff] }
 0x433   :  { %4645 = vmatprep.subr.bf16.mxu1 %v2915_v55  ;;  %v1714_v55 = vld [vmem:[#allocation7 + $0x27e0] sm:$0xff]  ;;  %v3379_v59 = vpack.c.bf16 %v2227_v42, %v2211_v41  ;;  %v1667_v2 = vld [vmem:[#allocation7 + $0x2668] sm:$0xff] }
 0x434   :  { %v2226_v1 = vld [vmem:[#allocation7 + $0x37e0] sm:$0xff]  ;;  %v1683_v43 = vld [vmem:[#allocation7 + $0x26e8] sm:$0xff] }
 0x435   :  { %4605 = vmatpush2.bf16.msra.mxu0 %v2658_v3  ;;  %v3122_v3 = vpack.c.bf16 %v1714_v55, %v1698_v54  ;;  %v3378_v7 = vpack.c.bf16 %v2226_v1, %v2210_v0  ;;  %v1666_v11 = vld [vmem:[#allocation7 + $0x2660] sm:$0xff]  ;;  %v3107_v16 = vpack.c.bf16 %v1683_v43, %v1667_v2  ;;  %v1635_v27 = vld [vmem:[#allocation7 + $0x2568] sm:$0xff] }
 0x436   :  { %4646 = vmatpush2.bf16.msra.mxu1 %v2914_v33  ;;  %4606 = vmatprep.subr.bf16.mxu0 %v2643_v6  ;;  %v2179_v33 = vld [vmem:[#allocation7 + $0x3668] sm:$0xff]  ;;  %v1682_v13 = vld [vmem:[#allocation7 + $0x26e0] sm:$0xff] }
 0x437   :  { %4647 = vmatprep.subr.bf16.mxu1 %v2899_v15  ;;  %v2195_v6 = vld [vmem:[#allocation7 + $0x36e8] sm:$0xff]  ;;  %v2178_v15 = vld [vmem:[#allocation7 + $0x3660] sm:$0xff]  ;;  %v3106_v37 = vpack.c.bf16 %v1682_v13, %v1666_v11 }
 0x438   :  { %v2194_v18 = vld [vmem:[#allocation7 + $0x36e0] sm:$0xff]  ;;  %v1651_v30 = vld [vmem:[#allocation7 + $0x25e8] sm:$0xff] }
 0x439   :  { %4607 = vmatpush2.bf16.msra.mxu0 %v2642_v14  ;;  %v3363_v14 = vpack.c.bf16 %v2195_v6, %v2179_v33  ;;  %v3362_v39 = vpack.c.bf16 %v2194_v18, %v2178_v15  ;;  %v3091_v26 = vpack.c.bf16 %v1651_v30, %v1635_v27  ;;  %v1634_v25 = vld [vmem:[#allocation7 + $0x2560] sm:$0xff]  ;;  %v1603_v55 = vld [vmem:[#allocation7 + $0x2468] sm:$0xff] }
 0x43a   :  { %4648 = vmatpush2.bf16.msra.mxu1 %v2898_v32  ;;  %4608 = vmatprep.subr.bf16.mxu0 %v2627_v21  ;;  %v2147_v32 = vld [vmem:[#allocation7 + $0x3568] sm:$0xff]  ;;  %v1650_v41 = vld [vmem:[#allocation7 + $0x25e0] sm:$0xff] }
 0x43b   :  { %4649 = vmatprep.subr.bf16.mxu1 %v2883_v38  ;;  %v2163_v21 = vld [vmem:[#allocation7 + $0x35e8] sm:$0xff]  ;;  %v2146_v42 = vld [vmem:[#allocation7 + $0x3560] sm:$0xff]  ;;  %v3090_v33 = vpack.c.bf16 %v1650_v41, %v1634_v25 }
 0x43c   :  { %v2162_v54 = vld [vmem:[#allocation7 + $0x35e0] sm:$0xff]  ;;  %v2115_v1 = vld [vmem:[#allocation7 + $0x3468] sm:$0xff] }
 0x43d   :  { %4609 = vmatpush2.bf16.msra.mxu0 %v2626_v45  ;;  %v2131_v2 = vld [vmem:[#allocation7 + $0x34e8] sm:$0xff]  ;;  %v1602_v11 = vld [vmem:[#allocation7 + $0x2460] sm:$0xff] }
 0x43e   :  { %4650 = vmatpush2.bf16.msra.mxu1 %v2882_v46  ;;  %4660 = vmatprep.subr.bf16.mxu0 %v3123_v51  ;;  %v3347_v51 = vpack.c.bf16 %v2163_v21, %v2147_v32  ;;  %v1618_v13 = vld [vmem:[#allocation7 + $0x24e0] sm:$0xff]  ;;  %v3331_v18 = vpack.c.bf16 %v2131_v2, %v2115_v1  ;;  %v1571_v30 = vld [vmem:[#allocation7 + $0x2368] sm:$0xff] }
 0x43f   :  { %4701 = vmatprep.subr.bf16.mxu1 %v3379_v59  ;;  %v1619_v59 = vld [vmem:[#allocation7 + $0x24e8] sm:$0xff]  ;;  %v2114_v15 = vld [vmem:[#allocation7 + $0x3460] sm:$0xff]  ;;  %v3074_v21 = vpack.c.bf16 %v1618_v13, %v1602_v11 }
 0x440   :  { %v4366_v31 = vpop.f32.mrf.mxu0  ;;  %4611 = vmatmul.mubr.bf16.vlgmr.msra.gmra.mxu0 %v9281_v57  ;;  %v2130_v27 = vld [vmem:[#allocation7 + $0x34e0] sm:$0xff]  ;;  %v2099_v32 = vld [vmem:[#allocation7 + $0x33e8] sm:$0xff] }
 0x441   :  { %v4367_v35 = vadd.f32 %v4366_v31, %v9424_v48  ;;  %v4407_v36 = vpop.f32.mrf.mxu1  ;;  %4652 = vmatmul.mubr.bf16.vlgmr.msra.gmra.mxu1 %v9274_v52  ;;  %4661 = vmatpush1.bf16.msra.mxu0 %v3122_v3  ;;  %v1587_v31 = vld [vmem:[#allocation7 + $0x23e8] sm:$0xff]  ;;  %v2098_v25 = vld [vmem:[#allocation7 + $0x33e0] sm:$0xff] }
 0x442   :  { %4692 = vmatprep.mubr.bf16.mxu0 %v9300_v47  ;;  %4702 = vmatpush1.bf16.msra.mxu1 %v3378_v7  ;;  %v4368_v38 = vpop.f32.mrf.mxu0  ;;  %v3346_v7 = vpack.c.bf16 %v2162_v54, %v2146_v42  ;;  %v1539_v41 = vld [vmem:[#allocation7 + $0x2268] sm:$0xff]  ;;  %v2050_v1 = vld [vmem:[#allocation7 + $0x3260] sm:$0xff] }
 0x443   :  { %v9433_v45 = vadd.f32 %v4407_v36, %v4367_v35  ;;  %4733 = vmatprep.mubr.bf16.mxu1 %v9302_v62  ;;  %v4369_v48 = vadd.f32 %v4368_v38, %v9427_v44  ;;  %v4409_v46 = vpop.f32.mrf.mxu1  ;;  %4662 = vmatprep.subr.bf16.mxu0 %v3107_v16  ;;  %v3075_v44 = vpack.c.bf16 %v1619_v59, %v1603_v55  ;;  %v1586_v38 = vld [vmem:[#allocation7 + $0x23e0] sm:$0xff]  ;;  %v1555_v42 = vld [vmem:[#allocation7 + $0x22e8] sm:$0xff] }
 0x444   :  { %v4370_v0 = vpop.f32.mrf.mxu0  ;;  %4703 = vmatprep.subr.bf16.mxu1 %v3363_v14  ;;  %v2083_v14 = vld [vmem:[#allocation7 + $0x3368] sm:$0xff]  ;;  %v3330_v35 = vpack.c.bf16 %v2130_v27, %v2114_v15  ;;  %v3059_v36 = vpack.c.bf16 %v1587_v31, %v1571_v30  ;;  %v3043_v55 = vpack.c.bf16 %v1555_v42, %v1539_v41  ;;  %v1538_v59 = vld [vmem:[#allocation7 + $0x2260] sm:$0xff] }
 0x445   :  { %v9437_v43 = vadd.f32 %v4409_v46, %v4369_v48  ;;  %v4411_v3 = vpop.f32.mrf.mxu1  ;;  %4663 = vmatpush1.bf16.msra.mxu0 %v3106_v37  ;;  %v1570_v37 = vld [vmem:[#allocation7 + $0x2360] sm:$0xff]  ;;  %v2051_v48 = vld [vmem:[#allocation7 + $0x3268] sm:$0xff] }
 0x446   :  { %4704 = vmatpush1.bf16.msra.mxu1 %v3362_v39  ;;  %v4371_v6 = vpop.f32.mrf.mxu0  ;;  %4664 = vmatprep.subr.bf16.mxu0 %v3091_v26  ;;  %v2082_v39 = vld [vmem:[#allocation7 + $0x3360] sm:$0xff]  ;;  %v3315_v26 = vpack.c.bf16 %v2099_v32, %v2083_v14  ;;  %v2067_v46 = vld [vmem:[#allocation7 + $0x32e8] sm:$0xff] }
 0x447   :  { %v4412_v16 = vpop.f32.mrf.mxu1  ;;  %4705 = vmatprep.subr.bf16.mxu1 %v3347_v51  ;;  %v3058_v51 = vpack.c.bf16 %v1586_v38, %v1570_v37  ;;  %v3314_v54 = vpack.c.bf16 %v2098_v25, %v2082_v39  ;;  %v1554_v0 = vld [vmem:[#allocation7 + $0x22e0] sm:$0xff]  ;;  %v3299_v2 = vpack.c.bf16 %v2067_v46, %v2051_v48  ;;  %v1523_v6 = vld [vmem:[#allocation7 + $0x21e8] sm:$0xff] }
 0x448   :  { %v2066_v3 = vld [vmem:[#allocation7 + $0x32e0] sm:$0xff]  ;;  %v3042_v11 = vpack.c.bf16 %v1554_v0, %v1538_v59  ;;  %v1475_v14 = vld [vmem:[#allocation7 + $0x2068] sm:$0xff] }
 0x449   :  { %4665 = vmatpush1.bf16.msra.mxu0 %v3090_v33  ;;  %v1507_v33 = vld [vmem:[#allocation7 + $0x2168] sm:$0xff]  ;;  %v3298_v13 = vpack.c.bf16 %v2066_v3, %v2050_v1  ;;  %v1506_v16 = vld [vmem:[#allocation7 + $0x2160] sm:$0xff] }
 0x44a   :  { %4706 = vmatpush1.bf16.msra.mxu1 %v3346_v7  ;;  %4666 = vmatprep.subr.bf16.mxu0 %v3075_v44  ;;  %v2019_v7 = vld [vmem:[#allocation7 + $0x3168] sm:$0xff]  ;;  %v3027_v15 = vpack.c.bf16 %v1523_v6, %v1507_v33  ;;  %v2018_v27 = vld [vmem:[#allocation7 + $0x3160] sm:$0xff] }
 0x44b   :  { %4707 = vmatprep.subr.bf16.mxu1 %v3331_v18  ;;  %v2035_v44 = vld [vmem:[#allocation7 + $0x31e8] sm:$0xff]  ;;  %v1522_v18 = vld [vmem:[#allocation7 + $0x21e0] sm:$0xff] }
 0x44c   :  { %v3283_v30 = vpack.c.bf16 %v2035_v44, %v2019_v7  ;;  %v2034_v31 = vld [vmem:[#allocation7 + $0x31e0] sm:$0xff]  ;;  %v1491_v32 = vld [vmem:[#allocation7 + $0x20e8] sm:$0xff] }
 0x44d   :  { %4667 = vmatpush1.bf16.msra.mxu0 %v3074_v21  ;;  %v1987_v21 = vld [vmem:[#allocation7 + $0x3068] sm:$0xff]  ;;  %v3282_v37 = vpack.c.bf16 %v2034_v31, %v2018_v27  ;;  %v3011_v38 = vpack.c.bf16 %v1491_v32, %v1475_v14  ;;  %v1474_v39 = vld [vmem:[#allocation7 + $0x2060] sm:$0xff] }
 0x44e   :  { %4708 = vmatpush1.bf16.msra.mxu1 %v3330_v35  ;;  %4668 = vmatprep.subr.bf16.mxu0 %v3059_v36  ;;  %v2003_v35 = vld [vmem:[#allocation7 + $0x30e8] sm:$0xff]  ;;  %v3026_v36 = vpack.c.bf16 %v1522_v18, %v1506_v16  ;;  %v1986_v25 = vld [vmem:[#allocation7 + $0x3060] sm:$0xff] }
 0x44f   :  { %4709 = vmatprep.subr.bf16.mxu1 %v3315_v26  ;;  %v1490_v26 = vld [vmem:[#allocation7 + $0x20e0] sm:$0xff]  ;;  %v3267_v41 = vpack.c.bf16 %v2003_v35, %v1987_v21  ;;  %v1955_v48 = vld [vmem:[#allocation7 + $0x2f68] sm:$0xff] }
 0x450   :  { %v2002_v42 = vld [vmem:[#allocation7 + $0x30e0] sm:$0xff]  ;;  %v1971_v46 = vld [vmem:[#allocation7 + $0x2fe8] sm:$0xff] }
 0x451   :  { %4669 = vmatpush1.bf16.msra.mxu0 %v3058_v51  ;;  %v2467_v51 = vld [vmem:[#allocation7 + $0x3f68] sm:$0xff]  ;;  %v3266_v59 = vpack.c.bf16 %v2002_v42, %v1986_v25  ;;  %v3251_v0 = vpack.c.bf16 %v1971_v46, %v1955_v48  ;;  %v1954_v1 = vld [vmem:[#allocation7 + $0x2f60] sm:$0xff] }
 0x452   :  { %4710 = vmatpush1.bf16.msra.mxu1 %v3314_v54  ;;  %4670 = vmatprep.subr.bf16.mxu0 %v3043_v55  ;;  %v2483_v54 = vld [vmem:[#allocation7 + $0x3fe8] sm:$0xff]  ;;  %v3010_v55 = vpack.c.bf16 %v1490_v26, %v1474_v39  ;;  %v2466_v3 = vld [vmem:[#allocation7 + $0x3f60] sm:$0xff] }
 0x453   :  { %4711 = vmatprep.subr.bf16.mxu1 %v3299_v2  ;;  %v1970_v2 = vld [vmem:[#allocation7 + $0x2fe0] sm:$0xff]  ;;  %v3507_v33 = vpack.c.bf16 %v2483_v54, %v2467_v51  ;;  %v1923_v7 = vld [vmem:[#allocation7 + $0x2e68] sm:$0xff] }
 0x454   :  { %v2482_v6 = vld [vmem:[#allocation7 + $0x3fe0] sm:$0xff]  ;;  %v1939_v44 = vld [vmem:[#allocation7 + $0x2ee8] sm:$0xff] }
 0x455   :  { %4671 = vmatpush1.bf16.msra.mxu0 %v3042_v11  ;;  %v2435_v11 = vld [vmem:[#allocation7 + $0x3e68] sm:$0xff]  ;;  %v3506_v16 = vpack.c.bf16 %v2482_v6, %v2466_v3  ;;  %v3235_v18 = vpack.c.bf16 %v1939_v44, %v1923_v7  ;;  %v1922_v27 = vld [vmem:[#allocation7 + $0x2e60] sm:$0xff] }
 0x456   :  { %4712 = vmatpush1.bf16.msra.mxu1 %v3298_v13  ;;  %4672 = vmatprep.subr.bf16.mxu0 %v3027_v15  ;;  %v2451_v13 = vld [vmem:[#allocation7 + $0x3ee8] sm:$0xff]  ;;  %v3250_v15 = vpack.c.bf16 %v1970_v2, %v1954_v1  ;;  %v2434_v31 = vld [vmem:[#allocation7 + $0x3e60] sm:$0xff] }
 0x457   :  { %4713 = vmatprep.subr.bf16.mxu1 %v3283_v30  ;;  %v1938_v30 = vld [vmem:[#allocation7 + $0x2ee0] sm:$0xff]  ;;  %v3491_v14 = vpack.c.bf16 %v2451_v13, %v2435_v11  ;;  %v1891_v21 = vld [vmem:[#allocation7 + $0x2d68] sm:$0xff] }
 0x458   :  { %v2450_v32 = vld [vmem:[#allocation7 + $0x3ee0] sm:$0xff]  ;;  %v1907_v35 = vld [vmem:[#allocation7 + $0x2de8] sm:$0xff] }
 0x459   :  { %4673 = vmatpush1.bf16.msra.mxu0 %v3026_v36  ;;  %v2403_v36 = vld [vmem:[#allocation7 + $0x3d68] sm:$0xff]  ;;  %v3490_v39 = vpack.c.bf16 %v2450_v32, %v2434_v31  ;;  %v3219_v26 = vpack.c.bf16 %v1907_v35, %v1891_v21  ;;  %v1890_v25 = vld [vmem:[#allocation7 + $0x2d60] sm:$0xff] }
 0x45a   :  { %4714 = vmatpush1.bf16.msra.mxu1 %v3282_v37  ;;  %4674 = vmatprep.subr.bf16.mxu0 %v3011_v38  ;;  %v2419_v37 = vld [vmem:[#allocation7 + $0x3de8] sm:$0xff]  ;;  %v3234_v38 = vpack.c.bf16 %v1938_v30, %v1922_v27  ;;  %v2402_v42 = vld [vmem:[#allocation7 + $0x3d60] sm:$0xff] }
 0x45b   :  { %4715 = vmatprep.subr.bf16.mxu1 %v3267_v41  ;;  %v1906_v41 = vld [vmem:[#allocation7 + $0x2de0] sm:$0xff]  ;;  %v3475_v48 = vpack.c.bf16 %v2419_v37, %v2403_v36  ;;  %v1859_v51 = vld [vmem:[#allocation7 + $0x2c68] sm:$0xff] }
 0x45c   :  { %v2418_v46 = vld [vmem:[#allocation7 + $0x3de0] sm:$0xff]  ;;  %v1875_v54 = vld [vmem:[#allocation7 + $0x2ce8] sm:$0xff] }
 0x45d   :  { %4675 = vmatpush1.bf16.msra.mxu0 %v3010_v55  ;;  %v2371_v55 = vld [vmem:[#allocation7 + $0x3c68] sm:$0xff]  ;;  %v3474_v1 = vpack.c.bf16 %v2418_v46, %v2402_v42  ;;  %v3203_v2 = vpack.c.bf16 %v1875_v54, %v1859_v51  ;;  %v1858_v3 = vld [vmem:[#allocation7 + $0x2c60] sm:$0xff] }
 0x45e   :  { %4716 = vmatpush1.bf16.msra.mxu1 %v3266_v59  ;;  %4676 = vmatprep.subr.bf16.mxu0 %v3251_v0  ;;  %v2387_v59 = vld [vmem:[#allocation7 + $0x3ce8] sm:$0xff]  ;;  %v3218_v0 = vpack.c.bf16 %v1906_v41, %v1890_v25  ;;  %v2370_v6 = vld [vmem:[#allocation7 + $0x3c60] sm:$0xff] }
 0x45f   :  { %4717 = vmatprep.subr.bf16.mxu1 %v3507_v33  ;;  %v1874_v33 = vld [vmem:[#allocation7 + $0x2ce0] sm:$0xff]  ;;  %v3459_v7 = vpack.c.bf16 %v2387_v59, %v2371_v55  ;;  %v1827_v11 = vld [vmem:[#allocation7 + $0x2b68] sm:$0xff] }
 0x460   :  { %v2386_v44 = vld [vmem:[#allocation7 + $0x3ce0] sm:$0xff]  ;;  %v1843_v13 = vld [vmem:[#allocation7 + $0x2be8] sm:$0xff] }
 0x461   :  { %4677 = vmatpush2.bf16.msra.mxu0 %v3250_v15  ;;  %v2339_v15 = vld [vmem:[#allocation7 + $0x3b68] sm:$0xff]  ;;  %v3458_v27 = vpack.c.bf16 %v2386_v44, %v2370_v6  ;;  %v3187_v30 = vpack.c.bf16 %v1843_v13, %v1827_v11  ;;  %v1826_v31 = vld [vmem:[#allocation7 + $0x2b60] sm:$0xff] }
 0x462   :  { %4718 = vmatpush2.bf16.msra.mxu1 %v3506_v16  ;;  %4678 = vmatprep.subr.bf16.mxu0 %v3235_v18  ;;  %v2355_v16 = vld [vmem:[#allocation7 + $0x3be8] sm:$0xff]  ;;  %v3202_v18 = vpack.c.bf16 %v1874_v33, %v1858_v3  ;;  %v2338_v32 = vld [vmem:[#allocation7 + $0x3b60] sm:$0xff] }
 0x463   :  { %4719 = vmatprep.subr.bf16.mxu1 %v3491_v14  ;;  %v1842_v14 = vld [vmem:[#allocation7 + $0x2be0] sm:$0xff]  ;;  %v3443_v21 = vpack.c.bf16 %v2355_v16, %v2339_v15  ;;  %v1795_v36 = vld [vmem:[#allocation7 + $0x2a68] sm:$0xff] }
 0x464   :  { %v2354_v35 = vld [vmem:[#allocation7 + $0x3be0] sm:$0xff]  ;;  %v1811_v37 = vld [vmem:[#allocation7 + $0x2ae8] sm:$0xff] }
 0x465   :  { %4679 = vmatpush2.bf16.msra.mxu0 %v3234_v38  ;;  %v2307_v38 = vld [vmem:[#allocation7 + $0x3a68] sm:$0xff]  ;;  %v3442_v25 = vpack.c.bf16 %v2354_v35, %v2338_v32  ;;  %v3171_v41 = vpack.c.bf16 %v1811_v37, %v1795_v36  ;;  %v1794_v42 = vld [vmem:[#allocation7 + $0x2a60] sm:$0xff] }
 0x466   :  { %4720 = vmatpush2.bf16.msra.mxu1 %v3490_v39  ;;  %4680 = vmatprep.subr.bf16.mxu0 %v3219_v26  ;;  %v2323_v39 = vld [vmem:[#allocation7 + $0x3ae8] sm:$0xff]  ;;  %v3186_v26 = vpack.c.bf16 %v1842_v14, %v1826_v31  ;;  %v2306_v46 = vld [vmem:[#allocation7 + $0x3a60] sm:$0xff] }
 0x467   :  { %4721 = vmatprep.subr.bf16.mxu1 %v3475_v48  ;;  %v1810_v48 = vld [vmem:[#allocation7 + $0x2ae0] sm:$0xff]  ;;  %v3427_v51 = vpack.c.bf16 %v2323_v39, %v2307_v38  ;;  %v1763_v55 = vld [vmem:[#allocation7 + $0x2968] sm:$0xff]  ;;  %v677_v38 = vld [vmem:[#allocation7 + $0x778] sm:$0xff] }
 0x468   :  { %v2322_v54 = vld [vmem:[#allocation7 + $0x3ae0] sm:$0xff]  ;;  %v1779_v59 = vld [vmem:[#allocation7 + $0x29e8] sm:$0xff]  ;;  %v693_v39 = vld [vmem:[#allocation7 + $0x7f8] sm:$0xff] }
 0x469   :  { %4681 = vmatpush2.bf16.msra.mxu0 %v3218_v0  ;;  %v2275_v0 = vld [vmem:[#allocation7 + $0x3968] sm:$0xff]  ;;  %v3426_v3 = vpack.c.bf16 %v2322_v54, %v2306_v46  ;;  %v3155_v33 = vpack.c.bf16 %v1779_v59, %v1763_v55  ;;  %v1762_v6 = vld [vmem:[#allocation7 + $0x2960] sm:$0xff]  ;;  %v676_v46 = vld [vmem:[#allocation7 + $0x770] sm:$0xff] }
 0x46a   :  { %4722 = vmatpush2.bf16.msra.mxu1 %v3474_v1  ;;  %4682 = vmatprep.subr.bf16.mxu0 %v3203_v2  ;;  %v2291_v1 = vld [vmem:[#allocation7 + $0x39e8] sm:$0xff]  ;;  %v3170_v2 = vpack.c.bf16 %v1810_v48, %v1794_v42  ;;  %v2274_v44 = vld [vmem:[#allocation7 + $0x3960] sm:$0xff]  ;;  %v2613_v48 = vpack.c.bf16 %v693_v39, %v677_v38  ;;  %v1188_v55 = vld [vmem:[#allocation7 + $0x1770] sm:$0xff] }
 0x46b   :  { %4723 = vmatprep.subr.bf16.mxu1 %v3459_v7  ;;  %v1778_v7 = vld [vmem:[#allocation7 + $0x29e0] sm:$0xff]  ;;  %v3411_v11 = vpack.c.bf16 %v2291_v1, %v2275_v0  ;;  %v1731_v15 = vld [vmem:[#allocation7 + $0x2868] sm:$0xff]  ;;  %v1204_v59 = vld [vmem:[#allocation7 + $0x17f0] sm:$0xff] }
 0x46c   :  { %v2290_v13 = vld [vmem:[#allocation7 + $0x39e0] sm:$0xff]  ;;  %v1747_v16 = vld [vmem:[#allocation7 + $0x28e8] sm:$0xff]  ;;  %v645_v0 = vld [vmem:[#allocation7 + $0x678] sm:$0xff] }
 0x46d   :  { %4683 = vmatpush2.bf16.msra.mxu0 %v3202_v18  ;;  %v2243_v18 = vld [vmem:[#allocation7 + $0x3868] sm:$0xff]  ;;  %v3410_v31 = vpack.c.bf16 %v2290_v13, %v2274_v44  ;;  %v3139_v14 = vpack.c.bf16 %v1747_v16, %v1731_v15  ;;  %v1730_v32 = vld [vmem:[#allocation7 + $0x2860] sm:$0xff]  ;;  %v661_v1 = vld [vmem:[#allocation7 + $0x6f8] sm:$0xff]  ;;  %v2868_v44 = vpack.c.bf16 %v1204_v59, %v1188_v55 }
 0x46e   :  { %4724 = vmatpush2.bf16.msra.mxu1 %v3458_v27  ;;  %4684 = vmatprep.subr.bf16.mxu0 %v3187_v30  ;;  %v2259_v27 = vld [vmem:[#allocation7 + $0x38e8] sm:$0xff]  ;;  %v3154_v30 = vpack.c.bf16 %v1778_v7, %v1762_v6  ;;  %v2242_v35 = vld [vmem:[#allocation7 + $0x3860] sm:$0xff]  ;;  %v1157_v6 = vld [vmem:[#allocation7 + $0x1678] sm:$0xff] }
 0x46f   :  { %4725 = vmatprep.subr.bf16.mxu1 %v3443_v21  ;;  %v1746_v21 = vld [vmem:[#allocation7 + $0x28e0] sm:$0xff]  ;;  %v3395_v36 = vpack.c.bf16 %v2259_v27, %v2243_v18  ;;  %v1173_v7 = vld [vmem:[#allocation7 + $0x16f8] sm:$0xff]  ;;  %v660_v13 = vld [vmem:[#allocation7 + $0x6f0] sm:$0xff]  ;;  %v2597_v18 = vpack.c.bf16 %v661_v1, %v645_v0 }
 0x470   :  { %v2258_v37 = vld [vmem:[#allocation7 + $0x38e0] sm:$0xff]  ;;  %v1156_v15 = vld [vmem:[#allocation7 + $0x1670] sm:$0xff]  ;;  %v581_v59 = vld [vmem:[#allocation7 + $0x478] sm:$0xff] }
 0x471   :  { %4685 = vmatpush2.bf16.msra.mxu0 %v3186_v26  ;;  %v1189_v26 = vld [vmem:[#allocation7 + $0x1778] sm:$0xff]  ;;  %v3394_v42 = vpack.c.bf16 %v2258_v37, %v2242_v35  ;;  %v1172_v27 = vld [vmem:[#allocation7 + $0x16f0] sm:$0xff] }
 0x472   :  { %4726 = vmatpush2.bf16.msra.mxu1 %v3442_v25  ;;  %4686 = vmatprep.subr.bf16.mxu0 %v3171_v41  ;;  %v1205_v25 = vld [vmem:[#allocation7 + $0x17f8] sm:$0xff]  ;;  %v3138_v41 = vpack.c.bf16 %v1746_v21, %v1730_v32  ;;  %v2853_v32 = vpack.c.bf16 %v1173_v7, %v1157_v6  ;;  %v2852_v39 = vpack.c.bf16 %v1172_v27, %v1156_v15  ;;  %v1140_v55 = vld [vmem:[#allocation7 + $0x15f0] sm:$0xff] }
 0x473   :  { %4727 = vmatprep.subr.bf16.mxu1 %v3427_v51  ;;  %v692_v51 = vld [vmem:[#allocation7 + $0x7f0] sm:$0xff]  ;;  %v2869_v54 = vpack.c.bf16 %v1205_v25, %v1189_v26  ;;  %v1125_v21 = vld [vmem:[#allocation7 + $0x1578] sm:$0xff] }
 0x474   :  { %v1141_v35 = vld [vmem:[#allocation7 + $0x15f8] sm:$0xff]  ;;  %v612_v25 = vld [vmem:[#allocation7 + $0x570] sm:$0xff] }
 0x475   :  { %4687 = vmatpush2.bf16.msra.mxu0 %v3170_v2  ;;  %v8959_v2 = vld [vmem:[#allocation9 + $0x8] sm:$0xff]  ;;  %v597_v0 = vld [vmem:[#allocation7 + $0x4f8] sm:$0xff]  ;;  %v1092_v15 = vld [vmem:[#allocation7 + $0x1470] sm:$0xff] }
 0x476   :  { %4728 = vmatpush2.bf16.msra.mxu1 %v3426_v3  ;;  %4688 = vmatprep.subr.bf16.mxu0 %v3155_v33  ;;  %v3557_v3 = vrot.slane %v8959_v2, %v9258_v22  ;;  %v2612_v33 = vpack.c.bf16 %v692_v51, %v676_v46  ;;  %v3561_v16 = vrot.slane %v8959_v2, %v9264_v24  ;;  %v1109_v2 = vld [vmem:[#allocation7 + $0x14f8] sm:$0xff]  ;;  %v1108_v27 = vld [vmem:[#allocation7 + $0x14f0] sm:$0xff] }
 0x477   :  { %4729 = vmatprep.subr.bf16.mxu1 %v3411_v11  ;;  %v644_v11 = vld [vmem:[#allocation7 + $0x670] sm:$0xff] }
 0x478   :  { %v2596_v38 = vpack.c.bf16 %v660_v13, %v644_v11  ;;  %v580_v11 = vld [vmem:[#allocation7 + $0x470] sm:$0xff] }
 0x479   :  { %4689 = vmatpush2.bf16.msra.mxu0 %v3154_v30  ;;  %v613_v30 = vld [vmem:[#allocation7 + $0x578] sm:$0xff]  ;;  %v596_v13 = vld [vmem:[#allocation7 + $0x4f0] sm:$0xff] }
 0x47a   :  { %4730 = vmatpush2.bf16.msra.mxu1 %v3410_v31  ;;  %4690 = vmatprep.subr.bf16.mxu0 %v3139_v14  ;;  %v629_v31 = vld [vmem:[#allocation7 + $0x5f8] sm:$0xff] }
 0x47b   :  { %4731 = vmatprep.subr.bf16.mxu1 %v3395_v36  ;;  %v2581_v26 = vpack.c.bf16 %v629_v31, %v613_v30  ;;  %v549_v30 = vld [vmem:[#allocation7 + $0x378] sm:$0xff] }
 0x47c   :  { %v565_v31 = vld [vmem:[#allocation7 + $0x3f8] sm:$0xff] }
 0x47d   :  { %4691 = vmatpush2.bf16.msra.mxu0 %v3138_v41  ;;  %v628_v41 = vld [vmem:[#allocation7 + $0x5f0] sm:$0xff] }
 0x47e   :  { %4732 = vmatpush2.bf16.msra.mxu1 %v3394_v42  ;;  %4742 = vmatprep.subr.bf16.mxu0 %v2613_v48  ;;  %v1124_v42 = vld [vmem:[#allocation7 + $0x1570] sm:$0xff]  ;;  %v2580_v6 = vpack.c.bf16 %v628_v41, %v612_v25  ;;  %v517_v25 = vld [vmem:[#allocation7 + $0x278] sm:$0xff] }
 0x47f   :  { %4783 = vmatprep.subr.bf16.mxu1 %v2869_v54  ;;  %v2837_v54 = vpack.c.bf16 %v1141_v35, %v1125_v21  ;;  %v2564_v21 = vpack.c.bf16 %v596_v13, %v580_v11  ;;  %v2820_v35 = vpack.c.bf16 %v1108_v27, %v1092_v15  ;;  %v533_v41 = vld [vmem:[#allocation7 + $0x2f8] sm:$0xff]  ;;  %v484_v15 = vld [vmem:[#allocation7 + $0x170] sm:$0xff] }
 0x480   :  { %v4448_v14 = vpop.f32.mrf.mxu0  ;;  %4693 = vmatmul.mubr.bf16.vlgmr.msra.gmra.mxu0 %v9320_v17 }
 0x481   :  { %v4449_v36 = vadd.f32 %v4448_v14, %v3557_v3  ;;  %v4489_v37 = vpop.f32.mrf.mxu1  ;;  %4734 = vmatmul.mubr.bf16.vlgmr.msra.gmra.mxu1 %v9318_v12  ;;  %4743 = vmatpush1.bf16.msra.mxu0 %v2612_v33  ;;  %v1061_v14 = vld [vmem:[#allocation7 + $0x1378] sm:$0xff] }
 0x482   :  { %4774 = vmatprep.mubr.bf16.mxu0 %v9276_v53  ;;  %4784 = vmatpush1.bf16.msra.mxu1 %v2868_v44  ;;  %v4450_v24 = vpop.f32.mrf.mxu0  ;;  %v1093_v53 = vld [vmem:[#allocation7 + $0x1478] sm:$0xff]  ;;  %v2565_v44 = vpack.c.bf16 %v597_v0, %v581_v59  ;;  %v516_v59 = vld [vmem:[#allocation7 + $0x270] sm:$0xff] }
 0x483   :  { %v9444_v48 = vadd.f32 %v4489_v37, %v4449_v36  ;;  %4815 = vmatprep.mubr.bf16.mxu1 %v9283_v58  ;;  %v4451_v46 = vadd.f32 %v4450_v24, %v3561_v16  ;;  %v4491_v51 = vpop.f32.mrf.mxu1  ;;  %4744 = vmatprep.subr.bf16.mxu0 %v2597_v18  ;;  %v2836_v58 = vpack.c.bf16 %v1140_v55, %v1124_v42  ;;  %v548_v37 = vld [vmem:[#allocation7 + $0x370] sm:$0xff]  ;;  %v1029_v42 = vld [vmem:[#allocation7 + $0x1278] sm:$0xff] }
 0x484   :  { %v4452_v1 = vpop.f32.mrf.mxu0  ;;  %4785 = vmatprep.subr.bf16.mxu1 %v2853_v32  ;;  %v2821_v18 = vpack.c.bf16 %v1109_v2, %v1093_v53  ;;  %v1077_v32 = vld [vmem:[#allocation7 + $0x13f8] sm:$0xff]  ;;  %v2549_v36 = vpack.c.bf16 %v565_v31, %v549_v30  ;;  %v1060_v24 = vld [vmem:[#allocation7 + $0x1370] sm:$0xff]  ;;  %v2533_v55 = vpack.c.bf16 %v533_v41, %v517_v25 }
 0x485   :  { %v9447_v3 = vadd.f32 %v4491_v51, %v4451_v46  ;;  %v4493_v33 = vpop.f32.mrf.mxu1  ;;  %4745 = vmatpush1.bf16.msra.mxu0 %v2596_v38  ;;  %v564_v38 = vld [vmem:[#allocation7 + $0x3f0] sm:$0xff]  ;;  %v1045_v46 = vld [vmem:[#allocation7 + $0x12f8] sm:$0xff] }
 0x486   :  { %4786 = vmatpush1.bf16.msra.mxu1 %v2852_v39  ;;  %v4453_v7 = vpop.f32.mrf.mxu0  ;;  %4746 = vmatprep.subr.bf16.mxu0 %v2581_v26  ;;  %v2805_v39 = vpack.c.bf16 %v1077_v32, %v1061_v14  ;;  %v1076_v26 = vld [vmem:[#allocation7 + $0x13f0] sm:$0xff]  ;;  %v2548_v51 = vpack.c.bf16 %v564_v38, %v548_v37  ;;  %v2789_v53 = vpack.c.bf16 %v1045_v46, %v1029_v42  ;;  %v485_v33 = vld [vmem:[#allocation7 + $0x178] sm:$0xff] }
 0x487   :  { %v4494_v16 = vpop.f32.mrf.mxu1  ;;  %4787 = vmatprep.subr.bf16.mxu1 %v2837_v54  ;;  %v2804_v54 = vpack.c.bf16 %v1076_v26, %v1060_v24  ;;  %v532_v0 = vld [vmem:[#allocation7 + $0x2f0] sm:$0xff]  ;;  %v997_v7 = vld [vmem:[#allocation7 + $0x1178] sm:$0xff] }
 0x488   :  { %v1028_v1 = vld [vmem:[#allocation7 + $0x1270] sm:$0xff]  ;;  %v453_v31 = vld [vmem:[#allocation7 + $0x78] sm:$0xff] }
 0x489   :  { %4747 = vmatpush1.bf16.msra.mxu0 %v2580_v6  ;;  %v1044_v2 = vld [vmem:[#allocation7 + $0x12f0] sm:$0xff]  ;;  %v501_v6 = vld [vmem:[#allocation7 + $0x1f8] sm:$0xff] }
 0x48a   :  { %4788 = vmatpush1.bf16.msra.mxu1 %v2836_v58  ;;  %4748 = vmatprep.subr.bf16.mxu0 %v2565_v44  ;;  %v1013_v58 = vld [vmem:[#allocation7 + $0x11f8] sm:$0xff]  ;;  %v2532_v44 = vpack.c.bf16 %v532_v0, %v516_v59  ;;  %v2788_v11 = vpack.c.bf16 %v1044_v2, %v1028_v1  ;;  %v2517_v13 = vpack.c.bf16 %v501_v6, %v485_v33  ;;  %v500_v16 = vld [vmem:[#allocation7 + $0x1f0] sm:$0xff] }
 0x48b   :  { %4789 = vmatprep.subr.bf16.mxu1 %v2821_v18  ;;  %v996_v18 = vld [vmem:[#allocation7 + $0x1170] sm:$0xff]  ;;  %v2773_v27 = vpack.c.bf16 %v1013_v58, %v997_v7  ;;  %v469_v14 = vld [vmem:[#allocation7 + $0xf8] sm:$0xff] }
 0x48c   :  { %v1012_v30 = vld [vmem:[#allocation7 + $0x11f0] sm:$0xff]  ;;  %v965_v32 = vld [vmem:[#allocation7 + $0x1078] sm:$0xff]  ;;  %v2501_v37 = vpack.c.bf16 %v469_v14, %v453_v31 }
 0x48d   :  { %4749 = vmatpush1.bf16.msra.mxu0 %v2564_v21  ;;  %v981_v21 = vld [vmem:[#allocation7 + $0x10f8] sm:$0xff]  ;;  %v452_v38 = vld [vmem:[#allocation7 + $0x70] sm:$0xff] }
 0x48e   :  { %4790 = vmatpush1.bf16.msra.mxu1 %v2820_v35  ;;  %4750 = vmatprep.subr.bf16.mxu0 %v2549_v36  ;;  %v2516_v35 = vpack.c.bf16 %v500_v16, %v484_v15  ;;  %v2772_v36 = vpack.c.bf16 %v1012_v30, %v996_v18  ;;  %v468_v24 = vld [vmem:[#allocation7 + $0xf0] sm:$0xff]  ;;  %v2757_v26 = vpack.c.bf16 %v981_v21, %v965_v32  ;;  %v933_v41 = vld [vmem:[#allocation7 + $0xf78] sm:$0xff] }
 0x48f   :  { %4791 = vmatprep.subr.bf16.mxu1 %v2805_v39  ;;  %v964_v39 = vld [vmem:[#allocation7 + $0x1070] sm:$0xff]  ;;  %v949_v42 = vld [vmem:[#allocation7 + $0xff8] sm:$0xff] }
 0x490   :  { %v980_v25 = vld [vmem:[#allocation7 + $0x10f0] sm:$0xff]  ;;  %v1445_v46 = vld [vmem:[#allocation7 + $0x1f78] sm:$0xff]  ;;  %v2741_v59 = vpack.c.bf16 %v949_v42, %v933_v41 }
 0x491   :  { %4751 = vmatpush1.bf16.msra.mxu0 %v2548_v51  ;;  %v1461_v51 = vld [vmem:[#allocation7 + $0x1ff8] sm:$0xff]  ;;  %v932_v0 = vld [vmem:[#allocation7 + $0xf70] sm:$0xff] }
 0x492   :  { %4792 = vmatpush1.bf16.msra.mxu1 %v2804_v54  ;;  %4752 = vmatprep.subr.bf16.mxu0 %v2533_v55  ;;  %v2500_v54 = vpack.c.bf16 %v468_v24, %v452_v38  ;;  %v2756_v55 = vpack.c.bf16 %v980_v25, %v964_v39  ;;  %v948_v1 = vld [vmem:[#allocation7 + $0xff0] sm:$0xff]  ;;  %v2997_v2 = vpack.c.bf16 %v1461_v51, %v1445_v46  ;;  %v901_v6 = vld [vmem:[#allocation7 + $0xe78] sm:$0xff] }
 0x493   :  { %4793 = vmatprep.subr.bf16.mxu1 %v2789_v53  ;;  %v1444_v53 = vld [vmem:[#allocation7 + $0x1f70] sm:$0xff]  ;;  %v917_v7 = vld [vmem:[#allocation7 + $0xef8] sm:$0xff] }
 0x494   :  { %v1460_v33 = vld [vmem:[#allocation7 + $0x1ff0] sm:$0xff]  ;;  %v1413_v58 = vld [vmem:[#allocation7 + $0x1e78] sm:$0xff]  ;;  %v2725_v15 = vpack.c.bf16 %v917_v7, %v901_v6 }
 0x495   :  { %4753 = vmatpush1.bf16.msra.mxu0 %v2532_v44  ;;  %v1429_v44 = vld [vmem:[#allocation7 + $0x1ef8] sm:$0xff]  ;;  %v900_v16 = vld [vmem:[#allocation7 + $0xe70] sm:$0xff] }
 0x496   :  { %4794 = vmatpush1.bf16.msra.mxu1 %v2788_v11  ;;  %4754 = vmatprep.subr.bf16.mxu0 %v2517_v13  ;;  %v2740_v11 = vpack.c.bf16 %v948_v1, %v932_v0  ;;  %v2996_v13 = vpack.c.bf16 %v1460_v33, %v1444_v53  ;;  %v916_v18 = vld [vmem:[#allocation7 + $0xef0] sm:$0xff]  ;;  %v2981_v30 = vpack.c.bf16 %v1429_v44, %v1413_v58  ;;  %v869_v14 = vld [vmem:[#allocation7 + $0xd78] sm:$0xff] }
 0x497   :  { %4795 = vmatprep.subr.bf16.mxu1 %v2773_v27  ;;  %v1412_v27 = vld [vmem:[#allocation7 + $0x1e70] sm:$0xff]  ;;  %v885_v32 = vld [vmem:[#allocation7 + $0xdf8] sm:$0xff] }
 0x498   :  { %v1428_v31 = vld [vmem:[#allocation7 + $0x1ef0] sm:$0xff]  ;;  %v1381_v21 = vld [vmem:[#allocation7 + $0x1d78] sm:$0xff]  ;;  %v2709_v38 = vpack.c.bf16 %v885_v32, %v869_v14 }
 0x499   :  { %4755 = vmatpush1.bf16.msra.mxu0 %v2516_v35  ;;  %v1397_v35 = vld [vmem:[#allocation7 + $0x1df8] sm:$0xff]  ;;  %v868_v24 = vld [vmem:[#allocation7 + $0xd70] sm:$0xff] }
 0x49a   :  { %4796 = vmatpush1.bf16.msra.mxu1 %v2772_v36  ;;  %4756 = vmatprep.subr.bf16.mxu0 %v2501_v37  ;;  %v2724_v36 = vpack.c.bf16 %v916_v18, %v900_v16  ;;  %v2980_v37 = vpack.c.bf16 %v1428_v31, %v1412_v27  ;;  %v884_v39 = vld [vmem:[#allocation7 + $0xdf0] sm:$0xff]  ;;  %v2965_v25 = vpack.c.bf16 %v1397_v35, %v1381_v21  ;;  %v837_v42 = vld [vmem:[#allocation7 + $0xc78] sm:$0xff] }
 0x49b   :  { %4797 = vmatprep.subr.bf16.mxu1 %v2757_v26  ;;  %v1380_v26 = vld [vmem:[#allocation7 + $0x1d70] sm:$0xff]  ;;  %v853_v46 = vld [vmem:[#allocation7 + $0xcf8] sm:$0xff] }
 0x49c   :  { %v1396_v41 = vld [vmem:[#allocation7 + $0x1df0] sm:$0xff]  ;;  %v1349_v51 = vld [vmem:[#allocation7 + $0x1c78] sm:$0xff]  ;;  %v2693_v0 = vpack.c.bf16 %v853_v46, %v837_v42 }
 0x49d   :  { %4757 = vmatpush1.bf16.msra.mxu0 %v2500_v54  ;;  %v1365_v54 = vld [vmem:[#allocation7 + $0x1cf8] sm:$0xff]  ;;  %v836_v1 = vld [vmem:[#allocation7 + $0xc70] sm:$0xff] }
 0x49e   :  { %4798 = vmatpush1.bf16.msra.mxu1 %v2756_v55  ;;  %4758 = vmatprep.subr.bf16.mxu0 %v2741_v59  ;;  %v2708_v55 = vpack.c.bf16 %v884_v39, %v868_v24  ;;  %v2964_v59 = vpack.c.bf16 %v1396_v41, %v1380_v26  ;;  %v852_v53 = vld [vmem:[#allocation7 + $0xcf0] sm:$0xff]  ;;  %v2949_v33 = vpack.c.bf16 %v1365_v54, %v1349_v51  ;;  %v805_v7 = vld [vmem:[#allocation7 + $0xb78] sm:$0xff] }
 0x49f   :  { %4799 = vmatprep.subr.bf16.mxu1 %v2997_v2  ;;  %v1348_v2 = vld [vmem:[#allocation7 + $0x1c70] sm:$0xff]  ;;  %v821_v58 = vld [vmem:[#allocation7 + $0xbf8] sm:$0xff] }
 0x4a0   :  { %v1364_v6 = vld [vmem:[#allocation7 + $0x1cf0] sm:$0xff]  ;;  %v1317_v44 = vld [vmem:[#allocation7 + $0x1b78] sm:$0xff]  ;;  %v2677_v16 = vpack.c.bf16 %v821_v58, %v805_v7 }
 0x4a1   :  { %4759 = vmatpush2.bf16.msra.mxu0 %v2740_v11  ;;  %v1333_v11 = vld [vmem:[#allocation7 + $0x1bf8] sm:$0xff]  ;;  %v804_v18 = vld [vmem:[#allocation7 + $0xb70] sm:$0xff] }
 0x4a2   :  { %4800 = vmatpush2.bf16.msra.mxu1 %v2996_v13  ;;  %4760 = vmatprep.subr.bf16.mxu0 %v2725_v15  ;;  %v2692_v13 = vpack.c.bf16 %v852_v53, %v836_v1  ;;  %v2948_v15 = vpack.c.bf16 %v1364_v6, %v1348_v2  ;;  %v820_v27 = vld [vmem:[#allocation7 + $0xbf0] sm:$0xff]  ;;  %v2933_v31 = vpack.c.bf16 %v1333_v11, %v1317_v44  ;;  %v773_v32 = vld [vmem:[#allocation7 + $0xa78] sm:$0xff] }
 0x4a3   :  { %4801 = vmatprep.subr.bf16.mxu1 %v2981_v30  ;;  %v1316_v30 = vld [vmem:[#allocation7 + $0x1b70] sm:$0xff]  ;;  %v789_v21 = vld [vmem:[#allocation7 + $0xaf8] sm:$0xff] }
 0x4a4   :  { %v1332_v14 = vld [vmem:[#allocation7 + $0x1bf0] sm:$0xff]  ;;  %v1285_v35 = vld [vmem:[#allocation7 + $0x1a78] sm:$0xff]  ;;  %v2661_v24 = vpack.c.bf16 %v789_v21, %v773_v32 }
 0x4a5   :  { %4761 = vmatpush2.bf16.msra.mxu0 %v2724_v36  ;;  %v1301_v36 = vld [vmem:[#allocation7 + $0x1af8] sm:$0xff]  ;;  %v772_v39 = vld [vmem:[#allocation7 + $0xa70] sm:$0xff] }
 0x4a6   :  { %4802 = vmatpush2.bf16.msra.mxu1 %v2980_v37  ;;  %4762 = vmatprep.subr.bf16.mxu0 %v2709_v38  ;;  %v2676_v37 = vpack.c.bf16 %v820_v27, %v804_v18  ;;  %v2932_v38 = vpack.c.bf16 %v1332_v14, %v1316_v30  ;;  %v788_v26 = vld [vmem:[#allocation7 + $0xaf0] sm:$0xff]  ;;  %v2917_v41 = vpack.c.bf16 %v1301_v36, %v1285_v35  ;;  %v741_v46 = vld [vmem:[#allocation7 + $0x978] sm:$0xff] }
 0x4a7   :  { %4803 = vmatprep.subr.bf16.mxu1 %v2965_v25  ;;  %v1284_v25 = vld [vmem:[#allocation7 + $0x1a70] sm:$0xff]  ;;  %v757_v51 = vld [vmem:[#allocation7 + $0x9f8] sm:$0xff] }
 0x4a8   :  { %v1300_v42 = vld [vmem:[#allocation7 + $0x1af0] sm:$0xff]  ;;  %v1253_v54 = vld [vmem:[#allocation7 + $0x1978] sm:$0xff]  ;;  %v2645_v1 = vpack.c.bf16 %v757_v51, %v741_v46 }
 0x4a9   :  { %4763 = vmatpush2.bf16.msra.mxu0 %v2708_v55  ;;  %v1269_v55 = vld [vmem:[#allocation7 + $0x19f8] sm:$0xff]  ;;  %v740_v53 = vld [vmem:[#allocation7 + $0x970] sm:$0xff] }
 0x4aa   :  { %4804 = vmatpush2.bf16.msra.mxu1 %v2964_v59  ;;  %4764 = vmatprep.subr.bf16.mxu0 %v2693_v0  ;;  %v2660_v59 = vpack.c.bf16 %v788_v26, %v772_v39  ;;  %v2916_v0 = vpack.c.bf16 %v1300_v42, %v1284_v25  ;;  %v756_v2 = vld [vmem:[#allocation7 + $0x9f0] sm:$0xff]  ;;  %v2901_v6 = vpack.c.bf16 %v1269_v55, %v1253_v54  ;;  %v709_v58 = vld [vmem:[#allocation7 + $0x878] sm:$0xff] }
 0x4ab   :  { %4805 = vmatprep.subr.bf16.mxu1 %v2949_v33  ;;  %v1252_v33 = vld [vmem:[#allocation7 + $0x1970] sm:$0xff]  ;;  %v725_v44 = vld [vmem:[#allocation7 + $0x8f8] sm:$0xff] }
 0x4ac   :  { %v1268_v7 = vld [vmem:[#allocation7 + $0x19f0] sm:$0xff]  ;;  %v1221_v11 = vld [vmem:[#allocation7 + $0x1878] sm:$0xff]  ;;  %v2629_v18 = vpack.c.bf16 %v725_v44, %v709_v58 }
 0x4ad   :  { %4765 = vmatpush2.bf16.msra.mxu0 %v2692_v13  ;;  %v1237_v13 = vld [vmem:[#allocation7 + $0x18f8] sm:$0xff]  ;;  %v708_v27 = vld [vmem:[#allocation7 + $0x870] sm:$0xff] }
 0x4ae   :  { %4806 = vmatpush2.bf16.msra.mxu1 %v2948_v15  ;;  %4766 = vmatprep.subr.bf16.mxu0 %v2677_v16  ;;  %v2644_v15 = vpack.c.bf16 %v756_v2, %v740_v53  ;;  %v2900_v16 = vpack.c.bf16 %v1268_v7, %v1252_v33  ;;  %v724_v30 = vld [vmem:[#allocation7 + $0x8f0] sm:$0xff]  ;;  %v2885_v14 = vpack.c.bf16 %v1237_v13, %v1221_v11  ;;  %v1701_v21 = vld [vmem:[#allocation7 + $0x2778] sm:$0xff] }
 0x4af   :  { %4807 = vmatprep.subr.bf16.mxu1 %v2933_v31  ;;  %v1220_v31 = vld [vmem:[#allocation7 + $0x1870] sm:$0xff]  ;;  %v1717_v35 = vld [vmem:[#allocation7 + $0x27f8] sm:$0xff] }
 0x4b0   :  { %v1236_v32 = vld [vmem:[#allocation7 + $0x18f0] sm:$0xff]  ;;  %v2213_v36 = vld [vmem:[#allocation7 + $0x3778] sm:$0xff]  ;;  %v3125_v39 = vpack.c.bf16 %v1717_v35, %v1701_v21 }
 0x4b1   :  { %4767 = vmatpush2.bf16.msra.mxu0 %v2676_v37  ;;  %v2229_v37 = vld [vmem:[#allocation7 + $0x37f8] sm:$0xff]  ;;  %v1700_v26 = vld [vmem:[#allocation7 + $0x2770] sm:$0xff] }
 0x4b2   :  { %4808 = vmatpush2.bf16.msra.mxu1 %v2932_v38  ;;  %4768 = vmatprep.subr.bf16.mxu0 %v2661_v24  ;;  %v2628_v38 = vpack.c.bf16 %v724_v30, %v708_v27  ;;  %v2884_v24 = vpack.c.bf16 %v1236_v32, %v1220_v31  ;;  %v1716_v25 = vld [vmem:[#allocation7 + $0x27f0] sm:$0xff]  ;;  %v1669_v51 = vld [vmem:[#allocation7 + $0x2678] sm:$0xff] }
 0x4b3   :  { %4809 = vmatprep.subr.bf16.mxu1 %v2917_v41  ;;  %v3381_v41 = vpack.c.bf16 %v2229_v37, %v2213_v36  ;;  %v2212_v42 = vld [vmem:[#allocation7 + $0x3770] sm:$0xff]  ;;  %v1685_v54 = vld [vmem:[#allocation7 + $0x26f8] sm:$0xff]  ;;  %v3124_v55 = vpack.c.bf16 %v1716_v25, %v1700_v26 }
 0x4b4   :  { %v2228_v46 = vld [vmem:[#allocation7 + $0x37f0] sm:$0xff]  ;;  %v1637_v58 = vld [vmem:[#allocation7 + $0x2578] sm:$0xff] }
 0x4b5   :  { %4769 = vmatpush2.bf16.msra.mxu0 %v2660_v59  ;;  %v2181_v59 = vld [vmem:[#allocation7 + $0x3678] sm:$0xff]  ;;  %v1668_v53 = vld [vmem:[#allocation7 + $0x2670] sm:$0xff] }
 0x4b6   :  { %4810 = vmatpush2.bf16.msra.mxu1 %v2916_v0  ;;  %4770 = vmatprep.subr.bf16.mxu0 %v2645_v1  ;;  %v2197_v0 = vld [vmem:[#allocation7 + $0x36f8] sm:$0xff]  ;;  %v3380_v1 = vpack.c.bf16 %v2228_v46, %v2212_v42  ;;  %v1684_v2 = vld [vmem:[#allocation7 + $0x26f0] sm:$0xff] }
 0x4b7   :  { %4811 = vmatprep.subr.bf16.mxu1 %v2901_v6  ;;  %v2180_v33 = vld [vmem:[#allocation7 + $0x3670] sm:$0xff]  ;;  %v3109_v6 = vpack.c.bf16 %v1685_v54, %v1669_v51  ;;  %v1653_v44 = vld [vmem:[#allocation7 + $0x25f8] sm:$0xff]  ;;  %v3365_v13 = vpack.c.bf16 %v2197_v0, %v2181_v59  ;;  %v3108_v30 = vpack.c.bf16 %v1684_v2, %v1668_v53 }
 0x4b8   :  { %v2196_v7 = vld [vmem:[#allocation7 + $0x36f0] sm:$0xff]  ;;  %v3093_v32 = vpack.c.bf16 %v1653_v44, %v1637_v58  ;;  %v2117_v26 = vld [vmem:[#allocation7 + $0x3478] sm:$0xff] }
 0x4b9   :  { %4771 = vmatpush2.bf16.msra.mxu0 %v2644_v15  ;;  %v2149_v15 = vld [vmem:[#allocation7 + $0x3578] sm:$0xff]  ;;  %v1636_v21 = vld [vmem:[#allocation7 + $0x2570] sm:$0xff] }
 0x4ba   :  { %4812 = vmatpush2.bf16.msra.mxu1 %v2900_v16  ;;  %4772 = vmatprep.subr.bf16.mxu0 %v2629_v18  ;;  %v2165_v16 = vld [vmem:[#allocation7 + $0x35f8] sm:$0xff]  ;;  %v1652_v35 = vld [vmem:[#allocation7 + $0x25f0] sm:$0xff] }
 0x4bb   :  { %4813 = vmatprep.subr.bf16.mxu1 %v2885_v14  ;;  %v3364_v14 = vpack.c.bf16 %v2196_v7, %v2180_v33  ;;  %v2148_v36 = vld [vmem:[#allocation7 + $0x3570] sm:$0xff]  ;;  %v2133_v25 = vld [vmem:[#allocation7 + $0x34f8] sm:$0xff]  ;;  %v3092_v46 = vpack.c.bf16 %v1652_v35, %v1636_v21 }
 0x4bc   :  { %v1604_v54 = vld [vmem:[#allocation7 + $0x2470] sm:$0xff]  ;;  %v1573_v2 = vld [vmem:[#allocation7 + $0x2378] sm:$0xff] }
 0x4bd   :  { %4773 = vmatpush2.bf16.msra.mxu0 %v2628_v38  ;;  %v2164_v38 = vld [vmem:[#allocation7 + $0x35f0] sm:$0xff]  ;;  %v1589_v33 = vld [vmem:[#allocation7 + $0x23f8] sm:$0xff] }
 0x4be   :  { %4814 = vmatpush2.bf16.msra.mxu1 %v2884_v24  ;;  %4824 = vmatprep.subr.bf16.mxu0 %v3125_v39  ;;  %v1605_v24 = vld [vmem:[#allocation7 + $0x2478] sm:$0xff]  ;;  %v2116_v59 = vld [vmem:[#allocation7 + $0x3470] sm:$0xff] }
 0x4bf   :  { %4865 = vmatprep.subr.bf16.mxu1 %v3381_v41  ;;  %v1621_v39 = vld [vmem:[#allocation7 + $0x24f8] sm:$0xff]  ;;  %v2132_v53 = vld [vmem:[#allocation7 + $0x34f0] sm:$0xff] }
 0x4c0   :  { %v4530_v11 = vpop.f32.mrf.mxu0  ;;  %4775 = vmatmul.mubr.bf16.vlgmr.msra.gmra.mxu0 %v9281_v57  ;;  %v2101_v7 = vld [vmem:[#allocation7 + $0x33f8] sm:$0xff]  ;;  %v3332_v44 = vpack.c.bf16 %v2132_v53, %v2116_v59  ;;  %v2036_v59 = vld [vmem:[#allocation7 + $0x31f0] sm:$0xff] }
 0x4c1   :  { %v4531_v18 = vadd.f32 %v4530_v11, %v9444_v48  ;;  %v4571_v27 = vpop.f32.mrf.mxu1  ;;  %4816 = vmatmul.mubr.bf16.vlgmr.msra.gmra.mxu1 %v9274_v52  ;;  %4825 = vmatpush1.bf16.msra.mxu0 %v3124_v55  ;;  %v3349_v52 = vpack.c.bf16 %v2165_v16, %v2149_v15  ;;  %v1620_v55 = vld [vmem:[#allocation7 + $0x24f0] sm:$0xff]  ;;  %v3061_v11 = vpack.c.bf16 %v1589_v33, %v1573_v2  ;;  %v1989_v53 = vld [vmem:[#allocation7 + $0x3078] sm:$0xff] }
 0x4c2   :  { %4856 = vmatprep.mubr.bf16.mxu0 %v9300_v47  ;;  %4866 = vmatpush1.bf16.msra.mxu1 %v3380_v1  ;;  %v4532_v31 = vpop.f32.mrf.mxu0  ;;  %v3333_v1 = vpack.c.bf16 %v2133_v25, %v2117_v26  ;;  %v3076_v58 = vpack.c.bf16 %v1620_v55, %v1604_v54  ;;  %v1588_v15 = vld [vmem:[#allocation7 + $0x23f0] sm:$0xff]  ;;  %v2021_v26 = vld [vmem:[#allocation7 + $0x3178] sm:$0xff] }
 0x4c3   :  { %v9453_v57 = vadd.f32 %v4571_v27, %v4531_v18  ;;  %4897 = vmatprep.mubr.bf16.mxu1 %v9302_v62  ;;  %v4533_v48 = vadd.f32 %v4532_v31, %v9447_v3  ;;  %v4573_v37 = vpop.f32.mrf.mxu1  ;;  %4826 = vmatprep.subr.bf16.mxu0 %v3109_v6  ;;  %v3348_v62 = vpack.c.bf16 %v2164_v38, %v2148_v36  ;;  %v2085_v6 = vld [vmem:[#allocation7 + $0x3378] sm:$0xff]  ;;  %v2084_v16 = vld [vmem:[#allocation7 + $0x3370] sm:$0xff] }
 0x4c4   :  { %v4534_v47 = vpop.f32.mrf.mxu0  ;;  %4867 = vmatprep.subr.bf16.mxu1 %v3365_v13  ;;  %v3077_v3 = vpack.c.bf16 %v1621_v39, %v1605_v24  ;;  %v1572_v13 = vld [vmem:[#allocation7 + $0x2370] sm:$0xff]  ;;  %v3317_v18 = vpack.c.bf16 %v2101_v7, %v2085_v6  ;;  %v1557_v31 = vld [vmem:[#allocation7 + $0x22f8] sm:$0xff] }
 0x4c5   :  { %v9457_v41 = vadd.f32 %v4573_v37, %v4533_v48  ;;  %v4575_v42 = vpop.f32.mrf.mxu1  ;;  %4827 = vmatpush1.bf16.msra.mxu0 %v3108_v30  ;;  %v2100_v27 = vld [vmem:[#allocation7 + $0x33f0] sm:$0xff]  ;;  %v1541_v30 = vld [vmem:[#allocation7 + $0x2278] sm:$0xff]  ;;  %v3060_v21 = vpack.c.bf16 %v1588_v15, %v1572_v13 }
 0x4c6   :  { %4868 = vmatpush1.bf16.msra.mxu1 %v3364_v14  ;;  %v4535_v51 = vpop.f32.mrf.mxu0  ;;  %4828 = vmatprep.subr.bf16.mxu0 %v3093_v32  ;;  %v2053_v14 = vld [vmem:[#allocation7 + $0x3278] sm:$0xff]  ;;  %v3316_v35 = vpack.c.bf16 %v2100_v27, %v2084_v16  ;;  %v3045_v36 = vpack.c.bf16 %v1557_v31, %v1541_v30  ;;  %v1540_v48 = vld [vmem:[#allocation7 + $0x2270] sm:$0xff] }
 0x4c7   :  { %v4576_v0 = vpop.f32.mrf.mxu1  ;;  %4869 = vmatprep.subr.bf16.mxu1 %v3349_v52  ;;  %v2069_v32 = vld [vmem:[#allocation7 + $0x32f8] sm:$0xff]  ;;  %v1556_v37 = vld [vmem:[#allocation7 + $0x22f0] sm:$0xff] }
 0x4c8   :  { %v2052_v52 = vld [vmem:[#allocation7 + $0x3270] sm:$0xff]  ;;  %v3301_v38 = vpack.c.bf16 %v2069_v32, %v2053_v14  ;;  %v1509_v39 = vld [vmem:[#allocation7 + $0x2178] sm:$0xff]  ;;  %v3044_v42 = vpack.c.bf16 %v1556_v37, %v1540_v48 }
 0x4c9   :  { %4829 = vmatpush1.bf16.msra.mxu0 %v3092_v46  ;;  %v2068_v24 = vld [vmem:[#allocation7 + $0x32f0] sm:$0xff]  ;;  %v1525_v47 = vld [vmem:[#allocation7 + $0x21f8] sm:$0xff] }
 0x4ca   :  { %4870 = vmatpush1.bf16.msra.mxu1 %v3348_v62  ;;  %4830 = vmatprep.subr.bf16.mxu0 %v3077_v3  ;;  %v2037_v25 = vld [vmem:[#allocation7 + $0x31f8] sm:$0xff]  ;;  %v3300_v46 = vpack.c.bf16 %v2068_v24, %v2052_v52  ;;  %v3029_v51 = vpack.c.bf16 %v1525_v47, %v1509_v39  ;;  %v1508_v62 = vld [vmem:[#allocation7 + $0x2170] sm:$0xff] }
 0x4cb   :  { %4871 = vmatprep.subr.bf16.mxu1 %v3333_v1  ;;  %v1524_v3 = vld [vmem:[#allocation7 + $0x21f0] sm:$0xff]  ;;  %v3285_v55 = vpack.c.bf16 %v2037_v25, %v2021_v26  ;;  %v1477_v0 = vld [vmem:[#allocation7 + $0x2078] sm:$0xff] }
 0x4cc   :  { %v2020_v54 = vld [vmem:[#allocation7 + $0x3170] sm:$0xff]  ;;  %v1493_v1 = vld [vmem:[#allocation7 + $0x20f8] sm:$0xff]  ;;  %v3028_v33 = vpack.c.bf16 %v1524_v3, %v1508_v62 }
 0x4cd   :  { %4831 = vmatpush1.bf16.msra.mxu0 %v3076_v58  ;;  %v2005_v2 = vld [vmem:[#allocation7 + $0x30f8] sm:$0xff]  ;;  %v3284_v6 = vpack.c.bf16 %v2036_v59, %v2020_v54  ;;  %v3013_v7 = vpack.c.bf16 %v1493_v1, %v1477_v0  ;;  %v1476_v58 = vld [vmem:[#allocation7 + $0x2070] sm:$0xff] }
 0x4ce   :  { %4872 = vmatpush1.bf16.msra.mxu1 %v3332_v44  ;;  %4832 = vmatprep.subr.bf16.mxu0 %v3061_v11  ;;  %v1492_v44 = vld [vmem:[#allocation7 + $0x20f0] sm:$0xff]  ;;  %v3269_v13 = vpack.c.bf16 %v2005_v2, %v1989_v53  ;;  %v1957_v16 = vld [vmem:[#allocation7 + $0x2f78] sm:$0xff] }
 0x4cf   :  { %4873 = vmatprep.subr.bf16.mxu1 %v3317_v18  ;;  %v1988_v11 = vld [vmem:[#allocation7 + $0x3070] sm:$0xff]  ;;  %v1973_v18 = vld [vmem:[#allocation7 + $0x2ff8] sm:$0xff]  ;;  %v3012_v31 = vpack.c.bf16 %v1492_v44, %v1476_v58 }
 0x4d0   :  { %v2004_v15 = vld [vmem:[#allocation7 + $0x30f0] sm:$0xff]  ;;  %v2469_v27 = vld [vmem:[#allocation7 + $0x3f78] sm:$0xff]  ;;  %v3253_v32 = vpack.c.bf16 %v1973_v18, %v1957_v16 }
 0x4d1   :  { %4833 = vmatpush1.bf16.msra.mxu0 %v3060_v21  ;;  %v2485_v30 = vld [vmem:[#allocation7 + $0x3ff8] sm:$0xff]  ;;  %v3268_v14 = vpack.c.bf16 %v2004_v15, %v1988_v11  ;;  %v1956_v21 = vld [vmem:[#allocation7 + $0x2f70] sm:$0xff] }
 0x4d2   :  { %4874 = vmatpush1.bf16.msra.mxu1 %v3316_v35  ;;  %4834 = vmatprep.subr.bf16.mxu0 %v3045_v36  ;;  %v1972_v35 = vld [vmem:[#allocation7 + $0x2ff0] sm:$0xff]  ;;  %v3509_v48 = vpack.c.bf16 %v2485_v30, %v2469_v27  ;;  %v1925_v52 = vld [vmem:[#allocation7 + $0x2e78] sm:$0xff] }
 0x4d3   :  { %4875 = vmatprep.subr.bf16.mxu1 %v3301_v38  ;;  %v2468_v36 = vld [vmem:[#allocation7 + $0x3f70] sm:$0xff]  ;;  %v1941_v38 = vld [vmem:[#allocation7 + $0x2ef8] sm:$0xff]  ;;  %v3252_v47 = vpack.c.bf16 %v1972_v35, %v1956_v21 }
 0x4d4   :  { %v2484_v37 = vld [vmem:[#allocation7 + $0x3ff0] sm:$0xff]  ;;  %v2437_v24 = vld [vmem:[#allocation7 + $0x3e78] sm:$0xff]  ;;  %v3237_v25 = vpack.c.bf16 %v1941_v38, %v1925_v52 }
 0x4d5   :  { %4835 = vmatpush1.bf16.msra.mxu0 %v3044_v42  ;;  %v2453_v39 = vld [vmem:[#allocation7 + $0x3ef8] sm:$0xff]  ;;  %v3508_v26 = vpack.c.bf16 %v2484_v37, %v2468_v36  ;;  %v1924_v42 = vld [vmem:[#allocation7 + $0x2e70] sm:$0xff] }
 0x4d6   :  { %4876 = vmatpush1.bf16.msra.mxu1 %v3300_v46  ;;  %4836 = vmatprep.subr.bf16.mxu0 %v3029_v51  ;;  %v1940_v46 = vld [vmem:[#allocation7 + $0x2ef0] sm:$0xff]  ;;  %v3493_v62 = vpack.c.bf16 %v2453_v39, %v2437_v24  ;;  %v1893_v54 = vld [vmem:[#allocation7 + $0x2d78] sm:$0xff]  ;;  %v8960_v24 = vld [vmem:[#allocation9] sm:$0xff] }
 0x4d7   :  { %4877 = vmatprep.subr.bf16.mxu1 %v3285_v55  ;;  %v2436_v51 = vld [vmem:[#allocation7 + $0x3e70] sm:$0xff]  ;;  %v1909_v55 = vld [vmem:[#allocation7 + $0x2df8] sm:$0xff]  ;;  %v3236_v1 = vpack.c.bf16 %v1940_v46, %v1924_v42  ;;  %v3521_v39 = vrot.slane %v8960_v24, %v9261_v23 }
 0x4d8   :  { %v2452_v3 = vld [vmem:[#allocation7 + $0x3ef0] sm:$0xff]  ;;  %v2405_v59 = vld [vmem:[#allocation7 + $0x3d78] sm:$0xff]  ;;  %v3221_v2 = vpack.c.bf16 %v1909_v55, %v1893_v54 }
 0x4d9   :  { %4837 = vmatpush1.bf16.msra.mxu0 %v3028_v33  ;;  %v2421_v0 = vld [vmem:[#allocation7 + $0x3df8] sm:$0xff]  ;;  %v3492_v53 = vpack.c.bf16 %v2452_v3, %v2436_v51  ;;  %v1892_v33 = vld [vmem:[#allocation7 + $0x2d70] sm:$0xff] }
 0x4da   :  { %4878 = vmatpush1.bf16.msra.mxu1 %v3284_v6  ;;  %4838 = vmatprep.subr.bf16.mxu0 %v3013_v7  ;;  %v1908_v6 = vld [vmem:[#allocation7 + $0x2df0] sm:$0xff]  ;;  %v3477_v58 = vpack.c.bf16 %v2421_v0, %v2405_v59  ;;  %v1861_v11 = vld [vmem:[#allocation7 + $0x2c78] sm:$0xff] }
 0x4db   :  { %4879 = vmatprep.subr.bf16.mxu1 %v3269_v13  ;;  %v2404_v7 = vld [vmem:[#allocation7 + $0x3d70] sm:$0xff]  ;;  %v1877_v13 = vld [vmem:[#allocation7 + $0x2cf8] sm:$0xff]  ;;  %v3220_v18 = vpack.c.bf16 %v1908_v6, %v1892_v33 }
 0x4dc   :  { %v2420_v44 = vld [vmem:[#allocation7 + $0x3df0] sm:$0xff]  ;;  %v2373_v15 = vld [vmem:[#allocation7 + $0x3c78] sm:$0xff]  ;;  %v3205_v30 = vpack.c.bf16 %v1877_v13, %v1861_v11 }
 0x4dd   :  { %4839 = vmatpush1.bf16.msra.mxu0 %v3012_v31  ;;  %v2389_v16 = vld [vmem:[#allocation7 + $0x3cf8] sm:$0xff]  ;;  %v3476_v27 = vpack.c.bf16 %v2420_v44, %v2404_v7  ;;  %v1860_v31 = vld [vmem:[#allocation7 + $0x2c70] sm:$0xff] }
 0x4de   :  { %4880 = vmatpush1.bf16.msra.mxu1 %v3268_v14  ;;  %4840 = vmatprep.subr.bf16.mxu0 %v3253_v32  ;;  %v1876_v14 = vld [vmem:[#allocation7 + $0x2cf0] sm:$0xff]  ;;  %v3461_v21 = vpack.c.bf16 %v2389_v16, %v2373_v15  ;;  %v1829_v36 = vld [vmem:[#allocation7 + $0x2b78] sm:$0xff] }
 0x4df   :  { %4881 = vmatprep.subr.bf16.mxu1 %v3509_v48  ;;  %v2372_v32 = vld [vmem:[#allocation7 + $0x3c70] sm:$0xff]  ;;  %v1845_v48 = vld [vmem:[#allocation7 + $0x2bf8] sm:$0xff]  ;;  %v3204_v38 = vpack.c.bf16 %v1876_v14, %v1860_v31 }
 0x4e0   :  { %v2388_v35 = vld [vmem:[#allocation7 + $0x3cf0] sm:$0xff]  ;;  %v2341_v37 = vld [vmem:[#allocation7 + $0x3b78] sm:$0xff] }
 0x4e1   :  { %4841 = vmatpush2.bf16.msra.mxu0 %v3252_v47  ;;  %v2357_v52 = vld [vmem:[#allocation7 + $0x3bf8] sm:$0xff]  ;;  %v3460_v47 = vpack.c.bf16 %v2388_v35, %v2372_v32  ;;  %v1844_v42 = vld [vmem:[#allocation7 + $0x2bf0] sm:$0xff] }
 0x4e2   :  { %4882 = vmatpush2.bf16.msra.mxu1 %v3508_v26  ;;  %4842 = vmatprep.subr.bf16.mxu0 %v3237_v25  ;;  %v3189_v26 = vpack.c.bf16 %v1845_v48, %v1829_v36  ;;  %v1828_v25 = vld [vmem:[#allocation7 + $0x2b70] sm:$0xff]  ;;  %v3445_v51 = vpack.c.bf16 %v2357_v52, %v2341_v37  ;;  %v1797_v3 = vld [vmem:[#allocation7 + $0x2a78] sm:$0xff] }
 0x4e3   :  { %4883 = vmatprep.subr.bf16.mxu1 %v3493_v62  ;;  %v2340_v46 = vld [vmem:[#allocation7 + $0x3b70] sm:$0xff]  ;;  %v1813_v54 = vld [vmem:[#allocation7 + $0x2af8] sm:$0xff]  ;;  %v3188_v0 = vpack.c.bf16 %v1844_v42, %v1828_v25 }
 0x4e4   :  { %v2356_v62 = vld [vmem:[#allocation7 + $0x3bf0] sm:$0xff]  ;;  %v2309_v55 = vld [vmem:[#allocation7 + $0x3a78] sm:$0xff] }
 0x4e5   :  { %4843 = vmatpush2.bf16.msra.mxu0 %v3236_v1  ;;  %v2325_v59 = vld [vmem:[#allocation7 + $0x3af8] sm:$0xff]  ;;  %v3631_v1 = vadd.f32 %v9334_v49, %v3521_v39  ;;  %v1796_v33 = vld [vmem:[#allocation7 + $0x2a70] sm:$0xff] }
 0x4e6   :  { %4884 = vmatpush2.bf16.msra.mxu1 %v3492_v53  ;;  %4844 = vmatprep.subr.bf16.mxu0 %v3221_v2  ;;  %v3444_v53 = vpack.c.bf16 %v2356_v62, %v2340_v46  ;;  %v3173_v2 = vpack.c.bf16 %v1813_v54, %v1797_v3  ;;  %v1812_v6 = vld [vmem:[#allocation7 + $0x2af0] sm:$0xff]  ;;  %v1765_v11 = vld [vmem:[#allocation7 + $0x2978] sm:$0xff]  ;;  %v5000_v3 = vld [vmem:[%s10556_s5 + $0x1f0] sm:$0xff] }
 0x4e7   :  { %4885 = vmatprep.subr.bf16.mxu1 %v3477_v58  ;;  %v2308_v7 = vld [vmem:[#allocation7 + $0x3a70] sm:$0xff]  ;;  %v3429_v58 = vpack.c.bf16 %v2325_v59, %v2309_v55  ;;  %v1781_v13 = vld [vmem:[#allocation7 + $0x29f8] sm:$0xff] }
 0x4e8   :  { %v2324_v44 = vld [vmem:[#allocation7 + $0x3af0] sm:$0xff]  ;;  %v2277_v15 = vld [vmem:[#allocation7 + $0x3978] sm:$0xff] }
 0x4e9   :  { %4845 = vmatpush2.bf16.msra.mxu0 %v3220_v18  ;;  %v2293_v16 = vld [vmem:[#allocation7 + $0x39f8] sm:$0xff]  ;;  %v3172_v18 = vpack.c.bf16 %v1812_v6, %v1796_v33  ;;  %v3428_v49 = vpack.c.bf16 %v2324_v44, %v2308_v7  ;;  %v1764_v31 = vld [vmem:[#allocation7 + $0x2970] sm:$0xff]  ;;  %v4909_v44 = vmax.f32 %v9377_v50, 0.0 }
 0x4ea   :  { %4886 = vmatpush2.bf16.msra.mxu1 %v3476_v27  ;;  %4846 = vmatprep.subr.bf16.mxu0 %v3205_v30  ;;  %v3672_v27 = vadd.f32 %v9339_v61, %v3631_v1  ;;  %v3157_v30 = vpack.c.bf16 %v1781_v13, %v1765_v11  ;;  %v1780_v14 = vld [vmem:[#allocation7 + $0x29f0] sm:$0xff]  ;;  %v1733_v36 = vld [vmem:[#allocation7 + $0x2878] sm:$0xff]  ;;  %v4952_v1 = vld [vmem:[%s10556_s5 + $0x70] sm:$0xff] }
 0x4eb   :  { %4887 = vmatprep.subr.bf16.mxu1 %v3461_v21  ;;  %v2276_v32 = vld [vmem:[#allocation7 + $0x3970] sm:$0xff]  ;;  %v3413_v21 = vpack.c.bf16 %v2293_v16, %v2277_v15  ;;  %v1749_v48 = vld [vmem:[#allocation7 + $0x28f8] sm:$0xff]  ;;  %v3156_v24 = vpack.c.bf16 %v1780_v14, %v1764_v31  ;;  %v8961_v11 = vld [vmem:[#allocation9 + $0x8] sm:$0xff] }
 0x4ec   :  { %v2292_v35 = vld [vmem:[#allocation7 + $0x39f0] sm:$0xff]  ;;  %v3713_v37 = vadd.f32 %v9345_v28, %v3672_v27  ;;  %v2245_v52 = vld [vmem:[#allocation7 + $0x3878] sm:$0xff]  ;;  %v3141_v39 = vpack.c.bf16 %v1749_v48, %v1733_v36  ;;  %v3565_v13 = vrot.slane %v8961_v11, %v9310_v9 }
 0x4ed   :  { %4847 = vmatpush2.bf16.msra.mxu0 %v3204_v38  ;;  %v2261_v38 = vld [vmem:[#allocation7 + $0x38f8] sm:$0xff]  ;;  %v3412_v61 = vpack.c.bf16 %v2292_v35, %v2276_v32  ;;  %v2244_v25 = vld [vmem:[#allocation7 + $0x3870] sm:$0xff]  ;;  %v4964_v32 = vld [vmem:[%s10556_s5 + $0xd0] sm:$0xff] }
 0x4ee   :  { %4888 = vmatpush2.bf16.msra.mxu1 %v3460_v47  ;;  %4848 = vmatprep.subr.bf16.mxu0 %v3189_v26  ;;  %v1732_v47 = vld [vmem:[#allocation7 + $0x2870] sm:$0xff]  ;;  %v3397_v42 = vpack.c.bf16 %v2261_v38, %v2245_v52  ;;  %v3754_v62 = vadd.f32 %v9350_v60, %v3713_v37  ;;  %v4951_v9 = vld [vmem:[%s10556_s5 + $0x68] sm:$0xff]  ;;  %v9530_v52 = vpack.c.bf16 %v4909_v44, %v4909_v44 }
 0x4ef   :  { %4889 = vmatprep.subr.bf16.mxu1 %v3445_v51  ;;  %v1748_v26 = vld [vmem:[#allocation7 + $0x28f0] sm:$0xff]  ;;  %v4968_v51 = vld [vmem:[%s10556_s5 + $0xf0] sm:$0xff]  ;;  %v4983_v14 = vld [vmem:[%s10556_s5 + $0x168] sm:$0xff] }
 0x4f0   :  { %v2260_v46 = vld [vmem:[#allocation7 + $0x38f0] sm:$0xff]  ;;  %v3140_v55 = vpack.c.bf16 %v1748_v26, %v1732_v47  ;;  %v4907_v6 = vmax.f32 %v3754_v62, 0.0  ;;  %v4948_v26 = vld [vmem:[%s10556_s5 + $0x50] sm:$0xff] }
 0x4f1   :  { %4849 = vmatpush2.bf16.msra.mxu0 %v3188_v0  ;;  %v4969_v28 = vld [vmem:[%s10556_s5 + $0xf8] sm:$0xff]  ;;  %v3396_v59 = vpack.c.bf16 %v2260_v46, %v2244_v25  ;;  %v4966_v7 = vld [vmem:[%s10556_s5 + $0xe0] sm:$0xff] }
 0x4f2   :  { %4890 = vmatpush2.bf16.msra.mxu1 %v3444_v53  ;;  %4850 = vmatprep.subr.bf16.mxu0 %v3173_v2  ;;  %v5001_v54 = vld [vmem:[%s10556_s5 + $0x1f8] sm:$0xff]  ;;  %v5209_v0 = vpack.c.bf16 %v4969_v28, %v4968_v51  ;;  %v4984_v2 = vld [vmem:[%s10556_s5 + $0x170] sm:$0xff]  ;;  %v4998_v16 = vld [vmem:[%s10556_s5 + $0x1e0] sm:$0xff]  ;;  %v9521_v35 = vpack.c.bf16 %v4907_v6, %v4907_v6 }
 0x4f3   :  { %4891 = vmatprep.subr.bf16.mxu1 %v3429_v58  ;;  %v4953_v60 = vld [vmem:[%s10556_s5 + $0x78] sm:$0xff]  ;;  %v5225_v53 = vpack.c.bf16 %v5001_v54, %v5000_v3  ;;  %v4967_v58 = vld [vmem:[%s10556_s5 + $0xe8] sm:$0xff]  ;;  %v4950_v50 = vld [vmem:[%s10556_s5 + $0x60] sm:$0xff] }
 0x4f4   :  { %v4985_v33 = vld [vmem:[%s10556_s5 + $0x178] sm:$0xff]  ;;  %v5201_v15 = vpack.c.bf16 %v4953_v60, %v4952_v1  ;;  %v5208_v31 = vpack.c.bf16 %v4967_v58, %v4966_v7  ;;  %v4962_v3 = vld [vmem:[%s10556_s5 + $0xc0] sm:$0xff]  ;;  %v4963_v54 = vld [vmem:[%s10556_s5 + $0xc8] sm:$0xff] }
 0x4f5   :  { %4851 = vmatpush2.bf16.msra.mxu0 %v3172_v18  ;;  %v4999_v18 = vld [vmem:[%s10556_s5 + $0x1e8] sm:$0xff]  ;;  %v5217_v27 = vpack.c.bf16 %v4985_v33, %v4984_v2  ;;  %v4997_v37 = vld [vmem:[%s10556_s5 + $0x1d8] sm:$0xff]  ;;  %v5206_v6 = vpack.c.bf16 %v4963_v54, %v4962_v3  ;;  %v4946_v7 = vld [vmem:[%s10556_s5 + $0x40] sm:$0xff] }
 0x4f6   :  { %4892 = vmatpush2.bf16.msra.mxu1 %v3428_v49  ;;  %4852 = vmatprep.subr.bf16.mxu0 %v3157_v30  ;;  %v4982_v49 = vld [vmem:[%s10556_s5 + $0x160] sm:$0xff]  ;;  %v3569_v30 = vrot.slane %v8961_v11, %v9279_v56  ;;  %v5224_v48 = vpack.c.bf16 %v4999_v18, %v4998_v16  ;;  %v4996_v56 = vld [vmem:[%s10556_s5 + $0x1d0] sm:$0xff]  ;;  %v4949_v25 = vld [vmem:[%s10556_s5 + $0x58] sm:$0xff] }
 0x4f7   :  { %4893 = vmatprep.subr.bf16.mxu1 %v3413_v21  ;;  %v4965_v21 = vld [vmem:[%s10556_s5 + $0xd8] sm:$0xff]  ;;  %v5223_v28 = vpack.c.bf16 %v4997_v37, %v4996_v56  ;;  %v4947_v58 = vld [vmem:[%s10556_s5 + $0x48] sm:$0xff]  ;;  %v4978_v44 = vld [vmem:[%s10556_s5 + $0x140] sm:$0xff] }
 0x4f8   :  { %v5207_v47 = vpack.c.bf16 %v4965_v21, %v4964_v32  ;;  %v4981_v62 = vld [vmem:[%s10556_s5 + $0x158] sm:$0xff]  ;;  %v4960_v16 = vld [vmem:[%s10556_s5 + $0xb0] sm:$0xff]  ;;  %v4959_v56 = vld [vmem:[%s10556_s5 + $0xa8] sm:$0xff] }
 0x4f9   :  { %4853 = vmatpush2.bf16.msra.mxu0 %v3156_v24  ;;  %v4961_v18 = vld [vmem:[%s10556_s5 + $0xb8] sm:$0xff]  ;;  %v4976_v32 = vld [vmem:[%s10556_s5 + $0x130] sm:$0xff]  ;;  %v4990_v37 = vld [vmem:[%s10556_s5 + $0x1a0] sm:$0xff] }
 0x4fa   :  { %4894 = vmatpush2.bf16.msra.mxu1 %v3412_v61  ;;  %4854 = vmatprep.subr.bf16.mxu0 %v3141_v39  ;;  %v5200_v61 = vpack.c.bf16 %v4951_v9, %v4950_v50  ;;  %v5216_v39 = vpack.c.bf16 %v4983_v14, %v4982_v49  ;;  %v4993_v50 = vld [vmem:[%s10556_s5 + $0x1b8] sm:$0xff]  ;;  %v5198_v9 = vpack.c.bf16 %v4947_v58, %v4946_v7  ;;  %v4986_v7 = vld [vmem:[%s10556_s5 + $0x180] sm:$0xff]  ;;  %v4987_v58 = vld [vmem:[%s10556_s5 + $0x188] sm:$0xff] }
 0x4fb   :  { %4895 = vmatprep.subr.bf16.mxu1 %v3397_v42  ;;  %v4945_v14 = vld [vmem:[%s10556_s5 + $0x38] sm:$0xff] }
 0x4fd   :  { %4855 = vmatpush2.bf16.msra.mxu0 %v3140_v55 }
 0x4fe   :  { %4896 = vmatpush2.bf16.msra.mxu1 %v3396_v59  ;;  %8525 = vmatprep.subr.bf16.mxu0 %v5209_v0  ;;  %v4994_v59 = vld [vmem:[%s10556_s5 + $0x1c0] sm:$0xff]  ;;  %v4995_v0 = vld [vmem:[%s10556_s5 + $0x1c8] sm:$0xff] }
 0x4ff   :  { %8547 = vmatprep.subr.bf16.mxu1 %v5225_v53  ;;  %v5199_v53 = vpack.c.bf16 %v4949_v25, %v4948_v26  ;;  %v4974_v26 = vld [vmem:[%s10556_s5 + $0x120] sm:$0xff] }
 0x500   :  { %v4612_v36 = vpop.f32.mrf.mxu0  ;;  %4857 = vmatmul.mubr.bf16.vlgmr.msra.gmra.mxu0 %v9320_v17 }
 0x501   :  { %v4613_v38 = vadd.f32 %v4612_v36, %v3565_v13  ;;  %v4653_v24 = vpop.f32.mrf.mxu1  ;;  %4898 = vmatmul.mubr.bf16.vlgmr.msra.gmra.mxu1 %v9318_v12  ;;  %8526 = vmatpush3.bf16.msra.mxu0 %v5201_v15  ;;  %v4980_v12 = vld [vmem:[%s10556_s5 + $0x150] sm:$0xff]  ;;  %v5222_v13 = vpack.c.bf16 %v4995_v0, %v4994_v59  ;;  %v4979_v15 = vld [vmem:[%s10556_s5 + $0x148] sm:$0xff]  ;;  %v4977_v36 = vld [vmem:[%s10556_s5 + $0x138] sm:$0xff] }
 0x502   :  { %5361 = vmatprep.mubr.bf16.mxu0 %v9521_v35  ;;  %8548 = vmatpush3.bf16.msra.mxu1 %v5217_v27  ;;  %v4614_v17 = vpop.f32.mrf.mxu0  ;;  %v5215_v33 = vpack.c.bf16 %v4981_v62, %v4980_v12  ;;  %v4992_v27 = vld [vmem:[%s10556_s5 + $0x1b0] sm:$0xff]  ;;  %v5214_v49 = vpack.c.bf16 %v4979_v15, %v4978_v44  ;;  %v4975_v12 = vld [vmem:[%s10556_s5 + $0x128] sm:$0xff]  ;;  %v4989_v62 = vld [vmem:[%s10556_s5 + $0x198] sm:$0xff] }
 0x503   :  { %v9543_v42 = vadd.f32 %v4653_v24, %v4613_v38  ;;  %5401 = vmatprep.mubr.bf16.mxu1 %v9530_v52  ;;  %v4615_v46 = vadd.f32 %v4614_v17, %v3569_v30  ;;  %v4655_v51 = vpop.f32.mrf.mxu1  ;;  %8527 = vmatprep.subr.bf16.mxu0 %v5208_v31  ;;  %v5205_v30 = vpack.c.bf16 %v4961_v18, %v4960_v16  ;;  %v4944_v31 = vld [vmem:[%s10556_s5 + $0x30] sm:$0xff]  ;;  %v4991_v38 = vld [vmem:[%s10556_s5 + $0x1a8] sm:$0xff]  ;;  %v4941_v0 = vld [vmem:[%s10556_s5 + $0x18] sm:$0xff] }
 0x504   :  { %v4616_v55 = vpop.f32.mrf.mxu0  ;;  %8549 = vmatprep.subr.bf16.mxu1 %v5224_v48  ;;  %v5221_v21 = vpack.c.bf16 %v4993_v50, %v4992_v27  ;;  %v4958_v48 = vld [vmem:[%s10556_s5 + $0xa0] sm:$0xff]  ;;  %v5197_v24 = vpack.c.bf16 %v4945_v14, %v4944_v31  ;;  %v5220_v25 = vpack.c.bf16 %v4991_v38, %v4990_v37  ;;  %v5212_v54 = vpack.c.bf16 %v4975_v12, %v4974_v26  ;;  %v4940_v59 = vld [vmem:[%s10556_s5 + $0x10] sm:$0xff]  ;;  %v4939_v16 = vld [vmem:[%s10556_s5 + $0x8] sm:$0xff] }
 0x505   :  { %v9561_v1 = vadd.f32 %v4655_v51, %v4615_v46  ;;  %v4657_v60 = vpop.f32.mrf.mxu1  ;;  %8528 = vmatpush3.bf16.msra.mxu0 %v5200_v61  ;;  %v5213_v61 = vpack.c.bf16 %v4977_v36, %v4976_v32  ;;  %v5204_v17 = vpack.c.bf16 %v4959_v56, %v4958_v48  ;;  %v4956_v46 = vld [vmem:[%s10556_s5 + $0x90] sm:$0xff]  ;;  %v4957_v51 = vld [vmem:[%s10556_s5 + $0x98] sm:$0xff]  ;;  %v5195_v44 = vpack.c.bf16 %v4941_v0, %v4940_v59  ;;  %v4938_v15 = vld [vmem:[%s10556_s5] sm:$0xff] }
 0x506   :  { %8550 = vmatpush3.bf16.msra.mxu1 %v5216_v39  ;;  %v4617_v2 = vpop.f32.mrf.mxu0  ;;  %8529 = vmatprep.subr.bf16.mxu0 %v5207_v47  ;;  %v4942_v39 = vld [vmem:[%s10556_s5 + $0x20] sm:$0xff]  ;;  %v4943_v47 = vld [vmem:[%s10556_s5 + $0x28] sm:$0xff]  ;;  %v5203_v55 = vpack.c.bf16 %v4957_v51, %v4956_v46  ;;  %v4972_v60 = vld [vmem:[%s10556_s5 + $0x110] sm:$0xff]  ;;  %v5218_v27 = vpack.c.bf16 %v4987_v58, %v4986_v7  ;;  %v5194_v14 = vpack.c.bf16 %v4939_v16, %v4938_v15  ;;  %v4906_v32 = vmax.f32 %v9347_v34, 0.0 }
 0x507   :  { %v4658_v11 = vpop.f32.mrf.mxu1  ;;  %8551 = vmatprep.subr.bf16.mxu1 %v5223_v28  ;;  %v4988_v28 = vld [vmem:[%s10556_s5 + $0x190] sm:$0xff]  ;;  %v5196_v3 = vpack.c.bf16 %v4943_v47, %v4942_v39  ;;  %v4973_v2 = vld [vmem:[%s10556_s5 + $0x118] sm:$0xff]  ;;  %v4970_v18 = vld [vmem:[%s10556_s5 + $0x100] sm:$0xff]  ;;  %v4908_v37 = vmax.f32 %v9374_v40, 0.0  ;;  %v4913_v39 = vmax.f32 %v9417_v29, 0.0 }
 0x508   :  { %v5211_v11 = vpack.c.bf16 %v4973_v2, %v4972_v60  ;;  %v4971_v50 = vld [vmem:[%s10556_s5 + $0x108] sm:$0xff]  ;;  %v5065_v31 = vld [vmem:[%s10556_s5 + $0x3f8] sm:$0xff]  ;;  %v5016_v48 = vld [vmem:[%s10556_s5 + $0x270] sm:$0xff] }
 0x509   :  { %8530 = vmatpush3.bf16.msra.mxu0 %v5199_v53  ;;  %v5219_v53 = vpack.c.bf16 %v4989_v62, %v4988_v28  ;;  %v5017_v56 = vld [vmem:[%s10556_s5 + $0x278] sm:$0xff]  ;;  %v5048_v34 = vld [vmem:[%s10556_s5 + $0x370] sm:$0xff]  ;;  %v5031_v40 = vld [vmem:[%s10556_s5 + $0x2e8] sm:$0xff]  ;;  %v9722_v28 = vpack.c.bf16 %v4908_v37, %v4908_v37  ;;  %v9742_v2 = vpack.c.bf16 %v4913_v39, %v4913_v39 }
 0x50a   :  { %8552 = vmatpush3.bf16.msra.mxu1 %v5215_v33  ;;  %8531 = vmatprep.subr.bf16.mxu0 %v5206_v6  ;;  %v4954_v33 = vld [vmem:[%s10556_s5 + $0x80] sm:$0xff]  ;;  %v4955_v6 = vld [vmem:[%s10556_s5 + $0x88] sm:$0xff]  ;;  %v5233_v47 = vpack.c.bf16 %v5017_v56, %v5016_v48  ;;  %v5060_v60 = vld [vmem:[%s10556_s5 + $0x3d0] sm:$0xff] }
 0x50b   :  { %8553 = vmatprep.subr.bf16.mxu1 %v5222_v13  ;;  %v5202_v13 = vpack.c.bf16 %v4955_v6, %v4954_v33  ;;  %v5062_v26 = vld [vmem:[%s10556_s5 + $0x3e0] sm:$0xff]  ;;  %v5015_v29 = vld [vmem:[%s10556_s5 + $0x268] sm:$0xff]  ;;  %v5012_v58 = vld [vmem:[%s10556_s5 + $0x250] sm:$0xff] }
 0x50c   :  { %v5014_v46 = vld [vmem:[%s10556_s5 + $0x260] sm:$0xff]  ;;  %v5045_v15 = vld [vmem:[%s10556_s5 + $0x358] sm:$0xff]  ;;  %v5024_v48 = vld [vmem:[%s10556_s5 + $0x2b0] sm:$0xff] }
 0x50d   :  { %8532 = vmatpush3.bf16.msra.mxu0 %v5198_v9  ;;  %v5032_v9 = vld [vmem:[%s10556_s5 + $0x2f0] sm:$0xff]  ;;  %v5046_v51 = vld [vmem:[%s10556_s5 + $0x360] sm:$0xff]  ;;  %v5232_v33 = vpack.c.bf16 %v5015_v29, %v5014_v46  ;;  %v5025_v56 = vld [vmem:[%s10556_s5 + $0x2b8] sm:$0xff] }
 0x50e   :  { %8554 = vmatpush3.bf16.msra.mxu1 %v5214_v49  ;;  %8533 = vmatprep.subr.bf16.mxu0 %v5205_v30  ;;  %v5033_v49 = vld [vmem:[%s10556_s5 + $0x2f8] sm:$0xff]  ;;  %v5064_v30 = vld [vmem:[%s10556_s5 + $0x3f0] sm:$0xff]  ;;  %v5026_v16 = vld [vmem:[%s10556_s5 + $0x2c0] sm:$0xff] }
 0x50f   :  { %8555 = vmatprep.subr.bf16.mxu1 %v5221_v21  ;;  %v5210_v21 = vpack.c.bf16 %v4971_v50, %v4970_v18  ;;  %v5241_v36 = vpack.c.bf16 %v5033_v49, %v5032_v9  ;;  %v5257_v38 = vpack.c.bf16 %v5065_v31, %v5064_v30  ;;  %v5027_v18 = vld [vmem:[%s10556_s5 + $0x2c8] sm:$0xff]  ;;  %v5010_v31 = vld [vmem:[%s10556_s5 + $0x240] sm:$0xff]  ;;  %v5056_v37 = vld [vmem:[%s10556_s5 + $0x3b0] sm:$0xff] }
 0x510   :  { %v5059_v50 = vld [vmem:[%s10556_s5 + $0x3c8] sm:$0xff]  ;;  %v5238_v30 = vpack.c.bf16 %v5027_v18, %v5026_v16  ;;  %v5040_v39 = vld [vmem:[%s10556_s5 + $0x330] sm:$0xff]  ;;  %v5054_v46 = vld [vmem:[%s10556_s5 + $0x3a0] sm:$0xff] }
 0x511   :  { %8534 = vmatpush3.bf16.msra.mxu0 %v5197_v24  ;;  %v5049_v24 = vld [vmem:[%s10556_s5 + $0x378] sm:$0xff]  ;;  %v5055_v29 = vld [vmem:[%s10556_s5 + $0x3a8] sm:$0xff]  ;;  %v5036_v18 = vld [vmem:[%s10556_s5 + $0x310] sm:$0xff] }
 0x512   :  { %8556 = vmatpush3.bf16.msra.mxu1 %v5213_v61  ;;  %8535 = vmatprep.subr.bf16.mxu0 %v5204_v17  ;;  %v4911_v61 = vmax.f32 %v9397_v10, 0.0  ;;  %v5030_v17 = vld [vmem:[%s10556_s5 + $0x2e0] sm:$0xff]  ;;  %v5063_v10 = vld [vmem:[%s10556_s5 + $0x3e8] sm:$0xff]  ;;  %v5249_v12 = vpack.c.bf16 %v5049_v24, %v5048_v34  ;;  %v5005_v16 = vld [vmem:[%s10556_s5 + $0x218] sm:$0xff] }
 0x513   :  { %8557 = vmatprep.subr.bf16.mxu1 %v5220_v25  ;;  %v9711_v25 = vpack.c.bf16 %v4906_v32, %v4906_v32  ;;  %v5240_v62 = vpack.c.bf16 %v5031_v40, %v5030_v17  ;;  %v5256_v0 = vpack.c.bf16 %v5063_v10, %v5062_v26  ;;  %v5042_v32 = vld [vmem:[%s10556_s5 + $0x340] sm:$0xff]  ;;  %v5008_v17 = vld [vmem:[%s10556_s5 + $0x230] sm:$0xff]  ;;  %v5009_v40 = vld [vmem:[%s10556_s5 + $0x238] sm:$0xff] }
 0x514   :  { %v9733_v59 = vpack.c.bf16 %v4911_v61, %v4911_v61  ;;  %v5237_v61 = vpack.c.bf16 %v5025_v56, %v5024_v48  ;;  %v5041_v26 = vld [vmem:[%s10556_s5 + $0x338] sm:$0xff]  ;;  %v5022_v10 = vld [vmem:[%s10556_s5 + $0x2a0] sm:$0xff]  ;;  %v5003_v48 = vld [vmem:[%s10556_s5 + $0x208] sm:$0xff] }
 0x515   :  { %8536 = vmatpush3.bf16.msra.mxu0 %v5196_v3  ;;  %v5047_v3 = vld [vmem:[%s10556_s5 + $0x368] sm:$0xff]  ;;  %v5034_v56 = vld [vmem:[%s10556_s5 + $0x300] sm:$0xff] }
 0x516   :  { %8558 = vmatpush3.bf16.msra.mxu1 %v5212_v54  ;;  %8537 = vmatprep.subr.bf16.mxu0 %v5203_v55  ;;  %v5028_v54 = vld [vmem:[%s10556_s5 + $0x2d0] sm:$0xff]  ;;  %v5029_v55 = vld [vmem:[%s10556_s5 + $0x2d8] sm:$0xff]  ;;  %v5248_v6 = vpack.c.bf16 %v5047_v3, %v5046_v51  ;;  %v5229_v51 = vpack.c.bf16 %v5009_v40, %v5008_v17 }
 0x517   :  { %8559 = vmatprep.subr.bf16.mxu1 %v5219_v53  ;;  %v5061_v53 = vld [vmem:[%s10556_s5 + $0x3d8] sm:$0xff]  ;;  %v5239_v7 = vpack.c.bf16 %v5029_v55, %v5028_v54  ;;  %v5006_v54 = vld [vmem:[%s10556_s5 + $0x220] sm:$0xff]  ;;  %v5007_v55 = vld [vmem:[%s10556_s5 + $0x228] sm:$0xff] }
 0x518   :  { %v5129_v17 = vld [vmem:[%s10556_s5 + $0x5f8] sm:$0xff] }
 0x519   :  { %8538 = vmatpush3.bf16.msra.mxu0 %v5195_v44  ;;  %v5013_v44 = vld [vmem:[%s10556_s5 + $0x258] sm:$0xff] }
 0x51a   :  { %8560 = vmatpush3.bf16.msra.mxu1 %v5211_v11  ;;  %8539 = vmatprep.subr.bf16.mxu0 %v5202_v13  ;;  %v5044_v11 = vld [vmem:[%s10556_s5 + $0x350] sm:$0xff]  ;;  %v5255_v13 = vpack.c.bf16 %v5061_v53, %v5060_v60  ;;  %v5231_v9 = vpack.c.bf16 %v5013_v44, %v5012_v58  ;;  %v5252_v60 = vpack.c.bf16 %v5055_v29, %v5054_v46  ;;  %v5039_v53 = vld [vmem:[%s10556_s5 + $0x328] sm:$0xff]  ;;  %v5053_v58 = vld [vmem:[%s10556_s5 + $0x398] sm:$0xff]  ;;  %v4912_v46 = vmax.f32 %v9413_v5, 0.0 }
 0x51b   :  { %8561 = vmatprep.subr.bf16.mxu1 %v5218_v27  ;;  %v5058_v27 = vld [vmem:[%s10556_s5 + $0x3c0] sm:$0xff]  ;;  %v5247_v49 = vpack.c.bf16 %v5045_v15, %v5044_v11  ;;  %v5228_v44 = vpack.c.bf16 %v5007_v55, %v5006_v54  ;;  %v5004_v15 = vld [vmem:[%s10556_s5 + $0x210] sm:$0xff]  ;;  %v5095_v5 = vld [vmem:[%s10556_s5 + $0x4e8] sm:$0xff]  ;;  %v4917_v54 = vmax.f32 %v9457_v41, 0.0 }
 0x51c   :  { %v5079_v41 = vld [vmem:[%s10556_s5 + $0x468] sm:$0xff] }
 0x51d   :  { %8540 = vmatpush3.bf16.msra.mxu0 %v5194_v14  ;;  %v5011_v14 = vld [vmem:[%s10556_s5 + $0x248] sm:$0xff] }
 0x51e   :  { %8562 = vmatpush3.bf16.msra.mxu1 %v5210_v21  ;;  %8569 = vmatprep.subr.bf16.mxu0 %v5241_v36  ;;  %v5254_v21 = vpack.c.bf16 %v5059_v50, %v5058_v27  ;;  %v5043_v36 = vld [vmem:[%s10556_s5 + $0x348] sm:$0xff]  ;;  %v5230_v34 = vpack.c.bf16 %v5011_v14, %v5010_v31  ;;  %v5037_v50 = vld [vmem:[%s10556_s5 + $0x318] sm:$0xff]  ;;  %v5227_v14 = vpack.c.bf16 %v5005_v16, %v5004_v15 }
 0x51f   :  { %8591 = vmatprep.subr.bf16.mxu1 %v5257_v38  ;;  %v5057_v38 = vld [vmem:[%s10556_s5 + $0x3b8] sm:$0xff]  ;;  %v5246_v24 = vpack.c.bf16 %v5043_v36, %v5042_v32  ;;  %v5051_v31 = vld [vmem:[%s10556_s5 + $0x388] sm:$0xff]  ;;  %v5243_v32 = vpack.c.bf16 %v5037_v50, %v5036_v18  ;;  %v5002_v36 = vld [vmem:[%s10556_s5 + $0x200] sm:$0xff] }
 0x520   :  { %5362 = vmatmul.mubr.bf16.vlgmr.msra.gmra.mxu0 %v9711_v25  ;;  %v5226_v40 = vpack.c.bf16 %v5003_v48, %v5002_v36  ;;  %v5125_v50 = vld [vmem:[%s10556_s5 + $0x5d8] sm:$0xff]  ;;  %v5108_v48 = vld [vmem:[%s10556_s5 + $0x550] sm:$0xff] }
 0x521   :  { %5402 = vmatmul.mubr.bf16.vlgmr.msra.gmra.mxu1 %v9722_v28  ;;  %8570 = vmatpush3.bf16.msra.mxu0 %v5233_v47  ;;  %v5253_v47 = vpack.c.bf16 %v5057_v38, %v5056_v37  ;;  %v5035_v38 = vld [vmem:[%s10556_s5 + $0x308] sm:$0xff]  ;;  %v5077_v36 = vld [vmem:[%s10556_s5 + $0x458] sm:$0xff] }
 0x522   :  { %5441 = vmatprep.mubr.bf16.mxu0 %v9733_v59  ;;  %8592 = vmatpush3.bf16.msra.mxu1 %v5249_v12  ;;  %v5023_v12 = vld [vmem:[%s10556_s5 + $0x2a8] sm:$0xff] }
 0x523   :  { %5481 = vmatprep.mubr.bf16.mxu1 %v9742_v2  ;;  %8571 = vmatprep.subr.bf16.mxu0 %v5240_v62  ;;  %v5245_v62 = vpack.c.bf16 %v5041_v26, %v5040_v39  ;;  %v5236_v3 = vpack.c.bf16 %v5023_v12, %v5022_v10  ;;  %v4910_v39 = vmax.f32 %v9393_v4, 0.0  ;;  %v5080_v10 = vld [vmem:[%s10556_s5 + $0x470] sm:$0xff]  ;;  %v5081_v12 = vld [vmem:[%s10556_s5 + $0x478] sm:$0xff] }
 0x524   :  { %8593 = vmatprep.subr.bf16.mxu1 %v5256_v0  ;;  %v5038_v0 = vld [vmem:[%s10556_s5 + $0x320] sm:$0xff]  ;;  %v5112_v4 = vld [vmem:[%s10556_s5 + $0x570] sm:$0xff]  ;;  %v5265_v55 = vpack.c.bf16 %v5081_v12, %v5080_v10 }
 0x525   :  { %8572 = vmatpush3.bf16.msra.mxu0 %v5232_v33  ;;  %v5020_v33 = vld [vmem:[%s10556_s5 + $0x290] sm:$0xff]  ;;  %v5244_v11 = vpack.c.bf16 %v5039_v53, %v5038_v0  ;;  %v5126_v0 = vld [vmem:[%s10556_s5 + $0x5e0] sm:$0xff] }
 0x526   :  { %8594 = vmatpush3.bf16.msra.mxu1 %v5248_v6  ;;  %8573 = vmatprep.subr.bf16.mxu0 %v5239_v7  ;;  %v5021_v6 = vld [vmem:[%s10556_s5 + $0x298] sm:$0xff]  ;;  %v5052_v7 = vld [vmem:[%s10556_s5 + $0x390] sm:$0xff] }
 0x527   :  { %8595 = vmatprep.subr.bf16.mxu1 %v5255_v13  ;;  %v5235_v13 = vpack.c.bf16 %v5021_v6, %v5020_v33  ;;  %v5251_v27 = vpack.c.bf16 %v5053_v58, %v5052_v7  ;;  %v5078_v33 = vld [vmem:[%s10556_s5 + $0x460] sm:$0xff]  ;;  %v9930_v7 = vpack.c.bf16 %v4912_v46, %v4912_v46 }
 0x528   :  { %v5110_v6 = vld [vmem:[%s10556_s5 + $0x560] sm:$0xff] }
 0x529   :  { %8574 = vmatpush3.bf16.msra.mxu0 %v5231_v9  ;;  %v5018_v9 = vld [vmem:[%s10556_s5 + $0x280] sm:$0xff] }
 0x52a   :  { %8596 = vmatpush3.bf16.msra.mxu1 %v5247_v49  ;;  %8575 = vmatprep.subr.bf16.mxu0 %v5238_v30  ;;  %v5019_v49 = vld [vmem:[%s10556_s5 + $0x288] sm:$0xff]  ;;  %v5050_v30 = vld [vmem:[%s10556_s5 + $0x380] sm:$0xff] }
 0x52b   :  { %8597 = vmatprep.subr.bf16.mxu1 %v5254_v21  ;;  %v5234_v21 = vpack.c.bf16 %v5019_v49, %v5018_v9  ;;  %v5250_v37 = vpack.c.bf16 %v5051_v31, %v5050_v30  ;;  %v9952_v9 = vpack.c.bf16 %v4917_v54, %v4917_v54  ;;  %v5264_v30 = vpack.c.bf16 %v5079_v41, %v5078_v33  ;;  %v5074_v46 = vld [vmem:[%s10556_s5 + $0x440] sm:$0xff]  ;;  %v5089_v54 = vld [vmem:[%s10556_s5 + $0x4b8] sm:$0xff]  ;;  %v5072_v41 = vld [vmem:[%s10556_s5 + $0x430] sm:$0xff] }
 0x52d   :  { %8576 = vmatpush3.bf16.msra.mxu0 %v5230_v34  ;;  %v5096_v34 = vld [vmem:[%s10556_s5 + $0x4f0] sm:$0xff] }
 0x52e   :  { %8598 = vmatpush3.bf16.msra.mxu1 %v5246_v24  ;;  %8577 = vmatprep.subr.bf16.mxu0 %v5237_v61  ;;  %v5097_v24 = vld [vmem:[%s10556_s5 + $0x4f8] sm:$0xff]  ;;  %v5128_v61 = vld [vmem:[%s10556_s5 + $0x5f0] sm:$0xff] }
 0x52f   :  { %8599 = vmatprep.subr.bf16.mxu1 %v5253_v47  ;;  %v5242_v47 = vpack.c.bf16 %v5035_v38, %v5034_v56  ;;  %v5273_v26 = vpack.c.bf16 %v5097_v24, %v5096_v34  ;;  %v5289_v29 = vpack.c.bf16 %v5129_v17, %v5128_v61  ;;  %v5109_v38 = vld [vmem:[%s10556_s5 + $0x558] sm:$0xff]  ;;  %v5090_v34 = vld [vmem:[%s10556_s5 + $0x4c0] sm:$0xff]  ;;  %v5091_v24 = vld [vmem:[%s10556_s5 + $0x4c8] sm:$0xff] }
 0x530   :  { %v5122_v17 = vld [vmem:[%s10556_s5 + $0x5c0] sm:$0xff]  ;;  %v5279_v10 = vpack.c.bf16 %v5109_v38, %v5108_v48  ;;  %v5270_v12 = vpack.c.bf16 %v5091_v24, %v5090_v34  ;;  %v5103_v38 = vld [vmem:[%s10556_s5 + $0x528] sm:$0xff]  ;;  %v5084_v34 = vld [vmem:[%s10556_s5 + $0x490] sm:$0xff] }
 0x531   :  { %8578 = vmatpush3.bf16.msra.mxu0 %v5229_v51  ;;  %v5113_v51 = vld [vmem:[%s10556_s5 + $0x578] sm:$0xff]  ;;  %v5102_v48 = vld [vmem:[%s10556_s5 + $0x520] sm:$0xff] }
 0x532   :  { %8600 = vmatpush3.bf16.msra.mxu1 %v5245_v62  ;;  %8579 = vmatprep.subr.bf16.mxu0 %v5236_v3  ;;  %v4915_v62 = vmax.f32 %v9437_v43, 0.0  ;;  %v5094_v3 = vld [vmem:[%s10556_s5 + $0x4e0] sm:$0xff]  ;;  %v5127_v43 = vld [vmem:[%s10556_s5 + $0x5e8] sm:$0xff]  ;;  %v5281_v53 = vpack.c.bf16 %v5113_v51, %v5112_v4  ;;  %v5085_v24 = vld [vmem:[%s10556_s5 + $0x498] sm:$0xff] }
 0x533   :  { %8601 = vmatprep.subr.bf16.mxu1 %v5252_v60  ;;  %v9919_v60 = vpack.c.bf16 %v4910_v39, %v4910_v39  ;;  %v5272_v58 = vpack.c.bf16 %v5095_v5, %v5094_v3  ;;  %v5288_v18 = vpack.c.bf16 %v5127_v43, %v5126_v0  ;;  %v5106_v4 = vld [vmem:[%s10556_s5 + $0x540] sm:$0xff]  ;;  %v5107_v3 = vld [vmem:[%s10556_s5 + $0x548] sm:$0xff]  ;;  %v5088_v5 = vld [vmem:[%s10556_s5 + $0x4b0] sm:$0xff] }
 0x534   :  { %v9941_v15 = vpack.c.bf16 %v4915_v62, %v4915_v62  ;;  %v5121_v0 = vld [vmem:[%s10556_s5 + $0x5b8] sm:$0xff]  ;;  %v5269_v33 = vpack.c.bf16 %v5089_v54, %v5088_v5  ;;  %v5115_v5 = vld [vmem:[%s10556_s5 + $0x588] sm:$0xff] }
 0x535   :  { %8580 = vmatpush3.bf16.msra.mxu0 %v5228_v44  ;;  %v5111_v44 = vld [vmem:[%s10556_s5 + $0x568] sm:$0xff] }
 0x536   :  { %8602 = vmatpush3.bf16.msra.mxu1 %v5244_v11  ;;  %8581 = vmatprep.subr.bf16.mxu0 %v5235_v13  ;;  %v5092_v11 = vld [vmem:[%s10556_s5 + $0x4d0] sm:$0xff]  ;;  %v5093_v13 = vld [vmem:[%s10556_s5 + $0x4d8] sm:$0xff] }
 0x537   :  { %8603 = vmatprep.subr.bf16.mxu1 %v5251_v27  ;;  %v5124_v27 = vld [vmem:[%s10556_s5 + $0x5d0] sm:$0xff] }
 0x539   :  { %8582 = vmatpush3.bf16.msra.mxu0 %v5227_v14  ;;  %v5280_v14 = vpack.c.bf16 %v5111_v44, %v5110_v6  ;;  %v5073_v6 = vld [vmem:[%s10556_s5 + $0x438] sm:$0xff] }
 0x53a   :  { %8604 = vmatpush3.bf16.msra.mxu1 %v5243_v32  ;;  %8583 = vmatprep.subr.bf16.mxu0 %v5234_v21  ;;  %v5271_v32 = vpack.c.bf16 %v5093_v13, %v5092_v11  ;;  %v5076_v21 = vld [vmem:[%s10556_s5 + $0x450] sm:$0xff]  ;;  %v5105_v11 = vld [vmem:[%s10556_s5 + $0x538] sm:$0xff]  ;;  %v5086_v13 = vld [vmem:[%s10556_s5 + $0x4a0] sm:$0xff] }
 0x53b   :  { %8605 = vmatprep.subr.bf16.mxu1 %v5250_v37  ;;  %v5287_v37 = vpack.c.bf16 %v5125_v50, %v5124_v27  ;;  %v5118_v27 = vld [vmem:[%s10556_s5 + $0x5a0] sm:$0xff]  ;;  %v5119_v50 = vld [vmem:[%s10556_s5 + $0x5a8] sm:$0xff] }
 0x53d   :  { %8584 = vmatpush3.bf16.msra.mxu0 %v5226_v40  ;;  %v5123_v40 = vld [vmem:[%s10556_s5 + $0x5c8] sm:$0xff] }
 0x53e   :  { %8606 = vmatpush3.bf16.msra.mxu1 %v5242_v47  ;;  %8613 = vmatprep.subr.bf16.mxu0 %v5273_v26  ;;  %v5263_v47 = vpack.c.bf16 %v5077_v36, %v5076_v21  ;;  %v5286_v62 = vpack.c.bf16 %v5123_v40, %v5122_v17  ;;  %v5070_v21 = vld [vmem:[%s10556_s5 + $0x420] sm:$0xff]  ;;  %v5071_v36 = vld [vmem:[%s10556_s5 + $0x428] sm:$0xff]  ;;  %v5117_v17 = vld [vmem:[%s10556_s5 + $0x598] sm:$0xff] }
 0x53f   :  { %8635 = vmatprep.subr.bf16.mxu1 %v5289_v29  ;;  %v5075_v29 = vld [vmem:[%s10556_s5 + $0x448] sm:$0xff]  ;;  %v5260_v40 = vpack.c.bf16 %v5071_v36, %v5070_v21 }
 0x540   :  { %v9943_v16 = vpop.f32.mrf.mxu0  ;;  %5442 = vmatmul.mubr.bf16.vlgmr.msra.gmra.mxu0 %v9919_v60  ;;  %v5262_v43 = vpack.c.bf16 %v5075_v29, %v5074_v46  ;;  %v5101_v29 = vld [vmem:[%s10556_s5 + $0x518] sm:$0xff] }
 0x541   :  { %v9954_v49 = vpop.f32.mrf.mxu1  ;;  %5482 = vmatmul.mubr.bf16.vlgmr.msra.gmra.mxu1 %v9930_v7  ;;  %8614 = vmatpush3.bf16.msra.mxu0 %v5265_v55  ;;  %v5120_v55 = vld [vmem:[%s10556_s5 + $0x5b0] sm:$0xff] }
 0x542   :  { %5521 = vmatprep.mubr.bf16.mxu0 %v9941_v15  ;;  %8636 = vmatpush3.bf16.msra.mxu1 %v5281_v53  ;;  %v9958_v31 = vpop.f32.mrf.mxu0  ;;  %v5278_v53 = vpack.c.bf16 %v5107_v3, %v5106_v4  ;;  %v5285_v44 = vpack.c.bf16 %v5121_v0, %v5120_v55  ;;  %v5082_v4 = vld [vmem:[%s10556_s5 + $0x480] sm:$0xff] }
 0x543   :  { %5561 = vmatprep.mubr.bf16.mxu1 %v9952_v9  ;;  %v9970_v56 = vpop.f32.mrf.mxu1  ;;  %8615 = vmatprep.subr.bf16.mxu0 %v5272_v58  ;;  %v5104_v58 = vld [vmem:[%s10556_s5 + $0x530] sm:$0xff]  ;;  %v5114_v3 = vld [vmem:[%s10556_s5 + $0x580] sm:$0xff] }
 0x544   :  { %v4698_v61 = vpop.f32.mrf.mxu0  ;;  %8637 = vmatprep.subr.bf16.mxu1 %v5288_v18  ;;  %v5087_v18 = vld [vmem:[%s10556_s5 + $0x4a8] sm:$0xff] }
 0x545   :  { %v4739_v39 = vpop.f32.mrf.mxu1  ;;  %8616 = vmatpush3.bf16.msra.mxu0 %v5264_v30  ;;  %v5261_v30 = vpack.c.bf16 %v5073_v6, %v5072_v41  ;;  %v5116_v61 = vld [vmem:[%s10556_s5 + $0x590] sm:$0xff]  ;;  %v5161_v6 = vld [vmem:[%s10556_s5 + $0x6f8] sm:$0xff] }
 0x546   :  { %8638 = vmatpush3.bf16.msra.mxu1 %v5280_v14  ;;  %v4699_v26 = vpop.f32.mrf.mxu0  ;;  %8617 = vmatprep.subr.bf16.mxu0 %v5271_v32  ;;  %v5277_v14 = vpack.c.bf16 %v5105_v11, %v5104_v58  ;;  %v5268_v32 = vpack.c.bf16 %v5087_v18, %v5086_v13  ;;  %v5276_v39 = vpack.c.bf16 %v5103_v38, %v5102_v48  ;;  %v5160_v41 = vld [vmem:[%s10556_s5 + $0x6f0] sm:$0xff]  ;;  %v5193_v11 = vld [vmem:[%s10556_s5 + $0x7f8] sm:$0xff]  ;;  %v4914_v18 = vmax.f32 %v9433_v45, 0.0  ;;  %v5159_v45 = vld [vmem:[%s10556_s5 + $0x6e8] sm:$0xff] }
 0x547   :  { %v4740_v51 = vpop.f32.mrf.mxu1  ;;  %8639 = vmatprep.subr.bf16.mxu1 %v5287_v37  ;;  %v5284_v37 = vpack.c.bf16 %v5119_v50, %v5118_v27  ;;  %v5068_v26 = vld [vmem:[%s10556_s5 + $0x410] sm:$0xff]  ;;  %v5283_v46 = vpack.c.bf16 %v5117_v17, %v5116_v61  ;;  %v5305_v50 = vpack.c.bf16 %v5161_v6, %v5160_v41  ;;  %v5190_v38 = vld [vmem:[%s10556_s5 + $0x7e0] sm:$0xff] }
 0x548   :  { %v5083_v51 = vld [vmem:[%s10556_s5 + $0x488] sm:$0xff]  ;;  %v5176_v48 = vld [vmem:[%s10556_s5 + $0x770] sm:$0xff]  ;;  %v5142_v17 = vld [vmem:[%s10556_s5 + $0x660] sm:$0xff] }
 0x549   :  { %8618 = vmatpush3.bf16.msra.mxu0 %v5263_v47  ;;  %v5267_v47 = vpack.c.bf16 %v5085_v24, %v5084_v34  ;;  %v5266_v0 = vpack.c.bf16 %v5083_v51, %v5082_v4  ;;  %v5191_v34 = vld [vmem:[%s10556_s5 + $0x7e8] sm:$0xff]  ;;  %v10136_v24 = vpack.c.bf16 %v4914_v18, %v4914_v18  ;;  %v5186_v6 = vld [vmem:[%s10556_s5 + $0x7c0] sm:$0xff]  ;;  %v5152_v18 = vld [vmem:[%s10556_s5 + $0x6b0] sm:$0xff] }
 0x54a   :  { %8640 = vmatpush3.bf16.msra.mxu1 %v5279_v10  ;;  %8619 = vmatprep.subr.bf16.mxu0 %v5270_v12  ;;  %v5069_v10 = vld [vmem:[%s10556_s5 + $0x418] sm:$0xff]  ;;  %v5100_v12 = vld [vmem:[%s10556_s5 + $0x510] sm:$0xff]  ;;  %v5175_v4 = vld [vmem:[%s10556_s5 + $0x768] sm:$0xff] }
 0x54b   :  { %8641 = vmatprep.subr.bf16.mxu1 %v5286_v62  ;;  %v4697_v62 = vadd.f32 %v9958_v31, %v9561_v1  ;;  %v5259_v54 = vpack.c.bf16 %v5069_v10, %v5068_v26  ;;  %v5275_v55 = vpack.c.bf16 %v5101_v29, %v5100_v12  ;;  %v5067_v1 = vld [vmem:[%s10556_s5 + $0x408] sm:$0xff]  ;;  %v5098_v31 = vld [vmem:[%s10556_s5 + $0x500] sm:$0xff]  ;;  %v5157_v26 = vld [vmem:[%s10556_s5 + $0x6d8] sm:$0xff] }
 0x54c   :  { %v5174_v29 = vld [vmem:[%s10556_s5 + $0x760] sm:$0xff] }
 0x54d   :  { %8620 = vmatpush3.bf16.msra.mxu0 %v5262_v43  ;;  %v5066_v43 = vld [vmem:[%s10556_s5 + $0x400] sm:$0xff]  ;;  %v4738_v58 = vadd.f32 %v9970_v56, %v4697_v62  ;;  %v5144_v56 = vld [vmem:[%s10556_s5 + $0x670] sm:$0xff] }
 0x54e   :  { %8642 = vmatpush3.bf16.msra.mxu1 %v5278_v53  ;;  %8621 = vmatprep.subr.bf16.mxu0 %v5269_v33  ;;  %v5282_v53 = vpack.c.bf16 %v5115_v5, %v5114_v3  ;;  %v5099_v33 = vld [vmem:[%s10556_s5 + $0x508] sm:$0xff]  ;;  %v5258_v13 = vpack.c.bf16 %v5067_v1, %v5066_v43  ;;  %v5188_v62 = vld [vmem:[%s10556_s5 + $0x7d0] sm:$0xff]  ;;  %v5189_v3 = vld [vmem:[%s10556_s5 + $0x7d8] sm:$0xff]  ;;  %v5312_v1 = vpack.c.bf16 %v5175_v4, %v5174_v29 }
 0x54f   :  { %8643 = vmatprep.subr.bf16.mxu1 %v5285_v44  ;;  %v5192_v44 = vld [vmem:[%s10556_s5 + $0x7f0] sm:$0xff]  ;;  %v5274_v27 = vpack.c.bf16 %v5099_v33, %v5098_v31  ;;  %v4919_v36 = vmax.f32 %v4738_v58, 0.0  ;;  %v5155_v43 = vld [vmem:[%s10556_s5 + $0x6c8] sm:$0xff]  ;;  %v5319_v31 = vpack.c.bf16 %v5189_v3, %v5188_v62  ;;  %v5173_v33 = vld [vmem:[%s10556_s5 + $0x758] sm:$0xff] }
 0x550   :  { %v5321_v21 = vpack.c.bf16 %v5193_v11, %v5192_v44  ;;  %v5187_v58 = vld [vmem:[%s10556_s5 + $0x7c8] sm:$0xff]  ;;  %v5138_v11 = vld [vmem:[%s10556_s5 + $0x640] sm:$0xff]  ;;  %v5149_v62 = vld [vmem:[%s10556_s5 + $0x698] sm:$0xff] }
 0x551   :  { %8622 = vmatpush3.bf16.msra.mxu0 %v5261_v30  ;;  %v5145_v30 = vld [vmem:[%s10556_s5 + $0x678] sm:$0xff]  ;;  %v10152_v12 = vpack.c.bf16 %v4919_v36, %v4919_v36  ;;  %v5134_v29 = vld [vmem:[%s10556_s5 + $0x620] sm:$0xff]  ;;  %v5135_v4 = vld [vmem:[%s10556_s5 + $0x628] sm:$0xff] }
 0x552   :  { %8644 = vmatpush3.bf16.msra.mxu1 %v5277_v14  ;;  %8623 = vmatprep.subr.bf16.mxu0 %v5268_v32  ;;  %v4916_v14 = vmax.f32 %v9453_v57, 0.0  ;;  %v5158_v32 = vld [vmem:[%s10556_s5 + $0x6e0] sm:$0xff]  ;;  %v5297_v57 = vpack.c.bf16 %v5145_v30, %v5144_v56  ;;  %v5318_v56 = vpack.c.bf16 %v5187_v58, %v5186_v6  ;;  %v5147_v58 = vld [vmem:[%s10556_s5 + $0x688] sm:$0xff] }
 0x553   :  { %8645 = vmatprep.subr.bf16.mxu1 %v5284_v37  ;;  %v5177_v37 = vld [vmem:[%s10556_s5 + $0x778] sm:$0xff]  ;;  %v5304_v61 = vpack.c.bf16 %v5159_v45, %v5158_v32  ;;  %v5170_v30 = vld [vmem:[%s10556_s5 + $0x740] sm:$0xff]  ;;  %v5184_v45 = vld [vmem:[%s10556_s5 + $0x7b0] sm:$0xff] }
 0x554   :  { %v5313_v10 = vpack.c.bf16 %v5177_v37, %v5176_v48  ;;  %v5136_v48 = vld [vmem:[%s10556_s5 + $0x630] sm:$0xff]  ;;  %v5137_v37 = vld [vmem:[%s10556_s5 + $0x638] sm:$0xff]  ;;  %v5146_v6 = vld [vmem:[%s10556_s5 + $0x680] sm:$0xff] }
 0x555   :  { %8624 = vmatpush3.bf16.msra.mxu0 %v5260_v40  ;;  %v5143_v40 = vld [vmem:[%s10556_s5 + $0x668] sm:$0xff] }
 0x556   :  { %8646 = vmatpush3.bf16.msra.mxu1 %v5276_v39  ;;  %8625 = vmatprep.subr.bf16.mxu0 %v5267_v47  ;;  %v10144_v39 = vpack.c.bf16 %v4916_v14, %v4916_v14  ;;  %v5156_v47 = vld [vmem:[%s10556_s5 + $0x6d0] sm:$0xff]  ;;  %v5296_v51 = vpack.c.bf16 %v5143_v40, %v5142_v17  ;;  %v5171_v14 = vld [vmem:[%s10556_s5 + $0x748] sm:$0xff]  ;;  %v5169_v40 = vld [vmem:[%s10556_s5 + $0x738] sm:$0xff] }
 0x557   :  { %8647 = vmatprep.subr.bf16.mxu1 %v5283_v46  ;;  %v5320_v46 = vpack.c.bf16 %v5191_v34, %v5190_v38  ;;  %v5303_v5 = vpack.c.bf16 %v5157_v26, %v5156_v47  ;;  %v5151_v38 = vld [vmem:[%s10556_s5 + $0x6a8] sm:$0xff]  ;;  %v5310_v34 = vpack.c.bf16 %v5171_v14, %v5170_v30  ;;  %v5168_v17 = vld [vmem:[%s10556_s5 + $0x730] sm:$0xff]  ;;  %v5293_v47 = vpack.c.bf16 %v5137_v37, %v5136_v48  ;;  %v5182_v26 = vld [vmem:[%s10556_s5 + $0x7a0] sm:$0xff] }
 0x558   :  { %v5309_v3 = vpack.c.bf16 %v5169_v40, %v5168_v17  ;;  %v5130_v30 = vld [vmem:[%s10556_s5 + $0x600] sm:$0xff]  ;;  %v5131_v14 = vld [vmem:[%s10556_s5 + $0x608] sm:$0xff] }
 0x559   :  { %8626 = vmatpush3.bf16.msra.mxu0 %v5259_v54  ;;  %v5140_v54 = vld [vmem:[%s10556_s5 + $0x650] sm:$0xff]  ;;  %v5163_v48 = vld [vmem:[%s10556_s5 + $0x708] sm:$0xff]  ;;  %v5290_v37 = vpack.c.bf16 %v5131_v14, %v5130_v30 }
 0x55a   :  { %8648 = vmatpush3.bf16.msra.mxu1 %v5275_v55  ;;  %8627 = vmatprep.subr.bf16.mxu0 %v5266_v0  ;;  %v5141_v55 = vld [vmem:[%s10556_s5 + $0x658] sm:$0xff]  ;;  %v5154_v0 = vld [vmem:[%s10556_s5 + $0x6c0] sm:$0xff]  ;;  %v5692_v17 = vld [vmem:[#allocation12 + $0x150] sm:$0xff] }
 0x55b   :  { %8649 = vmatprep.subr.bf16.mxu1 %v5282_v53  ;;  %v5172_v53 = vld [vmem:[%s10556_s5 + $0x750] sm:$0xff]  ;;  %v5295_v41 = vpack.c.bf16 %v5141_v55, %v5140_v54  ;;  %v5302_v44 = vpack.c.bf16 %v5155_v43, %v5154_v0  ;;  %v5166_v54 = vld [vmem:[%s10556_s5 + $0x720] sm:$0xff]  ;;  %v5167_v55 = vld [vmem:[%s10556_s5 + $0x728] sm:$0xff]  ;;  %v5292_v0 = vpack.c.bf16 %v5135_v4, %v5134_v29 }
 0x55c   :  { %v5180_v43 = vld [vmem:[%s10556_s5 + $0x790] sm:$0xff]  ;;  %v5695_v40 = vld [vmem:[#allocation12 + $0x168] sm:$0xff] }
 0x55d   :  { %8628 = vmatpush3.bf16.msra.mxu0 %v5258_v13  ;;  %v5139_v13 = vld [vmem:[%s10556_s5 + $0x648] sm:$0xff]  ;;  %v6439_v29 = vpack.c.bf16 %v5695_v40, %v5692_v17 }
 0x55e   :  { %8650 = vmatpush3.bf16.msra.mxu1 %v5274_v27  ;;  %8657 = vmatprep.subr.bf16.mxu0 %v5305_v50  ;;  %v5153_v27 = vld [vmem:[%s10556_s5 + $0x6b8] sm:$0xff]  ;;  %v5311_v50 = vpack.c.bf16 %v5173_v33, %v5172_v53  ;;  %v5294_v32 = vpack.c.bf16 %v5139_v13, %v5138_v11  ;;  %v5132_v33 = vld [vmem:[%s10556_s5 + $0x610] sm:$0xff] }
 0x55f   :  { %8679 = vmatprep.subr.bf16.mxu1 %v5321_v21  ;;  %v5185_v21 = vld [vmem:[%s10556_s5 + $0x7b8] sm:$0xff]  ;;  %v5301_v36 = vpack.c.bf16 %v5153_v27, %v5152_v18  ;;  %v5178_v18 = vld [vmem:[%s10556_s5 + $0x780] sm:$0xff]  ;;  %v5179_v27 = vld [vmem:[%s10556_s5 + $0x788] sm:$0xff] }
 0x560   :  { %5522 = vmatmul.mubr.bf16.vlgmr.msra.gmra.mxu0 %v10136_v24  ;;  %v5165_v11 = vld [vmem:[%s10556_s5 + $0x718] sm:$0xff]  ;;  %v5672_v30 = vld [vmem:[#allocation12 + $0xb0] sm:$0xff] }
 0x561   :  { %5562 = vmatmul.mubr.bf16.vlgmr.msra.gmra.mxu1 %v10144_v39  ;;  %8658 = vmatpush3.bf16.msra.mxu0 %v5297_v57  ;;  %v5150_v57 = vld [vmem:[%s10556_s5 + $0x6a0] sm:$0xff] }
 0x562   :  { %5601 = vmatprep.mubr.bf16.mxu0 %v10152_v12  ;;  %8659 = vmatprep.subr.bf16.mxu0 %v5304_v61  ;;  %v5317_v61 = vpack.c.bf16 %v5185_v21, %v5184_v45  ;;  %v5696_v45 = vld [vmem:[#allocation12 + $0x170] sm:$0xff] }
 0x563   :  { %8680 = vmatpush3.bf16.msra.mxu1 %v5313_v10  ;;  %v5183_v10 = vld [vmem:[%s10556_s5 + $0x7a8] sm:$0xff] }
 0x564   :  { %8681 = vmatprep.subr.bf16.mxu1 %v5320_v46  ;;  %v5300_v46 = vpack.c.bf16 %v5151_v38, %v5150_v57  ;;  %v5789_v57 = vld [vmem:[#allocation12 + $0x458] sm:$0xff]  ;;  %v5792_v38 = vld [vmem:[#allocation12 + $0x470] sm:$0xff] }
 0x565   :  { %8660 = vmatpush3.bf16.msra.mxu0 %v5296_v51  ;;  %v5148_v51 = vld [vmem:[%s10556_s5 + $0x690] sm:$0xff] }
 0x566   :  { %8661 = vmatprep.subr.bf16.mxu0 %v5303_v5  ;;  %v5316_v5 = vpack.c.bf16 %v5183_v10, %v5182_v26  ;;  %v5299_v53 = vpack.c.bf16 %v5149_v62, %v5148_v51  ;;  %v5690_v26 = vld [vmem:[#allocation12 + $0x140] sm:$0xff] }
 0x567   :  { %8682 = vmatpush3.bf16.msra.mxu1 %v5312_v1  ;;  %v5181_v1 = vld [vmem:[%s10556_s5 + $0x798] sm:$0xff] }
 0x568   :  { %8683 = vmatprep.subr.bf16.mxu1 %v5319_v31  ;;  %v4695_v31 = vadd.f32 %v9943_v16, %v9543_v42  ;;  %v5308_v42 = vpack.c.bf16 %v5167_v55, %v5166_v54  ;;  %v5315_v16 = vpack.c.bf16 %v5181_v1, %v5180_v43  ;;  %v5686_v62 = vld [vmem:[#allocation12 + $0x120] sm:$0xff]  ;;  %v5684_v54 = vld [vmem:[#allocation12 + $0x110] sm:$0xff] }
 0x569   :  { %8662 = vmatpush3.bf16.msra.mxu0 %v5295_v41  ;;  %v5133_v41 = vld [vmem:[%s10556_s5 + $0x618] sm:$0xff] }
 0x56a   :  { %8663 = vmatprep.subr.bf16.mxu0 %v5302_v44  ;;  %v5164_v44 = vld [vmem:[%s10556_s5 + $0x710] sm:$0xff]  ;;  %v5291_v13 = vpack.c.bf16 %v5133_v41, %v5132_v33  ;;  %v5683_v33 = vld [vmem:[#allocation12 + $0x108] sm:$0xff] }
 0x56b   :  { %8684 = vmatpush3.bf16.msra.mxu1 %v5311_v50  ;;  %v4736_v50 = vadd.f32 %v9954_v49, %v4695_v31  ;;  %v5307_v21 = vpack.c.bf16 %v5165_v11, %v5164_v44  ;;  %v5162_v49 = vld [vmem:[%s10556_s5 + $0x700] sm:$0xff] }
 0x56c   :  { %8685 = vmatprep.subr.bf16.mxu1 %v5318_v56  ;;  %v5298_v56 = vpack.c.bf16 %v5147_v58, %v5146_v6  ;;  %v5306_v10 = vpack.c.bf16 %v5163_v48, %v5162_v49  ;;  %v5675_v6 = vld [vmem:[#allocation12 + $0xc8] sm:$0xff]  ;;  %v5678_v58 = vld [vmem:[#allocation12 + $0xe0] sm:$0xff] }
 0x56d   :  { %8664 = vmatpush3.bf16.msra.mxu0 %v5294_v32  ;;  %v5693_v32 = vld [vmem:[#allocation12 + $0x158] sm:$0xff]  ;;  %v5666_v49 = vld [vmem:[#allocation12 + $0x80] sm:$0xff] }
 0x56e   :  { %8665 = vmatprep.subr.bf16.mxu0 %v5301_v36  ;;  %v5314_v36 = vpack.c.bf16 %v5179_v27, %v5178_v18  ;;  %v5674_v18 = vld [vmem:[#allocation12 + $0xc0] sm:$0xff]  ;;  %v5677_v27 = vld [vmem:[#allocation12 + $0xd8] sm:$0xff] }
 0x56f   :  { %8686 = vmatpush3.bf16.msra.mxu1 %v5310_v34  ;;  %v4918_v34 = vmax.f32 %v4736_v50, 0.0  ;;  %v6430_v14 = vpack.c.bf16 %v5677_v27, %v5674_v18  ;;  %v5732_v18 = vld [vmem:[#allocation12 + $0x290] sm:$0xff] }
 0x570   :  { %8687 = vmatprep.subr.bf16.mxu1 %v5317_v61  ;;  %v6440_v61 = vpack.c.bf16 %v5696_v45, %v5693_v32  ;;  %v5668_v45 = vld [vmem:[#allocation12 + $0x90] sm:$0xff] }
 0x571   :  { %8666 = vmatpush3.bf16.msra.mxu0 %v5293_v47  ;;  %v5687_v47 = vld [vmem:[#allocation12 + $0x128] sm:$0xff]  ;;  %v10304_v4 = vpack.c.bf16 %v4918_v34, %v4918_v34  ;;  %v5657_v34 = vld [vmem:[#allocation12 + $0x38] sm:$0xff] }
 0x572   :  { %8667 = vmatprep.subr.bf16.mxu0 %v5300_v46  ;;  %v6488_v46 = vpack.c.bf16 %v5792_v38, %v5789_v57  ;;  %v6437_v51 = vpack.c.bf16 %v5690_v26, %v5687_v47  ;;  %v5662_v57 = vld [vmem:[#allocation12 + $0x60] sm:$0xff]  ;;  %v5665_v38 = vld [vmem:[#allocation12 + $0x78] sm:$0xff]  ;;  %v5656_v47 = vld [vmem:[#allocation12 + $0x30] sm:$0xff] }
 0x573   :  { %8688 = vmatpush3.bf16.msra.mxu1 %v5309_v3  ;;  %v5689_v3 = vld [vmem:[#allocation12 + $0x138] sm:$0xff]  ;;  %v6424_v17 = vpack.c.bf16 %v5665_v38, %v5662_v57  ;;  %v5659_v26 = vld [vmem:[#allocation12 + $0x48] sm:$0xff] }
 0x574   :  { %8689 = vmatprep.subr.bf16.mxu1 %v5316_v5  ;;  %v5681_v5 = vld [vmem:[#allocation12 + $0xf8] sm:$0xff]  ;;  %v6436_v43 = vpack.c.bf16 %v5689_v3, %v5686_v62  ;;  %v5650_v62 = vld [vmem:[#allocation12] sm:$0xff] }
 0x575   :  { %8668 = vmatpush3.bf16.msra.mxu0 %v5292_v0  ;;  %v6434_v31 = vpack.c.bf16 %v5684_v54, %v5681_v5  ;;  %v5653_v3 = vld [vmem:[#allocation12 + $0x18] sm:$0xff]  ;;  %v5744_v54 = vld [vmem:[#allocation12 + $0x2f0] sm:$0xff] }
 0x576   :  { %8669 = vmatprep.subr.bf16.mxu0 %v5299_v53  ;;  %v5680_v53 = vld [vmem:[#allocation12 + $0xf0] sm:$0xff]  ;;  %v5741_v5 = vld [vmem:[#allocation12 + $0x2d8] sm:$0xff] }
 0x577   :  { %8690 = vmatpush3.bf16.msra.mxu1 %v5308_v42  ;;  %v6433_v44 = vpack.c.bf16 %v5683_v33, %v5680_v53  ;;  %v5740_v53 = vld [vmem:[#allocation12 + $0x2d0] sm:$0xff]  ;;  %v5743_v33 = vld [vmem:[#allocation12 + $0x2e8] sm:$0xff] }
 0x578   :  { %8691 = vmatprep.subr.bf16.mxu1 %v5315_v16 }
 0x579   :  { %8670 = vmatpush3.bf16.msra.mxu0 %v5291_v13  ;;  %v6431_v13 = vpack.c.bf16 %v5678_v58, %v5675_v6  ;;  %v5735_v6 = vld [vmem:[#allocation12 + $0x2a8] sm:$0xff]  ;;  %v5738_v58 = vld [vmem:[#allocation12 + $0x2c0] sm:$0xff] }
 0x57a   :  { %8671 = vmatprep.subr.bf16.mxu0 %v5298_v56  ;;  %v5669_v56 = vld [vmem:[#allocation12 + $0x98] sm:$0xff] }
 0x57b   :  { %8692 = vmatpush3.bf16.msra.mxu1 %v5307_v21  ;;  %v6428_v32 = vpack.c.bf16 %v5672_v30, %v5669_v56  ;;  %v5671_v21 = vld [vmem:[#allocation12 + $0xa8] sm:$0xff]  ;;  %v5728_v56 = vld [vmem:[#allocation12 + $0x270] sm:$0xff] }
 0x57c   :  { %8693 = vmatprep.subr.bf16.mxu1 %v5314_v36  ;;  %v5663_v36 = vld [vmem:[#allocation12 + $0x68] sm:$0xff]  ;;  %v6427_v48 = vpack.c.bf16 %v5671_v21, %v5668_v45 }
 0x57d   :  { %8672 = vmatpush3.bf16.msra.mxu0 %v5290_v37  ;;  %v6425_v37 = vpack.c.bf16 %v5666_v49, %v5663_v36  ;;  %v5731_v30 = vld [vmem:[#allocation12 + $0x288] sm:$0xff]  ;;  %v5722_v36 = vld [vmem:[#allocation12 + $0x240] sm:$0xff]  ;;  %v5725_v49 = vld [vmem:[#allocation12 + $0x258] sm:$0xff] }
 0x57e   :  { %6819 = vmatprep.subr.bf16.mxu0 %v6440_v61  ;;  %v5660_v61 = vld [vmem:[#allocation12 + $0x50] sm:$0xff]  ;;  %v6457_v45 = vpack.c.bf16 %v5731_v30, %v5728_v56  ;;  %v6454_v57 = vpack.c.bf16 %v5725_v49, %v5722_v36  ;;  %v5887_v56 = vld [vmem:[#allocation12 + $0x768] sm:$0xff]  ;;  %v5878_v36 = vld [vmem:[#allocation12 + $0x720] sm:$0xff] }
 0x57f   :  { %8694 = vmatpush3.bf16.msra.mxu1 %v5306_v10  ;;  %v6422_v40 = vpack.c.bf16 %v5660_v61, %v5657_v34  ;;  %v5651_v10 = vld [vmem:[#allocation12 + $0x8] sm:$0xff]  ;;  %v5716_v34 = vld [vmem:[#allocation12 + $0x210] sm:$0xff]  ;;  %v5881_v49 = vld [vmem:[#allocation12 + $0x738] sm:$0xff] }
 0x580   :  { %v10306_v55 = vpop.f32.mrf.mxu0  ;;  %5602 = vmatmul.mubr.bf16.vlgmr.msra.gmra.mxu0 %v10304_v4  ;;  %6860 = vmatprep.subr.bf16.mxu1 %v6488_v46  ;;  %v5654_v46 = vld [vmem:[#allocation12 + $0x20] sm:$0xff]  ;;  %v5719_v61 = vld [vmem:[#allocation12 + $0x228] sm:$0xff] }
 0x581   :  { %v10309_v0 = vpop.f32.mrf.mxu1  ;;  %6820 = vmatpush1.bf16.msra.mxu0 %v6439_v29  ;;  %6851 = vmatprep.mubr.bf16.mxu0 %v9521_v35  ;;  %v6421_v29 = vpack.c.bf16 %v5659_v26, %v5656_v47  ;;  %v6451_v47 = vpack.c.bf16 %v5719_v61, %v5716_v34 }
 0x582   :  { %v10312_v1 = vpop.f32.mrf.mxu0  ;;  %6821 = vmatprep.subr.bf16.mxu0 %v6437_v51  ;;  %v6419_v51 = vpack.c.bf16 %v5654_v46, %v5651_v10  ;;  %v5710_v10 = vld [vmem:[#allocation12 + $0x1e0] sm:$0xff]  ;;  %v5713_v46 = vld [vmem:[#allocation12 + $0x1f8] sm:$0xff] }
 0x583   :  { %v10314_v41 = vpop.f32.mrf.mxu1 }
 0x584   :  { %v4780_v42 = vpop.f32.mrf.mxu0 }
 0x585   :  { %v4821_v16 = vpop.f32.mrf.mxu1  ;;  %6822 = vmatpush1.bf16.msra.mxu0 %v6436_v43  ;;  %v6418_v43 = vpack.c.bf16 %v5653_v3, %v5650_v62  ;;  %v6463_v42 = vpack.c.bf16 %v5743_v33, %v5740_v53  ;;  %v6448_v62 = vpack.c.bf16 %v5713_v46, %v5710_v10  ;;  %v5867_v46 = vld [vmem:[#allocation12 + $0x6c8] sm:$0xff] }
 0x586   :  { %v4781_v11 = vpop.f32.mrf.mxu0  ;;  %6823 = vmatprep.subr.bf16.mxu0 %v6434_v31  ;;  %v6464_v31 = vpack.c.bf16 %v5744_v54, %v5741_v5  ;;  %v6461_v16 = vpack.c.bf16 %v5738_v58, %v5735_v6  ;;  %v5704_v5 = vld [vmem:[#allocation12 + $0x1b0] sm:$0xff]  ;;  %v5707_v54 = vld [vmem:[#allocation12 + $0x1c8] sm:$0xff]  ;;  %v5698_v6 = vld [vmem:[#allocation12 + $0x180] sm:$0xff] }
 0x587   :  { %v4822_v50 = vpop.f32.mrf.mxu1  ;;  %v5737_v11 = vld [vmem:[#allocation12 + $0x2b8] sm:$0xff]  ;;  %v6445_v53 = vpack.c.bf16 %v5707_v54, %v5704_v5 }
 0x588   :  { %v5701_v58 = vld [vmem:[#allocation12 + $0x198] sm:$0xff] }
 0x589   :  { %6824 = vmatpush1.bf16.msra.mxu0 %v6433_v44  ;;  %v5734_v44 = vld [vmem:[#allocation12 + $0x2a0] sm:$0xff] }
 0x58a   :  { %6825 = vmatprep.subr.bf16.mxu0 %v6431_v13  ;;  %v5729_v13 = vld [vmem:[#allocation12 + $0x278] sm:$0xff]  ;;  %v6460_v27 = vpack.c.bf16 %v5737_v11, %v5734_v44  ;;  %v5888_v11 = vld [vmem:[#allocation12 + $0x770] sm:$0xff] }
 0x58b   :  { %v6458_v50 = vpack.c.bf16 %v5732_v18, %v5729_v13  ;;  %v5885_v44 = vld [vmem:[#allocation12 + $0x758] sm:$0xff]  ;;  %v6442_v18 = vpack.c.bf16 %v5701_v58, %v5698_v6 }
 0x58d   :  { %6826 = vmatpush1.bf16.msra.mxu0 %v6430_v14  ;;  %v5723_v14 = vld [vmem:[#allocation12 + $0x248] sm:$0xff] }
 0x58e   :  { %6827 = vmatprep.subr.bf16.mxu0 %v6428_v32  ;;  %v5726_v32 = vld [vmem:[#allocation12 + $0x260] sm:$0xff] }
 0x58f   :  { %v6455_v21 = vpack.c.bf16 %v5726_v32, %v5723_v14  ;;  %v5879_v14 = vld [vmem:[#allocation12 + $0x728] sm:$0xff]  ;;  %v5882_v32 = vld [vmem:[#allocation12 + $0x740] sm:$0xff] }
 0x591   :  { %6828 = vmatpush1.bf16.msra.mxu0 %v6427_v48  ;;  %v5717_v48 = vld [vmem:[#allocation12 + $0x218] sm:$0xff] }
 0x592   :  { %6829 = vmatprep.subr.bf16.mxu0 %v6425_v37  ;;  %v5720_v37 = vld [vmem:[#allocation12 + $0x230] sm:$0xff] }
 0x593   :  { %v6452_v38 = vpack.c.bf16 %v5720_v37, %v5717_v48  ;;  %v5873_v48 = vld [vmem:[#allocation12 + $0x6f8] sm:$0xff]  ;;  %v5876_v37 = vld [vmem:[#allocation12 + $0x710] sm:$0xff] }
 0x595   :  { %6830 = vmatpush1.bf16.msra.mxu0 %v6424_v17  ;;  %v5711_v17 = vld [vmem:[#allocation12 + $0x1e8] sm:$0xff] }
 0x596   :  { %6831 = vmatprep.subr.bf16.mxu0 %v6422_v40  ;;  %v5714_v40 = vld [vmem:[#allocation12 + $0x200] sm:$0xff] }
 0x597   :  { %v6449_v26 = vpack.c.bf16 %v5714_v40, %v5711_v17  ;;  %v6530_v17 = vpack.c.bf16 %v5876_v37, %v5873_v48  ;;  %v5872_v40 = vld [vmem:[#allocation12 + $0x6f0] sm:$0xff]  ;;  %v5858_v48 = vld [vmem:[#allocation12 + $0x680] sm:$0xff] }
 0x599   :  { %6832 = vmatpush1.bf16.msra.mxu0 %v6421_v29  ;;  %v5705_v29 = vld [vmem:[#allocation12 + $0x1b8] sm:$0xff] }
 0x59a   :  { %6833 = vmatprep.subr.bf16.mxu0 %v6419_v51  ;;  %v5708_v51 = vld [vmem:[#allocation12 + $0x1d0] sm:$0xff] }
 0x59b   :  { %v6446_v3 = vpack.c.bf16 %v5708_v51, %v5705_v29  ;;  %v5870_v29 = vld [vmem:[#allocation12 + $0x6e0] sm:$0xff] }
 0x59d   :  { %6834 = vmatpush1.bf16.msra.mxu0 %v6418_v43  ;;  %v5699_v43 = vld [vmem:[#allocation12 + $0x188] sm:$0xff] }
 0x59e   :  { %6835 = vmatprep.subr.bf16.mxu0 %v6464_v31  ;;  %v5702_v31 = vld [vmem:[#allocation12 + $0x1a0] sm:$0xff] }
 0x59f   :  { %v6443_v33 = vpack.c.bf16 %v5702_v31, %v5699_v43  ;;  %v5788_v43 = vld [vmem:[#allocation12 + $0x450] sm:$0xff]  ;;  %v5791_v31 = vld [vmem:[#allocation12 + $0x468] sm:$0xff] }
 0x5a1   :  { %6836 = vmatpush2.bf16.msra.mxu0 %v6463_v42  ;;  %v8962_v42 = vld [vmem:[#allocation9 + $0x8] sm:$0xff] }
 0x5a2   :  { %6837 = vmatprep.subr.bf16.mxu0 %v6461_v16  ;;  %v3573_v16 = vrot.slane %v8962_v42, %v9307_v8  ;;  %v3577_v13 = vrot.slane %v8962_v42, %v9286_v63  ;;  %v6533_v8 = vpack.c.bf16 %v5882_v32, %v5879_v14  ;;  %v5869_v42 = vld [vmem:[#allocation12 + $0x6d8] sm:$0xff]  ;;  %v5782_v14 = vld [vmem:[#allocation12 + $0x420] sm:$0xff] }
 0x5a3   :  { %v5785_v32 = vld [vmem:[#allocation12 + $0x438] sm:$0xff] }
 0x5a4   :  { %v4777_v30 = vadd.f32 %v10306_v55, %v3573_v16  ;;  %v5783_v16 = vld [vmem:[#allocation12 + $0x428] sm:$0xff]  ;;  %v6484_v37 = vpack.c.bf16 %v5785_v32, %v5782_v14  ;;  %v5936_v14 = vld [vmem:[#allocation12 + $0x8f0] sm:$0xff] }
 0x5a5   :  { %6838 = vmatpush2.bf16.msra.mxu0 %v6460_v27  ;;  %v6536_v27 = vpack.c.bf16 %v5888_v11, %v5885_v44  ;;  %v5786_v44 = vld [vmem:[#allocation12 + $0x440] sm:$0xff]  ;;  %v5861_v11 = vld [vmem:[#allocation12 + $0x698] sm:$0xff] }
 0x5a6   :  { %6839 = vmatprep.subr.bf16.mxu0 %v6458_v50  ;;  %v5884_v50 = vld [vmem:[#allocation12 + $0x750] sm:$0xff]  ;;  %v4818_v63 = vadd.f32 %v10309_v0, %v4777_v30  ;;  %v6485_v30 = vpack.c.bf16 %v5786_v44, %v5783_v16  ;;  %v5767_v16 = vld [vmem:[#allocation12 + $0x3a8] sm:$0xff]  ;;  %v5842_v44 = vld [vmem:[#allocation12 + $0x600] sm:$0xff] }
 0x5a9   :  { %6840 = vmatpush2.bf16.msra.mxu0 %v6457_v45  ;;  %v4779_v45 = vadd.f32 %v10312_v1, %v3577_v13  ;;  %v6532_v1 = vpack.c.bf16 %v5881_v49, %v5878_v36  ;;  %v5864_v13 = vld [vmem:[#allocation12 + $0x6b0] sm:$0xff]  ;;  %v5777_v36 = vld [vmem:[#allocation12 + $0x3f8] sm:$0xff] }
 0x5aa   :  { %6841 = vmatprep.subr.bf16.mxu0 %v6455_v21  ;;  %v6535_v21 = vpack.c.bf16 %v5887_v56, %v5884_v50  ;;  %v5780_v49 = vld [vmem:[#allocation12 + $0x410] sm:$0xff] }
 0x5ad   :  { %6842 = vmatpush2.bf16.msra.mxu0 %v6454_v57 }
 0x5ae   :  { %6843 = vmatprep.subr.bf16.mxu0 %v6452_v38  ;;  %v4820_v38 = vadd.f32 %v10314_v41, %v4779_v45  ;;  %v5860_v45 = vld [vmem:[#allocation12 + $0x690] sm:$0xff] }
 0x5b1   :  { %6844 = vmatpush2.bf16.msra.mxu0 %v6451_v47  ;;  %v5875_v47 = vld [vmem:[#allocation12 + $0x708] sm:$0xff] }
 0x5b2   :  { %6845 = vmatprep.subr.bf16.mxu0 %v6449_v26  ;;  %v6529_v41 = vpack.c.bf16 %v5875_v47, %v5872_v40  ;;  %v5771_v40 = vld [vmem:[#allocation12 + $0x3c8] sm:$0xff]  ;;  %v5774_v47 = vld [vmem:[#allocation12 + $0x3e0] sm:$0xff] }
 0x5b5   :  { %6846 = vmatpush2.bf16.msra.mxu0 %v6448_v62 }
 0x5b6   :  { %6847 = vmatprep.subr.bf16.mxu0 %v6446_v3 }
 0x5b9   :  { %6848 = vmatpush2.bf16.msra.mxu0 %v6445_v53  ;;  %v6527_v53 = vpack.c.bf16 %v5870_v29, %v5867_v46  ;;  %v6479_v29 = vpack.c.bf16 %v5774_v47, %v5771_v40  ;;  %v5755_v40 = vld [vmem:[#allocation12 + $0x348] sm:$0xff]  ;;  %v5926_v47 = vld [vmem:[#allocation12 + $0x8a0] sm:$0xff] }
 0x5ba   :  { %6849 = vmatprep.subr.bf16.mxu0 %v6443_v33  ;;  %v5866_v33 = vld [vmem:[#allocation12 + $0x6c0] sm:$0xff] }
 0x5bb   :  { %v6526_v56 = vpack.c.bf16 %v5869_v42, %v5866_v33  ;;  %v5764_v42 = vld [vmem:[#allocation12 + $0x390] sm:$0xff] }
 0x5bc   :  { %v6475_v32 = vpack.c.bf16 %v5767_v16, %v5764_v42 }
 0x5bd   :  { %6850 = vmatpush2.bf16.msra.mxu0 %v6442_v18 }
 0x5be   :  { %6901 = vmatprep.subr.bf16.mxu0 %v6536_v27  ;;  %v6487_v27 = vpack.c.bf16 %v5791_v31, %v5788_v43  ;;  %v5768_v43 = vld [vmem:[#allocation12 + $0x3b0] sm:$0xff]  ;;  %v5843_v31 = vld [vmem:[#allocation12 + $0x608] sm:$0xff] }
 0x5c0   :  { %v4858_v57 = vpop.f32.mrf.mxu0  ;;  %6852 = vmatmul.mubr.bf16.vlgmr.msra.gmra.mxu0 %v9711_v25 }
 0x5c1   :  { %v4859_v55 = vadd.f32 %v4858_v57, %v4818_v63  ;;  %v4899_v34 = vpop.f32.mrf.mxu1  ;;  %6902 = vmatpush1.bf16.msra.mxu0 %v6535_v21  ;;  %6933 = vmatprep.mubr.bf16.mxu0 %v9733_v59  ;;  %v6524_v21 = vpack.c.bf16 %v5864_v13, %v5861_v11  ;;  %v5855_v63 = vld [vmem:[#allocation12 + $0x668] sm:$0xff]  ;;  %v5845_v13 = vld [vmem:[#allocation12 + $0x618] sm:$0xff] }
 0x5c2   :  { %v4860_v61 = vpop.f32.mrf.mxu0  ;;  %6903 = vmatprep.subr.bf16.mxu0 %v6533_v8  ;;  %v5863_v8 = vld [vmem:[#allocation12 + $0x6a8] sm:$0xff] }
 0x5c3   :  { %v4900_v26 = vadd.f32 %v4899_v34, %v4859_v55  ;;  %v4861_v0 = vadd.f32 %v4860_v61, %v4820_v38  ;;  %v4901_v10 = vpop.f32.mrf.mxu1  ;;  %v6523_v57 = vpack.c.bf16 %v5863_v8, %v5860_v45  ;;  %v6482_v38 = vpack.c.bf16 %v5780_v49, %v5777_v36  ;;  %v5776_v55 = vld [vmem:[#allocation12 + $0x3f0] sm:$0xff]  ;;  %v5779_v34 = vld [vmem:[#allocation12 + $0x408] sm:$0xff]  ;;  %v5758_v8 = vld [vmem:[#allocation12 + $0x360] sm:$0xff] }
 0x5c4   :  { %v4862_v51 = vpop.f32.mrf.mxu0  ;;  %v6521_v61 = vpack.c.bf16 %v5858_v48, %v5855_v63  ;;  %v6514_v45 = vpack.c.bf16 %v5845_v13, %v5842_v44  ;;  %v5761_v36 = vld [vmem:[#allocation12 + $0x378] sm:$0xff]  ;;  %v5932_v49 = vld [vmem:[#allocation12 + $0x8d0] sm:$0xff]  ;;  %v5935_v48 = vld [vmem:[#allocation12 + $0x8e8] sm:$0xff] }
 0x5c5   :  { %v4902_v62 = vadd.f32 %v4901_v10, %v4861_v0  ;;  %v4903_v3 = vpop.f32.mrf.mxu1  ;;  %6904 = vmatpush1.bf16.msra.mxu0 %v6532_v1  ;;  %v4920_v5 = vmax.f32 %v4900_v26, 0.0  ;;  %v5854_v1 = vld [vmem:[#allocation12 + $0x660] sm:$0xff]  ;;  %v5849_v26 = vld [vmem:[#allocation12 + $0x638] sm:$0xff]  ;;  %v5852_v0 = vld [vmem:[#allocation12 + $0x650] sm:$0xff]  ;;  %v6481_v10 = vpack.c.bf16 %v5779_v34, %v5776_v55  ;;  %v6472_v34 = vpack.c.bf16 %v5761_v36, %v5758_v8 }
 0x5c6   :  { %v4863_v54 = vpop.f32.mrf.mxu0  ;;  %6905 = vmatprep.subr.bf16.mxu0 %v6530_v17  ;;  %v5857_v17 = vld [vmem:[#allocation12 + $0x678] sm:$0xff]  ;;  %v5770_v51 = vld [vmem:[#allocation12 + $0x3c0] sm:$0xff]  ;;  %v5848_v3 = vld [vmem:[#allocation12 + $0x630] sm:$0xff] }
 0x5c7   :  { %v4921_v6 = vmax.f32 %v4902_v62, 0.0  ;;  %v4904_v58 = vpop.f32.mrf.mxu1  ;;  %v10326_v50 = vpack.c.bf16 %v4920_v5, %v4920_v5  ;;  %v6520_v46 = vpack.c.bf16 %v5857_v17, %v5854_v1  ;;  %v5773_v62 = vld [vmem:[#allocation12 + $0x3d8] sm:$0xff]  ;;  %v5851_v5 = vld [vmem:[#allocation12 + $0x648] sm:$0xff]  ;;  %v5930_v55 = vld [vmem:[#allocation12 + $0x8c0] sm:$0xff]  ;;  %v6559_v1 = vpack.c.bf16 %v5935_v48, %v5932_v49 }
 0x5c8   :  { %v5765_v54 = vld [vmem:[#allocation12 + $0x398] sm:$0xff]  ;;  %v6478_v33 = vpack.c.bf16 %v5773_v62, %v5770_v51  ;;  %v5752_v17 = vld [vmem:[#allocation12 + $0x330] sm:$0xff]  ;;  %v5923_v44 = vld [vmem:[#allocation12 + $0x888] sm:$0xff] }
 0x5c9   :  { %v10324_v18 = vpack.c.bf16 %v4921_v6, %v4921_v6  ;;  %6906 = vmatpush1.bf16.msra.mxu0 %v6529_v41  ;;  %v6518_v41 = vpack.c.bf16 %v5852_v0, %v5849_v26  ;;  %v6517_v6 = vpack.c.bf16 %v5851_v5, %v5848_v3  ;;  %v6476_v58 = vpack.c.bf16 %v5768_v43, %v5765_v54  ;;  %v5929_v0 = vld [vmem:[#allocation12 + $0x8b8] sm:$0xff]  ;;  %v5924_v62 = vld [vmem:[#allocation12 + $0x890] sm:$0xff]  ;;  %v5839_v48 = vld [vmem:[#allocation12 + $0x5e8] sm:$0xff] }
 0x5ca   :  { %6907 = vmatprep.subr.bf16.mxu0 %v6527_v53  ;;  %v5846_v53 = vld [vmem:[#allocation12 + $0x620] sm:$0xff]  ;;  %v5921_v51 = vld [vmem:[#allocation12 + $0x878] sm:$0xff]  ;;  %v6469_v5 = vpack.c.bf16 %v5755_v40, %v5752_v17  ;;  %v6556_v43 = vpack.c.bf16 %v5929_v0, %v5926_v47  ;;  %v5840_v13 = vld [vmem:[#allocation12 + $0x5f0] sm:$0xff] }
 0x5cb   :  { %5641 = vmatprep.mubr.bf16.mxu1 %v10324_v18  ;;  %v6515_v11 = vpack.c.bf16 %v5846_v53, %v5843_v31  ;;  %v5746_v53 = vld [vmem:[#allocation12 + $0x300] sm:$0xff]  ;;  %v6554_v16 = vpack.c.bf16 %v5924_v62, %v5921_v51  ;;  %v5909_v17 = vld [vmem:[#allocation12 + $0x818] sm:$0xff]  ;;  %v5912_v40 = vld [vmem:[#allocation12 + $0x830] sm:$0xff] }
 0x5cc   :  { %5642 = vmatmul.mubr.bf16.vlgmr.msra.gmra.mxu1 %v10326_v50  ;;  %v6548_v51 = vpack.c.bf16 %v5912_v40, %v5909_v17  ;;  %v5911_v62 = vld [vmem:[#allocation12 + $0x828] sm:$0xff]  ;;  %v5890_v17 = vld [vmem:[#allocation12 + $0x780] sm:$0xff] }
 0x5cd   :  { %6861 = vmatpush1.bf16.msra.mxu1 %v6487_v27  ;;  %6892 = vmatprep.mubr.bf16.mxu1 %v9530_v52  ;;  %v5759_v27 = vld [vmem:[#allocation12 + $0x368] sm:$0xff] }
 0x5ce   :  { %6908 = vmatpush1.bf16.msra.mxu0 %v6526_v56  ;;  %6862 = vmatprep.subr.bf16.mxu1 %v6485_v30  ;;  %v5762_v56 = vld [vmem:[#allocation12 + $0x380] sm:$0xff]  ;;  %v5933_v30 = vld [vmem:[#allocation12 + $0x8d8] sm:$0xff] }
 0x5cf   :  { %6909 = vmatprep.subr.bf16.mxu0 %v6524_v21  ;;  %v6473_v21 = vpack.c.bf16 %v5762_v56, %v5759_v27  ;;  %v6560_v63 = vpack.c.bf16 %v5936_v14, %v5933_v30  ;;  %v5915_v30 = vld [vmem:[#allocation12 + $0x848] sm:$0xff]  ;;  %v5918_v14 = vld [vmem:[#allocation12 + $0x860] sm:$0xff] }
 0x5d1   :  { %6863 = vmatpush1.bf16.msra.mxu1 %v6484_v37  ;;  %v5753_v37 = vld [vmem:[#allocation12 + $0x338] sm:$0xff] }
 0x5d2   :  { %6910 = vmatpush1.bf16.msra.mxu0 %v6523_v57  ;;  %6864 = vmatprep.subr.bf16.mxu1 %v6482_v38  ;;  %v5756_v57 = vld [vmem:[#allocation12 + $0x350] sm:$0xff]  ;;  %v5927_v38 = vld [vmem:[#allocation12 + $0x8a8] sm:$0xff] }
 0x5d3   :  { %6911 = vmatprep.subr.bf16.mxu0 %v6521_v61  ;;  %v6470_v61 = vpack.c.bf16 %v5756_v57, %v5753_v37  ;;  %v6557_v26 = vpack.c.bf16 %v5930_v55, %v5927_v38  ;;  %v5914_v37 = vld [vmem:[#allocation12 + $0x840] sm:$0xff]  ;;  %v6551_v55 = vpack.c.bf16 %v5918_v14, %v5915_v30 }
 0x5d5   :  { %6865 = vmatpush1.bf16.msra.mxu1 %v6481_v10  ;;  %v5747_v10 = vld [vmem:[#allocation12 + $0x308] sm:$0xff] }
 0x5d6   :  { %6912 = vmatpush1.bf16.msra.mxu0 %v6520_v46  ;;  %6866 = vmatprep.subr.bf16.mxu1 %v6479_v29  ;;  %v5750_v46 = vld [vmem:[#allocation12 + $0x320] sm:$0xff] }
 0x5d7   :  { %6913 = vmatprep.subr.bf16.mxu0 %v6518_v41  ;;  %v8524_v41 = vld [vmem:[#allocation10] ss:$0 sm:$0xff]  ;;  %v6467_v31 = vpack.c.bf16 %v5750_v46, %v5747_v10  ;;  %v5830_v10 = vld [vmem:[#allocation12 + $0x5a0] sm:$0xff] }
 0x5d8   :  { %v5833_v46 = vld [vmem:[#allocation12 + $0x5b8] sm:$0xff] }
 0x5d9   :  { %6867 = vmatpush1.bf16.msra.mxu1 %v6478_v33  ;;  %v5749_v33 = vld [vmem:[#allocation12 + $0x318] sm:$0xff] }
 0x5da   :  { %6914 = vmatpush1.bf16.msra.mxu0 %v6517_v6  ;;  %6868 = vmatprep.subr.bf16.mxu1 %v6476_v58  ;;  %v5920_v6 = vld [vmem:[#allocation12 + $0x870] sm:$0xff] }
 0x5db   :  { %6915 = vmatprep.subr.bf16.mxu0 %v6515_v11  ;;  %v5837_v11 = vld [vmem:[#allocation12 + $0x5d8] sm:$0xff]  ;;  %v6553_v36 = vpack.c.bf16 %v5923_v44, %v5920_v6  ;;  %v5827_v6 = vld [vmem:[#allocation12 + $0x588] sm:$0xff] }
 0x5dc   :  { %v6512_v49 = vpack.c.bf16 %v5840_v13, %v5837_v11  ;;  %v5819_v44 = vld [vmem:[#allocation12 + $0x548] sm:$0xff]  ;;  %v5822_v11 = vld [vmem:[#allocation12 + $0x560] sm:$0xff]  ;;  %v5897_v13 = vld [vmem:[#allocation12 + $0x7b8] sm:$0xff] }
 0x5dd   :  { %6869 = vmatpush1.bf16.msra.mxu1 %v6475_v32  ;;  %v6503_v14 = vpack.c.bf16 %v5822_v11, %v5819_v44  ;;  %v5803_v44 = vld [vmem:[#allocation12 + $0x4c8] sm:$0xff]  ;;  %v6070_v11 = vld [vmem:[#allocation12 + $0xd20] sm:$0xff] }
 0x5de   :  { %6916 = vmatpush1.bf16.msra.mxu0 %v6514_v45  ;;  %6870 = vmatprep.subr.bf16.mxu1 %v6473_v21  ;;  %v6466_v21 = vpack.c.bf16 %v5749_v33, %v5746_v53  ;;  %v5824_v33 = vld [vmem:[#allocation12 + $0x570] sm:$0xff] }
 0x5df   :  { %6917 = vmatprep.subr.bf16.mxu0 %v6560_v63  ;;  %v5836_v63 = vld [vmem:[#allocation12 + $0x5d0] sm:$0xff] }
 0x5e0   :  { %v8541_v29 = vpop.f32.mrf.mxu0  ;;  %v6511_v47 = vpack.c.bf16 %v5839_v48, %v5836_v63  ;;  %v5816_v63 = vld [vmem:[#allocation12 + $0x530] sm:$0xff]  ;;  %v5891_v48 = vld [vmem:[#allocation12 + $0x788] sm:$0xff] }
 0x5e1   :  { %v8563_v3 = vpop.f32.mrf.mxu1  ;;  %6871 = vmatpush1.bf16.msra.mxu1 %v6472_v34  ;;  %v5917_v34 = vld [vmem:[#allocation12 + $0x858] sm:$0xff] }
 0x5e2   :  { %6918 = vmatpush2.bf16.msra.mxu0 %v6559_v1  ;;  %v8542_v54 = vpop.f32.mrf.mxu0  ;;  %6872 = vmatprep.subr.bf16.mxu1 %v6470_v61  ;;  %v5831_v1 = vld [vmem:[#allocation12 + $0x5a8] sm:$0xff]  ;;  %v5834_v61 = vld [vmem:[#allocation12 + $0x5c0] sm:$0xff] }
 0x5e3   :  { %v8543_v58 = vadd.f32 %v8542_v54, %v8541_v29  ;;  %v8564_v42 = vpop.f32.mrf.mxu1  ;;  %6919 = vmatprep.subr.bf16.mxu0 %v6557_v26  ;;  %v6550_v26 = vpack.c.bf16 %v5917_v34, %v5914_v37  ;;  %v6509_v0 = vpack.c.bf16 %v5834_v61, %v5831_v1  ;;  %v5908_v29 = vld [vmem:[#allocation12 + $0x810] sm:$0xff]  ;;  %v5906_v54 = vld [vmem:[#allocation12 + $0x800] sm:$0xff]  ;;  %v5815_v61 = vld [vmem:[#allocation12 + $0x528] sm:$0xff] }
 0x5e4   :  { %v8565_v27 = vadd.f32 %v8564_v42, %v8563_v3  ;;  %v8544_v56 = vpop.f32.mrf.mxu0  ;;  %v5825_v3 = vld [vmem:[#allocation12 + $0x578] sm:$0xff]  ;;  %v5894_v37 = vld [vmem:[#allocation12 + $0x7a0] sm:$0xff]  ;;  %v5812_v1 = vld [vmem:[#allocation12 + $0x510] sm:$0xff] }
 0x5e5   :  { %v5364_v32 = vadd.f32 %v8543_v58, %v8524_v41  ;;  %v8566_v45 = vpop.f32.mrf.mxu1  ;;  %6873 = vmatpush1.bf16.msra.mxu1 %v6469_v5  ;;  %v5828_v41 = vld [vmem:[#allocation12 + $0x590] sm:$0xff]  ;;  %v5903_v5 = vld [vmem:[#allocation12 + $0x7e8] sm:$0xff]  ;;  %v5902_v58 = vld [vmem:[#allocation12 + $0x7e0] sm:$0xff]  ;;  %v6505_v56 = vpack.c.bf16 %v5827_v6, %v5824_v33  ;;  %v6539_v40 = vpack.c.bf16 %v5894_v37, %v5891_v48 }
 0x5e6   :  { %6920 = vmatpush2.bf16.msra.mxu0 %v6556_v43  ;;  %v8545_v8 = vpop.f32.mrf.mxu0  ;;  %6874 = vmatprep.subr.bf16.mxu1 %v6467_v31  ;;  %v6508_v43 = vpack.c.bf16 %v5833_v46, %v5830_v10  ;;  %v6547_v31 = vpack.c.bf16 %v5911_v62, %v5908_v29  ;;  %v6506_v53 = vpack.c.bf16 %v5828_v41, %v5825_v3  ;;  %v5821_v45 = vld [vmem:[#allocation12 + $0x558] sm:$0xff]  ;;  %v6080_v46 = vld [vmem:[#allocation12 + $0xd70] sm:$0xff]  ;;  %v5806_v3 = vld [vmem:[#allocation12 + $0x4e0] sm:$0xff] }
 0x5e7   :  { %v10331_v57 = vadd.f32 %v8565_v27, %v5364_v32  ;;  %v8567_v38 = vpop.f32.mrf.mxu1  ;;  %6921 = vmatprep.subr.bf16.mxu0 %v6554_v16  ;;  %v6545_v42 = vpack.c.bf16 %v5906_v54, %v5903_v5  ;;  %v5905_v16 = vld [vmem:[#allocation12 + $0x7f8] sm:$0xff]  ;;  %v5900_v27 = vld [vmem:[#allocation12 + $0x7d0] sm:$0xff]  ;;  %v5818_v32 = vld [vmem:[#allocation12 + $0x540] sm:$0xff]  ;;  %v6499_v29 = vpack.c.bf16 %v5815_v61, %v5812_v1 }
 0x5e8   :  { %v6544_v30 = vpack.c.bf16 %v5905_v16, %v5902_v58  ;;  %v6542_v8 = vpack.c.bf16 %v5900_v27, %v5897_v13  ;;  %v6502_v38 = vpack.c.bf16 %v5821_v45, %v5818_v32  ;;  %v6077_v10 = vld [vmem:[#allocation12 + $0xd58] sm:$0xff]  ;;  %v6076_v54 = vld [vmem:[#allocation12 + $0xd50] sm:$0xff]  ;;  %v6071_v33 = vld [vmem:[#allocation12 + $0xd28] sm:$0xff] }
 0x5e9   :  { %6875 = vmatpush1.bf16.msra.mxu1 %v6466_v21  ;;  %v5896_v21 = vld [vmem:[#allocation12 + $0x7b0] sm:$0xff]  ;;  %v5809_v41 = vld [vmem:[#allocation12 + $0x4f8] sm:$0xff]  ;;  %v6632_v5 = vpack.c.bf16 %v6080_v46, %v6077_v10  ;;  %v6074_v6 = vld [vmem:[#allocation12 + $0xd40] sm:$0xff] }
 0x5ea   :  { %6922 = vmatpush2.bf16.msra.mxu0 %v6553_v36  ;;  %6876 = vmatprep.subr.bf16.mxu1 %v6512_v49  ;;  %v5899_v36 = vld [vmem:[#allocation12 + $0x7c8] sm:$0xff]  ;;  %v5813_v49 = vld [vmem:[#allocation12 + $0x518] sm:$0xff]  ;;  %v6496_v58 = vpack.c.bf16 %v5809_v41, %v5806_v3  ;;  %v5800_v16 = vld [vmem:[#allocation12 + $0x4b0] sm:$0xff]  ;;  %v6629_v27 = vpack.c.bf16 %v6074_v6, %v6071_v33 }
 0x5eb   :  { %6923 = vmatprep.subr.bf16.mxu0 %v6551_v55  ;;  %v6541_v55 = vpack.c.bf16 %v5899_v36, %v5896_v21  ;;  %v6500_v34 = vpack.c.bf16 %v5816_v63, %v5813_v49  ;;  %v6065_v45 = vld [vmem:[#allocation12 + $0xcf8] sm:$0xff]  ;;  %v6068_v21 = vld [vmem:[#allocation12 + $0xd10] sm:$0xff]  ;;  %v6493_v36 = vpack.c.bf16 %v5803_v44, %v5800_v16  ;;  %v5794_v37 = vld [vmem:[#allocation12 + $0x480] sm:$0xff] }
 0x5ec   :  { %v6626_v61 = vpack.c.bf16 %v6068_v21, %v6065_v45  ;;  %v6059_v10 = vld [vmem:[#allocation12 + $0xcc8] sm:$0xff]  ;;  %v6062_v46 = vld [vmem:[#allocation12 + $0xce0] sm:$0xff]  ;;  %v6056_v44 = vld [vmem:[#allocation12 + $0xcb0] sm:$0xff] }
 0x5ed   :  { %6877 = vmatpush2.bf16.msra.mxu1 %v6511_v47  ;;  %v5893_v47 = vld [vmem:[#allocation12 + $0x798] sm:$0xff]  ;;  %v6623_v6 = vpack.c.bf16 %v6062_v46, %v6059_v10  ;;  %v5978_v16 = vld [vmem:[#allocation12 + $0xa40] sm:$0xff]  ;;  %v6055_v45 = vld [vmem:[#allocation12 + $0xca8] sm:$0xff] }
 0x5ee   :  { %6924 = vmatpush2.bf16.msra.mxu0 %v6550_v26  ;;  %6878 = vmatprep.subr.bf16.mxu1 %v6509_v0  ;;  %v5807_v26 = vld [vmem:[#allocation12 + $0x4e8] sm:$0xff]  ;;  %v5810_v0 = vld [vmem:[#allocation12 + $0x500] sm:$0xff]  ;;  %v5969_v21 = vld [vmem:[#allocation12 + $0x9f8] sm:$0xff] }
 0x5ef   :  { %6925 = vmatprep.subr.bf16.mxu0 %v6548_v51  ;;  %v6538_v51 = vpack.c.bf16 %v5893_v47, %v5890_v17  ;;  %v6497_v62 = vpack.c.bf16 %v5810_v0, %v5807_v26  ;;  %v6067_v17 = vld [vmem:[#allocation12 + $0xd08] sm:$0xff]  ;;  %v5984_v47 = vld [vmem:[#allocation12 + $0xa70] sm:$0xff] }
 0x5f1   :  { %6879 = vmatpush2.bf16.msra.mxu1 %v6508_v43  ;;  %v6079_v43 = vld [vmem:[#allocation12 + $0xd68] sm:$0xff] }
 0x5f2   :  { %6926 = vmatpush2.bf16.msra.mxu0 %v6547_v31  ;;  %6880 = vmatprep.subr.bf16.mxu1 %v6506_v53  ;;  %v5801_v31 = vld [vmem:[#allocation12 + $0x4b8] sm:$0xff]  ;;  %v5804_v53 = vld [vmem:[#allocation12 + $0x4d0] sm:$0xff] }
 0x5f3   :  { %6927 = vmatprep.subr.bf16.mxu0 %v6545_v42  ;;  %v6631_v42 = vpack.c.bf16 %v6079_v43, %v6076_v54  ;;  %v6494_v13 = vpack.c.bf16 %v5804_v53, %v5801_v31  ;;  %v5980_v54 = vld [vmem:[#allocation12 + $0xa50] sm:$0xff]  ;;  %v5983_v43 = vld [vmem:[#allocation12 + $0xa68] sm:$0xff]  ;;  %v6058_v31 = vld [vmem:[#allocation12 + $0xcc0] sm:$0xff] }
 0x5f5   :  { %6881 = vmatpush2.bf16.msra.mxu1 %v6505_v56  ;;  %v6073_v56 = vld [vmem:[#allocation12 + $0xd38] sm:$0xff] }
 0x5f6   :  { %6928 = vmatpush2.bf16.msra.mxu0 %v6544_v30  ;;  %6882 = vmatprep.subr.bf16.mxu1 %v6503_v14  ;;  %v5795_v30 = vld [vmem:[#allocation12 + $0x488] sm:$0xff]  ;;  %v5798_v14 = vld [vmem:[#allocation12 + $0x4a0] sm:$0xff]  ;;  %v6628_v63 = vpack.c.bf16 %v6073_v56, %v6070_v11  ;;  %v6583_v11 = vpack.c.bf16 %v5983_v43, %v5980_v54  ;;  %v5960_v54 = vld [vmem:[#allocation12 + $0x9b0] sm:$0xff] }
 0x5f7   :  { %6929 = vmatprep.subr.bf16.mxu0 %v6542_v8  ;;  %v6491_v48 = vpack.c.bf16 %v5798_v14, %v5795_v30  ;;  %v5974_v56 = vld [vmem:[#allocation12 + $0xa20] sm:$0xff]  ;;  %v5977_v30 = vld [vmem:[#allocation12 + $0xa38] sm:$0xff]  ;;  %v6052_v14 = vld [vmem:[#allocation12 + $0xc90] sm:$0xff] }
 0x5f8   :  { %v6035_v43 = vld [vmem:[#allocation12 + $0xc08] sm:$0xff] }
 0x5f9   :  { %6883 = vmatpush2.bf16.msra.mxu1 %v6502_v38  ;;  %v5797_v38 = vld [vmem:[#allocation12 + $0x498] sm:$0xff] }
 0x5fa   :  { %6930 = vmatpush2.bf16.msra.mxu0 %v6541_v55  ;;  %6884 = vmatprep.subr.bf16.mxu1 %v6500_v34  ;;  %v6064_v55 = vld [vmem:[#allocation12 + $0xcf0] sm:$0xff] }
 0x5fb   :  { %6931 = vmatprep.subr.bf16.mxu0 %v6539_v40  ;;  %v5981_v40 = vld [vmem:[#allocation12 + $0xa58] sm:$0xff]  ;;  %v6625_v41 = vpack.c.bf16 %v6067_v17, %v6064_v55  ;;  %v5971_v55 = vld [vmem:[#allocation12 + $0xa08] sm:$0xff] }
 0x5fc   :  { %v5963_v17 = vld [vmem:[#allocation12 + $0x9c8] sm:$0xff] }
 0x5fd   :  { %6885 = vmatpush2.bf16.msra.mxu1 %v6499_v29 }
 0x5fe   :  { %6932 = vmatpush2.bf16.msra.mxu0 %v6538_v51  ;;  %6886 = vmatprep.subr.bf16.mxu1 %v6497_v62  ;;  %v6490_v62 = vpack.c.bf16 %v5797_v38, %v5794_v37  ;;  %v5968_v38 = vld [vmem:[#allocation12 + $0x9f0] sm:$0xff] }
 0x5ff   :  { %6983 = vmatprep.subr.bf16.mxu0 %v6632_v5  ;;  %v6584_v5 = vpack.c.bf16 %v5984_v47, %v5981_v40  ;;  %v5966_v40 = vld [vmem:[#allocation12 + $0x9e0] sm:$0xff]  ;;  %v6041_v47 = vld [vmem:[#allocation12 + $0xc38] sm:$0xff] }
 0x600   :  { %v8585_v32 = vpop.f32.mrf.mxu0  ;;  %v6575_v46 = vpack.c.bf16 %v5966_v40, %v5963_v17  ;;  %v5944_v17 = vld [vmem:[#allocation12 + $0x930] sm:$0xff]  ;;  %v5947_v40 = vld [vmem:[#allocation12 + $0x948] sm:$0xff] }
 0x601   :  { %v8607_v8 = vpop.f32.mrf.mxu1  ;;  %6887 = vmatpush2.bf16.msra.mxu1 %v6496_v58  ;;  %6934 = vmatmul.mubr.bf16.vlgmr.msra.gmra.mxu0 %v9919_v60  ;;  %v6061_v58 = vld [vmem:[#allocation12 + $0xcd8] sm:$0xff] }
 0x602   :  { %6984 = vmatpush1.bf16.msra.mxu0 %v6631_v42  ;;  %7015 = vmatprep.mubr.bf16.mxu0 %v9941_v15  ;;  %v8586_v49 = vpop.f32.mrf.mxu0  ;;  %v5975_v42 = vld [vmem:[#allocation12 + $0xa28] sm:$0xff] }
 0x603   :  { %v8587_v34 = vadd.f32 %v8586_v49, %v8585_v32  ;;  %v8608_v1 = vpop.f32.mrf.mxu1  ;;  %6888 = vmatprep.subr.bf16.mxu1 %v6494_v13  ;;  %6985 = vmatprep.subr.bf16.mxu0 %v6629_v27  ;;  %v6622_v13 = vpack.c.bf16 %v6061_v58, %v6058_v31  ;;  %v6581_v27 = vpack.c.bf16 %v5978_v16, %v5975_v42  ;;  %v6050_v49 = vld [vmem:[#allocation12 + $0xc80] sm:$0xff]  ;;  %v5956_v42 = vld [vmem:[#allocation12 + $0x990] sm:$0xff]  ;;  %v5959_v16 = vld [vmem:[#allocation12 + $0x9a8] sm:$0xff] }
 0x604   :  { %v8609_v26 = vadd.f32 %v8608_v1, %v8607_v8  ;;  %v8588_v0 = vpop.f32.mrf.mxu0  ;;  %v5972_v8 = vld [vmem:[#allocation12 + $0xa10] sm:$0xff]  ;;  %v6038_v31 = vld [vmem:[#allocation12 + $0xc20] sm:$0xff] }
 0x605   :  { %v5444_v29 = vadd.f32 %v8587_v34, %v10331_v57  ;;  %v8610_v51 = vpop.f32.mrf.mxu1  ;;  %6889 = vmatpush2.bf16.msra.mxu1 %v6493_v36  ;;  %v6053_v57 = vld [vmem:[#allocation12 + $0xc98] sm:$0xff]  ;;  %v6047_v36 = vld [vmem:[#allocation12 + $0xc68] sm:$0xff]  ;;  %v6578_v37 = vpack.c.bf16 %v5972_v8, %v5969_v21  ;;  %v6046_v34 = vld [vmem:[#allocation12 + $0xc60] sm:$0xff]  ;;  %v6577_v0 = vpack.c.bf16 %v5971_v55, %v5968_v38 }
 0x606   :  { %6986 = vmatpush1.bf16.msra.mxu0 %v6628_v63  ;;  %v8589_v3 = vpop.f32.mrf.mxu0  ;;  %6890 = vmatprep.subr.bf16.mxu1 %v6491_v48  ;;  %v6620_v32 = vpack.c.bf16 %v6056_v44, %v6053_v57  ;;  %v6580_v63 = vpack.c.bf16 %v5977_v30, %v5974_v56  ;;  %v6619_v48 = vpack.c.bf16 %v6055_v45, %v6052_v14  ;;  %v5965_v51 = vld [vmem:[#allocation12 + $0x9d8] sm:$0xff]  ;;  %v6034_v57 = vld [vmem:[#allocation12 + $0xc00] sm:$0xff]  ;;  %v6128_v30 = vld [vmem:[#allocation12 + $0xef0] sm:$0xff] }
 0x607   :  { %v10336_v53 = vadd.f32 %v8609_v26, %v5444_v29  ;;  %v8611_v33 = vpop.f32.mrf.mxu1  ;;  %6987 = vmatprep.subr.bf16.mxu0 %v6626_v61  ;;  %v6617_v1 = vpack.c.bf16 %v6050_v49, %v6047_v36  ;;  %v6049_v61 = vld [vmem:[#allocation12 + $0xc78] sm:$0xff]  ;;  %v6044_v26 = vld [vmem:[#allocation12 + $0xc50] sm:$0xff]  ;;  %v5962_v29 = vld [vmem:[#allocation12 + $0x9c0] sm:$0xff]  ;;  %v6611_v44 = vpack.c.bf16 %v6038_v31, %v6035_v43  ;;  %v6571_v14 = vpack.c.bf16 %v5959_v16, %v5956_v42 }
 0x608   :  { %v6616_v10 = vpack.c.bf16 %v6049_v61, %v6046_v34  ;;  %v6614_v3 = vpack.c.bf16 %v6044_v26, %v6041_v47  ;;  %v6574_v33 = vpack.c.bf16 %v5965_v51, %v5962_v29  ;;  %v6125_v56 = vld [vmem:[#allocation12 + $0xed8] sm:$0xff]  ;;  %v5950_v21 = vld [vmem:[#allocation12 + $0x960] sm:$0xff]  ;;  %v6124_v36 = vld [vmem:[#allocation12 + $0xed0] sm:$0xff] }
 0x609   :  { %6891 = vmatpush2.bf16.msra.mxu1 %v6490_v62  ;;  %v6040_v62 = vld [vmem:[#allocation12 + $0xc30] sm:$0xff]  ;;  %v5953_v8 = vld [vmem:[#allocation12 + $0x978] sm:$0xff]  ;;  %v6656_v49 = vpack.c.bf16 %v6128_v30, %v6125_v56  ;;  %v6119_v38 = vld [vmem:[#allocation12 + $0xea8] sm:$0xff] }
 0x60a   :  { %6988 = vmatpush1.bf16.msra.mxu0 %v6625_v41  ;;  %6942 = vmatprep.subr.bf16.mxu1 %v6584_v5  ;;  %v6043_v41 = vld [vmem:[#allocation12 + $0xc48] sm:$0xff]  ;;  %v5957_v5 = vld [vmem:[#allocation12 + $0x998] sm:$0xff]  ;;  %v6122_v55 = vld [vmem:[#allocation12 + $0xec0] sm:$0xff]  ;;  %v6568_v34 = vpack.c.bf16 %v5953_v8, %v5950_v21 }
 0x60b   :  { %6989 = vmatprep.subr.bf16.mxu0 %v6623_v6  ;;  %v6613_v6 = vpack.c.bf16 %v6043_v41, %v6040_v62  ;;  %v6572_v58 = vpack.c.bf16 %v5960_v54, %v5957_v5  ;;  %v6118_v47 = vld [vmem:[#allocation12 + $0xea0] sm:$0xff]  ;;  %v6653_v26 = vpack.c.bf16 %v6122_v55, %v6119_v38  ;;  %v6113_v51 = vld [vmem:[#allocation12 + $0xe78] sm:$0xff]  ;;  %v6116_v62 = vld [vmem:[#allocation12 + $0xe90] sm:$0xff]  ;;  %v6565_v41 = vpack.c.bf16 %v5947_v40, %v5944_v17 }
 0x60c   :  { %6893 = vmatmul.mubr.bf16.vlgmr.msra.gmra.mxu1 %v9722_v28  ;;  %v5938_v31 = vld [vmem:[#allocation12 + $0x900] sm:$0xff]  ;;  %v6650_v16 = vpack.c.bf16 %v6116_v62, %v6113_v51  ;;  %v6107_v56 = vld [vmem:[#allocation12 + $0xe48] sm:$0xff]  ;;  %v6104_v17 = vld [vmem:[#allocation12 + $0xe30] sm:$0xff] }
 0x60d   :  { %6943 = vmatpush1.bf16.msra.mxu1 %v6583_v11  ;;  %6974 = vmatprep.mubr.bf16.mxu1 %v9742_v2  ;;  %v6037_v11 = vld [vmem:[#allocation12 + $0xc18] sm:$0xff]  ;;  %v6110_v30 = vld [vmem:[#allocation12 + $0xe60] sm:$0xff]  ;;  %v6103_v51 = vld [vmem:[#allocation12 + $0xe28] sm:$0xff] }
 0x60e   :  { %6990 = vmatpush1.bf16.msra.mxu0 %v6622_v13  ;;  %6944 = vmatprep.subr.bf16.mxu1 %v6581_v27  ;;  %v5951_v13 = vld [vmem:[#allocation12 + $0x968] sm:$0xff]  ;;  %v5954_v27 = vld [vmem:[#allocation12 + $0x980] sm:$0xff]  ;;  %v6647_v55 = vpack.c.bf16 %v6110_v30, %v6107_v56  ;;  %v6017_v62 = vld [vmem:[#allocation12 + $0xb78] sm:$0xff] }
 0x60f   :  { %6991 = vmatprep.subr.bf16.mxu0 %v6620_v32  ;;  %v6610_v32 = vpack.c.bf16 %v6037_v11, %v6034_v57  ;;  %v6569_v45 = vpack.c.bf16 %v5954_v27, %v5951_v13  ;;  %v6115_v57 = vld [vmem:[#allocation12 + $0xe88] sm:$0xff]  ;;  %v6032_v11 = vld [vmem:[#allocation12 + $0xbf0] sm:$0xff] }
 0x611   :  { %6945 = vmatpush1.bf16.msra.mxu1 %v6580_v63  ;;  %v6127_v63 = vld [vmem:[#allocation12 + $0xee8] sm:$0xff] }
 0x612   :  { %6992 = vmatpush1.bf16.msra.mxu0 %v6619_v48  ;;  %6946 = vmatprep.subr.bf16.mxu1 %v6578_v37  ;;  %v5945_v48 = vld [vmem:[#allocation12 + $0x938] sm:$0xff]  ;;  %v5948_v37 = vld [vmem:[#allocation12 + $0x950] sm:$0xff] }
 0x613   :  { %6993 = vmatprep.subr.bf16.mxu0 %v6617_v1  ;;  %v6655_v1 = vpack.c.bf16 %v6127_v63, %v6124_v36  ;;  %v6566_v61 = vpack.c.bf16 %v5948_v37, %v5945_v48  ;;  %v6031_v63 = vld [vmem:[#allocation12 + $0xbe8] sm:$0xff]  ;;  %v6106_v48 = vld [vmem:[#allocation12 + $0xe40] sm:$0xff] }
 0x615   :  { %6947 = vmatpush1.bf16.msra.mxu1 %v6577_v0  ;;  %v6121_v0 = vld [vmem:[#allocation12 + $0xeb8] sm:$0xff] }
 0x616   :  { %6994 = vmatpush1.bf16.msra.mxu0 %v6616_v10  ;;  %6948 = vmatprep.subr.bf16.mxu1 %v6575_v46  ;;  %v5939_v10 = vld [vmem:[#allocation12 + $0x908] sm:$0xff]  ;;  %v5942_v46 = vld [vmem:[#allocation12 + $0x920] sm:$0xff]  ;;  %v6652_v54 = vpack.c.bf16 %v6121_v0, %v6118_v47 }
 0x617   :  { %6995 = vmatprep.subr.bf16.mxu0 %v6614_v3  ;;  %v6563_v43 = vpack.c.bf16 %v5942_v46, %v5939_v10  ;;  %v6022_v0 = vld [vmem:[#allocation12 + $0xba0] sm:$0xff]  ;;  %v6025_v10 = vld [vmem:[#allocation12 + $0xbb8] sm:$0xff]  ;;  %v6100_v46 = vld [vmem:[#allocation12 + $0xe10] sm:$0xff] }
 0x619   :  { %6949 = vmatpush1.bf16.msra.mxu1 %v6574_v33  ;;  %v5941_v33 = vld [vmem:[#allocation12 + $0x918] sm:$0xff] }
 0x61a   :  { %6996 = vmatpush1.bf16.msra.mxu0 %v6613_v6  ;;  %6950 = vmatprep.subr.bf16.mxu1 %v6572_v58  ;;  %v6112_v6 = vld [vmem:[#allocation12 + $0xe70] sm:$0xff] }
 0x61b   :  { %6997 = vmatprep.subr.bf16.mxu0 %v6611_v44  ;;  %v6029_v44 = vld [vmem:[#allocation12 + $0xbd8] sm:$0xff]  ;;  %v6649_v8 = vpack.c.bf16 %v6115_v57, %v6112_v6  ;;  %v6019_v6 = vld [vmem:[#allocation12 + $0xb88] sm:$0xff] }
 0x61c   :  { %v6608_v36 = vpack.c.bf16 %v6032_v11, %v6029_v44  ;;  %v6011_v57 = vld [vmem:[#allocation12 + $0xb48] sm:$0xff]  ;;  %v6014_v44 = vld [vmem:[#allocation12 + $0xb60] sm:$0xff]  ;;  %v6089_v11 = vld [vmem:[#allocation12 + $0xdb8] sm:$0xff] }
 0x61d   :  { %6951 = vmatpush1.bf16.msra.mxu1 %v6571_v14  ;;  %v6599_v30 = vpack.c.bf16 %v6014_v44, %v6011_v57  ;;  %v5995_v57 = vld [vmem:[#allocation12 + $0xac8] sm:$0xff]  ;;  %v6262_v44 = vld [vmem:[#allocation12 + $0x1320] sm:$0xff] }
 0x61e   :  { %6998 = vmatpush1.bf16.msra.mxu0 %v6610_v32  ;;  %6952 = vmatprep.subr.bf16.mxu1 %v6569_v45  ;;  %v6562_v45 = vpack.c.bf16 %v5941_v33, %v5938_v31  ;;  %v6016_v33 = vld [vmem:[#allocation12 + $0xb70] sm:$0xff] }
 0x61f   :  { %6999 = vmatprep.subr.bf16.mxu0 %v6656_v49  ;;  %v6028_v49 = vld [vmem:[#allocation12 + $0xbd0] sm:$0xff] }
 0x620   :  { %v8629_v29 = vpop.f32.mrf.mxu0  ;;  %v6607_v40 = vpack.c.bf16 %v6031_v63, %v6028_v49  ;;  %v6008_v49 = vld [vmem:[#allocation12 + $0xb30] sm:$0xff]  ;;  %v6083_v63 = vld [vmem:[#allocation12 + $0xd88] sm:$0xff] }
 0x621   :  { %v8651_v3 = vpop.f32.mrf.mxu1  ;;  %6953 = vmatpush1.bf16.msra.mxu1 %v6568_v34  ;;  %v6109_v34 = vld [vmem:[#allocation12 + $0xe58] sm:$0xff] }
 0x622   :  { %7000 = vmatpush2.bf16.msra.mxu0 %v6655_v1  ;;  %v8630_v5 = vpop.f32.mrf.mxu0  ;;  %6954 = vmatprep.subr.bf16.mxu1 %v6566_v61  ;;  %v6023_v1 = vld [vmem:[#allocation12 + $0xba8] sm:$0xff]  ;;  %v6026_v61 = vld [vmem:[#allocation12 + $0xbc0] sm:$0xff]  ;;  %v6646_v47 = vpack.c.bf16 %v6109_v34, %v6106_v48 }
 0x623   :  { %v8631_v58 = vadd.f32 %v8630_v5, %v8629_v29  ;;  %v8652_v42 = vpop.f32.mrf.mxu1  ;;  %7001 = vmatprep.subr.bf16.mxu0 %v6653_v26  ;;  %v6605_v26 = vpack.c.bf16 %v6026_v61, %v6023_v1  ;;  %v6098_v5 = vld [vmem:[#allocation12 + $0xe00] sm:$0xff]  ;;  %v6004_v1 = vld [vmem:[#allocation12 + $0xb10] sm:$0xff]  ;;  %v6007_v61 = vld [vmem:[#allocation12 + $0xb28] sm:$0xff] }
 0x624   :  { %v8653_v13 = vadd.f32 %v8652_v42, %v8651_v3  ;;  %v8632_v27 = vpop.f32.mrf.mxu0  ;;  %v6020_v3 = vld [vmem:[#allocation12 + $0xb90] sm:$0xff]  ;;  %v6086_v48 = vld [vmem:[#allocation12 + $0xda0] sm:$0xff] }
 0x625   :  { %v5524_v14 = vadd.f32 %v8631_v58, %v10336_v53  ;;  %v8654_v32 = vpop.f32.mrf.mxu1  ;;  %6955 = vmatpush1.bf16.msra.mxu1 %v6565_v41  ;;  %v6101_v53 = vld [vmem:[#allocation12 + $0xe18] sm:$0xff]  ;;  %v6095_v41 = vld [vmem:[#allocation12 + $0xde8] sm:$0xff]  ;;  %v6602_v31 = vpack.c.bf16 %v6020_v3, %v6017_v62  ;;  %v6094_v58 = vld [vmem:[#allocation12 + $0xde0] sm:$0xff]  ;;  %v6601_v27 = vpack.c.bf16 %v6019_v6, %v6016_v33 }
 0x626   :  { %7002 = vmatpush2.bf16.msra.mxu0 %v6652_v54  ;;  %v8633_v21 = vpop.f32.mrf.mxu0  ;;  %6956 = vmatprep.subr.bf16.mxu1 %v6563_v43  ;;  %v6644_v29 = vpack.c.bf16 %v6104_v17, %v6101_v53  ;;  %v6604_v54 = vpack.c.bf16 %v6025_v10, %v6022_v0  ;;  %v6643_v43 = vpack.c.bf16 %v6103_v51, %v6100_v46  ;;  %v6013_v32 = vld [vmem:[#allocation12 + $0xb58] sm:$0xff]  ;;  %v6082_v53 = vld [vmem:[#allocation12 + $0xd80] sm:$0xff]  ;;  %v6272_v10 = vld [vmem:[#allocation12 + $0x1370] sm:$0xff] }
 0x627   :  { %v10341_v37 = vadd.f32 %v8653_v13, %v5524_v14  ;;  %v8655_v38 = vpop.f32.mrf.mxu1  ;;  %7003 = vmatprep.subr.bf16.mxu0 %v6650_v16  ;;  %v6641_v42 = vpack.c.bf16 %v6098_v5, %v6095_v41  ;;  %v6097_v16 = vld [vmem:[#allocation12 + $0xdf8] sm:$0xff]  ;;  %v6092_v13 = vld [vmem:[#allocation12 + $0xdd0] sm:$0xff]  ;;  %v6010_v14 = vld [vmem:[#allocation12 + $0xb40] sm:$0xff]  ;;  %v6635_v17 = vpack.c.bf16 %v6086_v48, %v6083_v63  ;;  %v6595_v46 = vpack.c.bf16 %v6007_v61, %v6004_v1 }
 0x628   :  { %v6640_v56 = vpack.c.bf16 %v6097_v16, %v6094_v58  ;;  %v6638_v21 = vpack.c.bf16 %v6092_v13, %v6089_v11  ;;  %v6598_v38 = vpack.c.bf16 %v6013_v32, %v6010_v14  ;;  %v6269_v0 = vld [vmem:[#allocation12 + $0x1358] sm:$0xff]  ;;  %v5998_v62 = vld [vmem:[#allocation12 + $0xae0] sm:$0xff]  ;;  %v6268_v5 = vld [vmem:[#allocation12 + $0x1350] sm:$0xff] }
 0x629   :  { %6957 = vmatpush1.bf16.msra.mxu1 %v6562_v45  ;;  %v6088_v45 = vld [vmem:[#allocation12 + $0xdb0] sm:$0xff]  ;;  %v6001_v3 = vld [vmem:[#allocation12 + $0xaf8] sm:$0xff]  ;;  %v6728_v41 = vpack.c.bf16 %v6272_v10, %v6269_v0  ;;  %v6263_v33 = vld [vmem:[#allocation12 + $0x1328] sm:$0xff] }
 0x62a   :  { %7004 = vmatpush2.bf16.msra.mxu0 %v6649_v8  ;;  %6958 = vmatprep.subr.bf16.mxu1 %v6608_v36  ;;  %v6091_v8 = vld [vmem:[#allocation12 + $0xdc8] sm:$0xff]  ;;  %v6005_v36 = vld [vmem:[#allocation12 + $0xb18] sm:$0xff]  ;;  %v6266_v6 = vld [vmem:[#allocation12 + $0x1340] sm:$0xff]  ;;  %v6592_v58 = vpack.c.bf16 %v6001_v3, %v5998_v62 }
 0x62b   :  { %7005 = vmatprep.subr.bf16.mxu0 %v6647_v55  ;;  %v6637_v55 = vpack.c.bf16 %v6091_v8, %v6088_v45  ;;  %v6596_v34 = vpack.c.bf16 %v6008_v49, %v6005_v36  ;;  %v5992_v16 = vld [vmem:[#allocation12 + $0xab0] sm:$0xff]  ;;  %v6725_v13 = vpack.c.bf16 %v6266_v6, %v6263_v33  ;;  %v6257_v32 = vld [vmem:[#allocation12 + $0x12f8] sm:$0xff]  ;;  %v5986_v63 = vld [vmem:[#allocation12 + $0xa80] sm:$0xff] }
 0x62c   :  { %v6260_v45 = vld [vmem:[#allocation12 + $0x1310] sm:$0xff]  ;;  %v5989_v48 = vld [vmem:[#allocation12 + $0xa98] sm:$0xff]  ;;  %v6259_v1 = vld [vmem:[#allocation12 + $0x1308] sm:$0xff] }
 0x62d   :  { %6959 = vmatpush2.bf16.msra.mxu1 %v6607_v40  ;;  %v6085_v40 = vld [vmem:[#allocation12 + $0xd98] sm:$0xff]  ;;  %v6586_v0 = vpack.c.bf16 %v5989_v48, %v5986_v63  ;;  %v6175_v62 = vld [vmem:[#allocation12 + $0x1068] sm:$0xff]  ;;  %v6250_v3 = vld [vmem:[#allocation12 + $0x12c0] sm:$0xff] }
 0x62e   :  { %7006 = vmatpush2.bf16.msra.mxu0 %v6646_v47  ;;  %6960 = vmatprep.subr.bf16.mxu1 %v6605_v26  ;;  %v5999_v47 = vld [vmem:[#allocation12 + $0xae8] sm:$0xff]  ;;  %v6002_v26 = vld [vmem:[#allocation12 + $0xb00] sm:$0xff]  ;;  %v6173_v61 = vld [vmem:[#allocation12 + $0x1058] sm:$0xff] }
 0x62f   :  { %7007 = vmatprep.subr.bf16.mxu0 %v6644_v29  ;;  %v6634_v29 = vpack.c.bf16 %v6085_v40, %v6082_v53  ;;  %v6593_v51 = vpack.c.bf16 %v6002_v26, %v5999_v47  ;;  %v6176_v53 = vld [vmem:[#allocation12 + $0x1070] sm:$0xff]  ;;  %v6251_v40 = vld [vmem:[#allocation12 + $0x12c8] sm:$0xff]  ;;  %v6254_v47 = vld [vmem:[#allocation12 + $0x12e0] sm:$0xff] }
 0x630   :  { %v6248_v33 = vld [vmem:[#allocation12 + $0x12b0] sm:$0xff]  ;;  %v6241_v63 = vld [vmem:[#allocation12 + $0x1278] sm:$0xff]  ;;  %v6155_v48 = vld [vmem:[#allocation12 + $0xfc8] sm:$0xff] }
 0x631   :  { %6961 = vmatpush2.bf16.msra.mxu1 %v6604_v54  ;;  %v6271_v54 = vld [vmem:[#allocation12 + $0x1368] sm:$0xff] }
 0x632   :  { %7008 = vmatpush2.bf16.msra.mxu0 %v6643_v43  ;;  %6962 = vmatprep.subr.bf16.mxu1 %v6602_v31  ;;  %v5993_v43 = vld [vmem:[#allocation12 + $0xab8] sm:$0xff]  ;;  %v5996_v31 = vld [vmem:[#allocation12 + $0xad0] sm:$0xff] }
 0x633   :  { %7009 = vmatprep.subr.bf16.mxu0 %v6641_v42  ;;  %v6727_v42 = vpack.c.bf16 %v6271_v54, %v6268_v5  ;;  %v6590_v11 = vpack.c.bf16 %v5996_v31, %v5993_v43  ;;  %v6253_v5 = vld [vmem:[#allocation12 + $0x12d8] sm:$0xff]  ;;  %v6167_v54 = vld [vmem:[#allocation12 + $0x1028] sm:$0xff]  ;;  %v6170_v43 = vld [vmem:[#allocation12 + $0x1040] sm:$0xff] }
 0x634   :  { %v6245_v31 = vld [vmem:[#allocation12 + $0x1298] sm:$0xff]  ;;  %v6718_v6 = vpack.c.bf16 %v6253_v5, %v6250_v3 }
 0x635   :  { %6963 = vmatpush2.bf16.msra.mxu1 %v6601_v27  ;;  %v6265_v27 = vld [vmem:[#allocation12 + $0x1338] sm:$0xff] }
 0x636   :  { %7010 = vmatpush2.bf16.msra.mxu0 %v6640_v56  ;;  %6964 = vmatprep.subr.bf16.mxu1 %v6599_v30  ;;  %v5987_v56 = vld [vmem:[#allocation12 + $0xa88] sm:$0xff]  ;;  %v5990_v30 = vld [vmem:[#allocation12 + $0xaa0] sm:$0xff]  ;;  %v6724_v36 = vpack.c.bf16 %v6265_v27, %v6262_v44  ;;  %v6716_v44 = vpack.c.bf16 %v6248_v33, %v6245_v31  ;;  %v6164_v27 = vld [vmem:[#allocation12 + $0x1010] sm:$0xff] }
 0x637   :  { %7011 = vmatprep.subr.bf16.mxu0 %v6638_v21  ;;  %v6589_v21 = vpack.c.bf16 %v5995_v57, %v5992_v16  ;;  %v6587_v49 = vpack.c.bf16 %v5990_v30, %v5987_v56  ;;  %v6169_v16 = vld [vmem:[#allocation12 + $0x1038] sm:$0xff]  ;;  %v6244_v57 = vld [vmem:[#allocation12 + $0x1290] sm:$0xff]  ;;  %v6239_v56 = vld [vmem:[#allocation12 + $0x1268] sm:$0xff] }
 0x638   :  { %v6242_v30 = vld [vmem:[#allocation12 + $0x1280] sm:$0xff] }
 0x639   :  { %6965 = vmatpush2.bf16.msra.mxu1 %v6598_v38  ;;  %v6256_v38 = vld [vmem:[#allocation12 + $0x12f0] sm:$0xff]  ;;  %v6226_v31 = vld [vmem:[#allocation12 + $0x1200] sm:$0xff] }
 0x63a   :  { %7012 = vmatpush2.bf16.msra.mxu0 %v6637_v55  ;;  %6966 = vmatprep.subr.bf16.mxu1 %v6596_v34  ;;  %v6722_v34 = vpack.c.bf16 %v6260_v45, %v6257_v32 }
 0x63b   :  { %7013 = vmatprep.subr.bf16.mxu0 %v6635_v17 }
 0x63d   :  { %6967 = vmatpush2.bf16.msra.mxu1 %v6595_v46  ;;  %v6721_v46 = vpack.c.bf16 %v6259_v1, %v6256_v38  ;;  %v6158_v38 = vld [vmem:[#allocation12 + $0xfe0] sm:$0xff] }
 0x63e   :  { %7014 = vmatpush2.bf16.msra.mxu0 %v6634_v29  ;;  %6968 = vmatprep.subr.bf16.mxu1 %v6593_v51  ;;  %v6680_v29 = vpack.c.bf16 %v6176_v53, %v6173_v61  ;;  %v6172_v51 = vld [vmem:[#allocation12 + $0x1050] sm:$0xff]  ;;  %v6671_v53 = vpack.c.bf16 %v6158_v38, %v6155_v48  ;;  %v6139_v38 = vld [vmem:[#allocation12 + $0xf48] sm:$0xff] }
 0x63f   :  { %7065 = vmatprep.subr.bf16.mxu0 %v6728_v41  ;;  %v6719_v41 = vpack.c.bf16 %v6254_v47, %v6251_v40  ;;  %v6157_v40 = vld [vmem:[#allocation12 + $0xfd8] sm:$0xff]  ;;  %v6232_v47 = vld [vmem:[#allocation12 + $0x1230] sm:$0xff] }
 0x640   :  { %v8673_v14 = vpop.f32.mrf.mxu0  ;;  %v6136_v48 = vld [vmem:[#allocation12 + $0xf30] sm:$0xff] }
 0x641   :  { %6969 = vmatpush2.bf16.msra.mxu1 %v6592_v58  ;;  %7016 = vmatmul.mubr.bf16.vlgmr.msra.gmra.mxu0 %v10136_v24  ;;  %v6677_v58 = vpack.c.bf16 %v6170_v43, %v6167_v54  ;;  %v6148_v54 = vld [vmem:[#allocation12 + $0xf90] sm:$0xff]  ;;  %v6151_v43 = vld [vmem:[#allocation12 + $0xfa8] sm:$0xff] }
 0x642   :  { %7066 = vmatpush1.bf16.msra.mxu0 %v6727_v42  ;;  %7097 = vmatprep.mubr.bf16.mxu0 %v10152_v12  ;;  %v8674_v8 = vpop.f32.mrf.mxu0  ;;  %v6166_v42 = vld [vmem:[#allocation12 + $0x1020] sm:$0xff] }
 0x643   :  { %v8675_v55 = vadd.f32 %v8674_v8, %v8673_v14  ;;  %6970 = vmatprep.subr.bf16.mxu1 %v6590_v11  ;;  %7067 = vmatprep.subr.bf16.mxu0 %v6725_v13  ;;  %v6247_v11 = vld [vmem:[#allocation12 + $0x12a8] sm:$0xff]  ;;  %v6161_v13 = vld [vmem:[#allocation12 + $0xff8] sm:$0xff]  ;;  %v6676_v14 = vpack.c.bf16 %v6169_v16, %v6166_v42  ;;  %v6320_v16 = vld [vmem:[#allocation12 + $0x14f0] sm:$0xff] }
 0x644   :  { %v8676_v17 = vpop.f32.mrf.mxu0  ;;  %v6715_v32 = vpack.c.bf16 %v6247_v11, %v6244_v57  ;;  %v6674_v45 = vpack.c.bf16 %v6164_v27, %v6161_v13  ;;  %v6163_v8 = vld [vmem:[#allocation12 + $0x1008] sm:$0xff]  ;;  %v6317_v42 = vld [vmem:[#allocation12 + $0x14d8] sm:$0xff]  ;;  %v6667_v57 = vpack.c.bf16 %v6151_v43, %v6148_v54  ;;  %v6142_v13 = vld [vmem:[#allocation12 + $0xf60] sm:$0xff] }
 0x645   :  { %v10346_v26 = vadd.f32 %v8675_v55, %v10341_v37  ;;  %6971 = vmatpush2.bf16.msra.mxu1 %v6589_v21  ;;  %v6679_v37 = vpack.c.bf16 %v6175_v62, %v6172_v51  ;;  %v6160_v21 = vld [vmem:[#allocation12 + $0xff0] sm:$0xff]  ;;  %v6233_v55 = vld [vmem:[#allocation12 + $0x1238] sm:$0xff]  ;;  %v6154_v17 = vld [vmem:[#allocation12 + $0xfc0] sm:$0xff] }
 0x646   :  { %7068 = vmatpush1.bf16.msra.mxu0 %v6724_v36  ;;  %v8677_v10 = vpop.f32.mrf.mxu0  ;;  %6972 = vmatprep.subr.bf16.mxu1 %v6587_v49  ;;  %v6238_v36 = vld [vmem:[#allocation12 + $0x1260] sm:$0xff]  ;;  %v6713_v49 = vpack.c.bf16 %v6242_v30, %v6239_v56  ;;  %v6673_v1 = vpack.c.bf16 %v6163_v8, %v6160_v21  ;;  %v6227_v51 = vld [vmem:[#allocation12 + $0x1208] sm:$0xff]  ;;  %v6670_v3 = vpack.c.bf16 %v6157_v40, %v6154_v17  ;;  %v6145_v27 = vld [vmem:[#allocation12 + $0xf78] sm:$0xff] }
 0x647   :  { %7069 = vmatprep.subr.bf16.mxu0 %v6722_v34  ;;  %v6236_v34 = vld [vmem:[#allocation12 + $0x1250] sm:$0xff]  ;;  %v6712_v61 = vpack.c.bf16 %v6241_v63, %v6238_v36  ;;  %v6235_v10 = vld [vmem:[#allocation12 + $0x1248] sm:$0xff]  ;;  %v6230_v62 = vld [vmem:[#allocation12 + $0x1220] sm:$0xff]  ;;  %v6752_v30 = vpack.c.bf16 %v6320_v16, %v6317_v42  ;;  %v6664_v36 = vpack.c.bf16 %v6145_v27, %v6142_v13 }
 0x648   :  { %v6707_v33 = vpack.c.bf16 %v6230_v62, %v6227_v51  ;;  %v6316_v56 = vld [vmem:[#allocation12 + $0x14d0] sm:$0xff]  ;;  %v6311_v21 = vld [vmem:[#allocation12 + $0x14a8] sm:$0xff]  ;;  %v6314_v8 = vld [vmem:[#allocation12 + $0x14c0] sm:$0xff] }
 0x649   :  { %6973 = vmatpush2.bf16.msra.mxu1 %v6586_v0  ;;  %v6710_v0 = vpack.c.bf16 %v6236_v34, %v6233_v55  ;;  %v6310_v55 = vld [vmem:[#allocation12 + $0x14a0] sm:$0xff]  ;;  %v6749_v34 = vpack.c.bf16 %v6314_v8, %v6311_v21  ;;  %v6305_v17 = vld [vmem:[#allocation12 + $0x1478] sm:$0xff]  ;;  %v6308_v40 = vld [vmem:[#allocation12 + $0x1490] sm:$0xff] }
 0x64a   :  { %7070 = vmatpush1.bf16.msra.mxu0 %v6721_v46  ;;  %7024 = vmatprep.subr.bf16.mxu1 %v6680_v29  ;;  %v6149_v46 = vld [vmem:[#allocation12 + $0xf98] sm:$0xff]  ;;  %v6152_v29 = vld [vmem:[#allocation12 + $0xfb0] sm:$0xff]  ;;  %v6746_v62 = vpack.c.bf16 %v6308_v40, %v6305_v17  ;;  %v6299_v54 = vld [vmem:[#allocation12 + $0x1448] sm:$0xff] }
 0x64b   :  { %7071 = vmatprep.subr.bf16.mxu0 %v6719_v41  ;;  %v6709_v41 = vpack.c.bf16 %v6235_v10, %v6232_v47  ;;  %v6668_v5 = vpack.c.bf16 %v6152_v29, %v6149_v46  ;;  %v6661_v47 = vpack.c.bf16 %v6139_v38, %v6136_v48  ;;  %v6130_v46 = vld [vmem:[#allocation12 + $0xf00] sm:$0xff]  ;;  %v6133_v29 = vld [vmem:[#allocation12 + $0xf18] sm:$0xff]  ;;  %v6304_v51 = vld [vmem:[#allocation12 + $0x1470] sm:$0xff] }
 0x64c   :  { %6975 = vmatmul.mubr.bf16.vlgmr.msra.gmra.mxu1 %v9930_v7  ;;  %v6302_v43 = vld [vmem:[#allocation12 + $0x1460] sm:$0xff]  ;;  %v6293_v13 = vld [vmem:[#allocation12 + $0x1418] sm:$0xff]  ;;  %v6296_v27 = vld [vmem:[#allocation12 + $0x1430] sm:$0xff] }
 0x64d   :  { %7025 = vmatpush1.bf16.msra.mxu1 %v6679_v37  ;;  %7056 = vmatprep.mubr.bf16.mxu1 %v9952_v9  ;;  %v6229_v37 = vld [vmem:[#allocation12 + $0x1218] sm:$0xff]  ;;  %v6298_v42 = vld [vmem:[#allocation12 + $0x1440] sm:$0xff]  ;;  %v6743_v16 = vpack.c.bf16 %v6302_v43, %v6299_v54  ;;  %v6292_v21 = vld [vmem:[#allocation12 + $0x1410] sm:$0xff]  ;;  %v6740_v8 = vpack.c.bf16 %v6296_v27, %v6293_v13 }
 0x64e   :  { %7072 = vmatpush1.bf16.msra.mxu0 %v6718_v6  ;;  %7026 = vmatprep.subr.bf16.mxu1 %v6677_v58  ;;  %v6143_v6 = vld [vmem:[#allocation12 + $0xf68] sm:$0xff]  ;;  %v6146_v58 = vld [vmem:[#allocation12 + $0xf80] sm:$0xff]  ;;  %v6280_v54 = vld [vmem:[#allocation12 + $0x13b0] sm:$0xff] }
 0x64f   :  { %7073 = vmatprep.subr.bf16.mxu0 %v6716_v44  ;;  %v6706_v44 = vpack.c.bf16 %v6229_v37, %v6226_v31  ;;  %v6665_v11 = vpack.c.bf16 %v6146_v58, %v6143_v6  ;;  %v6658_v31 = vpack.c.bf16 %v6133_v29, %v6130_v46  ;;  %v6220_v6 = vld [vmem:[#allocation12 + $0x11d0] sm:$0xff]  ;;  %v6223_v58 = vld [vmem:[#allocation12 + $0x11e8] sm:$0xff]  ;;  %v6290_v38 = vld [vmem:[#allocation12 + $0x1400] sm:$0xff] }
 0x650   :  { %v6287_v48 = vld [vmem:[#allocation12 + $0x13e8] sm:$0xff]  ;;  %v6286_v17 = vld [vmem:[#allocation12 + $0x13e0] sm:$0xff]  ;;  %v6281_v46 = vld [vmem:[#allocation12 + $0x13b8] sm:$0xff] }
 0x651   :  { %7027 = vmatpush1.bf16.msra.mxu1 %v6676_v14  ;;  %v6319_v14 = vld [vmem:[#allocation12 + $0x14e8] sm:$0xff]  ;;  %v6737_v40 = vpack.c.bf16 %v6290_v38, %v6287_v48  ;;  %v6284_v29 = vld [vmem:[#allocation12 + $0x13d0] sm:$0xff]  ;;  %v6274_v13 = vld [vmem:[#allocation12 + $0x1380] sm:$0xff] }
 0x652   :  { %7074 = vmatpush1.bf16.msra.mxu0 %v6715_v32  ;;  %7028 = vmatprep.subr.bf16.mxu1 %v6674_v45  ;;  %v6137_v32 = vld [vmem:[#allocation12 + $0xf38] sm:$0xff]  ;;  %v6140_v45 = vld [vmem:[#allocation12 + $0xf50] sm:$0xff]  ;;  %v6734_v43 = vpack.c.bf16 %v6284_v29, %v6281_v46  ;;  %v5694_v38 = vld [vmem:[#allocation12 + $0x160] sm:$0xff] }
 0x653   :  { %7075 = vmatprep.subr.bf16.mxu0 %v6713_v49  ;;  %v6751_v49 = vpack.c.bf16 %v6319_v14, %v6316_v56  ;;  %v6662_v63 = vpack.c.bf16 %v6140_v45, %v6137_v32  ;;  %v6703_v56 = vpack.c.bf16 %v6223_v58, %v6220_v6  ;;  %v6214_v32 = vld [vmem:[#allocation12 + $0x11a0] sm:$0xff]  ;;  %v6217_v45 = vld [vmem:[#allocation12 + $0x11b8] sm:$0xff]  ;;  %v6275_v6 = vld [vmem:[#allocation12 + $0x1388] sm:$0xff] }
 0x654   :  { %v6278_v58 = vld [vmem:[#allocation12 + $0x13a0] sm:$0xff] }
 0x655   :  { %7029 = vmatpush1.bf16.msra.mxu1 %v6673_v1  ;;  %v6313_v1 = vld [vmem:[#allocation12 + $0x14b8] sm:$0xff]  ;;  %v6731_v27 = vpack.c.bf16 %v6278_v58, %v6275_v6  ;;  %v6178_v6 = vld [vmem:[#allocation12 + $0x1080] sm:$0xff] }
 0x656   :  { %7076 = vmatpush1.bf16.msra.mxu0 %v6712_v61  ;;  %7030 = vmatprep.subr.bf16.mxu1 %v6671_v53  ;;  %v6131_v61 = vld [vmem:[#allocation12 + $0xf08] sm:$0xff]  ;;  %v6134_v53 = vld [vmem:[#allocation12 + $0xf20] sm:$0xff]  ;;  %v6181_v58 = vld [vmem:[#allocation12 + $0x1098] sm:$0xff] }
 0x657   :  { %7077 = vmatprep.subr.bf16.mxu0 %v6710_v0  ;;  %v6748_v0 = vpack.c.bf16 %v6313_v1, %v6310_v55  ;;  %v6659_v10 = vpack.c.bf16 %v6134_v53, %v6131_v61  ;;  %v6700_v55 = vpack.c.bf16 %v6217_v45, %v6214_v32  ;;  %v6208_v61 = vld [vmem:[#allocation12 + $0x1170] sm:$0xff]  ;;  %v6211_v53 = vld [vmem:[#allocation12 + $0x1188] sm:$0xff]  ;;  %v5742_v32 = vld [vmem:[#allocation12 + $0x2e0] sm:$0xff] }
 0x658   :  { %v5745_v45 = vld [vmem:[#allocation12 + $0x2f8] sm:$0xff] }
 0x659   :  { %7031 = vmatpush1.bf16.msra.mxu1 %v6670_v3  ;;  %v6307_v3 = vld [vmem:[#allocation12 + $0x1488] sm:$0xff]  ;;  %v6465_v48 = vpack.c.bf16 %v5745_v45, %v5742_v32  ;;  %v6364_v45 = vld [vmem:[#allocation12 + $0x1650] sm:$0xff] }
 0x65a   :  { %7078 = vmatpush1.bf16.msra.mxu0 %v6709_v41  ;;  %7032 = vmatprep.subr.bf16.mxu1 %v6668_v5  ;;  %v6221_v41 = vld [vmem:[#allocation12 + $0x11d8] sm:$0xff]  ;;  %v6224_v5 = vld [vmem:[#allocation12 + $0x11f0] sm:$0xff] }
 0x65b   :  { %7079 = vmatprep.subr.bf16.mxu0 %v6707_v33  ;;  %v6745_v33 = vpack.c.bf16 %v6307_v3, %v6304_v51  ;;  %v6704_v37 = vpack.c.bf16 %v6224_v5, %v6221_v41  ;;  %v6697_v51 = vpack.c.bf16 %v6211_v53, %v6208_v61  ;;  %v6202_v41 = vld [vmem:[#allocation12 + $0x1140] sm:$0xff]  ;;  %v6205_v5 = vld [vmem:[#allocation12 + $0x1158] sm:$0xff]  ;;  %v5736_v61 = vld [vmem:[#allocation12 + $0x2b0] sm:$0xff] }
 0x65c   :  { %v5739_v53 = vld [vmem:[#allocation12 + $0x2c8] sm:$0xff] }
 0x65d   :  { %7033 = vmatpush1.bf16.msra.mxu1 %v6667_v57  ;;  %v6301_v57 = vld [vmem:[#allocation12 + $0x1458] sm:$0xff]  ;;  %v6462_v29 = vpack.c.bf16 %v5739_v53, %v5736_v61  ;;  %v6358_v53 = vld [vmem:[#allocation12 + $0x1620] sm:$0xff] }
 0x65e   :  { %7080 = vmatpush1.bf16.msra.mxu0 %v6706_v44  ;;  %7034 = vmatprep.subr.bf16.mxu1 %v6665_v11  ;;  %v6215_v44 = vld [vmem:[#allocation12 + $0x11a8] sm:$0xff]  ;;  %v6218_v11 = vld [vmem:[#allocation12 + $0x11c0] sm:$0xff] }
 0x65f   :  { %7081 = vmatprep.subr.bf16.mxu0 %v6752_v30  ;;  %v6742_v30 = vpack.c.bf16 %v6301_v57, %v6298_v42  ;;  %v6701_v14 = vpack.c.bf16 %v6218_v11, %v6215_v44  ;;  %v6694_v42 = vpack.c.bf16 %v6205_v5, %v6202_v41  ;;  %v6196_v44 = vld [vmem:[#allocation12 + $0x1110] sm:$0xff]  ;;  %v6199_v11 = vld [vmem:[#allocation12 + $0x1128] sm:$0xff]  ;;  %v5730_v5 = vld [vmem:[#allocation12 + $0x280] sm:$0xff] }
 0x661   :  { %7035 = vmatpush1.bf16.msra.mxu1 %v6664_v36  ;;  %v6295_v36 = vld [vmem:[#allocation12 + $0x1428] sm:$0xff] }
 0x662   :  { %7082 = vmatpush2.bf16.msra.mxu0 %v6751_v49  ;;  %7036 = vmatprep.subr.bf16.mxu1 %v6662_v63  ;;  %v6209_v49 = vld [vmem:[#allocation12 + $0x1178] sm:$0xff]  ;;  %v6212_v63 = vld [vmem:[#allocation12 + $0x1190] sm:$0xff] }
 0x663   :  { %7083 = vmatprep.subr.bf16.mxu0 %v6749_v34  ;;  %v6739_v34 = vpack.c.bf16 %v6295_v36, %v6292_v21  ;;  %v6698_v1 = vpack.c.bf16 %v6212_v63, %v6209_v49  ;;  %v6691_v21 = vpack.c.bf16 %v6199_v11, %v6196_v44  ;;  %v6190_v49 = vld [vmem:[#allocation12 + $0x10e0] sm:$0xff]  ;;  %v6193_v63 = vld [vmem:[#allocation12 + $0x10f8] sm:$0xff]  ;;  %v6368_v11 = vld [vmem:[#allocation12 + $0x1670] sm:$0xff] }
 0x664   :  { %v6365_v44 = vld [vmem:[#allocation12 + $0x1658] sm:$0xff] }
 0x665   :  { %7037 = vmatpush1.bf16.msra.mxu1 %v6661_v47  ;;  %v6289_v47 = vld [vmem:[#allocation12 + $0x13f8] sm:$0xff]  ;;  %v6776_v32 = vpack.c.bf16 %v6368_v11, %v6365_v44  ;;  %v6350_v44 = vld [vmem:[#allocation12 + $0x15e0] sm:$0xff] }
 0x666   :  { %7084 = vmatpush2.bf16.msra.mxu0 %v6748_v0  ;;  %7038 = vmatprep.subr.bf16.mxu1 %v6659_v10  ;;  %v6203_v0 = vld [vmem:[#allocation12 + $0x1148] sm:$0xff]  ;;  %v6206_v10 = vld [vmem:[#allocation12 + $0x1160] sm:$0xff] }
 0x667   :  { %7085 = vmatprep.subr.bf16.mxu0 %v6746_v62  ;;  %v6736_v62 = vpack.c.bf16 %v6289_v47, %v6286_v17  ;;  %v6695_v3 = vpack.c.bf16 %v6206_v10, %v6203_v0  ;;  %v6688_v17 = vpack.c.bf16 %v6193_v63, %v6190_v49  ;;  %v6184_v47 = vld [vmem:[#allocation12 + $0x10b0] sm:$0xff]  ;;  %v6187_v0 = vld [vmem:[#allocation12 + $0x10c8] sm:$0xff] }
 0x668   :  { %v5688_v10 = vld [vmem:[#allocation12 + $0x130] sm:$0xff]  ;;  %v5679_v49 = vld [vmem:[#allocation12 + $0xe8] sm:$0xff] }
 0x669   :  { %7039 = vmatpush1.bf16.msra.mxu1 %v6658_v31  ;;  %v6283_v31 = vld [vmem:[#allocation12 + $0x13c8] sm:$0xff] }
 0x66a   :  { %7086 = vmatpush2.bf16.msra.mxu0 %v6745_v33  ;;  %7040 = vmatprep.subr.bf16.mxu1 %v6704_v37  ;;  %v6197_v33 = vld [vmem:[#allocation12 + $0x1118] sm:$0xff]  ;;  %v6200_v37 = vld [vmem:[#allocation12 + $0x1130] sm:$0xff]  ;;  %v6359_v63 = vld [vmem:[#allocation12 + $0x1628] sm:$0xff] }
 0x66b   :  { %7087 = vmatprep.subr.bf16.mxu0 %v6743_v16  ;;  %v6733_v16 = vpack.c.bf16 %v6283_v31, %v6280_v54  ;;  %v6692_v57 = vpack.c.bf16 %v6200_v37, %v6197_v33  ;;  %v5733_v54 = vld [vmem:[#allocation12 + $0x298] sm:$0xff] }
 0x66d   :  { %7041 = vmatpush2.bf16.msra.mxu1 %v6703_v56  ;;  %v6277_v56 = vld [vmem:[#allocation12 + $0x1398] sm:$0xff] }
 0x66e   :  { %7088 = vmatpush2.bf16.msra.mxu0 %v6742_v30  ;;  %7042 = vmatprep.subr.bf16.mxu1 %v6701_v14  ;;  %v6191_v30 = vld [vmem:[#allocation12 + $0x10e8] sm:$0xff]  ;;  %v6194_v14 = vld [vmem:[#allocation12 + $0x1100] sm:$0xff] }
 0x66f   :  { %7089 = vmatprep.subr.bf16.mxu0 %v6740_v8  ;;  %v6730_v8 = vpack.c.bf16 %v6277_v56, %v6274_v13  ;;  %v6689_v36 = vpack.c.bf16 %v6194_v14, %v6191_v30  ;;  %v5727_v56 = vld [vmem:[#allocation12 + $0x268] sm:$0xff]  ;;  %v6682_v30 = vpack.c.bf16 %v6181_v58, %v6178_v6  ;;  %v5664_v6 = vld [vmem:[#allocation12 + $0x70] sm:$0xff] }
 0x671   :  { %7043 = vmatpush2.bf16.msra.mxu1 %v6700_v55  ;;  %v5697_v55 = vld [vmem:[#allocation12 + $0x178] sm:$0xff] }
 0x672   :  { %7090 = vmatpush2.bf16.msra.mxu0 %v6739_v34  ;;  %7044 = vmatprep.subr.bf16.mxu1 %v6698_v1  ;;  %v6185_v34 = vld [vmem:[#allocation12 + $0x10b8] sm:$0xff]  ;;  %v6188_v1 = vld [vmem:[#allocation12 + $0x10d0] sm:$0xff] }
 0x673   :  { %7091 = vmatprep.subr.bf16.mxu0 %v6737_v40  ;;  %v6441_v40 = vpack.c.bf16 %v5697_v55, %v5694_v38  ;;  %v6686_v46 = vpack.c.bf16 %v6188_v1, %v6185_v34  ;;  %v5718_v38 = vld [vmem:[#allocation12 + $0x220] sm:$0xff]  ;;  %v5721_v55 = vld [vmem:[#allocation12 + $0x238] sm:$0xff] }
 0x675   :  { %7045 = vmatpush2.bf16.msra.mxu1 %v6697_v51  ;;  %v5691_v51 = vld [vmem:[#allocation12 + $0x148] sm:$0xff] }
 0x676   :  { %7092 = vmatpush2.bf16.msra.mxu0 %v6736_v62  ;;  %7046 = vmatprep.subr.bf16.mxu1 %v6695_v3  ;;  %v6179_v62 = vld [vmem:[#allocation12 + $0x1088] sm:$0xff]  ;;  %v6182_v3 = vld [vmem:[#allocation12 + $0x10a0] sm:$0xff]  ;;  %v6438_v33 = vpack.c.bf16 %v5691_v51, %v5688_v10  ;;  %v6353_v10 = vld [vmem:[#allocation12 + $0x15f8] sm:$0xff] }
 0x677   :  { %7093 = vmatprep.subr.bf16.mxu0 %v6734_v43  ;;  %v6685_v43 = vpack.c.bf16 %v6187_v0, %v6184_v47  ;;  %v6683_v37 = vpack.c.bf16 %v6182_v3, %v6179_v62  ;;  %v6453_v47 = vpack.c.bf16 %v5721_v55, %v5718_v38  ;;  %v5673_v0 = vld [vmem:[#allocation12 + $0xb8] sm:$0xff]  ;;  %v5712_v51 = vld [vmem:[#allocation12 + $0x1f0] sm:$0xff]  ;;  %v5715_v62 = vld [vmem:[#allocation12 + $0x208] sm:$0xff] }
 0x678   :  { %v5700_v38 = vld [vmem:[#allocation12 + $0x190] sm:$0xff]  ;;  %v5703_v55 = vld [vmem:[#allocation12 + $0x1a8] sm:$0xff] }
 0x679   :  { %7047 = vmatpush2.bf16.msra.mxu1 %v6694_v42  ;;  %v5682_v42 = vld [vmem:[#allocation12 + $0x100] sm:$0xff] }
 0x67a   :  { %7094 = vmatpush2.bf16.msra.mxu0 %v6733_v16  ;;  %7048 = vmatprep.subr.bf16.mxu1 %v6692_v57  ;;  %v6459_v16 = vpack.c.bf16 %v5733_v54, %v5730_v5  ;;  %v5685_v57 = vld [vmem:[#allocation12 + $0x118] sm:$0xff] }
 0x67b   :  { %7095 = vmatprep.subr.bf16.mxu0 %v6731_v27  ;;  %v5724_v27 = vld [vmem:[#allocation12 + $0x250] sm:$0xff]  ;;  %v6435_v14 = vpack.c.bf16 %v5685_v57, %v5682_v42  ;;  %v6450_v42 = vpack.c.bf16 %v5715_v62, %v5712_v51  ;;  %v6347_v57 = vld [vmem:[#allocation12 + $0x15c8] sm:$0xff] }
 0x67d   :  { %7049 = vmatpush2.bf16.msra.mxu1 %v6691_v21  ;;  %v6367_v21 = vld [vmem:[#allocation12 + $0x1668] sm:$0xff] }
 0x67e   :  { %7096 = vmatpush2.bf16.msra.mxu0 %v6730_v8  ;;  %7050 = vmatprep.subr.bf16.mxu1 %v6689_v36  ;;  %v5676_v8 = vld [vmem:[#allocation12 + $0xd0] sm:$0xff]  ;;  %v6456_v36 = vpack.c.bf16 %v5727_v56, %v5724_v27  ;;  %v6775_v34 = vpack.c.bf16 %v6367_v21, %v6364_v45  ;;  %v5709_v27 = vld [vmem:[#allocation12 + $0x1d8] sm:$0xff]  ;;  %v6346_v45 = vld [vmem:[#allocation12 + $0x15c0] sm:$0xff] }
 0x67f   :  { %8701 = vmatprep.subr.bf16.mxu0 %v6465_v48  ;;  %v6362_v48 = vld [vmem:[#allocation12 + $0x1640] sm:$0xff]  ;;  %v6432_v1 = vpack.c.bf16 %v5679_v49, %v5676_v8  ;;  %v6349_v21 = vld [vmem:[#allocation12 + $0x15d8] sm:$0xff] }
 0x680   :  { %v10350_v41 = vpop.f32.mrf.mxu0  ;;  %v6773_v61 = vpack.c.bf16 %v6362_v48, %v6359_v63  ;;  %v5658_v8 = vld [vmem:[#allocation12 + $0x40] sm:$0xff]  ;;  %v5661_v49 = vld [vmem:[#allocation12 + $0x58] sm:$0xff]  ;;  %v6344_v48 = vld [vmem:[#allocation12 + $0x15b0] sm:$0xff] }
 0x681   :  { %7051 = vmatpush2.bf16.msra.mxu1 %v6688_v17  ;;  %7098 = vmatmul.mubr.bf16.vlgmr.msra.gmra.mxu0 %v10304_v4  ;;  %v6361_v17 = vld [vmem:[#allocation12 + $0x1638] sm:$0xff] }
 0x682   :  { %8702 = vmatpush3.bf16.msra.mxu0 %v6441_v40  ;;  %7179 = vmatprep.mubr.bf16.mxu0 %v9521_v35  ;;  %v10354_v31 = vpop.f32.mrf.mxu0  ;;  %v5670_v40 = vld [vmem:[#allocation12 + $0xa0] sm:$0xff]  ;;  %v6772_v3 = vpack.c.bf16 %v6361_v17, %v6358_v53  ;;  %v6341_v63 = vld [vmem:[#allocation12 + $0x1598] sm:$0xff]  ;;  %v6343_v53 = vld [vmem:[#allocation12 + $0x15a8] sm:$0xff] }
 0x683   :  { %7052 = vmatprep.subr.bf16.mxu1 %v6686_v46  ;;  %8703 = vmatprep.subr.bf16.mxu0 %v6462_v29  ;;  %v6356_v46 = vld [vmem:[#allocation12 + $0x1610] sm:$0xff]  ;;  %v6429_v54 = vpack.c.bf16 %v5673_v0, %v5670_v40  ;;  %v6444_v40 = vpack.c.bf16 %v5703_v55, %v5700_v38  ;;  %v6335_v0 = vld [vmem:[#allocation12 + $0x1568] sm:$0xff]  ;;  %v6325_v38 = vld [vmem:[#allocation12 + $0x1518] sm:$0xff] }
 0x684   :  { %v6857_v13 = vpop.f32.mrf.mxu0  ;;  %v5652_v17 = vld [vmem:[#allocation12 + $0x10] sm:$0xff]  ;;  %v5874_v55 = vld [vmem:[#allocation12 + $0x700] sm:$0xff] }
 0x685   :  { %7053 = vmatpush2.bf16.msra.mxu1 %v6685_v43  ;;  %v6770_v43 = vpack.c.bf16 %v6356_v46, %v6353_v10  ;;  %v5706_v13 = vld [vmem:[#allocation12 + $0x1c0] sm:$0xff] }
 0x686   :  { %8704 = vmatpush3.bf16.msra.mxu0 %v6438_v33  ;;  %v6858_v35 = vpop.f32.mrf.mxu0  ;;  %7054 = vmatprep.subr.bf16.mxu1 %v6683_v37  ;;  %v6352_v33 = vld [vmem:[#allocation12 + $0x15f0] sm:$0xff]  ;;  %v6355_v37 = vld [vmem:[#allocation12 + $0x1608] sm:$0xff]  ;;  %v6338_v10 = vld [vmem:[#allocation12 + $0x1580] sm:$0xff] }
 0x687   :  { %8705 = vmatprep.subr.bf16.mxu0 %v6459_v16  ;;  %v5667_v16 = vld [vmem:[#allocation12 + $0x88] sm:$0xff]  ;;  %v5934_v46 = vld [vmem:[#allocation12 + $0x8e0] sm:$0xff] }
 0x689   :  { %7055 = vmatpush2.bf16.msra.mxu1 %v6682_v30  ;;  %v6769_v30 = vpack.c.bf16 %v6355_v37, %v6352_v33  ;;  %v5886_v33 = vld [vmem:[#allocation12 + $0x760] sm:$0xff]  ;;  %v5889_v37 = vld [vmem:[#allocation12 + $0x778] sm:$0xff] }
 0x68a   :  { %8706 = vmatpush3.bf16.msra.mxu0 %v6435_v14  ;;  %7106 = vmatprep.subr.bf16.mxu1 %v6776_v32  ;;  %v6426_v14 = vpack.c.bf16 %v5667_v16, %v5664_v6  ;;  %v6767_v32 = vpack.c.bf16 %v6350_v44, %v6347_v57  ;;  %v6329_v6 = vld [vmem:[#allocation12 + $0x1538] sm:$0xff]  ;;  %v5931_v16 = vld [vmem:[#allocation12 + $0x8c8] sm:$0xff]  ;;  %v6537_v44 = vpack.c.bf16 %v5889_v37, %v5886_v33  ;;  %v6406_v37 = vld [vmem:[#allocation12 + $0x17a0] sm:$0xff] }
 0x68b   :  { %8707 = vmatprep.subr.bf16.mxu0 %v6456_v36  ;;  %v6447_v36 = vpack.c.bf16 %v5709_v27, %v5706_v13  ;;  %v6331_v13 = vld [vmem:[#allocation12 + $0x1548] sm:$0xff]  ;;  %v5880_v27 = vld [vmem:[#allocation12 + $0x730] sm:$0xff] }
 0x68c   :  { %7057 = vmatmul.mubr.bf16.vlgmr.msra.gmra.mxu1 %v10144_v39  ;;  %v8695_v29 = vpop.f32.mrf.mxu1 }
 0x68d   :  { %7107 = vmatpush1.bf16.msra.mxu1 %v6775_v34  ;;  %7138 = vmatprep.mubr.bf16.mxu1 %v10324_v18  ;;  %v6423_v34 = vpack.c.bf16 %v5661_v49, %v5658_v8  ;;  %v5925_v8 = vld [vmem:[#allocation12 + $0x898] sm:$0xff] }
 0x68e   :  { %8708 = vmatpush3.bf16.msra.mxu0 %v6432_v1  ;;  %v8696_v5 = vpop.f32.mrf.mxu1  ;;  %7108 = vmatprep.subr.bf16.mxu1 %v6773_v61  ;;  %v6764_v1 = vpack.c.bf16 %v6344_v48, %v6341_v63  ;;  %v6340_v61 = vld [vmem:[#allocation12 + $0x1590] sm:$0xff]  ;;  %v6322_v48 = vld [vmem:[#allocation12 + $0x1500] sm:$0xff] }
 0x68f   :  { %v8697_v58 = vadd.f32 %v8696_v5, %v8695_v29  ;;  %8709 = vmatprep.subr.bf16.mxu0 %v6453_v47  ;;  %v5655_v47 = vld [vmem:[#allocation12 + $0x28] sm:$0xff]  ;;  %v5937_v29 = vld [vmem:[#allocation12 + $0x8f8] sm:$0xff]  ;;  %v6763_v51 = vpack.c.bf16 %v6343_v53, %v6340_v61  ;;  %v6334_v5 = vld [vmem:[#allocation12 + $0x1560] sm:$0xff] }
 0x690   :  { %v8698_v11 = vpop.f32.mrf.mxu1  ;;  %v6420_v62 = vpack.c.bf16 %v5655_v47, %v5652_v17  ;;  %v6416_v61 = vld [vmem:[#allocation12 + $0x17f0] sm:$0xff]  ;;  %v5919_v17 = vld [vmem:[#allocation12 + $0x868] sm:$0xff] }
 0x691   :  { %v10359_v56 = vadd.f32 %v8697_v58, %v10346_v26  ;;  %7109 = vmatpush1.bf16.msra.mxu1 %v6772_v3  ;;  %v6766_v26 = vpack.c.bf16 %v6349_v21, %v6346_v45  ;;  %v6761_v3 = vpack.c.bf16 %v6338_v10, %v6335_v0  ;;  %v6332_v58 = vld [vmem:[#allocation12 + $0x1550] sm:$0xff]  ;;  %v6326_v45 = vld [vmem:[#allocation12 + $0x1520] sm:$0xff]  ;;  %v6415_v0 = vld [vmem:[#allocation12 + $0x17e8] sm:$0xff] }
 0x692   :  { %8710 = vmatpush3.bf16.msra.mxu0 %v6429_v54  ;;  %v8699_v35 = vpop.f32.mrf.mxu1  ;;  %7110 = vmatprep.subr.bf16.mxu1 %v6770_v43  ;;  %v6337_v54 = vld [vmem:[#allocation12 + $0x1578] sm:$0xff]  ;;  %v6561_v43 = vpack.c.bf16 %v5937_v29, %v5934_v46  ;;  %v6328_v11 = vld [vmem:[#allocation12 + $0x1530] sm:$0xff]  ;;  %v5922_v21 = vld [vmem:[#allocation12 + $0x880] sm:$0xff] }
 0x693   :  { %8711 = vmatprep.subr.bf16.mxu0 %v6450_v42  ;;  %v5928_v42 = vld [vmem:[#allocation12 + $0x8b0] sm:$0xff]  ;;  %v6760_v57 = vpack.c.bf16 %v6337_v54, %v6334_v5  ;;  %v5871_v29 = vld [vmem:[#allocation12 + $0x6e8] sm:$0xff]  ;;  %v5913_v5 = vld [vmem:[#allocation12 + $0x838] sm:$0xff] }
 0x694   :  { %v6558_v35 = vpack.c.bf16 %v5931_v16, %v5928_v42  ;;  %v5916_v53 = vld [vmem:[#allocation12 + $0x850] sm:$0xff]  ;;  %v5865_v16 = vld [vmem:[#allocation12 + $0x6b8] sm:$0xff] }
 0x695   :  { %7111 = vmatpush1.bf16.msra.mxu1 %v6769_v30  ;;  %v6758_v30 = vpack.c.bf16 %v6332_v58, %v6329_v6  ;;  %v5868_v10 = vld [vmem:[#allocation12 + $0x6d0] sm:$0xff]  ;;  %v6552_v46 = vpack.c.bf16 %v5919_v17, %v5916_v53  ;;  %v6409_v6 = vld [vmem:[#allocation12 + $0x17b8] sm:$0xff]  ;;  %v5862_v58 = vld [vmem:[#allocation12 + $0x6a0] sm:$0xff] }
 0x696   :  { %8712 = vmatpush3.bf16.msra.mxu0 %v6426_v14  ;;  %7112 = vmatprep.subr.bf16.mxu1 %v6767_v32  ;;  %v5883_v14 = vld [vmem:[#allocation12 + $0x748] sm:$0xff]  ;;  %v5853_v17 = vld [vmem:[#allocation12 + $0x658] sm:$0xff] }
 0x697   :  { %8713 = vmatprep.subr.bf16.mxu0 %v6447_v36  ;;  %v6323_v32 = vld [vmem:[#allocation12 + $0x1508] sm:$0xff]  ;;  %v6757_v36 = vpack.c.bf16 %v6331_v13, %v6328_v11  ;;  %v6534_v49 = vpack.c.bf16 %v5883_v14, %v5880_v27  ;;  %v5904_v11 = vld [vmem:[#allocation12 + $0x7f0] sm:$0xff]  ;;  %v6796_v27 = vpack.c.bf16 %v6409_v6, %v6406_v37  ;;  %v6129_v37 = vld [vmem:[#allocation12 + $0xef8] sm:$0xff] }
 0x698   :  { %v6755_v63 = vpack.c.bf16 %v6326_v45, %v6323_v32  ;;  %v5907_v13 = vld [vmem:[#allocation12 + $0x808] sm:$0xff]  ;;  %v6400_v14 = vld [vmem:[#allocation12 + $0x1770] sm:$0xff] }
 0x699   :  { %7113 = vmatpush1.bf16.msra.mxu1 %v6766_v26  ;;  %v6555_v26 = vpack.c.bf16 %v5925_v8, %v5922_v21  ;;  %v6403_v32 = vld [vmem:[#allocation12 + $0x1788] sm:$0xff]  ;;  %v5856_v45 = vld [vmem:[#allocation12 + $0x670] sm:$0xff]  ;;  %v6546_v21 = vpack.c.bf16 %v5907_v13, %v5904_v11  ;;  %v6078_v11 = vld [vmem:[#allocation12 + $0xd60] sm:$0xff] }
 0x69a   :  { %8714 = vmatpush3.bf16.msra.mxu0 %v6423_v34  ;;  %7114 = vmatprep.subr.bf16.mxu1 %v6764_v1  ;;  %v5877_v34 = vld [vmem:[#allocation12 + $0x718] sm:$0xff]  ;;  %v5859_v8 = vld [vmem:[#allocation12 + $0x688] sm:$0xff] }
 0x69b   :  { %8715 = vmatprep.subr.bf16.mxu0 %v6444_v40  ;;  %v6413_v1 = vld [vmem:[#allocation12 + $0x17d8] sm:$0xff]  ;;  %v6754_v40 = vpack.c.bf16 %v6325_v38, %v6322_v48  ;;  %v6793_v38 = vpack.c.bf16 %v6403_v32, %v6400_v14  ;;  %v6123_v14 = vld [vmem:[#allocation12 + $0xec8] sm:$0xff] }
 0x69c   :  { %v6800_v47 = vpack.c.bf16 %v6416_v61, %v6413_v1  ;;  %v5901_v48 = vld [vmem:[#allocation12 + $0x7d8] sm:$0xff]  ;;  %v5850_v61 = vld [vmem:[#allocation12 + $0x640] sm:$0xff] }
 0x69d   :  { %7115 = vmatpush1.bf16.msra.mxu1 %v6763_v51  ;;  %v6407_v51 = vld [vmem:[#allocation12 + $0x17a8] sm:$0xff]  ;;  %v6397_v1 = vld [vmem:[#allocation12 + $0x1758] sm:$0xff] }
 0x69e   :  { %8716 = vmatpush3.bf16.msra.mxu0 %v6420_v62  ;;  %7116 = vmatprep.subr.bf16.mxu1 %v6761_v3  ;;  %v6410_v62 = vld [vmem:[#allocation12 + $0x17c0] sm:$0xff]  ;;  %v6081_v13 = vld [vmem:[#allocation12 + $0xd78] sm:$0xff] }
 0x69f   :  { %8745 = vmatprep.subr.bf16.mxu0 %v6561_v43  ;;  %v5910_v3 = vld [vmem:[#allocation12 + $0x820] sm:$0xff]  ;;  %v6528_v43 = vpack.c.bf16 %v5871_v29, %v5868_v10  ;;  %v6797_v33 = vpack.c.bf16 %v6410_v62, %v6407_v51  ;;  %v6519_v10 = vpack.c.bf16 %v5853_v17, %v5850_v61  ;;  %v6388_v29 = vld [vmem:[#allocation12 + $0x1710] sm:$0xff]  ;;  %v6391_v51 = vld [vmem:[#allocation12 + $0x1728] sm:$0xff] }
 0x6a0   :  { %v6549_v42 = vpack.c.bf16 %v5913_v5, %v5910_v3  ;;  %v5844_v62 = vld [vmem:[#allocation12 + $0x610] sm:$0xff]  ;;  %v5847_v5 = vld [vmem:[#allocation12 + $0x628] sm:$0xff]  ;;  %v6787_v6 = vpack.c.bf16 %v6391_v51, %v6388_v29  ;;  %v5841_v29 = vld [vmem:[#allocation12 + $0x5f8] sm:$0xff] }
 0x6a1   :  { %7117 = vmatpush1.bf16.msra.mxu1 %v6760_v57  ;;  %7180 = vmatmul.mubr.bf16.vlgmr.msra.gmra.mxu0 %v9711_v25  ;;  %v6531_v25 = vpack.c.bf16 %v5877_v34, %v5874_v55  ;;  %v6401_v57 = vld [vmem:[#allocation12 + $0x1778] sm:$0xff]  ;;  %v6522_v55 = vpack.c.bf16 %v5859_v8, %v5856_v45  ;;  %v6394_v34 = vld [vmem:[#allocation12 + $0x1740] sm:$0xff]  ;;  %v6633_v45 = vpack.c.bf16 %v6081_v13, %v6078_v11  ;;  %v6379_v8 = vld [vmem:[#allocation12 + $0x16c8] sm:$0xff] }
 0x6a2   :  { %8746 = vmatpush3.bf16.msra.mxu0 %v6537_v44  ;;  %7259 = vmatprep.mubr.bf16.mxu0 %v9733_v59  ;;  %v6412_v59 = vld [vmem:[#allocation12 + $0x17d0] sm:$0xff]  ;;  %v6802_v51 = vld [vmem:[#allocation13] sm:$0x7]  ;;  %v6105_v13 = vld [vmem:[#allocation12 + $0xe38] sm:$0xff] }
 0x6a3   :  { %7118 = vmatprep.subr.bf16.mxu1 %v6758_v30  ;;  %8747 = vmatprep.subr.bf16.mxu0 %v6558_v35  ;;  %v6799_v54 = vpack.c.bf16 %v6415_v0, %v6412_v59  ;;  %v6404_v44 = vld [vmem:[#allocation12 + $0x1790] sm:$0xff]  ;;  %v6525_v30 = vpack.c.bf16 %v5865_v16, %v5862_v58  ;;  %v5895_v59 = vld [vmem:[#allocation12 + $0x7a8] sm:$0xff]  ;;  %v6790_v0 = vpack.c.bf16 %v6397_v1, %v6394_v34  ;;  %v6382_v16 = vld [vmem:[#allocation12 + $0x16e0] sm:$0xff] }
 0x6a4   :  { %v6794_v35 = vpack.c.bf16 %v6404_v44, %v6401_v57  ;;  %v6516_v58 = vpack.c.bf16 %v5847_v5, %v5844_v62  ;;  %v6385_v57 = vld [vmem:[#allocation12 + $0x16f8] sm:$0xff]  ;;  %v6108_v62 = vld [vmem:[#allocation12 + $0xe50] sm:$0xff]  ;;  %v6102_v11 = vld [vmem:[#allocation12 + $0xe20] sm:$0xff] }
 0x6a5   :  { %7119 = vmatpush1.bf16.msra.mxu1 %v6757_v36  ;;  %v6395_v36 = vld [vmem:[#allocation12 + $0x1748] sm:$0xff]  ;;  %v6784_v32 = vpack.c.bf16 %v6385_v57, %v6382_v16  ;;  %v6117_v34 = vld [vmem:[#allocation12 + $0xe98] sm:$0xff]  ;;  %v5832_v57 = vld [vmem:[#allocation12 + $0x5b0] sm:$0xff] }
 0x6a6   :  { %8748 = vmatpush3.bf16.msra.mxu0 %v6534_v49  ;;  %7120 = vmatprep.subr.bf16.mxu1 %v6755_v63  ;;  %v6398_v49 = vld [vmem:[#allocation12 + $0x1760] sm:$0xff]  ;;  %v6063_v16 = vld [vmem:[#allocation12 + $0xce8] sm:$0xff] }
 0x6a7   :  { %8749 = vmatprep.subr.bf16.mxu0 %v6555_v26  ;;  %v5898_v63 = vld [vmem:[#allocation12 + $0x7c0] sm:$0xff]  ;;  %v6791_v26 = vpack.c.bf16 %v6398_v49, %v6395_v36  ;;  %v6072_v36 = vld [vmem:[#allocation12 + $0xd30] sm:$0xff] }
 0x6a8   :  { %v6543_v53 = vpack.c.bf16 %v5901_v48, %v5898_v63  ;;  %v6075_v48 = vld [vmem:[#allocation12 + $0xd48] sm:$0xff] }
 0x6a9   :  { %7121 = vmatpush1.bf16.msra.mxu1 %v6754_v40  ;;  %v6389_v40 = vld [vmem:[#allocation12 + $0x1718] sm:$0xff] }
 0x6aa   :  { %8750 = vmatpush3.bf16.msra.mxu0 %v6531_v25  ;;  %7122 = vmatprep.subr.bf16.mxu1 %v6800_v47  ;;  %v6392_v25 = vld [vmem:[#allocation12 + $0x1730] sm:$0xff] }
 0x6ab   :  { %8751 = vmatprep.subr.bf16.mxu0 %v6552_v46  ;;  %v5892_v47 = vld [vmem:[#allocation12 + $0x790] sm:$0xff]  ;;  %v6788_v46 = vpack.c.bf16 %v6392_v25, %v6389_v40  ;;  %v6370_v40 = vld [vmem:[#allocation12 + $0x1680] sm:$0xff]  ;;  %v6373_v25 = vld [vmem:[#allocation12 + $0x1698] sm:$0xff] }
 0x6ac   :  { %v6540_v3 = vpack.c.bf16 %v5895_v59, %v5892_v47  ;;  %v6066_v47 = vld [vmem:[#allocation12 + $0xd00] sm:$0xff]  ;;  %v6778_v5 = vpack.c.bf16 %v6373_v25, %v6370_v40 }
 0x6ad   :  { %7123 = vmatpush2.bf16.msra.mxu1 %v6799_v54  ;;  %v6383_v54 = vld [vmem:[#allocation12 + $0x16e8] sm:$0xff]  ;;  %v5778_v25 = vld [vmem:[#allocation12 + $0x400] sm:$0xff] }
 0x6ae   :  { %8752 = vmatpush3.bf16.msra.mxu0 %v6528_v43  ;;  %7124 = vmatprep.subr.bf16.mxu1 %v6797_v33  ;;  %v6386_v43 = vld [vmem:[#allocation12 + $0x1700] sm:$0xff] }
 0x6af   :  { %8753 = vmatprep.subr.bf16.mxu0 %v6549_v42  ;;  %v6126_v33 = vld [vmem:[#allocation12 + $0xee0] sm:$0xff]  ;;  %v6785_v42 = vpack.c.bf16 %v6386_v43, %v6383_v54 }
 0x6b0   :  { %v6657_v44 = vpack.c.bf16 %v6129_v37, %v6126_v33  ;;  %v5790_v43 = vld [vmem:[#allocation12 + $0x460] sm:$0xff]  ;;  %v5793_v33 = vld [vmem:[#allocation12 + $0x478] sm:$0xff]  ;;  %v6060_v37 = vld [vmem:[#allocation12 + $0xcd0] sm:$0xff] }
 0x6b1   :  { %7125 = vmatpush2.bf16.msra.mxu1 %v6796_v27  ;;  %v6377_v27 = vld [vmem:[#allocation12 + $0x16b8] sm:$0xff] }
 0x6b2   :  { %8754 = vmatpush3.bf16.msra.mxu0 %v6525_v30  ;;  %7126 = vmatprep.subr.bf16.mxu1 %v6794_v35  ;;  %v6380_v30 = vld [vmem:[#allocation12 + $0x16d0] sm:$0xff] }
 0x6b3   :  { %8755 = vmatprep.subr.bf16.mxu0 %v6546_v21  ;;  %v6120_v35 = vld [vmem:[#allocation12 + $0xeb0] sm:$0xff]  ;;  %v6782_v49 = vpack.c.bf16 %v6380_v30, %v6377_v27  ;;  %v6811_v27 = vrot.slane %v6802_v51, %v9261_v23  ;;  %v6489_v30 = vpack.c.bf16 %v5793_v33, %v5790_v43 }
 0x6b4   :  { %v6376_v21 = vld [vmem:[#allocation12 + $0x16b0] sm:$0xff]  ;;  %v6654_v63 = vpack.c.bf16 %v6123_v14, %v6120_v35  ;;  %v6624_v35 = vpack.c.bf16 %v6063_v16, %v6060_v37  ;;  %v5814_v16 = vld [vmem:[#allocation12 + $0x520] sm:$0xff] }
 0x6b5   :  { %7127 = vmatpush2.bf16.msra.mxu1 %v6793_v38  ;;  %v6371_v38 = vld [vmem:[#allocation12 + $0x1688] sm:$0xff]  ;;  %v6781_v61 = vpack.c.bf16 %v6379_v8, %v6376_v21  ;;  %v6054_v21 = vld [vmem:[#allocation12 + $0xca0] sm:$0xff]  ;;  %v5772_v37 = vld [vmem:[#allocation12 + $0x3d0] sm:$0xff] }
 0x6b6   :  { %8756 = vmatpush3.bf16.msra.mxu0 %v6522_v55  ;;  %7128 = vmatprep.subr.bf16.mxu1 %v6791_v26  ;;  %v6374_v55 = vld [vmem:[#allocation12 + $0x16a0] sm:$0xff] }
 0x6b7   :  { %8757 = vmatprep.subr.bf16.mxu0 %v6543_v53  ;;  %v6114_v26 = vld [vmem:[#allocation12 + $0xe80] sm:$0xff]  ;;  %v6630_v53 = vpack.c.bf16 %v6075_v48, %v6072_v36  ;;  %v6779_v17 = vpack.c.bf16 %v6374_v55, %v6371_v38  ;;  %v6645_v36 = vpack.c.bf16 %v6105_v13, %v6102_v11  ;;  %v5829_v48 = vld [vmem:[#allocation12 + $0x598] sm:$0xff]  ;;  %v6096_v55 = vld [vmem:[#allocation12 + $0xdf0] sm:$0xff] }
 0x6b8   :  { %v6087_v11 = vld [vmem:[#allocation12 + $0xda8] sm:$0xff] }
 0x6b9   :  { %7129 = vmatpush2.bf16.msra.mxu1 %v6790_v0  ;;  %v6651_v0 = vpack.c.bf16 %v6117_v34, %v6114_v26  ;;  %v6099_v26 = vld [vmem:[#allocation12 + $0xe08] sm:$0xff]  ;;  %v6856_v34 = vadd.f32 %v10354_v31, %v6811_v27 }
 0x6ba   :  { %8758 = vmatpush3.bf16.msra.mxu0 %v6519_v10  ;;  %7130 = vmatprep.subr.bf16.mxu1 %v6788_v46  ;;  %v6069_v10 = vld [vmem:[#allocation12 + $0xd18] sm:$0xff]  ;;  %v5838_v46 = vld [vmem:[#allocation12 + $0x5e0] sm:$0xff] }
 0x6bb   :  { %8759 = vmatprep.subr.bf16.mxu0 %v6540_v3  ;;  %v6513_v54 = vpack.c.bf16 %v5841_v29, %v5838_v46  ;;  %v6642_v46 = vpack.c.bf16 %v6099_v26, %v6096_v55  ;;  %v6051_v29 = vld [vmem:[#allocation12 + $0xc88] sm:$0xff]  ;;  %v5760_v55 = vld [vmem:[#allocation12 + $0x370] sm:$0xff] }
 0x6bc   :  { %v5763_v26 = vld [vmem:[#allocation12 + $0x388] sm:$0xff] }
 0x6bd   :  { %7131 = vmatpush2.bf16.msra.mxu1 %v6787_v6  ;;  %v6807_v6 = vrot.slane %v6802_v51, %v9253_v20  ;;  %v5820_v51 = vld [vmem:[#allocation12 + $0x550] sm:$0xff] }
 0x6be   :  { %8760 = vmatpush3.bf16.msra.mxu0 %v6516_v58  ;;  %7132 = vmatprep.subr.bf16.mxu1 %v6785_v42 }
 0x6bf   :  { %8789 = vmatprep.subr.bf16.mxu0 %v6657_v44  ;;  %v5835_v44 = vld [vmem:[#allocation12 + $0x5c8] sm:$0xff]  ;;  %v6854_v8 = vadd.f32 %v10350_v41, %v6807_v6 }
 0x6c0   :  { %v6510_v14 = vpack.c.bf16 %v5835_v44, %v5832_v57  ;;  %v5775_v6 = vld [vmem:[#allocation12 + $0x3e8] sm:$0xff]  ;;  %v5817_v57 = vld [vmem:[#allocation12 + $0x538] sm:$0xff]  ;;  %v6084_v44 = vld [vmem:[#allocation12 + $0xd90] sm:$0xff] }
 0x6c1   :  { %v10363_v1 = vpop.f32.mrf.mxu0  ;;  %7133 = vmatpush2.bf16.msra.mxu1 %v6784_v32  ;;  %7260 = vmatmul.mubr.bf16.vlgmr.msra.gmra.mxu0 %v9919_v60  ;;  %v6111_v60 = vld [vmem:[#allocation12 + $0xe68] sm:$0xff]  ;;  %v5784_v32 = vld [vmem:[#allocation12 + $0x430] sm:$0xff]  ;;  %v6480_v13 = vpack.c.bf16 %v5775_v6, %v5772_v37  ;;  %v6501_v27 = vpack.c.bf16 %v5817_v57, %v5814_v16  ;;  %v6261_v57 = vld [vmem:[#allocation12 + $0x1318] sm:$0xff] }
 0x6c2   :  { %8790 = vmatpush3.bf16.msra.mxu0 %v6633_v45  ;;  %7339 = vmatprep.mubr.bf16.mxu0 %v9941_v15  ;;  %v6627_v15 = vpack.c.bf16 %v6069_v10, %v6066_v47  ;;  %v6648_v42 = vpack.c.bf16 %v6111_v60, %v6108_v62  ;;  %v5787_v45 = vld [vmem:[#allocation12 + $0x448] sm:$0xff]  ;;  %v5781_v47 = vld [vmem:[#allocation12 + $0x418] sm:$0xff] }
 0x6c3   :  { %v10367_v59 = vpop.f32.mrf.mxu0  ;;  %7134 = vmatprep.subr.bf16.mxu1 %v6782_v49  ;;  %8791 = vmatprep.subr.bf16.mxu0 %v6654_v63  ;;  %v6057_v49 = vld [vmem:[#allocation12 + $0xcb8] sm:$0xff]  ;;  %v5826_v63 = vld [vmem:[#allocation12 + $0x580] sm:$0xff]  ;;  %v5823_v62 = vld [vmem:[#allocation12 + $0x568] sm:$0xff] }
 0x6c4   :  { %v6621_v41 = vpack.c.bf16 %v6057_v49, %v6054_v21  ;;  %v6507_v40 = vpack.c.bf16 %v5829_v48, %v5826_v63  ;;  %v6504_v33 = vpack.c.bf16 %v5823_v62, %v5820_v51  ;;  %v5808_v21 = vld [vmem:[#allocation12 + $0x4f0] sm:$0xff]  ;;  %v6321_v49 = vld [vmem:[#allocation12 + $0x14f8] sm:$0xff] }
 0x6c5   :  { %v6939_v3 = vpop.f32.mrf.mxu0  ;;  %7135 = vmatpush2.bf16.msra.mxu1 %v6781_v61 }
 0x6c6   :  { %8792 = vmatpush3.bf16.msra.mxu0 %v6630_v53  ;;  %7136 = vmatprep.subr.bf16.mxu1 %v6779_v17  ;;  %v6486_v53 = vpack.c.bf16 %v5787_v45, %v5784_v32  ;;  %v6093_v3 = vld [vmem:[#allocation12 + $0xdd8] sm:$0xff]  ;;  %v6636_v32 = vpack.c.bf16 %v6087_v11, %v6084_v44  ;;  %v6039_v45 = vld [vmem:[#allocation12 + $0xc28] sm:$0xff]  ;;  %v6030_v44 = vld [vmem:[#allocation12 + $0xbe0] sm:$0xff] }
 0x6c7   :  { %v6940_v58 = vpop.f32.mrf.mxu0  ;;  %8793 = vmatprep.subr.bf16.mxu0 %v6651_v0  ;;  %v6048_v0 = vld [vmem:[#allocation12 + $0xc70] sm:$0xff] }
 0x6c8   :  { %v6618_v43 = vpack.c.bf16 %v6051_v29, %v6048_v0  ;;  %v6042_v58 = vld [vmem:[#allocation12 + $0xc40] sm:$0xff]  ;;  %v6264_v29 = vld [vmem:[#allocation12 + $0x1330] sm:$0xff] }
 0x6c9   :  { %7137 = vmatpush2.bf16.msra.mxu1 %v6778_v5  ;;  %v6483_v5 = vpack.c.bf16 %v5781_v47, %v5778_v25  ;;  %v6315_v25 = vld [vmem:[#allocation12 + $0x14c8] sm:$0xff]  ;;  %v6474_v47 = vpack.c.bf16 %v5763_v26, %v5760_v55  ;;  %v6300_v11 = vld [vmem:[#allocation12 + $0x1450] sm:$0xff]  ;;  %v6246_v26 = vld [vmem:[#allocation12 + $0x12a0] sm:$0xff] }
 0x6ca   :  { %8794 = vmatpush3.bf16.msra.mxu0 %v6627_v15  ;;  %8723 = vmatprep.subr.bf16.mxu1 %v6513_v54  ;;  %v5979_v55 = vld [vmem:[#allocation12 + $0xa48] sm:$0xff] }
 0x6cb   :  { %8795 = vmatprep.subr.bf16.mxu0 %v6648_v42 }
 0x6cc   :  { %v6894_v38 = vpop.f32.mrf.mxu1  ;;  %7139 = vmatmul.mubr.bf16.vlgmr.msra.gmra.mxu1 %v10326_v50 }
 0x6cd   :  { %v6895_v61 = vadd.f32 %v6894_v38, %v6854_v8  ;;  %8724 = vmatpush3.bf16.msra.mxu1 %v6489_v30  ;;  %7219 = vmatprep.mubr.bf16.mxu1 %v9530_v52  ;;  %v6090_v52 = vld [vmem:[#allocation12 + $0xdc0] sm:$0xff]  ;;  %v5811_v8 = vld [vmem:[#allocation12 + $0x508] sm:$0xff] }
 0x6ce   :  { %v6896_v17 = vpop.f32.mrf.mxu1  ;;  %8796 = vmatpush3.bf16.msra.mxu0 %v6624_v35  ;;  %8725 = vmatprep.subr.bf16.mxu1 %v6510_v14  ;;  %v6639_v42 = vpack.c.bf16 %v6093_v3, %v6090_v52  ;;  %v5766_v30 = vld [vmem:[#allocation12 + $0x3a0] sm:$0xff]  ;;  %v5769_v35 = vld [vmem:[#allocation12 + $0x3b8] sm:$0xff]  ;;  %v6036_v14 = vld [vmem:[#allocation12 + $0xc10] sm:$0xff]  ;;  %v6498_v38 = vpack.c.bf16 %v5811_v8, %v5808_v21 }
 0x6cf   :  { %v6897_v10 = vadd.f32 %v6896_v17, %v6856_v34  ;;  %8797 = vmatprep.subr.bf16.mxu0 %v6645_v36  ;;  %v10376_v31 = vadd.f32 %v10363_v1, %v6895_v61  ;;  %v6045_v1 = vld [vmem:[#allocation12 + $0xc58] sm:$0xff]  ;;  %v6318_v36 = vld [vmem:[#allocation12 + $0x14e0] sm:$0xff]  ;;  %v6477_v63 = vpack.c.bf16 %v5769_v35, %v5766_v30  ;;  %v6612_v48 = vpack.c.bf16 %v6039_v45, %v6036_v14  ;;  %v5796_v52 = vld [vmem:[#allocation12 + $0x490] sm:$0xff] }
 0x6d0   :  { %v6898_v60 = vpop.f32.mrf.mxu1  ;;  %v6753_v34 = vpack.c.bf16 %v6321_v49, %v6318_v36  ;;  %v6270_v61 = vld [vmem:[#allocation12 + $0x1360] sm:$0xff]  ;;  %v5799_v3 = vld [vmem:[#allocation12 + $0x4a8] sm:$0xff]  ;;  %v5985_v30 = vld [vmem:[#allocation12 + $0xa78] sm:$0xff] }
 0x6d1   :  { %8726 = vmatpush3.bf16.msra.mxu1 %v6486_v53  ;;  %v10379_v15 = vadd.f32 %v10367_v59, %v6897_v10  ;;  %v6615_v59 = vpack.c.bf16 %v6045_v1, %v6042_v58  ;;  %v6273_v53 = vld [vmem:[#allocation12 + $0x1378] sm:$0xff]  ;;  %v5802_v17 = vld [vmem:[#allocation12 + $0x4c0] sm:$0xff]  ;;  %v6267_v60 = vld [vmem:[#allocation12 + $0x1348] sm:$0xff]  ;;  %v6492_v6 = vpack.c.bf16 %v5799_v3, %v5796_v52 }
 0x6d2   :  { %v6899_v54 = vpop.f32.mrf.mxu1  ;;  %8798 = vmatpush3.bf16.msra.mxu0 %v6621_v41  ;;  %8727 = vmatprep.subr.bf16.mxu1 %v6507_v40  ;;  %v5805_v41 = vld [vmem:[#allocation12 + $0x4d8] sm:$0xff]  ;;  %v6312_v40 = vld [vmem:[#allocation12 + $0x14b0] sm:$0xff]  ;;  %v6729_v0 = vpack.c.bf16 %v6273_v53, %v6270_v61  ;;  %v5754_v10 = vld [vmem:[#allocation12 + $0x340] sm:$0xff]  ;;  %v6726_v37 = vpack.c.bf16 %v6267_v60, %v6264_v29 }
 0x6d3   :  { %8799 = vmatprep.subr.bf16.mxu0 %v6642_v46  ;;  %v5757_v46 = vld [vmem:[#allocation12 + $0x358] sm:$0xff]  ;;  %v6495_v51 = vpack.c.bf16 %v5805_v41, %v5802_v17  ;;  %v6750_v62 = vpack.c.bf16 %v6315_v25, %v6312_v40  ;;  %v6306_v54 = vld [vmem:[#allocation12 + $0x1480] sm:$0xff]  ;;  %v5748_v58 = vld [vmem:[#allocation12 + $0x310] sm:$0xff] }
 0x6d4   :  { %v6258_v1 = vld [vmem:[#allocation12 + $0x1300] sm:$0xff]  ;;  %v6252_v35 = vld [vmem:[#allocation12 + $0x12d0] sm:$0xff]  ;;  %v6027_v21 = vld [vmem:[#allocation12 + $0xbc8] sm:$0xff] }
 0x6d5   :  { %8728 = vmatpush3.bf16.msra.mxu1 %v6483_v5  ;;  %v5649_v5 = vmul.f32 0.1, %v10359_v56  ;;  %v6033_v56 = vld [vmem:[#allocation12 + $0xbf8] sm:$0xff]  ;;  %v6024_v45 = vld [vmem:[#allocation12 + $0xbb0] sm:$0xff]  ;;  %v6294_v8 = vld [vmem:[#allocation12 + $0x1420] sm:$0xff] }
 0x6d6   :  { %8800 = vmatpush3.bf16.msra.mxu0 %v6618_v43  ;;  %8729 = vmatprep.subr.bf16.mxu1 %v6504_v33  ;;  %v6309_v43 = vld [vmem:[#allocation12 + $0x1498] sm:$0xff]  ;;  %v6471_v33 = vpack.c.bf16 %v5757_v46, %v5754_v10  ;;  %v6018_v53 = vld [vmem:[#allocation12 + $0xb80] sm:$0xff]  ;;  %v6288_v41 = vld [vmem:[#allocation12 + $0x13f0] sm:$0xff] }
 0x6d7   :  { %8801 = vmatprep.subr.bf16.mxu0 %v6639_v42  ;;  %v5751_v42 = vld [vmem:[#allocation12 + $0x328] sm:$0xff]  ;;  %v6747_v16 = vpack.c.bf16 %v6309_v43, %v6306_v54  ;;  %8938 = vtanh.f32 %v5649_v5  ;;  %v6297_v36 = vld [vmem:[#allocation12 + $0x1438] sm:$0xff]  ;;  %v5970_v10 = vld [vmem:[#allocation12 + $0xa00] sm:$0xff] }
 0x6d8   :  { %v6249_v61 = vld [vmem:[#allocation12 + $0x12b8] sm:$0xff]  ;;  %v6291_v40 = vld [vmem:[#allocation12 + $0x1408] sm:$0xff]  ;;  %v6240_v29 = vld [vmem:[#allocation12 + $0x1270] sm:$0xff] }
 0x6d9   :  { %8730 = vmatpush3.bf16.msra.mxu1 %v6480_v13  ;;  %v6303_v13 = vld [vmem:[#allocation12 + $0x1468] sm:$0xff]  ;;  %v6021_v17 = vld [vmem:[#allocation12 + $0xb98] sm:$0xff]  ;;  %v6012_v60 = vld [vmem:[#allocation12 + $0xb50] sm:$0xff] }
 0x6da   :  { %8802 = vmatpush3.bf16.msra.mxu0 %v6615_v59  ;;  %8731 = vmatprep.subr.bf16.mxu1 %v6501_v27  ;;  %v6723_v59 = vpack.c.bf16 %v6261_v57, %v6258_v1  ;;  %v5982_v27 = vld [vmem:[#allocation12 + $0xa60] sm:$0xff]  ;;  %v6744_v14 = vpack.c.bf16 %v6303_v13, %v6300_v11  ;;  %v5973_v46 = vld [vmem:[#allocation12 + $0xa18] sm:$0xff]  ;;  %v6015_v52 = vld [vmem:[#allocation12 + $0xb68] sm:$0xff] }
 0x6db   :  { %8803 = vmatprep.subr.bf16.mxu0 %v6636_v32  ;;  %v6255_v32 = vld [vmem:[#allocation12 + $0x12e8] sm:$0xff]  ;;  %v6585_v49 = vpack.c.bf16 %v5985_v30, %v5982_v27  ;;  %v6282_v3 = vld [vmem:[#allocation12 + $0x13c0] sm:$0xff]  ;;  %v6579_v54 = vpack.c.bf16 %v5973_v46, %v5970_v10  ;;  %v6237_v1 = vld [vmem:[#allocation12 + $0x1258] sm:$0xff] }
 0x6dc   :  { %v6009_v57 = vld [vmem:[#allocation12 + $0xb38] sm:$0xff]  ;;  %v6279_v11 = vld [vmem:[#allocation12 + $0x13a8] sm:$0xff]  ;;  %v5958_v27 = vld [vmem:[#allocation12 + $0x9a0] sm:$0xff] }
 0x6dd   :  { %8732 = vmatpush3.bf16.msra.mxu1 %v6477_v63  ;;  %v6720_v63 = vpack.c.bf16 %v6255_v32, %v6252_v35  ;;  %v5961_v30 = vld [vmem:[#allocation12 + $0x9b8] sm:$0xff]  ;;  %v6228_v35 = vld [vmem:[#allocation12 + $0x1210] sm:$0xff]  ;;  %v5991_v46 = vld [vmem:[#allocation12 + $0xaa8] sm:$0xff] }
 0x6de   :  { %8804 = vmatpush3.bf16.msra.mxu0 %v6612_v48  ;;  %8733 = vmatprep.subr.bf16.mxu1 %v6498_v38  ;;  %v6606_v48 = vpack.c.bf16 %v6027_v21, %v6024_v45  ;;  %v5976_v38 = vld [vmem:[#allocation12 + $0xa30] sm:$0xff]  ;;  %v6231_v45 = vld [vmem:[#allocation12 + $0x1228] sm:$0xff] }
 0x6df   :  { %8833 = vmatprep.subr.bf16.mxu0 %v6753_v34  ;;  %v6741_v34 = vpack.c.bf16 %v6297_v36, %v6294_v8  ;;  %v6582_v25 = vpack.c.bf16 %v5979_v55, %v5976_v38  ;;  %v6000_v21 = vld [vmem:[#allocation12 + $0xaf0] sm:$0xff]  ;;  %v6003_v8 = vld [vmem:[#allocation12 + $0xb08] sm:$0xff] }
 0x6e0   :  { %v5952_v38 = vld [vmem:[#allocation12 + $0x970] sm:$0xff]  ;;  %v5955_v55 = vld [vmem:[#allocation12 + $0x988] sm:$0xff] }
 0x6e1   :  { %8734 = vmatpush3.bf16.msra.mxu1 %v6474_v47  ;;  %7340 = vmatmul.mubr.bf16.vlgmr.msra.gmra.mxu0 %v10136_v24  ;;  %v6468_v24 = vpack.c.bf16 %v5751_v42, %v5748_v58  ;;  %v6717_v47 = vpack.c.bf16 %v6249_v61, %v6246_v26  ;;  %v6234_v58 = vld [vmem:[#allocation12 + $0x1240] sm:$0xff]  ;;  %v5997_v61 = vld [vmem:[#allocation12 + $0xad8] sm:$0xff]  ;;  %v5988_v10 = vld [vmem:[#allocation12 + $0xa90] sm:$0xff] }
 0x6e2   :  { %8834 = vmatpush3.bf16.msra.mxu0 %v6729_v0  ;;  %7419 = vmatprep.mubr.bf16.mxu0 %v10152_v12  ;;  %v6609_v12 = vpack.c.bf16 %v6033_v56, %v6030_v44  ;;  %v6603_v0 = vpack.c.bf16 %v6021_v17, %v6018_v53  ;;  %v6276_v56 = vld [vmem:[#allocation12 + $0x1390] sm:$0xff] }
 0x6e3   :  { %8735 = vmatprep.subr.bf16.mxu1 %v6495_v51  ;;  %8835 = vmatprep.subr.bf16.mxu0 %v6750_v62  ;;  %v6738_v51 = vpack.c.bf16 %v6291_v40, %v6288_v41  ;;  %v6243_v62 = vld [vmem:[#allocation12 + $0x1288] sm:$0xff]  ;;  %v6732_v32 = vpack.c.bf16 %v6279_v11, %v6276_v56  ;;  %v6570_v41 = vpack.c.bf16 %v5955_v55, %v5952_v38  ;;  %v6216_v56 = vld [vmem:[#allocation12 + $0x11b0] sm:$0xff]  ;;  %v6165_v38 = vld [vmem:[#allocation12 + $0x1018] sm:$0xff] }
 0x6e4   :  { %v8939_v5 = vpop.eup %8938  ;;  %v6714_v43 = vpack.c.bf16 %v6243_v62, %v6240_v29  ;;  %v6219_v11 = vld [vmem:[#allocation12 + $0x11c8] sm:$0xff] }
 0x6e5   :  { %8736 = vmatpush3.bf16.msra.mxu1 %v6471_v33  ;;  %v6600_v33 = vpack.c.bf16 %v6015_v52, %v6012_v60  ;;  %v7487_v44 = vsel %vm7485_vm1, %v8939_v5, 0  ;;  %v6588_v52 = vpack.c.bf16 %v5991_v46, %v5988_v10  ;;  %v6198_v46 = vld [vmem:[#allocation12 + $0x1120] sm:$0xff] }
 0x6e6   :  { %8836 = vmatpush3.bf16.msra.mxu0 %v6726_v37  ;;  %8737 = vmatprep.subr.bf16.mxu1 %v6492_v6  ;;  %v5964_v37 = vld [vmem:[#allocation12 + $0x9d0] sm:$0xff]  ;;  %v5967_v6 = vld [vmem:[#allocation12 + $0x9e8] sm:$0xff] }
 0x6e7   :  { %8837 = vmatprep.subr.bf16.mxu0 %v6747_v16  ;;  %v6006_v16 = vld [vmem:[#allocation12 + $0xb20] sm:$0xff] }
 0x6e9   :  { %8738 = vmatpush3.bf16.msra.mxu1 %v6468_v24  ;;  %v6576_v24 = vpack.c.bf16 %v5967_v6, %v5964_v37 }
 0x6ea   :  { %8838 = vmatpush3.bf16.msra.mxu0 %v6723_v59  ;;  %8767 = vmatprep.subr.bf16.mxu1 %v6609_v12  ;;  %v6711_v59 = vpack.c.bf16 %v6237_v1, %v6234_v58  ;;  %v6597_v12 = vpack.c.bf16 %v6009_v57, %v6006_v16  ;;  %v6177_v1 = vld [vmem:[#allocation12 + $0x1078] sm:$0xff] }
 0x6eb   :  { %8839 = vmatprep.subr.bf16.mxu0 %v6744_v14  ;;  %v10390_v14 = vand.u32 4294901760, %v7487_v44 }
 0x6ec   :  { %7220 = vmatmul.mubr.bf16.vlgmr.msra.gmra.mxu1 %v9722_v28  ;;  %v6285_v28 = vld [vmem:[#allocation12 + $0x13d8] sm:$0xff] }
 0x6ed   :  { %8768 = vmatpush3.bf16.msra.mxu1 %v6585_v49  ;;  %7299 = vmatprep.mubr.bf16.mxu1 %v9742_v2  ;;  %v7480_v2 = vld [vmem:[%s10561_s10] sm:$0x77]  ;;  %v6735_v42 = vpack.c.bf16 %v6285_v28, %v6282_v3  ;;  %v6573_v49 = vpack.c.bf16 %v5961_v30, %v5958_v27  ;;  %v10394_v26 = vsub.f32 %v7487_v44, %v10390_v14  ;;  %v5940_v3 = vld [vmem:[#allocation12 + $0x910] sm:$0xff] }
 0x6ee   :  { %8840 = vmatpush3.bf16.msra.mxu0 %v6720_v63  ;;  %8769 = vmatprep.subr.bf16.mxu1 %v6606_v48  ;;  %v7484_v13 = vcombine.high %v7480_v2, %v7480_v2  ;;  %v6708_v63 = vpack.c.bf16 %v6231_v45, %v6228_v35  ;;  %v6594_v48 = vpack.c.bf16 %v6003_v8, %v6000_v21  ;;  %v7490_v17 = vsel %vm7489_vm2, %v7480_v2, 0  ;;  %v5943_v28 = vld [vmem:[#allocation12 + $0x928] sm:$0xff]  ;;  %v6210_v35 = vld [vmem:[#allocation12 + $0x1180] sm:$0xff] }
 0x6ef   :  { %8841 = vmatprep.subr.bf16.mxu0 %v6741_v34  ;;  %v5994_v34 = vld [vmem:[#allocation12 + $0xac0] sm:$0xff]  ;;  %v10403_v29 = vand.u32 4294901760, %v10394_v26  ;;  %v6171_v27 = vld [vmem:[#allocation12 + $0x1048] sm:$0xff] }
 0x6f0   :  { %v7492_v36 = vsel %vm7489_vm2, %v7484_v13, 0  ;;  %v6591_v40 = vpack.c.bf16 %v5997_v61, %v5994_v34  ;;  %v6207_v34 = vld [vmem:[#allocation12 + $0x1168] sm:$0xff] }
 0x6f1   :  { %8770 = vmatpush3.bf16.msra.mxu1 %v6582_v25  ;;  %v10396_v53 = vand.u32 4294901760, %v7492_v36  ;;  %v5946_v25 = vld [vmem:[#allocation12 + $0x940] sm:$0xff]  ;;  %v7566_v2 = vsub.f32 %v10394_v26, %v10403_v29 }
 0x6f2   :  { %8842 = vmatpush3.bf16.msra.mxu0 %v6717_v47  ;;  %8771 = vmatprep.subr.bf16.mxu1 %v6603_v0  ;;  %v5949_v47 = vld [vmem:[#allocation12 + $0x958] sm:$0xff]  ;;  %v10399_v0 = vand.u32 4294901760, %v7490_v17 }
 0x6f3   :  { %8843 = vmatprep.subr.bf16.mxu0 %v6738_v51  ;;  %v10406_v51 = vsub.f32 %v7492_v36, %v10396_v53  ;;  %v6567_v60 = vpack.c.bf16 %v5949_v47, %v5946_v25  ;;  %v7567_v57 = vand.u32 4294901760, %v7566_v2  ;;  %v6156_v25 = vld [vmem:[#allocation12 + $0xfd0] sm:$0xff]  ;;  %v6159_v47 = vld [vmem:[#allocation12 + $0xfe8] sm:$0xff] }
 0x6f4   :  { %v10415_v58 = vsub.f32 %v7490_v17, %v10399_v0  ;;  %v6192_v2 = vld [vmem:[#allocation12 + $0x10f0] sm:$0xff] }
 0x6f5   :  { %8772 = vmatpush3.bf16.msra.mxu1 %v6579_v54  ;;  %v9149_v54 = vmov 0.0   ;;  %v7606_v44 = vand.u32 4294901760, %v10406_v51 }
 0x6f6   :  { %8844 = vmatpush3.bf16.msra.mxu0 %v6714_v43  ;;  %8773 = vmatprep.subr.bf16.mxu1 %v6600_v33  ;;  %v6222_v43 = vld [vmem:[#allocation12 + $0x11e0] sm:$0xff]  ;;  %v6225_v33 = vld [vmem:[#allocation12 + $0x11f8] sm:$0xff]  ;;  %v7612_v30 = vand.u32 4294901760, %v10415_v58 }
 0x6f7   :  { %8845 = vmatprep.subr.bf16.mxu0 %v6735_v42  ;;  %v6705_v6 = vpack.c.bf16 %v6225_v33, %v6222_v43  ;;  %v6174_v42 = vld [vmem:[#allocation12 + $0x1060] sm:$0xff]  ;;  %v6195_v43 = vld [vmem:[#allocation12 + $0x1108] sm:$0xff] }
 0x6f8   :  { %v6681_v13 = vpack.c.bf16 %v6177_v1, %v6174_v42  ;;  %v6186_v42 = vld [vmem:[#allocation12 + $0x10c0] sm:$0xff]  ;;  %v6189_v1 = vld [vmem:[#allocation12 + $0x10d8] sm:$0xff] }
 0x6f9   :  { %8774 = vmatpush3.bf16.msra.mxu1 %v6576_v24  ;;  %v7481_v24 = vld [vmem:[%s10561_s10 + $0x8] sm:$0x7] }
 0x6fa   :  { %8846 = vmatpush3.bf16.msra.mxu0 %v6711_v59  ;;  %8775 = vmatprep.subr.bf16.mxu1 %v6597_v12  ;;  %v6702_v59 = vpack.c.bf16 %v6219_v11, %v6216_v56  ;;  %v6168_v12 = vld [vmem:[#allocation12 + $0x1030] sm:$0xff]  ;;  %v7494_v21 = vsel %vm7489_vm2, %v7481_v24, 0  ;;  %v6138_v56 = vld [vmem:[#allocation12 + $0xf40] sm:$0xff] }
 0x6fb   :  { %8847 = vmatprep.subr.bf16.mxu0 %v6732_v32  ;;  %v6213_v32 = vld [vmem:[#allocation12 + $0x1198] sm:$0xff]  ;;  %v6678_v36 = vpack.c.bf16 %v6171_v27, %v6168_v12  ;;  %v6180_v11 = vld [vmem:[#allocation12 + $0x1090] sm:$0xff]  ;;  %v6135_v27 = vld [vmem:[#allocation12 + $0xf28] sm:$0xff] }
 0x6fc   :  { %v6132_v12 = vld [vmem:[#allocation12 + $0xf10] sm:$0xff] }
 0x6fd   :  { %8776 = vmatpush3.bf16.msra.mxu1 %v6573_v49 }
 0x6fe   :  { %8848 = vmatpush3.bf16.msra.mxu0 %v6708_v63  ;;  %8777 = vmatprep.subr.bf16.mxu1 %v6594_v48  ;;  %v6699_v63 = vpack.c.bf16 %v6213_v32, %v6210_v35  ;;  %v6162_v48 = vld [vmem:[#allocation12 + $0x1000] sm:$0xff]  ;;  %v6417_v32 = vld [vmem:[#allocation12 + $0x17f8] sm:$0xff] }
 0x6ff   :  { %7527 = vmatprep.subr.mxu0 %v10396_v53  ;;  %v6675_v17 = vpack.c.bf16 %v6165_v38, %v6162_v48  ;;  %v6414_v35 = vld [vmem:[#allocation12 + $0x17e0] sm:$0xff] }
 0x701   :  { %v7017_v62 = vpop.f32.mrf.mxu0  ;;  %8778 = vmatpush3.bf16.msra.mxu1 %v6570_v41  ;;  %7420 = vmatmul.mubr.bf16.vlgmr.msra.gmra.mxu0 %v10304_v4  ;;  %v6564_v4 = vpack.c.bf16 %v5943_v28, %v5940_v3  ;;  %v6150_v3 = vld [vmem:[#allocation12 + $0xfa0] sm:$0xff]  ;;  %v6153_v28 = vld [vmem:[#allocation12 + $0xfb8] sm:$0xff] }
 0x702   :  { %8779 = vmatprep.subr.bf16.mxu1 %v6591_v40  ;;  %7529 = vmatpush1.msra.mxu0 %v10399_v0  ;;  %v6669_v33 = vpack.c.bf16 %v6153_v28, %v6150_v3  ;;  %v6351_v3 = vld [vmem:[#allocation12 + $0x15e8] sm:$0xff]  ;;  %v6390_v28 = vld [vmem:[#allocation12 + $0x1720] sm:$0xff] }
 0x703   :  { %v7019_v5 = vpop.f32.mrf.mxu0  ;;  %7562 = vmatprep.mubr.f32.mxu0 %v9149_v54  ;;  %7688 = vmatprep.subr.mxu0 %v10406_v51 }
 0x705   :  { %v7021_v37 = vpop.f32.mrf.mxu0  ;;  %8780 = vmatpush3.bf16.msra.mxu1 %v6567_v60  ;;  %v6672_v60 = vpack.c.bf16 %v6159_v47, %v6156_v25  ;;  %v6357_v25 = vld [vmem:[#allocation12 + $0x1618] sm:$0xff]  ;;  %v6396_v47 = vld [vmem:[#allocation12 + $0x1750] sm:$0xff] }
 0x706   :  { %8781 = vmatprep.subr.bf16.mxu1 %v6588_v52  ;;  %v6690_v37 = vpack.c.bf16 %v6195_v43, %v6192_v2  ;;  %v6393_v2 = vld [vmem:[#allocation12 + $0x1738] sm:$0xff] }
 0x707   :  { %v7022_v16 = vpop.f32.mrf.mxu0  ;;  %v6789_v43 = vpack.c.bf16 %v6393_v2, %v6390_v28 }
 0x709   :  { %8782 = vmatpush3.bf16.msra.mxu1 %v6564_v4  ;;  %7568 = vmatmul.mubr.f32.vlgmr.msra.gmra.mxu0 %v7567_v57  ;;  %v6144_v4 = vld [vmem:[#allocation12 + $0xf70] sm:$0xff] }
 0x70a   :  { %8811 = vmatprep.subr.bf16.mxu1 %v6705_v6  ;;  %7691 = vmatpush1.msra.mxu0 %v10415_v58  ;;  %v6147_v6 = vld [vmem:[#allocation12 + $0xf88] sm:$0xff] }
 0x70b   :  { %7724 = vmatprep.mubr.f32.mxu0 %v9149_v54  ;;  %7842 = vmatprep.subr.mxu0 %v7606_v44  ;;  %v6666_v16 = vpack.c.bf16 %v6147_v6, %v6144_v4  ;;  %v6387_v4 = vld [vmem:[#allocation12 + $0x1708] sm:$0xff] }
 0x70c   :  { %v6976_v45 = vpop.f32.mrf.mxu1  ;;  %7300 = vmatmul.mubr.bf16.vlgmr.msra.gmra.mxu1 %v9930_v7  ;;  %v10435_v7 = vand.u32 4294901760, %v7494_v21 }
 0x70d   :  { %v6977_v8 = vadd.f32 %v6976_v45, %v10376_v31  ;;  %8812 = vmatpush3.bf16.msra.mxu1 %v6681_v13  ;;  %7379 = vmatprep.mubr.bf16.mxu1 %v9952_v9  ;;  %v6204_v31 = vld [vmem:[#allocation12 + $0x1150] sm:$0xff]  ;;  %v6183_v13 = vld [vmem:[#allocation12 + $0x10a8] sm:$0xff]  ;;  %v6660_v45 = vpack.c.bf16 %v6135_v27, %v6132_v12 }
 0x70e   :  { %7727 = vmatmul.mubr.f32.vlgmr.msra.gmra.mxu0 %v10394_v26  ;;  %v6978_v49 = vpop.f32.mrf.mxu1  ;;  %8813 = vmatprep.subr.bf16.mxu1 %v6702_v59  ;;  %v6696_v40 = vpack.c.bf16 %v6207_v34, %v6204_v31  ;;  %v10447_v10 = vsub.f32 %v7494_v21, %v10435_v7  ;;  %v6684_v59 = vpack.c.bf16 %v6183_v13, %v6180_v11  ;;  %v6363_v31 = vld [vmem:[#allocation12 + $0x1648] sm:$0xff]  ;;  %v6402_v34 = vld [vmem:[#allocation12 + $0x1780] sm:$0xff] }
 0x70f   :  { %v6979_v55 = vadd.f32 %v6978_v49, %v10379_v15  ;;  %7846 = vmatpush1.msra.mxu0 %v7612_v30  ;;  %7879 = vmatprep.mubr.f32.mxu0 %v9149_v54  ;;  %v10437_v9 = vadd.f32 %v7017_v62, %v6977_v8  ;;  %v6201_v62 = vld [vmem:[#allocation12 + $0x1138] sm:$0xff]  ;;  %v6801_v21 = vpack.c.bf16 %v6417_v32, %v6414_v35  ;;  %v6366_v8 = vld [vmem:[#allocation12 + $0x1660] sm:$0xff]  ;;  %v6408_v49 = vld [vmem:[#allocation12 + $0x17b0] sm:$0xff] }
 0x710   :  { %v6980_v61 = vpop.f32.mrf.mxu1  ;;  %8889 = vmatprep.subr.mxu0 %v9149_v54  ;;  %v6693_v52 = vpack.c.bf16 %v6201_v62, %v6198_v46  ;;  %v6399_v46 = vld [vmem:[#allocation12 + $0x1768] sm:$0xff]  ;;  %v6330_v13 = vld [vmem:[#allocation12 + $0x1540] sm:$0xff] }
 0x711   :  { %8814 = vmatpush3.bf16.msra.mxu1 %v6678_v36  ;;  %v10440_v41 = vadd.f32 %v7019_v5, %v6979_v55  ;;  %v8070_v5 = vand.u32 4294901760, %v10447_v10  ;;  %v6369_v36 = vld [vmem:[#allocation12 + $0x1678] sm:$0xff]  ;;  %v6360_v55 = vld [vmem:[#allocation12 + $0x1630] sm:$0xff]  ;;  %v6375_v12 = vld [vmem:[#allocation12 + $0x16a8] sm:$0xff] }
 0x712   :  { %7881 = vmatmul.mubr.f32.vlgmr.msra.gmra.mxu0 %v10390_v14  ;;  %v6981_v15 = vpop.f32.mrf.mxu1  ;;  %8815 = vmatprep.subr.bf16.mxu1 %v6699_v63  ;;  %v6411_v63 = vld [vmem:[#allocation12 + $0x17c8] sm:$0xff]  ;;  %v6777_v48 = vpack.c.bf16 %v6369_v36, %v6366_v8  ;;  %v6405_v61 = vld [vmem:[#allocation12 + $0x1798] sm:$0xff]  ;;  %v7607_v8 = vsub.f32 %v10406_v51, %v7606_v44 }
 0x713   :  { %8890 = vmatpush3.msra.mxu0 %v10435_v7  ;;  %8891 = vmatprep.mubr.msk.f32.mxu0 %vm9150_vm3, %v9149_v54  ;;  %v6798_v38 = vpack.c.bf16 %v6411_v63, %v6408_v49  ;;  %v6795_v15 = vpack.c.bf16 %v6405_v61, %v6402_v34 }
 0x714   :  { %8899 = vmatprep.subr.mxu0 %v9149_v54 }
 0x715   :  { %8816 = vmatpush3.bf16.msra.mxu1 %v6675_v17  ;;  %v6774_v17 = vpack.c.bf16 %v6363_v31, %v6360_v55 }
 0x716   :  { %8892 = vmatmul.mubr.f32.vlgmr.msra.gmra.mxu0 %v7567_v57  ;;  %8817 = vmatprep.subr.bf16.mxu1 %v6696_v40  ;;  %v6687_v57 = vpack.c.bf16 %v6189_v1, %v6186_v42  ;;  %v6354_v40 = vld [vmem:[#allocation12 + $0x1600] sm:$0xff]  ;;  %v6336_v1 = vld [vmem:[#allocation12 + $0x1570] sm:$0xff] }
 0x717   :  { %8900 = vmatpush3.msra.mxu0 %v10447_v10  ;;  %8901 = vmatprep.mubr.msk.f32.mxu0 %vm9150_vm3, %v9149_v54  ;;  %v6771_v62 = vpack.c.bf16 %v6357_v25, %v6354_v40 }
 0x718   :  { %8909 = vmatprep.subr.mxu0 %v9149_v54 }
 0x719   :  { %8818 = vmatpush3.bf16.msra.mxu1 %v6672_v60  ;;  %v6792_v60 = vpack.c.bf16 %v6399_v46, %v6396_v47 }
 0x71a   :  { %8902 = vmatmul.mubr.f32.vlgmr.msra.gmra.mxu0 %v10394_v26  ;;  %8819 = vmatprep.subr.bf16.mxu1 %v6693_v52  ;;  %v6141_v26 = vld [vmem:[#allocation12 + $0xf58] sm:$0xff]  ;;  %v6348_v52 = vld [vmem:[#allocation12 + $0x15d0] sm:$0xff] }
 0x71b   :  { %8910 = vmatpush3.msra.mxu0 %v8070_v5  ;;  %8911 = vmatprep.mubr.msk.f32.mxu0 %vm9150_vm3, %v9149_v54  ;;  %v6663_v24 = vpack.c.bf16 %v6141_v26, %v6138_v56  ;;  %v6381_v56 = vld [vmem:[#allocation12 + $0x16d8] sm:$0xff] }
 0x71d   :  { %8820 = vmatpush3.bf16.msra.mxu1 %v6669_v33  ;;  %v6345_v33 = vld [vmem:[#allocation12 + $0x15b8] sm:$0xff] }
 0x71e   :  { %8912 = vmatmul.mubr.f32.vlgmr.msra.gmra.mxu0 %v10390_v14  ;;  %8821 = vmatprep.subr.bf16.mxu1 %v6690_v37  ;;  %v6384_v37 = vld [vmem:[#allocation12 + $0x16f0] sm:$0xff] }
 0x71f   :  { %v6786_v42 = vpack.c.bf16 %v6387_v4, %v6384_v37  ;;  %v8963_v37 = vld [vmem:[#allocation13] sm:$0x7] }
 0x720   :  { %v6815_v4 = vrot.slane %v8963_v37, %v9258_v22 }
 0x721   :  { %8822 = vmatpush3.bf16.msra.mxu1 %v6666_v16  ;;  %v6339_v16 = vld [vmem:[#allocation12 + $0x1588] sm:$0xff] }
 0x722   :  { %8823 = vmatprep.subr.bf16.mxu1 %v6687_v57  ;;  %v6378_v57 = vld [vmem:[#allocation12 + $0x16c0] sm:$0xff]  ;;  %v6762_v26 = vpack.c.bf16 %v6339_v16, %v6336_v1 }
 0x723   :  { %v6783_v11 = vpack.c.bf16 %v6381_v56, %v6378_v57 }
 0x725   :  { %8824 = vmatpush3.bf16.msra.mxu1 %v6663_v24  ;;  %v6333_v24 = vld [vmem:[#allocation12 + $0x1558] sm:$0xff] }
 0x726   :  { %8825 = vmatprep.subr.bf16.mxu1 %v6684_v59  ;;  %v6372_v59 = vld [vmem:[#allocation12 + $0x1690] sm:$0xff]  ;;  %v6759_v35 = vpack.c.bf16 %v6333_v24, %v6330_v13 }
 0x727   :  { %v6780_v32 = vpack.c.bf16 %v6375_v12, %v6372_v59 }
 0x729   :  { %8826 = vmatpush3.bf16.msra.mxu1 %v6660_v45  ;;  %v6324_v45 = vld [vmem:[#allocation12 + $0x1510] sm:$0xff] }
 0x72a   :  { %8855 = vmatprep.subr.bf16.mxu1 %v6801_v21  ;;  %v6327_v21 = vld [vmem:[#allocation12 + $0x1528] sm:$0xff] }
 0x72b   :  { %v6756_v63 = vpack.c.bf16 %v6327_v21, %v6324_v45 }
 0x72c   :  { %7380 = vmatmul.mubr.bf16.vlgmr.msra.gmra.mxu1 %v10144_v39  ;;  %v6768_v39 = vpack.c.bf16 %v6351_v3, %v6348_v52 }
 0x72d   :  { %8856 = vmatpush3.bf16.msra.mxu1 %v6777_v48  ;;  %7459 = vmatprep.mubr.bf16.mxu1 %v10324_v18  ;;  %v6342_v18 = vld [vmem:[#allocation12 + $0x15a0] sm:$0xff]  ;;  %v7613_v48 = vsub.f32 %v10415_v58, %v7612_v30 }
 0x72e   :  { %8857 = vmatprep.subr.bf16.mxu1 %v6798_v38  ;;  %v6765_v6 = vpack.c.bf16 %v6345_v33, %v6342_v18  ;;  %v7608_v38 = vand.u32 4294901760, %v7607_v8 }
 0x72f   :  { %v7614_v31 = vand.u32 4294901760, %v7613_v48 }
 0x731   :  { %8858 = vmatpush3.bf16.msra.mxu1 %v6774_v17 }
 0x732   :  { %8859 = vmatprep.subr.bf16.mxu1 %v6795_v15 }
 0x735   :  { %8860 = vmatpush3.bf16.msra.mxu1 %v6771_v62 }
 0x736   :  { %8861 = vmatprep.subr.bf16.mxu1 %v6792_v60 }
 0x739   :  { %8862 = vmatpush3.bf16.msra.mxu1 %v6768_v39 }
 0x73a   :  { %8863 = vmatprep.subr.bf16.mxu1 %v6789_v43 }
 0x73d   :  { %8864 = vmatpush3.bf16.msra.mxu1 %v6765_v6 }
 0x73e   :  { %8865 = vmatprep.subr.bf16.mxu1 %v6786_v42 }
 0x741   :  { %v7099_v27 = vpop.f32.mrf.mxu0  ;;  %8866 = vmatpush3.bf16.msra.mxu1 %v6762_v26 }
 0x742   :  { %8867 = vmatprep.subr.bf16.mxu1 %v6783_v11 }
 0x743   :  { %v7101_v36 = vpop.f32.mrf.mxu0 }
 0x745   :  { %v7103_v49 = vpop.f32.mrf.mxu0  ;;  %8868 = vmatpush3.bf16.msra.mxu1 %v6759_v35 }
 0x746   :  { %8869 = vmatprep.subr.bf16.mxu1 %v6780_v32 }
 0x747   :  { %v7104_v55 = vpop.f32.mrf.mxu0 }
 0x749   :  { %8870 = vmatpush3.bf16.msra.mxu1 %v6756_v63 }
 0x74a   :  { %7609 = vmatprep.subr.mxu1 %v7608_v38 }
 0x74c   :  { %v7058_v34 = vpop.f32.mrf.mxu1  ;;  %7460 = vmatmul.mubr.bf16.vlgmr.msra.gmra.mxu1 %v10326_v50  ;;  %v8071_v50 = vsub.f32 %v10447_v10, %v8070_v5 }
 0x74d   :  { %v7059_v61 = vadd.f32 %v7058_v34, %v10437_v9  ;;  %7615 = vmatpush1.msra.mxu1 %v7614_v31  ;;  %7648 = vmatprep.mubr.f32.mxu1 %v9149_v54 }
 0x74e   :  { %v7060_v51 = vpop.f32.mrf.mxu1  ;;  %7764 = vmatprep.subr.mxu1 %v10396_v53  ;;  %v8072_v9 = vand.u32 4294901760, %v8071_v50 }
 0x74f   :  { %v7061_v44 = vadd.f32 %v7060_v51, %v10440_v41  ;;  %v7100_v58 = vadd.f32 %v7099_v27, %v7059_v61 }
 0x750   :  { %v7062_v30 = vpop.f32.mrf.mxu1 }
 0x751   :  { %v7102_v17 = vadd.f32 %v7101_v36, %v7061_v44 }
 0x752   :  { %v7063_v15 = vpop.f32.mrf.mxu1 }
 0x754   :  { %7650 = vmatmul.mubr.f32.vlgmr.msra.gmra.mxu1 %v10390_v14 }
 0x755   :  { %7766 = vmatpush1.msra.mxu1 %v10399_v0  ;;  %7799 = vmatprep.mubr.f32.mxu1 %v9149_v54 }
 0x756   :  { %7918 = vmatprep.subr.mxu1 %v10396_v53 }
 0x758   :  { %7803 = vmatmul.mubr.f32.vlgmr.msra.gmra.mxu1 %v10403_v29 }
 0x759   :  { %7920 = vmatpush1.msra.mxu1 %v10399_v0  ;;  %7953 = vmatprep.mubr.f32.mxu1 %v9149_v54 }
 0x75a   :  { %8894 = vmatprep.subr.mxu1 %v9149_v54 }
 0x75c   :  { %7955 = vmatmul.mubr.f32.vlgmr.msra.gmra.mxu1 %v10390_v14 }
 0x75d   :  { %8895 = vmatpush3.msra.mxu1 %v8072_v9  ;;  %8896 = vmatprep.mubr.msk.f32.mxu1 %vm9150_vm3, %v9149_v54 }
 0x75e   :  { %8904 = vmatprep.subr.mxu1 %v9149_v54 }
 0x760   :  { %8897 = vmatmul.mubr.f32.vlgmr.msra.gmra.mxu1 %v10390_v14 }
 0x761   :  { %v8717_v53 = vpop.f32.mrf.mxu0  ;;  %8905 = vmatpush3.msra.mxu1 %v10435_v7  ;;  %8906 = vmatprep.mubr.msk.f32.mxu1 %vm9150_vm3, %v9149_v54 }
 0x762   :  { %8914 = vmatprep.subr.mxu1 %v9149_v54 }
 0x763   :  { %v8718_v0 = vpop.f32.mrf.mxu0 }
 0x764   :  { %v8719_v41 = vadd.f32 %v8718_v0, %v8717_v53  ;;  %8907 = vmatmul.mubr.f32.vlgmr.msra.gmra.mxu1 %v10403_v29 }
 0x765   :  { %v8720_v10 = vpop.f32.mrf.mxu0  ;;  %8915 = vmatpush3.msra.mxu1 %v10435_v7  ;;  %8916 = vmatprep.mubr.msk.f32.mxu1 %vm9150_vm3, %v9149_v54 }
 0x766   :  { %v7182_v1 = vadd.f32 %v8719_v41, %v6815_v4 }
 0x767   :  { %v8721_v5 = vpop.f32.mrf.mxu0 }
 0x768   :  { %8917 = vmatmul.mubr.f32.vlgmr.msra.gmra.mxu1 %v10390_v14  ;;  %v7467_v14 = vld [vmem:[%s10560_s9] sm:$0x7] }
 0x769   :  { %v10503_v16 = vmul.f32 0.5, %v7467_v14 }
 0x76b   :  { %v7473_v13 = vand.u32 2147483647, %v10503_v16  ;;  %vm7470_vm4 = vcmp.lt.f32.partialorder %v10503_v16, 0.0  ;;  %vm7469_vm5 = vcmp.gt.f32.partialorder %v10503_v16, 0.0 }
 0x76d   :  { %v7474_v59 = vsub.f32 1.0, %v7473_v13 }
 0x76f   :  { %8940 = vrcp.f32 %v7474_v59 }
 0x77c   :  { %v8941_v21 = vpop.eup %8940 }
 0x77d   :  { %v7476_v36 = vmul.f32 %v8941_v21, %v7473_v13 }
 0x77f   :  { %8942 = vlog2.f32 %v7476_v36 }
 0x781   :  { %v8761_v40 = vpop.f32.mrf.mxu0 }
 0x783   :  { %v8762_v25 = vpop.f32.mrf.mxu0 }
 0x784   :  { %v8763_v47 = vadd.f32 %v8762_v25, %v8761_v40 }
 0x785   :  { %v8764_v46 = vpop.f32.mrf.mxu0 }
 0x787   :  { %v8765_v62 = vpop.f32.mrf.mxu0 }
 0x78c   :  { %v7140_v60 = vpop.f32.mrf.mxu1  ;;  %v8943_v9 = vpop.eup %8942 }
 0x78d   :  { %v7141_v52 = vadd.f32 %v7140_v60, %v7100_v58  ;;  %v7478_v41 = vmul.f32 0.6931472, %v8943_v9 }
 0x78e   :  { %v7142_v3 = vpop.f32.mrf.mxu1 }
 0x78f   :  { %v7143_v28 = vadd.f32 %v7142_v3, %v7102_v17  ;;  %v8417_v5 = vrot.slane %v7478_v41, %v9253_v20  ;;  %v8421_v40 = vrot.slane %v7478_v41, %v9261_v23 }
 0x790   :  { %v7144_v2 = vpop.f32.mrf.mxu1 }
 0x791   :  { %v8429_v25 = vadd.f32 %v8417_v5, %v7141_v52 }
 0x792   :  { %v7145_v29 = vpop.f32.mrf.mxu1 }
 0x793   :  { %v8432_v46 = vsub.f32 0.0, %v8429_v25 }
 0x795   :  { %v8435_v2 = vmul.f32 1.442695, %v8432_v46 }
 0x797   :  { %8944 = vpow2.f32 %v8435_v2 }
 0x7a1   :  { %v8805_v39 = vpop.f32.mrf.mxu0 }
 0x7a3   :  { %v8806_v43 = vpop.f32.mrf.mxu0 }
 0x7a4   :  { %v8807_v7 = vadd.f32 %v8806_v43, %v8805_v39  ;;  %v8945_v37 = vpop.eup %8944 }
 0x7a5   :  { %v8808_v18 = vpop.f32.mrf.mxu0  ;;  %v8441_v14 = vadd.f32 1.0, %v8945_v37 }
 0x7a7   :  { %v8809_v33 = vpop.f32.mrf.mxu0 }
 0x7ac   :  { %v8739_v6 = vpop.f32.mrf.mxu1 }
 0x7ae   :  { %v8740_v42 = vpop.f32.mrf.mxu1 }
 0x7af   :  { %v8741_v57 = vadd.f32 %v8740_v42, %v8739_v6 }
 0x7b0   :  { %v8742_v56 = vpop.f32.mrf.mxu1 }
 0x7b1   :  { %v7222_v26 = vadd.f32 %v8741_v57, %v7182_v1  ;;  %v8425_v57 = vrot.slane %v7478_v41, %v9258_v22 }
 0x7b2   :  { %v8743_v11 = vpop.f32.mrf.mxu1 }
 0x7b3   :  { %v7262_v24 = vadd.f32 %v8763_v47, %v7222_v26  ;;  %v8430_v47 = vadd.f32 %v8421_v40, %v7143_v28  ;;  %v7471_v28 = vsel %vm7470_vm4, -1.0, %v9149_v54 }
 0x7b4   :  { %v10530_v26 = vsel %vm7469_vm5, 1.0, %v7471_v28 }
 0x7b5   :  { %v8433_v62 = vsub.f32 0.0, %v8430_v47  ;;  %v8448_v59 = vrot.slane %v10530_v26, %v9253_v20  ;;  %v8452_v16 = vrot.slane %v10530_v26, %v9261_v23 }
 0x7b7   :  { %v8437_v39 = vmul.f32 1.442695, %v8433_v62 }
 0x7b9   :  { %8946 = vpow2.f32 %v8437_v39 }
 0x7ba   :  { %8948 = vrcp.f32 %v8441_v14 }
 0x7c1   :  { %v8849_v12 = vpop.f32.mrf.mxu0 }
 0x7c3   :  { %v8850_v27 = vpop.f32.mrf.mxu0 }
 0x7c4   :  { %v8851_v35 = vadd.f32 %v8850_v27, %v8849_v12 }
 0x7c5   :  { %v8852_v32 = vpop.f32.mrf.mxu0 }
 0x7c6   :  { %v8947_v4 = vpop.eup %8946 }
 0x7c7   :  { %v8853_v45 = vpop.f32.mrf.mxu0  ;;  %v8442_v6 = vadd.f32 1.0, %v8947_v4  ;;  %v8949_v12 = vpop.eup %8948 }
 0x7c9   :  { %v10506_v8 = vpop.f32.mrf.mxu0  ;;  %8950 = vrcp.f32 %v8442_v6 }
 0x7cb   :  { %v10508_v49 = vpop.f32.mrf.mxu0 }
 0x7cc   :  { %v8783_v63 = vpop.f32.mrf.mxu1 }
 0x7ce   :  { %v10510_v48 = vpop.f32.mrf.mxu0  ;;  %v8784_v38 = vpop.f32.mrf.mxu1 }
 0x7cf   :  { %v8785_v55 = vadd.f32 %v8784_v38, %v8783_v63  ;;  %v8461_v38 = vmul.f32 %v8949_v12, %v8448_v59 }
 0x7d0   :  { %v10512_v31 = vpop.f32.mrf.mxu0  ;;  %v8786_v34 = vpop.f32.mrf.mxu1 }
 0x7d1   :  { %v7302_v61 = vadd.f32 %v8785_v55, %v7262_v24 }
 0x7d2   :  { %v10514_v51 = vpop.f32.mrf.mxu0  ;;  %v8787_v44 = vpop.f32.mrf.mxu1 }
 0x7d3   :  { %v7342_v58 = vadd.f32 %v8807_v7, %v7302_v61 }
 0x7d4   :  { %v10516_v30 = vpop.f32.mrf.mxu0 }
 0x7d6   :  { %v10518_v17 = vpop.f32.mrf.mxu0 }
 0x7d8   :  { %v8893_v15 = vpop.f32.mrf.mxu0 }
 0x7d9   :  { %v8472_v15 = vsub.f32 0.0, %v8461_v38 }
 0x7da   :  { %v10520_v50 = vpop.f32.mrf.mxu0 }
 0x7db   :  { %v8475_v40 = vmax.f32 %v8472_v15, 0.0 }
 0x7dc   :  { %v8903_v53 = vpop.f32.mrf.mxu0 }
 0x7de   :  { %v10522_v0 = vpop.f32.mrf.mxu0 }
 0x7e0   :  { %v8913_v10 = vpop.f32.mrf.mxu0 }
 0x7ec   :  { %v8827_v60 = vpop.f32.mrf.mxu1 }
 0x7ee   :  { %v8828_v3 = vpop.f32.mrf.mxu1 }
 0x7ef   :  { %v8829_v29 = vadd.f32 %v8828_v3, %v8827_v60 }
 0x7f0   :  { %v8830_v43 = vpop.f32.mrf.mxu1 }
 0x7f1   :  { %v7382_v7 = vadd.f32 %v8829_v29, %v7342_v58 }
 0x7f2   :  { %v8831_v18 = vpop.f32.mrf.mxu1 }
 0x7f3   :  { %v7422_v33 = vadd.f32 %v8851_v35, %v7382_v7  ;;  %v8951_v35 = vpop.eup %8950 }
 0x7f4   :  { %v8463_v34 = vmul.f32 %v8951_v35, %v8452_v16  ;;  %v9151_v16 = vmov 1983009808  }
 0x7f5   :  { %v8495_v35 = vunpack.c.l.s4 %v9151_v16 }
 0x7f6   :  { %v8467_v47 = vmax.f32 %v8463_v34, 0.0 }
 0x80c   :  { %v8871_v52 = vpop.f32.mrf.mxu1 }
 0x80e   :  { %v8872_v42 = vpop.f32.mrf.mxu1 }
 0x80f   :  { %v8873_v1 = vadd.f32 %v8872_v42, %v8871_v52 }
 0x810   :  { %v8874_v56 = vpop.f32.mrf.mxu1 }
 0x811   :  { %v7462_v11 = vadd.f32 %v8873_v1, %v7422_v33 }
 0x812   :  { %v8875_v13 = vpop.f32.mrf.mxu1 }
 0x813   :  { %v8431_v24 = vadd.f32 %v8425_v57, %v7462_v11 }
 0x814   :  { %v7651_v27 = vpop.f32.mrf.mxu1 }
 0x815   :  { %v8434_v54 = vsub.f32 0.0, %v8431_v24  ;;  %v7652_v32 = vadd.f32 %v7651_v27, %v10506_v8  ;;  %v8473_v8 = vsub.f32 0.0, %v8463_v34  ;;  %v8456_v24 = vrot.slane %v10530_v26, %v9258_v22 }
 0x816   :  { %v7653_v45 = vpop.f32.mrf.mxu1 }
 0x817   :  { %v8439_v21 = vmul.f32 1.442695, %v8434_v54  ;;  %v7654_v36 = vadd.f32 %v7653_v45, %v10508_v49  ;;  %v7729_v63 = vadd.f32 %v10510_v48, %v7652_v32  ;;  %v8466_v49 = vmax.f32 %v8461_v38, 0.0 }
 0x818   :  { %v7804_v55 = vpop.f32.mrf.mxu1  ;;  %v8476_v46 = vmax.f32 %v8473_v8, 0.0 }
 0x819   :  { %8952 = vpow2.f32 %v8439_v21  ;;  %v7805_v20 = vadd.f32 %v7804_v55, %v7729_v63  ;;  %v7731_v61 = vadd.f32 %v10512_v31, %v7654_v36  ;;  %v8496_v36 = vunpack.c.0.s8 %v8495_v35 }
 0x81a   :  { %v7806_v44 = vpop.f32.mrf.mxu1 }
 0x81b   :  { %v7807_v58 = vadd.f32 %v7806_v44, %v7731_v61  ;;  %v7883_v23 = vadd.f32 %v10514_v51, %v7805_v20  ;;  %v8499_v55 = vsub.s32 %v8496_v36, %v9250_v19 }
 0x81c   :  { %v7956_v9 = vpop.f32.mrf.mxu1 }
 0x81d   :  { %v7957_v53 = vadd.f32 %v7956_v9, %v7883_v23  ;;  %v7885_v41 = vadd.f32 %v10516_v30, %v7807_v58 }
 0x81e   :  { %v7958_v10 = vpop.f32.mrf.mxu1 }
 0x81f   :  { %v8407_v48 = vsub.f32 1.0, %v7957_v53  ;;  %v8410_v5 = vadd.f32 1.0, %v7957_v53  ;;  %v7959_v25 = vadd.f32 %v7958_v10, %v7885_v41 }
 0x820   :  { %v8109_v62 = vpop.f32.mrf.mxu1 }
 0x821   :  { %v8469_v31 = vmul.f32 %v8466_v49, %v8407_v48  ;;  %v8478_v60 = vmul.f32 %v8475_v40, %v8410_v5  ;;  %v8408_v3 = vsub.f32 1.0, %v7959_v25  ;;  %v8411_v2 = vadd.f32 1.0, %v7959_v25 }
 0x822   :  { %v8898_v51 = vpop.f32.mrf.mxu1  ;;  %v8110_v6 = vadd.f32 %v8109_v62, %v10518_v17 }
 0x823   :  { %v8481_v29 = vsub.f32 %v8469_v31, %v8478_v60  ;;  %v8470_v39 = vmul.f32 %v8467_v47, %v8408_v3  ;;  %v8479_v43 = vmul.f32 %v8476_v46, %v8411_v2 }
 0x824   :  { %v8257_v7 = vpop.f32.mrf.mxu1  ;;  %v8184_v56 = vadd.f32 %v10520_v50, %v8110_v6 }
 0x825   :  { %v8484_v18 = vadd.f32 %v8481_v29, %v7957_v53  ;;  %v8482_v30 = vsub.f32 %v8470_v39, %v8479_v43 }
 0x826   :  { %v8953_v33 = vpop.eup %8952  ;;  %v8908_v37 = vpop.f32.mrf.mxu1  ;;  %v8258_v11 = vadd.f32 %v8257_v7, %v8184_v56 }
 0x827   :  { %v8443_v4 = vadd.f32 1.0, %v8953_v33  ;;  %v8485_v14 = vadd.f32 %v8482_v30, %v7959_v25  ;;  %v8487_v28 = vmul.f32 0.5, %v8484_v18 }
 0x828   :  { %v8403_v52 = vpop.f32.mrf.mxu1  ;;  %v8332_v13 = vadd.f32 %v10522_v0, %v8258_v11 }
 0x829   :  { %8954 = vrcp.f32 %v8443_v4  ;;  %v8488_v42 = vmul.f32 0.5, %v8485_v14 }
 0x82a   :  { %v8918_v1 = vpop.f32.mrf.mxu1  ;;  %v8404_v12 = vadd.f32 %v8403_v52, %v8332_v13 }
 0x82b   :  { %v8493_v57 = vcombine.low %v8487_v28, %v8488_v42 }
 0x82c   :  { %v8409_v32 = vsub.f32 1.0, %v8404_v12  ;;  %v8412_v45 = vadd.f32 1.0, %v8404_v12 }
 0x82d   :  { %v8500_v20 = vrot.slane %v8493_v57, %v8499_v55 }
 0x836   :  { %v8955_v59 = vpop.eup %8954 }
 0x837   :  { %v8465_v27 = vmul.f32 %v8955_v59, %v8456_v24 }
 0x839   :  { %v8468_v17 = vmax.f32 %v8465_v27, 0.0  ;;  %v8474_v54 = vsub.f32 0.0, %v8465_v27 }
 0x83b   :  { %v8477_v21 = vmax.f32 %v8474_v54, 0.0  ;;  %v8471_v63 = vmul.f32 %v8468_v17, %v8409_v32 }
 0x83d   :  { %v8480_v38 = vmul.f32 %v8477_v21, %v8412_v45 }
 0x83f   :  { %v8483_v50 = vsub.f32 %v8471_v63, %v8480_v38 }
 0x841   :  { %v8486_v0 = vadd.f32 %v8483_v50, %v8404_v12 }
 0x843   :  { %v8489_v34 = vmul.f32 0.5, %v8486_v0 }
 0x845   :  { %v8507_v22 = vrot.slane %v8489_v34, %v8499_v55 }
 0x847   :  { %v8508_v26 = vcombine.low %v8500_v20, %v8507_v22 }
 0x849   :  { %8510 = vst [vmem:[%s10562_s11] sm:$0x3f] %v8508_v26 }
 0x84a   :  { %8515 = vsyncpa [#allocation3], 1 }
 0x84b   :  { %8516 = vsyncpa [#allocation5], 1 }
 0x84c   :  { %8517 = vsyncpa [#allocation8], 1 }
 0x84d   :  { %8518 = vsyncpa [#allocation11], 1 }
 0x84e   :  { %8519 = vsyncpa [#allocation14], 1 }

</bundles_post_ra>
